<compile_context>
chip_gen: v5e
topology: v5e:2x2
jax: 0.10.0
libtpu: 0.0.40
codegen_flags: <defaults>
</compile_context>

<pallas_src>
import functools

import jax
import jax.numpy as jnp
import numpy as np
from jax.experimental import pallas as pl
from jax.experimental.pallas import tpu as pltpu

EPS = 1e-5
MATMUL_DTYPE = jnp.bfloat16  # MXU operand / activation-DMA dtype (f32 accumulation)


def _fused_kernel(gate_ref, x175_ref, x169_ref,
                  w1_ref, g1_ref, b1_ref,
                  w2_ref, g2_ref, b2_ref,
                  out_ref, *, spatial_valid, spatial_pad, n_batch):
    C, Mp = x175_ref.shape
    inv_m = 1.0 / float(n_batch * spatial_valid)     # stats over VALID lanes only

    # sigmoid on the tiny (C, N) gate, broadcast across lanes in VMEM only.
    sig = jax.nn.sigmoid(gate_ref[...])               # (C, N) f32

    x175 = x175_ref[...]                              # (C, Mp) bf16
    if n_batch == 1:
        x = sig.astype(MATMUL_DTYPE) * x175           # (C, 1) lane-broadcast
    else:
        x = (x175.reshape(C, n_batch, spatial_pad)
             * sig.astype(MATMUL_DTYPE)[:, :, None]).reshape(C, Mp)
    # padded lanes of x are exactly zero (x175 is zero-padded in the wrapper).

    # conv2d58: 1x1 conv == W1 @ x  (bf16 operands, f32 accumulation).
    # Padded columns of y stay exactly zero.
    y = jnp.dot(w1_ref[...], x, preferred_element_type=jnp.float32)   # (C, Mp) f32

    # batchnorm2d36 (training, biased variance) -- fused single-pass stats.
    mean1 = jnp.sum(y, axis=1, keepdims=True) * inv_m
    ex2_1 = jnp.sum(y * y, axis=1, keepdims=True) * inv_m
    var1 = jnp.maximum(ex2_1 - mean1 * mean1, 0.0)     # clamp: avoid NaN from cancellation
    y = (y - mean1) * (jax.lax.rsqrt(var1 + EPS) * g1_ref[...]) + b1_ref[...]

    # add skip + relu (skip upcast bf16 -> f32)
    z = jnp.maximum(x169_ref[...].astype(jnp.float32) + y, 0.0)

    # Zero the padded lanes of z so the second matmul's padded output columns
    # are exactly zero and BN2 statistics remain correct.
    lane = jax.lax.broadcasted_iota(jnp.int32, (C, Mp), 1)
    if n_batch == 1:
        valid = lane < spatial_valid
    else:
        valid = (lane % spatial_pad) < spatial_valid
    z = jnp.where(valid, z, 0.0)

    # conv2d59: 1x1 conv == W2 @ z
    w = jnp.dot(w2_ref[...], z.astype(MATMUL_DTYPE),
                preferred_element_type=jnp.float32)    # (C, Mp) f32

    # batchnorm2d37 (training) -- fused single-pass stats.
    mean2 = jnp.sum(w, axis=1, keepdims=True) * inv_m
    ex2_2 = jnp.sum(w * w, axis=1, keepdims=True) * inv_m
    var2 = jnp.maximum(ex2_2 - mean2 * mean2, 0.0)
    out_ref[...] = (w - mean2) * (jax.lax.rsqrt(var2 + EPS) * g2_ref[...]) + b2_ref[...]


def fused_block(x179, x175, x169, w1, gamma1, beta1, w2, gamma2, beta2):
    """x179: (N, C, 1, 1); x175, x169: (N, C, H, W).  Returns (N, C, H, W) f32."""
    N, C, H, W = x175.shape
    S = H * W
    Sp = max(128, ((S + 127) // 128) * 128)            # lane-dense padded spatial (196 -> 256)
    Mp = N * Sp

    def to_cm_padded(t):
        # NCHW -> (C, N, S) -> zero-pad S -> Sp -> (C, N*Sp), bf16 for HBM traffic.
        t = jnp.transpose(t.reshape(N, C, S), (1, 0, 2))     # free for N == 1
        t = jnp.pad(t, ((0, 0), (0, 0), (0, Sp - S)))
        return t.reshape(C, Mp).astype(MATMUL_DTYPE)

    x175_cm = to_cm_padded(x175)
    x169_cm = to_cm_padded(x169)
    gate_cn = x179.reshape(N, C).T.astype(jnp.float32)        # (C, N), tiny

    # conv weights (Cout, Cin, 1, 1) -> (Cout, Cin); bf16 MXU operands.
    w1_b = w1.reshape(C, C).astype(MATMUL_DTYPE)
    w2_b = w2.reshape(C, C).astype(MATMUL_DTYPE)
    g1 = gamma1.reshape(C, 1).astype(jnp.float32)
    b1 = beta1.reshape(C, 1).astype(jnp.float32)
    g2 = gamma2.reshape(C, 1).astype(jnp.float32)
    b2 = beta2.reshape(C, 1).astype(jnp.float32)

    full = lambda shape: pl.BlockSpec(shape, lambda: (0,) * len(shape))

    cost = pl.CostEstimate(
        flops=int(2 * 2 * C * C * Mp),                        # two (C,C)x(C,Mp) matmuls
        transcendentals=int(N * C + 2 * C),                   # sigmoid + 2x rsqrt (per channel)
        bytes_accessed=int(2 * C * Mp * 2                     # two bf16 activation inputs
                           + C * Mp * 4                       # f32 output
                           + 2 * C * C * 2                    # bf16 weights
                           + 4 * C * 4 + N * C * 4),          # BN params + gate
    )

    kernel = functools.partial(_fused_kernel,
                               spatial_valid=S, spatial_pad=Sp, n_batch=N)

    out_cm = pl.pallas_call(
        kernel,
        out_shape=jax.ShapeDtypeStruct((C, Mp), jnp.float32),
        grid=(),
        in_specs=[
            full((C, N)),   # gate (sigmoid + broadcast done in-kernel)
            full((C, Mp)),  # x175 (bf16, lane-padded)
            full((C, Mp)),  # x169 (bf16, lane-padded)
            full((C, C)),   # W1 (bf16)
            full((C, 1)),   # gamma1
            full((C, 1)),   # beta1
            full((C, C)),   # W2 (bf16)
            full((C, 1)),   # gamma2
            full((C, 1)),   # beta2
        ],
        out_specs=full((C, Mp)),
        compiler_params=pltpu.CompilerParams(vmem_limit_bytes=32 * 1024 * 1024),
        cost_estimate=cost,
    )(gate_cn, x175_cm, x169_cm, w1_b, g1, b1, w2_b, g2, b2)

    # (C, N*Sp) -> strip lane padding -> NCHW.  Free-ish reshapes for N == 1.
    out = out_cm.reshape(C, N, Sp)[:, :, :S]
    return jnp.transpose(out, (1, 0, 2)).reshape(N, C, H, W)


def reference(x179, x175, x169, w1, gamma1, beta1, w2, gamma2, beta2):
    """Pure-JAX f32 reference mirroring the PyTorch forward (training-mode BN)."""
    C = x175.shape[1]

    def bn(t, g, b):
        mean = jnp.mean(t, axis=(0, 2, 3), keepdims=True)
        var = jnp.mean((t - mean) ** 2, axis=(0, 2, 3), keepdims=True)
        return (t - mean) * jax.lax.rsqrt(var + EPS) * g.reshape(1, C, 1, 1) \
            + b.reshape(1, C, 1, 1)

    def conv1x1(t, w):
        return jnp.einsum('nchw,oc->nohw', t, w.reshape(C, C),
                          precision=jax.lax.Precision.HIGHEST)

    x = jax.nn.sigmoid(x179) * x175
    y = bn(conv1x1(x, w1), gamma1, beta1)
    z = jnp.maximum(x169 + y, 0.0)
    return bn(conv1x1(z, w2), gamma2, beta2)


if __name__ == "__main__":
    # Shapes straight from the module spec: N=1, C=336, H=W=14 (small).
    N, C, H, W = 1, 336, 14, 14

    key = jax.random.PRNGKey(0)
    k = jax.random.split(key, 9)
    x179 = jax.random.normal(k[0], (N, C, 1, 1), jnp.float32)
    x175 = jax.random.normal(k[1], (N, C, H, W), jnp.float32)
    x169 = jax.random.normal(k[2], (N, C, H, W), jnp.float32)

    # Deterministic parameter init (kaiming-ish conv weights, BN affine params).
    w1 = 0.055 * jax.random.normal(k[3], (C, C, 1, 1), jnp.float32)
    w2 = 0.055 * jax.random.normal(k[4], (C, C, 1, 1), jnp.float32)
    gamma1 = 1.0 + 0.1 * jax.random.normal(k[5], (C,), jnp.float32)
    beta1 = 0.1 * jax.random.normal(k[6], (C,), jnp.float32)
    gamma2 = 1.0 + 0.1 * jax.random.normal(k[7], (C,), jnp.float32)
    beta2 = 0.1 * jax.random.normal(k[8], (C,), jnp.float32)

    out = fused_block(x179, x175, x169, w1, gamma1, beta1, w2, gamma2, beta2)
    out = jax.block_until_ready(out)

    ref = reference(x179, x175, x169, w1, gamma1, beta1, w2, gamma2, beta2)
    ref = jax.block_until_ready(ref)

    # Tolerance accounts for bf16 activation DMA + bf16 MXU operands vs. the
    # f32-HIGHEST reference (errors are largely cancelled by the BN normalize).
    np.testing.assert_allclose(np.asarray(out), np.asarray(ref), atol=6e-2, rtol=5e-2)

    print("KERNEL_OK")
</pallas_src>

<mosaic_0001>
module attributes {stable_mosaic.version = 11 : i64} {
  func.func @_fused_kernel(%arg0: memref<336x1xf32, #tpu.memory_space<vmem>>, %arg1: memref<336x256xbf16, #tpu.memory_space<vmem>>, %arg2: memref<336x256xbf16, #tpu.memory_space<vmem>>, %arg3: memref<336x336xbf16, #tpu.memory_space<vmem>>, %arg4: memref<336x1xf32, #tpu.memory_space<vmem>>, %arg5: memref<336x1xf32, #tpu.memory_space<vmem>>, %arg6: memref<336x336xbf16, #tpu.memory_space<vmem>>, %arg7: memref<336x1xf32, #tpu.memory_space<vmem>>, %arg8: memref<336x1xf32, #tpu.memory_space<vmem>>, %arg9: memref<336x256xf32, #tpu.memory_space<vmem>>) attributes {dimension_semantics = [], scalar_prefetch = 0 : i64, scratch_operands = 0 : i64, tpu.core_type = #tpu.core_type<tc>} {
    %c0 = arith.constant 0 : index
    %c0_0 = arith.constant 0 : index
    %0 = vector.load %arg0[%c0, %c0_0] : memref<336x1xf32, #tpu.memory_space<vmem>>, vector<336x1xf32>
    %1 = arith.negf %0 : vector<336x1xf32>
    %2 = math.exp %1 : vector<336x1xf32>
    %cst = arith.constant 1.000000e+00 : f32
    %3 = vector.broadcast %cst : f32 to vector<336x1xf32>
    %4 = arith.addf %3, %2 : vector<336x1xf32>
    %5 = arith.divf %3, %4 : vector<336x1xf32>
    %c0_1 = arith.constant 0 : index
    %c0_2 = arith.constant 0 : index
    %6 = vector.load %arg1[%c0_1, %c0_2] : memref<336x256xbf16, #tpu.memory_space<vmem>>, vector<336x256xbf16>
    %7 = arith.truncf %5 : vector<336x1xf32> to vector<336x1xbf16>
    %8 = vector.broadcast %7 : vector<336x1xbf16> to vector<336x256xbf16>
    %9 = arith.mulf %8, %6 : vector<336x256xbf16>
    %c0_3 = arith.constant 0 : index
    %c0_4 = arith.constant 0 : index
    %10 = vector.load %arg3[%c0_3, %c0_4] : memref<336x336xbf16, #tpu.memory_space<vmem>>, vector<336x336xbf16>
    %cst_5 = arith.constant dense<0.000000e+00> : vector<336x256xf32>
    %11 = tpu.matmul %10, %9, %cst_5 {dimension_numbers = #tpu.dot_dimension_numbers<[1], [0], [0], [1], [0, 0, 1, 1], [], []>} : vector<336x336xbf16>, vector<336x256xbf16>, vector<336x256xf32> -> vector<336x256xf32>
    %cst_6 = arith.constant dense<0.000000e+00> : vector<336xf32>
    %12 = vector.multi_reduction <add>, %11, %cst_6 [1] : vector<336x256xf32> to vector<336xf32>
    %13 = vector.shape_cast %12 : vector<336xf32> to vector<336x1xf32>
    %cst_7 = arith.constant 0.00510204071 : f32
    %14 = vector.broadcast %cst_7 : f32 to vector<336x1xf32>
    %15 = arith.mulf %13, %14 : vector<336x1xf32>
    %16 = arith.mulf %11, %11 : vector<336x256xf32>
    %cst_8 = arith.constant dense<0.000000e+00> : vector<336xf32>
    %17 = vector.multi_reduction <add>, %16, %cst_8 [1] : vector<336x256xf32> to vector<336xf32>
    %18 = vector.shape_cast %17 : vector<336xf32> to vector<336x1xf32>
    %cst_9 = arith.constant 0.00510204071 : f32
    %19 = vector.broadcast %cst_9 : f32 to vector<336x1xf32>
    %20 = arith.mulf %18, %19 : vector<336x1xf32>
    %21 = arith.mulf %15, %15 : vector<336x1xf32>
    %22 = arith.subf %20, %21 : vector<336x1xf32>
    %cst_10 = arith.constant 0.000000e+00 : f32
    %23 = vector.broadcast %cst_10 : f32 to vector<336x1xf32>
    %24 = arith.maximumf %22, %23 : vector<336x1xf32>
    %25 = vector.broadcast %15 : vector<336x1xf32> to vector<336x256xf32>
    %26 = arith.subf %11, %25 : vector<336x256xf32>
    %cst_11 = arith.constant 9.99999974E-6 : f32
    %27 = vector.broadcast %cst_11 : f32 to vector<336x1xf32>
    %28 = arith.addf %24, %27 : vector<336x1xf32>
    %29 = math.rsqrt %28 : vector<336x1xf32>
    %c0_12 = arith.constant 0 : index
    %c0_13 = arith.constant 0 : index
    %30 = vector.load %arg4[%c0_12, %c0_13] : memref<336x1xf32, #tpu.memory_space<vmem>>, vector<336x1xf32>
    %31 = arith.mulf %29, %30 : vector<336x1xf32>
    %32 = vector.broadcast %31 : vector<336x1xf32> to vector<336x256xf32>
    %33 = arith.mulf %26, %32 : vector<336x256xf32>
    %c0_14 = arith.constant 0 : index
    %c0_15 = arith.constant 0 : index
    %34 = vector.load %arg5[%c0_14, %c0_15] : memref<336x1xf32, #tpu.memory_space<vmem>>, vector<336x1xf32>
    %35 = vector.broadcast %34 : vector<336x1xf32> to vector<336x256xf32>
    %36 = arith.addf %33, %35 : vector<336x256xf32>
    %c0_16 = arith.constant 0 : index
    %c0_17 = arith.constant 0 : index
    %37 = vector.load %arg2[%c0_16, %c0_17] : memref<336x256xbf16, #tpu.memory_space<vmem>>, vector<336x256xbf16>
    %38 = arith.extf %37 : vector<336x256xbf16> to vector<336x256xf32>
    %39 = arith.addf %38, %36 : vector<336x256xf32>
    %cst_18 = arith.constant 0.000000e+00 : f32
    %40 = vector.broadcast %cst_18 : f32 to vector<336x256xf32>
    %41 = arith.maximumf %39, %40 : vector<336x256xf32>
    %42 = tpu.iota {dimensions = array<i32: 1>} : vector<336x256xi32>
    %c196_i32 = arith.constant 196 : i32
    %43 = vector.broadcast %c196_i32 : i32 to vector<336x256xi32>
    %44 = arith.cmpi slt, %42, %43 : vector<336x256xi32>
    %cst_19 = arith.constant 0.000000e+00 : f32
    %45 = vector.broadcast %cst_19 : f32 to vector<336x256xf32>
    %46 = arith.select %44, %41, %45 : vector<336x256xi1>, vector<336x256xf32>
    %c0_20 = arith.constant 0 : index
    %c0_21 = arith.constant 0 : index
    %47 = vector.load %arg6[%c0_20, %c0_21] : memref<336x336xbf16, #tpu.memory_space<vmem>>, vector<336x336xbf16>
    %48 = arith.truncf %46 : vector<336x256xf32> to vector<336x256xbf16>
    %cst_22 = arith.constant dense<0.000000e+00> : vector<336x256xf32>
    %49 = tpu.matmul %47, %48, %cst_22 {dimension_numbers = #tpu.dot_dimension_numbers<[1], [0], [0], [1], [0, 0, 1, 1], [], []>} : vector<336x336xbf16>, vector<336x256xbf16>, vector<336x256xf32> -> vector<336x256xf32>
    %cst_23 = arith.constant dense<0.000000e+00> : vector<336xf32>
    %50 = vector.multi_reduction <add>, %49, %cst_23 [1] : vector<336x256xf32> to vector<336xf32>
    %51 = vector.shape_cast %50 : vector<336xf32> to vector<336x1xf32>
    %cst_24 = arith.constant 0.00510204071 : f32
    %52 = vector.broadcast %cst_24 : f32 to vector<336x1xf32>
    %53 = arith.mulf %51, %52 : vector<336x1xf32>
    %54 = arith.mulf %49, %49 : vector<336x256xf32>
    %cst_25 = arith.constant dense<0.000000e+00> : vector<336xf32>
    %55 = vector.multi_reduction <add>, %54, %cst_25 [1] : vector<336x256xf32> to vector<336xf32>
    %56 = vector.shape_cast %55 : vector<336xf32> to vector<336x1xf32>
    %cst_26 = arith.constant 0.00510204071 : f32
    %57 = vector.broadcast %cst_26 : f32 to vector<336x1xf32>
    %58 = arith.mulf %56, %57 : vector<336x1xf32>
    %59 = arith.mulf %53, %53 : vector<336x1xf32>
    %60 = arith.subf %58, %59 : vector<336x1xf32>
    %cst_27 = arith.constant 0.000000e+00 : f32
    %61 = vector.broadcast %cst_27 : f32 to vector<336x1xf32>
    %62 = arith.maximumf %60, %61 : vector<336x1xf32>
    %63 = vector.broadcast %53 : vector<336x1xf32> to vector<336x256xf32>
    %64 = arith.subf %49, %63 : vector<336x256xf32>
    %cst_28 = arith.constant 9.99999974E-6 : f32
    %65 = vector.broadcast %cst_28 : f32 to vector<336x1xf32>
    %66 = arith.addf %62, %65 : vector<336x1xf32>
    %67 = math.rsqrt %66 : vector<336x1xf32>
    %c0_29 = arith.constant 0 : index
    %c0_30 = arith.constant 0 : index
    %68 = vector.load %arg7[%c0_29, %c0_30] : memref<336x1xf32, #tpu.memory_space<vmem>>, vector<336x1xf32>
    %69 = arith.mulf %67, %68 : vector<336x1xf32>
    %70 = vector.broadcast %69 : vector<336x1xf32> to vector<336x256xf32>
    %71 = arith.mulf %64, %70 : vector<336x256xf32>
    %c0_31 = arith.constant 0 : index
    %c0_32 = arith.constant 0 : index
    %72 = vector.load %arg8[%c0_31, %c0_32] : memref<336x1xf32, #tpu.memory_space<vmem>>, vector<336x1xf32>
    %73 = vector.broadcast %72 : vector<336x1xf32> to vector<336x256xf32>
    %74 = arith.addf %71, %73 : vector<336x256xf32>
    %c0_33 = arith.constant 0 : index
    %c0_34 = arith.constant 0 : index
    %75 = vector.load %arg9[%c0_33, %c0_34] : memref<336x256xf32, #tpu.memory_space<vmem>>, vector<336x256xf32>
    tpu.vector_store %arg9[%c0_33, %c0_34], %74 {strides = array<i32>} : memref<336x256xf32, #tpu.memory_space<vmem>>, vector<336x256xf32>,
    return
  }
}

</mosaic_0001>

<bundles_post_ra>
// kernel: tpu_custom_call.1
= control target key start
LH: loop header
LB: loop body
LE: loop exit
PB: predicated region body
PF: predicated region fallthrough
CT: control target
= control target key end

     0   :  { %v9209_v3 = vmov 0   ;;  %s16321_s0 = inlined_call_operand.vmem [shape: f32[336,1], index: 0, kind: input, shape index: {}]   ;;  %s16322_s1 = inlined_call_operand.vmem [shape: bf16[336,256], index: 1, kind: input, shape index: {}]   ;;  %s16323_s2 = inlined_call_operand.vmem [shape: bf16[336,256], index: 2, kind: input, shape index: {}]   ;;  %s16324_s3 = inlined_call_operand.vmem [shape: bf16[336,336], index: 3, kind: input, shape index: {}]   ;;  %s16325_s4 = inlined_call_operand.vmem [shape: f32[336,1], index: 4, kind: input, shape index: {}]   ;;  %s16326_s5 = inlined_call_operand.vmem [shape: f32[336,1], index: 5, kind: input, shape index: {}]   ;;  %s16327_s6 = inlined_call_operand.vmem [shape: bf16[336,336], index: 6, kind: input, shape index: {}]   ;;  %s16328_s7 = inlined_call_operand.vmem [shape: f32[336,1], index: 7, kind: input, shape index: {}]   ;;  %s16329_s8 = inlined_call_operand.vmem [shape: f32[336,1], index: 8, kind: input, shape index: {}]   ;;  %s16330_s9 = inlined_call_operand.hbm [shape: f32[336,256], index: 9, kind: output, shape index: {}]  }
   0x1   :  { %v74_v0 = vld [vmem:[%s16321_s0 + $0x140] sm:$0xff]  ;;  %v48_v1 = vld [vmem:[%s16321_s0 + $0x70] sm:$0xff]  ;;  %8846 = vset.pattern.permute.xlu2 %v9209_v3  ;;  %8845 = vset.pattern.permute.xlu1 %v9209_v3  ;;  %v75_v7 = vld [vmem:[%s16321_s0 + $0x148] sm:$0xff] }
   0x2   :  { %v46_v2 = vld [vmem:[%s16321_s0 + $0x60] sm:$0xff]  ;;  %v8060_v4 = vmul.f32 -1.442695, %v74_v0  ;;  %v8034_v5 = vmul.f32 -1.442695, %v48_v1  ;;  %8844 = vset.pattern.permute.xlu0 %v9209_v3  ;;  %v49_v8 = vld [vmem:[%s16321_s0 + $0x78] sm:$0xff] }
   0x3   :  { %v8032_v6 = vmul.f32 -1.442695, %v46_v2  ;;  %v47_v9 = vld [vmem:[%s16321_s0 + $0x68] sm:$0xff]  ;;  %v8061_v10 = vmul.f32 -1.442695, %v75_v7  ;;  %v72_v13 = vld [vmem:[%s16321_s0 + $0x130] sm:$0xff] }
   0x4   :  { %8847 = vpow2.f32 %v8060_v4  ;;  %v8035_v11 = vmul.f32 -1.442695, %v49_v8  ;;  %v8033_v12 = vmul.f32 -1.442695, %v47_v9  ;;  %v45_v14 = vld [vmem:[%s16321_s0 + $0x58] sm:$0xff]  ;;  %v44_v17 = vld [vmem:[%s16321_s0 + $0x50] sm:$0xff] }
   0x5   :  { %8849 = vpow2.f32 %v8034_v5  ;;  %v8058_v15 = vmul.f32 -1.442695, %v72_v13  ;;  %v8031_v16 = vmul.f32 -1.442695, %v45_v14 }
   0x6   :  { %8851 = vpow2.f32 %v8032_v6 }
   0x7   :  { %8853 = vpow2.f32 %v8061_v10 }
   0x8   :  { %8855 = vpow2.f32 %v8035_v11 }
   0x9   :  { %8857 = vpow2.f32 %v8033_v12 }
   0xa   :  { %14 = vsyncpa [#allocation3], 0  ;;  %v8848_v18 = vpop.eup %8847  ;;  %8859 = vpow2.f32 %v8058_v15  ;;  %v8030_v23 = vmul.f32 -1.442695, %v44_v17  ;;  %v42_v43 = vld [vmem:[%s16321_s0 + $0x40] sm:$0xff]  ;;  %s8008_s11 = sshll.u32 %s16330_s9, 4  ;;  %s8009_s11 = int_to_ptr.hbm [resolvable:$true] %s8008_s11 }
   0xb   :  { %v8850_v19 = vpop.eup %8849  ;;  %v9291_v20 = vadd.f32 1.0, %v8848_v18  ;;  %8861 = vpow2.f32 %v8031_v16  ;;  %v8028_v54 = vmul.f32 -1.442695, %v42_v43  ;;  %s9212_s12 = smov 256   ;;  %s9213_s13 = smov 16  }
   0xc   :  { %v8852_v21 = vpop.eup %8851  ;;  %v9293_v22 = vadd.f32 1.0, %v8850_v19 }
   0xd   :  { %v8854_v24 = vpop.eup %8853  ;;  %8863 = vrcp.f32 %v9291_v20  ;;  %v855_v25 = vand.u32 2147483648, %v9291_v20  ;;  %v853_v27 = vand.u32 2147483647, %v9291_v20  ;;  %v9301_v31 = vadd.f32 1.0, %v8852_v21 }
   0xe   :  { %v8856_v26 = vpop.eup %8855  ;;  %8865 = vrcp.f32 %v9293_v22  ;;  %v463_v29 = vand.u32 2147483647, %v9293_v22  ;;  %v465_v30 = vand.u32 2147483648, %v9293_v22  ;;  %v9303_v32 = vadd.f32 1.0, %v8854_v24 }
   0xf   :  { %v8858_v28 = vpop.eup %8857  ;;  %vm849_vm0 = vweird.f32 %v9291_v20  ;;  %v9306_v33 = vadd.f32 1.0, %v8856_v26  ;;  %8867 = vpow2.f32 %v8030_v23  ;;  %v9308_v35 = vor.u32 1.1754944e-38, %v855_v25 }
  0x10   :  { %v8860_v34 = vpop.eup %8859  ;;  %vm459_vm1 = vweird.f32 %v9293_v22  ;;  %8869 = vrcp.f32 %v9301_v31  ;;  %v435_v36 = vand.u32 2147483648, %v9301_v31  ;;  %vm9313_vm2 = vcmp.eq.f32.partialorder %v853_v27, 8.507059e+37 }
  0x11   :  { %v8862_v37 = vpop.eup %8861  ;;  %v433_v39 = vand.u32 2147483647, %v9301_v31  ;;  %8871 = vrcp.f32 %v9303_v32  ;;  %v870_v40 = vand.u32 2147483648, %v9303_v32  ;;  %v9320_v41 = vadd.f32 1.0, %v8858_v28 }
  0x12   :  { %vm9322_vm3 = vcmp.eq.f32.partialorder %v463_v29, 8.507059e+37  ;;  %v466_v44 = vor.u32 1.1754944e-38, %v465_v30  ;;  %vm429_vm4 = vweird.f32 %v9301_v31  ;;  %v868_v45 = vand.u32 2147483647, %v9303_v32 }
  0x13   :  { %v8864_v42 = vpop.eup %8863  ;;  %8873 = vrcp.f32 %v9306_v33  ;;  %v9330_v48 = vor.u32 1.1754944e-38, %v435_v36  ;;  %vm864_vm5 = vweird.f32 %v9303_v32  ;;  %vm474_vm6 = vweird.f32 %v9306_v33 }
  0x14   :  { %v8866_v46 = vpop.eup %8865  ;;  %v845_v47 = vmul.f32 %v8864_v42, %v9291_v20  ;;  %vm850_vm7 = vweird.f32 %v8864_v42  ;;  %v478_v50 = vand.u32 2147483647, %v9306_v33  ;;  %v480_v51 = vand.u32 2147483648, %v9306_v33 }
  0x15   :  { %v455_v49 = vmul.f32 %v8866_v46, %v9293_v22  ;;  %v8868_v52 = vpop.eup %8867  ;;  %vm460_vm8 = vweird.f32 %v8866_v46  ;;  %vm9337_vm9 = vcmp.eq.f32.partialorder %v433_v39, 8.507059e+37  ;;  %v9341_v55 = vor.u32 1.1754944e-38, %v870_v40  ;;  %vm9359_vm13 = vmor %vm849_vm0, %vm850_vm7 }
  0x16   :  { %v846_v53 = vsub.f32 1.0, %v845_v47  ;;  %8875 = vrcp.f32 %v9320_v41  ;;  %v8870_v56 = vpop.eup %8869  ;;  %vm9344_vm10 = vcmp.eq.f32.partialorder %v868_v45, 8.507059e+37  ;;  %v448_v59 = vand.u32 2147483647, %v9320_v41  ;;  %vm9367_vm11 = vmor %vm459_vm1, %vm460_vm8 }
  0x17   :  { %v456_v57 = vsub.f32 1.0, %v455_v49  ;;  %v450_v60 = vand.u32 2147483648, %v9320_v41  ;;  %v8872_v61 = vpop.eup %8871  ;;  %v425_v63 = vmul.f32 %v8870_v56, %v9301_v31  ;;  %vm9352_vm12 = vcmp.eq.f32.partialorder %v478_v50, 8.507059e+37 }
  0x18   :  { %v847_v62 = vmul.f32 %v8864_v42, %v846_v53  ;;  %v481_v1 = vor.u32 1.1754944e-38, %v480_v51  ;;  %vm430_vm14 = vweird.f32 %v8870_v56  ;;  %v860_v5 = vmul.f32 %v8872_v61, %v9303_v32 }
  0x19   :  { %v8874_v2 = vpop.eup %8873  ;;  %v457_v4 = vmul.f32 %v8866_v46, %v456_v57  ;;  %vm865_vm15 = vweird.f32 %v8872_v61  ;;  %v426_v8 = vsub.f32 1.0, %v425_v63  ;;  %v451_v10 = vor.u32 1.1754944e-38, %v450_v60  ;;  %vm9386_vm1 = vmor %vm429_vm4, %vm430_vm14  ;;  %v70_v60 = vld [vmem:[%s16321_s0 + $0x120] sm:$0xff] }
  0x1a   :  { %v848_v6 = vadd.f32 %v8864_v42, %v847_v62  ;;  %v470_v9 = vmul.f32 %v8874_v2, %v9306_v33  ;;  %v861_v12 = vsub.f32 1.0, %v860_v5  ;;  %vm475_vm0 = vweird.f32 %v8874_v2  ;;  %v41_v5 = vld [vmem:[%s16321_s0 + $0x38] sm:$0xff] }
  0x1b   :  { %v458_v11 = vadd.f32 %v8866_v46, %v457_v4  ;;  %v9372_v13 = vadd.f32 1.0, %v8860_v34  ;;  %v427_v16 = vmul.f32 %v8870_v56, %v426_v8  ;;  %v9376_v18 = vadd.f32 1.0, %v8862_v37  ;;  %vm9403_vm4 = vmor %vm474_vm6, %vm475_vm0  ;;  %v73_v37 = vld [vmem:[%s16321_s0 + $0x138] sm:$0xff] }
  0x1c   :  { %v8876_v14 = vpop.eup %8875  ;;  %v852_v15 = vsel %vm9359_vm13, %v8864_v42, %v848_v6  ;;  %v471_v17 = vsub.f32 1.0, %v470_v9  ;;  %v862_v22 = vmul.f32 %v8872_v61, %v861_v12  ;;  %v9410_v36 = vadd.f32 1.0, %v8868_v52  ;;  %v43_v42 = vld [vmem:[%s16321_s0 + $0x48] sm:$0xff]  ;;  %v69_v9 = vld [vmem:[%s16321_s0 + $0x118] sm:$0xff] }
  0x1d   :  { %v857_v19 = vsel %vm9313_vm2, %v9308_v35, %v852_v15  ;;  %v462_v20 = vsel %vm9367_vm11, %v8866_v46, %v458_v11  ;;  %v440_v23 = vmul.f32 %v8876_v14, %v9320_v41  ;;  %v428_v26 = vadd.f32 %v8870_v56, %v427_v16  ;;  %vm9396_vm2 = vmor %vm864_vm5, %vm865_vm15 }
  0x1e   :  { %v956_v24 = vpack.c.bf16 %v857_v19, %v857_v19  ;;  %v467_v25 = vsel %vm9322_vm3, %v466_v44, %v462_v20  ;;  %v472_v28 = vmul.f32 %v8874_v2, %v471_v17  ;;  %v863_v30 = vadd.f32 %v8872_v61, %v862_v22 }
  0x1f   :  { %v930_v29 = vpack.c.bf16 %v467_v25, %v467_v25  ;;  %v441_v34 = vsub.f32 1.0, %v440_v23  ;;  %vm445_vm3 = vweird.f32 %v8876_v14  ;;  %v432_v32 = vsel %vm9386_vm1, %v8870_v56, %v428_v26 }
  0x20   :  { %1320 = vperm.xlu2 %8846, %v956_v24   ;;  %v473_v35 = vadd.f32 %v8874_v2, %v472_v28  ;;  %8877 = vrcp.f32 %v9372_v13  ;;  %v437_v33 = vsel %vm9337_vm9, %v9330_v48, %v432_v32  ;;  %v867_v38 = vsel %vm9396_vm2, %v8872_v61, %v863_v30  ;;  %v71_v61 = vld [vmem:[%s16321_s0 + $0x128] sm:$0xff] }
  0x21   :  { %1086 = vperm.xlu0 %8844, %v930_v29   ;;  %v442_v39 = vmul.f32 %v8876_v14, %v441_v34  ;;  %v823_v40 = vand.u32 2147483647, %v9372_v13  ;;  %v928_v44 = vpack.c.bf16 %v437_v33, %v437_v33  ;;  %v872_v45 = vsel %vm9344_vm10, %v9341_v55, %v867_v38 }
  0x22   :  { %v477_v46 = vsel %vm9403_vm4, %v8874_v2, %v473_v35  ;;  %vm16673_vm5 = vweird.f32 %v9320_v41  ;;  %v825_v48 = vand.u32 2147483648, %v9372_v13  ;;  %vm449_vm7 = vcmp.eq.f32.partialorder %v448_v59, 8.507059e+37  ;;  %v68_v2 = vld [vmem:[%s16321_s0 + $0x110] sm:$0xff] }
  0x23   :  { %vm9435_vm6 = vmor %vm16673_vm5, %vm445_vm3  ;;  %v482_v49 = vsel %vm9352_vm12, %v481_v1, %v477_v46  ;;  %v443_v50 = vadd.f32 %v8876_v14, %v442_v39  ;;  %v8059_v51 = vmul.f32 -1.442695, %v73_v37  ;;  %1068 = vperm.xlu1 %8845, %v928_v44   ;;  %v957_v52 = vpack.c.bf16 %v872_v45, %v872_v45  ;;  %v40_v1 = vld [vmem:[%s16321_s0 + $0x30] sm:$0xff]  ;;  %v39_v44 = vld [vmem:[%s16321_s0 + $0x28] sm:$0xff] }
  0x24   :  { %8879 = vrcp.f32 %v9376_v18  ;;  %v8029_v53 = vmul.f32 -1.442695, %v43_v42  ;;  %v931_v55 = vpack.c.bf16 %v482_v49, %v482_v49  ;;  %vm819_vm8 = vweird.f32 %v9372_v13 }
  0x25   :  { %v447_v41 = vsel %vm9435_vm6, %v8876_v14, %v443_v50  ;;  %8881 = vrcp.f32 %v9410_v36  ;;  %vm9447_vm9 = vcmp.eq.f32.partialorder %v823_v40, 8.507059e+37  ;;  %v826_v59 = vor.u32 1.1754944e-38, %v825_v48  ;;  %v38_v48 = vld [vmem:[%s16321_s0 + $0x20] sm:$0xff] }
  0x26   :  { %v8878_v56 = vpop.eup %8877  ;;  %v452_v57 = vsel %vm449_vm7, %v451_v10, %v447_v41  ;;  %vm414_vm10 = vweird.f32 %v9376_v18  ;;  %v418_v63 = vand.u32 2147483647, %v9376_v18  ;;  %v420_v0 = vand.u32 2147483648, %v9376_v18 }
  0x27   :  { %v815_v62 = vmul.f32 %v8878_v56, %v9372_v13  ;;  %vm399_vm11 = vweird.f32 %v9410_v36  ;;  %v929_v3 = vpack.c.bf16 %v452_v57, %v452_v57  ;;  %vm820_vm12 = vweird.f32 %v8878_v56 }
  0x28   :  { %1329 = vperm.xlu2 %8846, %v957_v52   ;;  %v403_v4 = vand.u32 2147483647, %v9410_v36  ;;  %8883 = vpow2.f32 %v8059_v51  ;;  %v8056_v7 = vmul.f32 -1.442695, %v70_v60  ;;  %v8057_v8 = vmul.f32 -1.442695, %v71_v61  ;;  %vm9480_vm13 = vmor %vm819_vm8, %vm820_vm12 }
  0x29   :  { %1095 = vperm.xlu0 %8844, %v931_v55   ;;  %v816_v6 = vsub.f32 1.0, %v815_v62  ;;  %8885 = vpow2.f32 %v8029_v53  ;;  %v405_v11 = vand.u32 2147483648, %v9410_v36  ;;  %v8026_v12 = vmul.f32 -1.442695, %v40_v1 }
  0x2a   :  { %v8880_v10 = vpop.eup %8879  ;;  %8887 = vpow2.f32 %v8028_v54  ;;  %v8054_v14 = vmul.f32 -1.442695, %v68_v2  ;;  %v8027_v19 = vmul.f32 -1.442695, %v41_v5  ;;  %vm9484_vm14 = vcmp.eq.f32.partialorder %v418_v63, 8.507059e+37 }
  0x2b   :  { %v8882_v15 = vpop.eup %8881  ;;  %v817_v16 = vmul.f32 %v8878_v56, %v816_v6  ;;  %v410_v17 = vmul.f32 %v8880_v10, %v9376_v18  ;;  %8889 = vpow2.f32 %v8056_v7  ;;  %1077 = vperm.xlu1 %8845, %v929_v3   ;;  %v8055_v23 = vmul.f32 -1.442695, %v69_v9  ;;  %v66_v18 = vld [vmem:[%s16321_s0 + $0x100] sm:$0xff] }
  0x2c   :  { %v395_v22 = vmul.f32 %v8882_v15, %v9410_v36  ;;  %8891 = vpow2.f32 %v8057_v8  ;;  %vm415_vm15 = vweird.f32 %v8880_v10  ;;  %v421_v27 = vor.u32 1.1754944e-38, %v420_v0 }
  0x2d   :  { %v818_v24 = vadd.f32 %v8878_v56, %v817_v16  ;;  %v411_v25 = vsub.f32 1.0, %v410_v17  ;;  %8893 = vpow2.f32 %v8026_v12  ;;  %vm400_vm0 = vweird.f32 %v8882_v15  ;;  %vm9497_vm1 = vmor %vm414_vm10, %vm415_vm15 }
  0x2e   :  { %v8884_v26 = vpop.eup %8883  ;;  %v396_v28 = vsub.f32 1.0, %v395_v22  ;;  %8895 = vpow2.f32 %v8054_v14  ;;  %vm9506_vm2 = vmor %vm399_vm11, %vm400_vm0  ;;  %v406_v43 = vor.u32 1.1754944e-38, %v405_v11  ;;  %vm9517_vm4 = vcmp.eq.f32.partialorder %v403_v4, 8.507059e+37 }
  0x2f   :  { %v8886_v13 = vpop.eup %8885  ;;  %v822_v29 = vsel %vm9480_vm13, %v8878_v56, %v818_v24  ;;  %v412_v30 = vmul.f32 %v8880_v10, %v411_v25  ;;  %v9491_v31 = vadd.f32 1.0, %v8884_v26  ;;  %8897 = vpow2.f32 %v8027_v19 }
  0x30   :  { %v8888_v34 = vpop.eup %8887  ;;  %v827_v32 = vsel %vm9447_vm9, %v826_v59, %v822_v29  ;;  %v397_v37 = vmul.f32 %v8882_v15, %v396_v28  ;;  %v9501_v33 = vadd.f32 1.0, %v8886_v13  ;;  %8899 = vpow2.f32 %v8055_v23 }
  0x31   :  { %v8890_v38 = vpop.eup %8889  ;;  %v954_v39 = vpack.c.bf16 %v827_v32, %v827_v32  ;;  %v413_v40 = vadd.f32 %v8880_v10, %v412_v30  ;;  %8901 = vrcp.f32 %v9491_v31  ;;  %v838_v36 = vand.u32 2147483647, %v9491_v31  ;;  %v67_v32 = vld [vmem:[%s16321_s0 + $0x108] sm:$0xff] }
  0x32   :  { %v8892_v45 = vpop.eup %8891  ;;  %v398_v46 = vadd.f32 %v8882_v15, %v397_v37  ;;  %8903 = vrcp.f32 %v9501_v33  ;;  %v840_v51 = vand.u32 2147483648, %v9491_v31  ;;  %v388_v52 = vand.u32 2147483647, %v9501_v33 }
  0x33   :  { %v8894_v49 = vpop.eup %8893  ;;  %1302 = vperm.xlu2 %8846, %v954_v39   ;;  %v417_v50 = vsel %vm9497_vm1, %v8880_v10, %v413_v40  ;;  %v390_v53 = vand.u32 2147483648, %v9501_v33  ;;  %v9535_v56 = vmul.f32 -1.442695, %v66_v18  ;;  %v9537_v57 = vmul.f32 -1.442695, %v39_v44 }
  0x34   :  { %v8896_v54 = vpop.eup %8895  ;;  %v422_v55 = vsel %vm9484_vm14, %v421_v27, %v417_v50  ;;  %v402_v41 = vsel %vm9506_vm2, %v8882_v15, %v398_v46  ;;  %vm834_vm3 = vweird.f32 %v9491_v31  ;;  %v9542_v61 = vmul.f32 -1.442695, %v38_v48 }
  0x35   :  { %v8898_v58 = vpop.eup %8897  ;;  %v927_v59 = vpack.c.bf16 %v422_v55, %v422_v55  ;;  %v407_v60 = vsel %vm9517_vm4, %v406_v43, %v402_v41  ;;  %vm384_vm5 = vweird.f32 %v9501_v33  ;;  %v9545_v0 = vadd.f32 1.0, %v8888_v34 }
  0x36   :  { %v8900_v62 = vpop.eup %8899  ;;  %v926_v63 = vpack.c.bf16 %v407_v60, %v407_v60  ;;  %v9547_v1 = vadd.f32 1.0, %v8890_v38  ;;  %vm9549_vm6 = vcmp.eq.f32.partialorder %v838_v36, 8.507059e+37  ;;  %v841_v4 = vor.u32 1.1754944e-38, %v840_v51 }
  0x37   :  { %v8902_v2 = vpop.eup %8901  ;;  %1059 = vperm.xlu1 %8845, %v927_v59   ;;  %vm9553_vm7 = vcmp.eq.f32.partialorder %v388_v52, 8.507059e+37  ;;  %v391_v6 = vor.u32 1.1754944e-38, %v390_v53  ;;  %8905 = vrcp.f32 %v9545_v0  ;;  %v9559_v9 = vadd.f32 1.0, %v8892_v45 }
  0x38   :  { %v8904_v7 = vpop.eup %8903  ;;  %1050 = vperm.xlu0 %8844, %v926_v63   ;;  %v830_v8 = vmul.f32 %v8902_v2, %v9491_v31  ;;  %v9561_v10 = vadd.f32 1.0, %v8894_v49  ;;  %v373_v12 = vand.u32 2147483647, %v9545_v0  ;;  %v9565_v14 = vadd.f32 1.0, %v8896_v54 }
  0x39   :  { %v380_v11 = vmul.f32 %v8904_v7, %v9501_v33  ;;  %v9567_v15 = vadd.f32 1.0, %v8898_v58  ;;  %vm835_vm8 = vweird.f32 %v8902_v2  ;;  %v375_v17 = vand.u32 2147483648, %v9545_v0 }
  0x3a   :  { %v831_v16 = vsub.f32 1.0, %v830_v8  ;;  %8907 = vrcp.f32 %v9547_v1  ;;  %vm385_vm9 = vweird.f32 %v8904_v7  ;;  %v793_v20 = vand.u32 2147483647, %v9547_v1  ;;  %vm9579_vm11 = vmor %vm834_vm3, %vm835_vm8 }
  0x3b   :  { %v381_v19 = vsub.f32 1.0, %v380_v11  ;;  %v795_v21 = vand.u32 2147483648, %v9547_v1  ;;  %vm369_vm10 = vweird.f32 %v9545_v0  ;;  %8909 = vrcp.f32 %v9559_v9  ;;  %vm9591_vm14 = vmor %vm384_vm5, %vm385_vm9 }
  0x3c   :  { %v832_v22 = vmul.f32 %v8902_v2, %v831_v16  ;;  %v9575_v23 = vadd.f32 1.0, %v8900_v62  ;;  %vm9583_vm12 = vcmp.eq.f32.partialorder %v373_v12, 8.507059e+37  ;;  %vm789_vm13 = vweird.f32 %v9547_v1 }
  0x3d   :  { %v382_v25 = vmul.f32 %v8904_v7, %v381_v19  ;;  %v808_v27 = vand.u32 2147483647, %v9559_v9  ;;  %v8906_v28 = vpop.eup %8905  ;;  %v376_v30 = vor.u32 1.1754944e-38, %v375_v17  ;;  %vm804_vm15 = vweird.f32 %v9559_v9 }
  0x3e   :  { %v833_v13 = vadd.f32 %v8902_v2, %v832_v22  ;;  %8911 = vrcp.f32 %v9561_v10  ;;  %v365_v34 = vmul.f32 %v8906_v28, %v9545_v0  ;;  %vm9598_vm0 = vcmp.eq.f32.partialorder %v793_v20, 8.507059e+37 }
  0x3f   :  { %v383_v31 = vadd.f32 %v8904_v7, %v382_v25  ;;  %v796_v35 = vor.u32 1.1754944e-38, %v795_v21  ;;  %v810_v37 = vand.u32 2147483648, %v9559_v9  ;;  %vm370_vm1 = vweird.f32 %v8906_v28 }
  0x40   :  { %v8908_v33 = vpop.eup %8907  ;;  %v837_v38 = vsel %vm9579_vm11, %v8902_v2, %v833_v13  ;;  %vm339_vm2 = vweird.f32 %v9561_v10  ;;  %v343_v39 = vand.u32 2147483647, %v9561_v10  ;;  %v366_v43 = vsub.f32 1.0, %v365_v34  ;;  %vm9623_vm5 = vmor %vm369_vm10, %vm370_vm1 }
  0x41   :  { %v842_v40 = vsel %vm9549_vm6, %v841_v4, %v837_v38  ;;  %v387_v42 = vsel %vm9591_vm14, %v8904_v7, %v383_v31  ;;  %v785_v18 = vmul.f32 %v8908_v33, %v9547_v1  ;;  %vm9612_vm4 = vcmp.eq.f32.partialorder %v808_v27, 8.507059e+37  ;;  %v8910_v45 = vpop.eup %8909 }
  0x42   :  { %v955_v46 = vpack.c.bf16 %v842_v40, %v842_v40  ;;  %v392_v47 = vsel %vm9553_vm7, %v391_v6, %v387_v42  ;;  %vm790_vm3 = vweird.f32 %v8908_v33  ;;  %v345_v36 = vand.u32 2147483648, %v9561_v10  ;;  %v37_v42 = vld [vmem:[%s16321_s0 + $0x18] sm:$0xff] }
  0x43   :  { %v925_v48 = vpack.c.bf16 %v392_v47, %v392_v47  ;;  %v367_v49 = vmul.f32 %v8906_v28, %v366_v43  ;;  %v786_v50 = vsub.f32 1.0, %v785_v18  ;;  %v800_v51 = vmul.f32 %v8910_v45, %v9559_v9  ;;  %vm9636_vm8 = vmor %vm789_vm13, %vm790_vm3  ;;  %v36_v43 = vld [vmem:[%s16321_s0 + $0x10] sm:$0xff] }
  0x44   :  { %v8912_v52 = vpop.eup %8911  ;;  %1311 = vperm.xlu0 %8844, %v955_v46   ;;  %vm805_vm6 = vweird.f32 %v8910_v45  ;;  %v811_v54 = vor.u32 1.1754944e-38, %v810_v37  ;;  %vm9627_vm7 = vcmp.eq.f32.partialorder %v343_v39, 8.507059e+37  ;;  %8913 = vrcp.f32 %v9565_v14 }
  0x45   :  { %1041 = vperm.xlu2 %8846, %v925_v48   ;;  %v368_v41 = vadd.f32 %v8906_v28, %v367_v49  ;;  %v787_v58 = vmul.f32 %v8908_v33, %v786_v50  ;;  %v801_v59 = vsub.f32 1.0, %v800_v51  ;;  %v335_v60 = vmul.f32 %v8912_v52, %v9561_v10  ;;  %vm9649_vm10 = vmor %vm804_vm15, %vm805_vm6 }
  0x46   :  { %vm340_vm9 = vweird.f32 %v8912_v52  ;;  %v346_v63 = vor.u32 1.1754944e-38, %v345_v36  ;;  %v763_v0 = vand.u32 2147483647, %v9565_v14  ;;  %8915 = vrcp.f32 %v9567_v15 }
  0x47   :  { %v372_v2 = vsel %vm9623_vm5, %v8906_v28, %v368_v41  ;;  %v788_v3 = vadd.f32 %v8908_v33, %v787_v58  ;;  %v802_v4 = vmul.f32 %v8910_v45, %v801_v59  ;;  %v336_v5 = vsub.f32 1.0, %v335_v60  ;;  %v35_v58 = vld [vmem:[%s16321_s0 + $0x8] sm:$0xff] }
  0x48   :  { %v377_v6 = vsel %vm9583_vm12, %v376_v30, %v372_v2  ;;  %vm759_vm11 = vweird.f32 %v9565_v14  ;;  %v765_v7 = vand.u32 2147483648, %v9565_v14  ;;  %v358_v8 = vand.u32 2147483647, %v9567_v15  ;;  %vm9663_vm12 = vmor %vm339_vm2, %vm340_vm9 }
  0x49   :  { %v924_v11 = vpack.c.bf16 %v377_v6, %v377_v6  ;;  %v792_v12 = vsel %vm9636_vm8, %v8908_v33, %v788_v3  ;;  %v803_v16 = vadd.f32 %v8910_v45, %v802_v4  ;;  %v337_v17 = vmul.f32 %v8912_v52, %v336_v5 }
  0x4a   :  { %v8914_v19 = vpop.eup %8913  ;;  %v797_v9 = vsel %vm9598_vm0, %v796_v35, %v792_v12  ;;  %vm9667_vm13 = vcmp.eq.f32.partialorder %v763_v0, 8.507059e+37  ;;  %v360_v22 = vand.u32 2147483648, %v9567_v15  ;;  %8917 = vrcp.f32 %v9575_v23 }
  0x4b   :  { %1032 = vperm.xlu1 %8845, %v924_v11   ;;  %v952_v24 = vpack.c.bf16 %v797_v9, %v797_v9  ;;  %v807_v25 = vsel %vm9649_vm10, %v8910_v45, %v803_v16  ;;  %v338_v26 = vadd.f32 %v8912_v52, %v337_v17  ;;  %v755_v10 = vmul.f32 %v8914_v19, %v9565_v14  ;;  %v34_v16 = vld [vmem:[%s16321_s0] sm:$0xff] }
  0x4c   :  { %v8916_v27 = vpop.eup %8915  ;;  %v812_v28 = vsel %vm9612_vm4, %v811_v54, %v807_v25  ;;  %v766_v13 = vor.u32 1.1754944e-38, %v765_v7  ;;  %vm354_vm14 = vweird.f32 %v9567_v15  ;;  %vm9679_vm15 = vcmp.eq.f32.partialorder %v358_v8, 8.507059e+37 }
  0x4d   :  { %1284 = vperm.xlu0 %8844, %v952_v24   ;;  %v342_v30 = vsel %vm9663_vm12, %v8912_v52, %v338_v26  ;;  %v756_v31 = vsub.f32 1.0, %v755_v10  ;;  %vm760_vm0 = vweird.f32 %v8914_v19  ;;  %v350_v34 = vmul.f32 %v8916_v27, %v9567_v15  ;;  %v50_v15 = vld [vmem:[%s16321_s0 + $0x80] sm:$0xff] }
  0x4e   :  { %v953_v35 = vpack.c.bf16 %v812_v28, %v812_v28  ;;  %v347_v37 = vsel %vm9627_vm7, %v346_v63, %v342_v30  ;;  %vm355_vm1 = vweird.f32 %v8916_v27  ;;  %v361_v33 = vor.u32 1.1754944e-38, %v360_v22  ;;  %vm9700_vm2 = vmor %vm759_vm11, %vm760_vm0  ;;  %v53_v30 = vld [vmem:[%s16321_s0 + $0x98] sm:$0xff] }
  0x4f   :  { %v922_v38 = vpack.c.bf16 %v347_v37, %v347_v37  ;;  %v757_v39 = vmul.f32 %v8914_v19, %v756_v31  ;;  %v351_v40 = vsub.f32 1.0, %v350_v34  ;;  %8919 = vpow2.f32 %v9535_v56  ;;  %vm9712_vm3 = vmor %vm354_vm14, %vm355_vm1 }
  0x50   :  { %v8918_v18 = vpop.eup %8917  ;;  %vm774_vm4 = vweird.f32 %v9575_v23  ;;  %v778_v45 = vand.u32 2147483647, %v9575_v23  ;;  %8921 = vpow2.f32 %v9537_v57  ;;  %v8053_v56 = vmul.f32 -1.442695, %v67_v32 }
  0x51   :  { %1014 = vperm.xlu2 %8846, %v922_v38   ;;  %v758_v46 = vadd.f32 %v8914_v19, %v757_v39  ;;  %v352_v47 = vmul.f32 %v8916_v27, %v351_v40  ;;  %v770_v36 = vmul.f32 %v8918_v18, %v9575_v23  ;;  %v780_v48 = vand.u32 2147483648, %v9575_v23 }
  0x52   :  { %vm775_vm5 = vweird.f32 %v8918_v18  ;;  %8923 = vpow2.f32 %v9542_v61  ;;  %v8023_v49 = vmul.f32 -1.442695, %v37_v42  ;;  %v8022_v57 = vmul.f32 -1.442695, %v36_v43 }
  0x53   :  { %1293 = vperm.xlu1 %8845, %v953_v35   ;;  %v762_v50 = vsel %vm9700_vm2, %v8914_v19, %v758_v46  ;;  %v353_v51 = vadd.f32 %v8916_v27, %v352_v47  ;;  %v771_v52 = vsub.f32 1.0, %v770_v36  ;;  %8925 = vpow2.f32 %v8053_v56  ;;  %vm9738_vm7 = vmor %vm774_vm4, %vm775_vm5  ;;  %v51_v36 = vld [vmem:[%s16321_s0 + $0x88] sm:$0xff] }
  0x54   :  { %v767_v53 = vsel %vm9667_vm13, %v766_v13, %v762_v50  ;;  %8927 = vpow2.f32 %v8023_v49  ;;  %vm9726_vm6 = vcmp.eq.f32.partialorder %v778_v45, 8.507059e+37  ;;  %v781_v63 = vor.u32 1.1754944e-38, %v780_v48 }
  0x55   :  { %v8920_v54 = vpop.eup %8919  ;;  %v357_v61 = vsel %vm9712_vm3, %v8916_v27, %v353_v51  ;;  %v772_v55 = vmul.f32 %v8918_v18, %v771_v52  ;;  %8929 = vpow2.f32 %v8022_v57  ;;  %v8036_v2 = vmul.f32 -1.442695, %v50_v15 }
  0x56   :  { %v8922_v59 = vpop.eup %8921  ;;  %v362_v60 = vsel %vm9679_vm15, %v361_v33, %v357_v61  ;;  %v9742_v0 = vadd.f32 1.0, %v8920_v54  ;;  %v950_v3 = vpack.c.bf16 %v767_v53, %v767_v53  ;;  %v8021_v7 = vmul.f32 -1.442695, %v35_v58 }
  0x57   :  { %v923_v4 = vpack.c.bf16 %v362_v60, %v362_v60  ;;  %v773_v5 = vadd.f32 %v8918_v18, %v772_v55  ;;  %v9744_v6 = vadd.f32 1.0, %v8922_v59  ;;  %v8020_v26 = vmul.f32 -1.442695, %v34_v16 }
  0x58   :  { %v8924_v1 = vpop.eup %8923  ;;  %8931 = vrcp.f32 %v9742_v0  ;;  %v733_v11 = vand.u32 2147483647, %v9742_v0  ;;  %v735_v12 = vand.u32 2147483648, %v9742_v0  ;;  %vm729_vm8 = vweird.f32 %v9742_v0 }
  0x59   :  { %v8926_v8 = vpop.eup %8925  ;;  %1023 = vperm.xlu0 %8844, %v923_v4   ;;  %v777_v23 = vsel %vm9738_vm7, %v8918_v18, %v773_v5  ;;  %8933 = vrcp.f32 %v9744_v6  ;;  %v328_v9 = vand.u32 2147483647, %v9744_v6  ;;  %v330_v22 = vand.u32 2147483648, %v9744_v6 }
  0x5a   :  { %v8928_v17 = vpop.eup %8927  ;;  %v782_v19 = vsel %vm9726_vm6, %v781_v63, %v777_v23  ;;  %8935 = vpow2.f32 %v8036_v2  ;;  %v9759_v24 = vadd.f32 1.0, %v8924_v1  ;;  %v9761_v25 = vadd.f32 1.0, %v8926_v8 }
  0x5b   :  { %v8930_v20 = vpop.eup %8929  ;;  %1266 = vperm.xlu1 %8845, %v950_v3   ;;  %v951_v21 = vpack.c.bf16 %v782_v19, %v782_v19  ;;  %vm324_vm9 = vweird.f32 %v9744_v6  ;;  %8937 = vpow2.f32 %v8021_v7  ;;  %vm9765_vm10 = vcmp.eq.f32.partialorder %v733_v11, 8.507059e+37 }
  0x5c   :  { %v736_v27 = vor.u32 1.1754944e-38, %v735_v12  ;;  %8939 = vrcp.f32 %v9759_v24  ;;  %v315_v28 = vand.u32 2147483648, %v9759_v24  ;;  %v9771_v13 = vadd.f32 1.0, %v8928_v17 }
  0x5d   :  { %1275 = vperm.xlu2 %8846, %v951_v21   ;;  %vm9773_vm11 = vcmp.eq.f32.partialorder %v328_v9, 8.507059e+37  ;;  %v313_v31 = vand.u32 2147483647, %v9759_v24  ;;  %8941 = vrcp.f32 %v9761_v25  ;;  %v9779_v34 = vadd.f32 1.0, %v8930_v20 }
  0x5e   :  { %v8932_v29 = vpop.eup %8931  ;;  %v331_v37 = vor.u32 1.1754944e-38, %v330_v22  ;;  %v748_v33 = vand.u32 2147483647, %v9761_v25  ;;  %v750_v38 = vand.u32 2147483648, %v9761_v25  ;;  %vm309_vm12 = vweird.f32 %v9759_v24 }
  0x5f   :  { %v8934_v32 = vpop.eup %8933  ;;  %v725_v35 = vmul.f32 %v8932_v29, %v9742_v0  ;;  %vm744_vm13 = vweird.f32 %v9761_v25  ;;  %8943 = vpow2.f32 %v8020_v26  ;;  %vm730_vm14 = vweird.f32 %v8932_v29 }
  0x60   :  { %v8936_v39 = vpop.eup %8935  ;;  %v320_v40 = vmul.f32 %v8934_v32, %v9744_v6  ;;  %v316_v43 = vor.u32 1.1754944e-38, %v315_v28  ;;  %8945 = vrcp.f32 %v9771_v13  ;;  %vm325_vm15 = vweird.f32 %v8934_v32  ;;  %vm9802_vm4 = vmor %vm729_vm8, %vm730_vm14 }
  0x61   :  { %v726_v42 = vsub.f32 1.0, %v725_v35  ;;  %v8938_v18 = vpop.eup %8937  ;;  %vm9788_vm0 = vcmp.eq.f32.partialorder %v313_v31, 8.507059e+37  ;;  %v298_v56 = vand.u32 2147483647, %v9771_v13  ;;  %8947 = vrcp.f32 %v9779_v34  ;;  %vm9812_vm5 = vmor %vm324_vm9, %vm325_vm15 }
  0x62   :  { %v321_v44 = vsub.f32 1.0, %v320_v40  ;;  %v8940_v46 = vpop.eup %8939  ;;  %vm9794_vm1 = vcmp.eq.f32.partialorder %v748_v33, 8.507059e+37  ;;  %v751_v48 = vor.u32 1.1754944e-38, %v750_v38  ;;  %vm294_vm2 = vweird.f32 %v9771_v13 }
  0x63   :  { %v727_v47 = vmul.f32 %v8932_v29, %v726_v42  ;;  %v8942_v14 = vpop.eup %8941  ;;  %v305_v50 = vmul.f32 %v8940_v46, %v9759_v24  ;;  %v300_v51 = vand.u32 2147483648, %v9771_v13  ;;  %vm279_vm3 = vweird.f32 %v9779_v34 }
  0x64   :  { %v322_v57 = vmul.f32 %v8934_v32, %v321_v44  ;;  %v740_v53 = vmul.f32 %v8942_v14, %v9761_v25  ;;  %v283_v54 = vand.u32 2147483647, %v9779_v34  ;;  %v285_v61 = vand.u32 2147483648, %v9779_v34 }
  0x65   :  { %v728_v52 = vadd.f32 %v8932_v29, %v727_v47  ;;  %v8944_v55 = vpop.eup %8943  ;;  %v306_v58 = vsub.f32 1.0, %v305_v50  ;;  %vm310_vm6 = vweird.f32 %v8940_v46  ;;  %vm745_vm7 = vweird.f32 %v8942_v14  ;;  %v52_v47 = vld [vmem:[%s16321_s0 + $0x90] sm:$0xff] }
  0x66   :  { %v323_v41 = vadd.f32 %v8934_v32, %v322_v57  ;;  %vm9819_vm8 = vcmp.eq.f32.partialorder %v298_v56, 8.507059e+37  ;;  %v8946_v60 = vpop.eup %8945  ;;  %v741_v63 = vsub.f32 1.0, %v740_v53  ;;  %v9825_v0 = vadd.f32 1.0, %v8936_v39  ;;  %vm9839_vm9 = vmor %vm309_vm12, %vm310_vm6  ;;  %v56_v50 = vld [vmem:[%s16321_s0 + $0xb0] sm:$0xff]  ;;  %v55_v53 = vld [vmem:[%s16321_s0 + $0xa8] sm:$0xff] }
  0x67   :  { %v732_v62 = vsel %vm9802_vm4, %v8932_v29, %v728_v52  ;;  %v9827_v2 = vadd.f32 1.0, %v8938_v18  ;;  %v8948_v3 = vpop.eup %8947  ;;  %v307_v6 = vmul.f32 %v8940_v46, %v306_v58  ;;  %v290_v1 = vmul.f32 %v8946_v60, %v9771_v13  ;;  %v57_v13 = vld [vmem:[%s16321_s0 + $0xb8] sm:$0xff] }
  0x68   :  { %v737_v4 = vsel %vm9765_vm10, %v736_v27, %v732_v62  ;;  %v327_v5 = vsel %vm9812_vm5, %v8934_v32, %v323_v41  ;;  %v742_v11 = vmul.f32 %v8942_v14, %v741_v63  ;;  %vm295_vm14 = vweird.f32 %v8946_v60  ;;  %vm9846_vm10 = vmor %vm744_vm13, %vm745_vm7 }
  0x69   :  { %v948_v7 = vpack.c.bf16 %v737_v4, %v737_v4  ;;  %v332_v8 = vsel %vm9773_vm11, %v331_v37, %v327_v5  ;;  %v308_v16 = vadd.f32 %v8940_v46, %v307_v6  ;;  %v291_v19 = vsub.f32 1.0, %v290_v1  ;;  %vm9863_vm12 = vmor %vm294_vm2, %vm295_vm14 }
  0x6a   :  { %v921_v12 = vpack.c.bf16 %v332_v8, %v332_v8  ;;  %v275_v9 = vmul.f32 %v8948_v3, %v9779_v34  ;;  %v743_v20 = vadd.f32 %v8942_v14, %v742_v11  ;;  %v301_v21 = vor.u32 1.1754944e-38, %v300_v51 }
  0x6b   :  { %1248 = vperm.xlu2 %8846, %v948_v7   ;;  %8949 = vrcp.f32 %v9825_v0  ;;  %v9852_v22 = vadd.f32 1.0, %v8944_v55  ;;  %v312_v24 = vsel %vm9839_vm9, %v8940_v46, %v308_v16  ;;  %v292_v26 = vmul.f32 %v8946_v60, %v291_v19  ;;  %v59_v7 = vld [vmem:[%s16321_s0 + $0xc8] sm:$0xff] }
  0x6c   :  { %1005 = vperm.xlu1 %8845, %v921_v12   ;;  %v276_v25 = vsub.f32 1.0, %v275_v9  ;;  %vm280_vm11 = vweird.f32 %v8948_v3  ;;  %v317_v10 = vsel %vm9788_vm0, %v316_v43, %v312_v24  ;;  %v747_v27 = vsel %vm9846_vm10, %v8942_v14, %v743_v20 }
  0x6d   :  { %v493_v29 = vand.u32 2147483647, %v9825_v0  ;;  %8951 = vrcp.f32 %v9827_v2  ;;  %v920_v31 = vpack.c.bf16 %v317_v10, %v317_v10  ;;  %v752_v32 = vsel %vm9794_vm1, %v751_v48, %v747_v27  ;;  %vm9876_vm13 = vmor %vm279_vm3, %vm280_vm11 }
  0x6e   :  { %v293_v35 = vadd.f32 %v8946_v60, %v292_v26  ;;  %v277_v37 = vmul.f32 %v8948_v3, %v276_v25  ;;  %v286_v33 = vor.u32 1.1754944e-38, %v285_v61  ;;  %v495_v38 = vand.u32 2147483648, %v9825_v0 }
  0x6f   :  { %996 = vperm.xlu0 %8844, %v920_v31   ;;  %vm284_vm15 = vcmp.eq.f32.partialorder %v283_v54, 8.507059e+37  ;;  %v8039_v42 = vmul.f32 -1.442695, %v53_v30  ;;  %v949_v18 = vpack.c.bf16 %v752_v32, %v752_v32  ;;  %vm489_vm0 = vweird.f32 %v9825_v0 }
  0x70   :  { %v297_v39 = vsel %vm9863_vm12, %v8946_v60, %v293_v35  ;;  %v278_v40 = vadd.f32 %v8948_v3, %v277_v37  ;;  %8953 = vrcp.f32 %v9852_v22  ;;  %vm9890_vm1 = vcmp.eq.f32.partialorder %v493_v29, 8.507059e+37 }
  0x71   :  { %v8950_v43 = vpop.eup %8949  ;;  %v302_v44 = vsel %vm9819_vm8, %v301_v21, %v297_v39  ;;  %v496_v49 = vor.u32 1.1754944e-38, %v495_v38  ;;  %vm264_vm2 = vweird.f32 %v9827_v2  ;;  %v268_v57 = vand.u32 2147483647, %v9827_v2  ;;  %v58_v21 = vld [vmem:[%s16321_s0 + $0xc0] sm:$0xff] }
  0x72   :  { %v919_v34 = vpack.c.bf16 %v302_v44, %v302_v44  ;;  %v282_v45 = vsel %vm9876_vm13, %v8948_v3, %v278_v40  ;;  %v485_v56 = vmul.f32 %v8950_v43, %v9825_v0  ;;  %vm490_vm4 = vweird.f32 %v8950_v43  ;;  %v54_v0 = vld [vmem:[%s16321_s0 + $0xa0] sm:$0xff] }
  0x73   :  { %v8952_v48 = vpop.eup %8951  ;;  %v287_v14 = vsel %vm284_vm15, %v286_v33, %v282_v45  ;;  %v270_v54 = vand.u32 2147483648, %v9827_v2  ;;  %8955 = vpow2.f32 %v8039_v42  ;;  %v8038_v61 = vmul.f32 -1.442695, %v52_v47  ;;  %vm9912_vm5 = vmor %vm489_vm0, %vm490_vm4 }
  0x74   :  { %987 = vperm.xlu2 %8846, %v919_v34   ;;  %v918_v51 = vpack.c.bf16 %v287_v14, %v287_v14  ;;  %v486_v52 = vsub.f32 1.0, %v485_v56  ;;  %v260_v15 = vmul.f32 %v8952_v48, %v9827_v2  ;;  %v8037_v55 = vmul.f32 -1.442695, %v51_v36 }
  0x75   :  { %vm265_vm3 = vweird.f32 %v8952_v48  ;;  %v8042_v59 = vmul.f32 -1.442695, %v56_v50  ;;  %vm249_vm6 = vweird.f32 %v9852_v22  ;;  %v253_v63 = vand.u32 2147483647, %v9852_v22 }
  0x76   :  { %978 = vperm.xlu1 %8845, %v918_v51   ;;  %v487_v41 = vmul.f32 %v8950_v43, %v486_v52  ;;  %v261_v58 = vsub.f32 1.0, %v260_v15  ;;  %v8954_v60 = vpop.eup %8953  ;;  %8957 = vpow2.f32 %v8038_v61  ;;  %v8041_v3 = vmul.f32 -1.442695, %v55_v53  ;;  %vm9932_vm8 = vmor %vm264_vm2, %vm265_vm3 }
  0x77   :  { %1257 = vperm.xlu0 %8844, %v949_v18   ;;  %vm9918_vm7 = vcmp.eq.f32.partialorder %v268_v57, 8.507059e+37  ;;  %v245_v1 = vmul.f32 %v8954_v60, %v9852_v22  ;;  %v271_v23 = vor.u32 1.1754944e-38, %v270_v54  ;;  %vm250_vm9 = vweird.f32 %v8954_v60 }
  0x78   :  { %v488_v4 = vadd.f32 %v8950_v43, %v487_v41  ;;  %v262_v5 = vmul.f32 %v8952_v48, %v261_v58  ;;  %v255_v11 = vand.u32 2147483648, %v9852_v22  ;;  %8959 = vpow2.f32 %v8037_v55  ;;  %vm9953_vm14 = vmor %vm249_vm6, %vm250_vm9 }
  0x79   :  { %v246_v17 = vsub.f32 1.0, %v245_v1  ;;  %8961 = vpow2.f32 %v8042_v59  ;;  %v8956_v19 = vpop.eup %8955  ;;  %v8040_v2 = vmul.f32 -1.442695, %v54_v0  ;;  %v8045_v20 = vmul.f32 -1.442695, %v59_v7 }
  0x7a   :  { %v492_v12 = vsel %vm9912_vm5, %v8950_v43, %v488_v4  ;;  %v263_v16 = vadd.f32 %v8952_v48, %v262_v5  ;;  %8963 = vpow2.f32 %v8041_v3  ;;  %v9946_v10 = vadd.f32 1.0, %v8956_v19  ;;  %v62_v43 = vld [vmem:[%s16321_s0 + $0xe0] sm:$0xff] }
  0x7b   :  { %v497_v9 = vsel %vm9890_vm1, %v496_v49, %v492_v12  ;;  %v247_v25 = vmul.f32 %v8954_v60, %v246_v17  ;;  %vm9957_vm10 = vcmp.eq.f32.partialorder %v253_v63, 8.507059e+37  ;;  %v256_v31 = vor.u32 1.1754944e-38, %v255_v11  ;;  %v64_v17 = vld [vmem:[%s16321_s0 + $0xf0] sm:$0xff] }
  0x7c   :  { %v932_v24 = vpack.c.bf16 %v497_v9, %v497_v9  ;;  %v267_v26 = vsel %vm9932_vm8, %v8952_v48, %v263_v16  ;;  %v8958_v27 = vpop.eup %8957  ;;  %8965 = vrcp.f32 %v9946_v10  ;;  %v8044_v37 = vmul.f32 -1.442695, %v58_v21 }
  0x7d   :  { %v272_v28 = vsel %vm9918_vm7, %v271_v23, %v267_v26  ;;  %v248_v35 = vadd.f32 %v8954_v60, %v247_v25  ;;  %v538_v33 = vand.u32 2147483647, %v9946_v10  ;;  %v9966_v38 = vadd.f32 1.0, %v8958_v27 }
  0x7e   :  { %1104 = vperm.xlu2 %8846, %v932_v24   ;;  %v917_v32 = vpack.c.bf16 %v272_v28, %v272_v28  ;;  %v8960_v22 = vpop.eup %8959  ;;  %8967 = vpow2.f32 %v8040_v2  ;;  %v540_v34 = vand.u32 2147483648, %v9946_v10  ;;  %v9979_v45 = vmul.f32 -1.442695, %v57_v13 }
  0x7f   :  { %v8962_v39 = vpop.eup %8961  ;;  %v252_v40 = vsel %vm9953_vm14, %v8954_v60, %v248_v35  ;;  %v9970_v42 = vadd.f32 1.0, %v8960_v22  ;;  %8969 = vpow2.f32 %v8045_v20  ;;  %v523_v46 = vand.u32 2147483647, %v9966_v38 }
  0x80   :  { %969 = vperm.xlu1 %8845, %v917_v32   ;;  %v8964_v18 = vpop.eup %8963  ;;  %v257_v44 = vsel %vm9957_vm10, %v256_v31, %v252_v40  ;;  %8971 = vrcp.f32 %v9966_v38  ;;  %v525_v47 = vand.u32 2147483648, %v9966_v38  ;;  %vm534_vm11 = vweird.f32 %v9946_v10 }
  0x81   :  { %v916_v56 = vpack.c.bf16 %v257_v44, %v257_v44  ;;  %8973 = vpow2.f32 %v8044_v37  ;;  %vm9984_vm12 = vcmp.eq.f32.partialorder %v538_v33, 8.507059e+37  ;;  %v9989_v48 = vmul.f32 -1.442695, %v62_v43 }
  0x82   :  { %8975 = vrcp.f32 %v9970_v42  ;;  %v8966_v14 = vpop.eup %8965  ;;  %v508_v49 = vand.u32 2147483647, %v9970_v42  ;;  %v510_v57 = vand.u32 2147483648, %v9970_v42  ;;  %v9993_v50 = vadd.f32 1.0, %v8962_v39 }
  0x83   :  { %960 = vperm.xlu0 %8844, %v916_v56   ;;  %v9995_v51 = vadd.f32 1.0, %v8964_v18  ;;  %v530_v15 = vmul.f32 %v8966_v14, %v9946_v10  ;;  %v541_v53 = vor.u32 1.1754944e-38, %v540_v34  ;;  %vm519_vm13 = vweird.f32 %v9966_v38 }
  0x84   :  { %v8968_v52 = vpop.eup %8967  ;;  %vm504_vm15 = vweird.f32 %v9970_v42  ;;  %vm535_vm0 = vweird.f32 %v8966_v14  ;;  %vm10000_vm1 = vcmp.eq.f32.partialorder %v523_v46, 8.507059e+37  ;;  %v526_v55 = vor.u32 1.1754944e-38, %v525_v47 }
  0x85   :  { %v8970_v54 = vpop.eup %8969  ;;  %8977 = vrcp.f32 %v9993_v50  ;;  %v531_v58 = vsub.f32 1.0, %v530_v15  ;;  %v583_v59 = vand.u32 2147483647, %v9993_v50  ;;  %v585_v60 = vand.u32 2147483648, %v9993_v50  ;;  %vm10024_vm5 = vmor %vm534_vm11, %vm535_vm0 }
  0x86   :  { %v8972_v41 = vpop.eup %8971  ;;  %8979 = vrcp.f32 %v9995_v51  ;;  %vm10011_vm2 = vcmp.eq.f32.partialorder %v508_v49, 8.507059e+37  ;;  %v511_v4 = vor.u32 1.1754944e-38, %v510_v57  ;;  %vm579_vm4 = vweird.f32 %v9993_v50 }
  0x87   :  { %v10008_v62 = vpop.eup %8973  ;;  %v515_v63 = vmul.f32 %v8972_v41, %v9966_v38  ;;  %v568_v5 = vand.u32 2147483647, %v9995_v51  ;;  %v532_v1 = vmul.f32 %v8966_v14, %v531_v58  ;;  %vm564_vm3 = vweird.f32 %v9995_v51 }
  0x88   :  { %v8976_v6 = vpop.eup %8975  ;;  %v570_v0 = vand.u32 2147483648, %v9995_v51  ;;  %v10019_v7 = vadd.f32 1.0, %v8968_v52  ;;  %vm520_vm6 = vweird.f32 %v8972_v41  ;;  %v10029_v12 = vadd.f32 1.0, %v8970_v54 }
  0x89   :  { %v516_v23 = vsub.f32 1.0, %v515_v63  ;;  %v500_v11 = vmul.f32 %v8976_v6, %v9970_v42  ;;  %v533_v16 = vadd.f32 %v8966_v14, %v532_v1  ;;  %vm10031_vm7 = vcmp.eq.f32.partialorder %v583_v59, 8.507059e+37  ;;  %vm10045_vm14 = vmor %vm519_vm13, %vm520_vm6 }
  0x8a   :  { %v586_v19 = vor.u32 1.1754944e-38, %v585_v60  ;;  %8981 = vrcp.f32 %v10019_v7  ;;  %vm505_vm8 = vweird.f32 %v8976_v6  ;;  %vm10036_vm9 = vcmp.eq.f32.partialorder %v568_v5, 8.507059e+37  ;;  %v10098_v60 = vpop.permute.xlu2 %1320 }
  0x8b   :  { %v8978_v9 = vpop.eup %8977  ;;  %v517_v2 = vmul.f32 %v8972_v41, %v516_v23  ;;  %v501_v20 = vsub.f32 1.0, %v500_v11  ;;  %v571_v24 = vor.u32 1.1754944e-38, %v570_v0  ;;  %v537_v25 = vsel %vm10024_vm5, %v8966_v14, %v533_v16  ;;  %vm10057_vm11 = vmor %vm504_vm15, %vm505_vm8  ;;  %v61_v0 = vld [vmem:[%s16321_s0 + $0xd8] sm:$0xff]  ;;  %v60_v23 = vld [vmem:[%s16321_s0 + $0xd0] sm:$0xff] }
  0x8c   :  { %v8980_v26 = vpop.eup %8979  ;;  %v575_v27 = vmul.f32 %v8978_v9, %v9993_v50  ;;  %vm549_vm10 = vweird.f32 %v10019_v7  ;;  %8983 = vrcp.f32 %v10029_v12  ;;  %v542_v28 = vsel %vm9984_vm12, %v541_v53, %v537_v25 }
  0x8d   :  { %v518_v29 = vadd.f32 %v8972_v41, %v517_v2  ;;  %v502_v30 = vmul.f32 %v8976_v6, %v501_v20  ;;  %v560_v31 = vmul.f32 %v8980_v26, %v9995_v51  ;;  %v935_v32 = vpack.c.bf16 %v542_v28, %v542_v28 }
  0x8e   :  { %v576_v37 = vsub.f32 1.0, %v575_v27  ;;  %vm580_vm13 = vweird.f32 %v8978_v9  ;;  %v553_v13 = vand.u32 2147483647, %v10019_v7  ;;  %vm565_vm12 = vweird.f32 %v8980_v26 }
  0x8f   :  { %v522_v22 = vsel %vm10045_vm14, %v8972_v41, %v518_v29  ;;  %v503_v33 = vadd.f32 %v8976_v6, %v502_v30  ;;  %v561_v38 = vsub.f32 1.0, %v560_v31  ;;  %1131 = vperm.xlu2 %8846, %v935_v32   ;;  %v555_v43 = vand.u32 2147483648, %v10019_v7  ;;  %vm10072_vm0 = vmor %vm579_vm4, %vm580_vm13 }
  0x90   :  { %v8982_v39 = vpop.eup %8981  ;;  %v527_v40 = vsel %vm10000_vm1, %v526_v55, %v522_v22  ;;  %v577_v42 = vmul.f32 %v8978_v9, %v576_v37  ;;  %vm624_vm15 = vweird.f32 %v10029_v12  ;;  %vm10082_vm1 = vmor %vm564_vm3, %vm565_vm12  ;;  %v628_v57 = vand.u32 2147483647, %v10029_v12 }
  0x91   :  { %v934_v18 = vpack.c.bf16 %v527_v40, %v527_v40  ;;  %v507_v44 = vsel %vm10057_vm11, %v8976_v6, %v503_v33  ;;  %v562_v56 = vmul.f32 %v8980_v26, %v561_v38  ;;  %v545_v46 = vmul.f32 %v8982_v39, %v10019_v7  ;;  %v63_v40 = vld [vmem:[%s16321_s0 + $0xe8] sm:$0xff] }
  0x92   :  { %v8984_v47 = vpop.eup %8983  ;;  %v512_v36 = vsel %vm10011_vm2, %v511_v4, %v507_v44  ;;  %v578_v14 = vadd.f32 %v8978_v9, %v577_v42  ;;  %vm550_vm5 = vweird.f32 %v8982_v39  ;;  %v630_v61 = vand.u32 2147483648, %v10029_v12  ;;  %v1330_v22 = vpop.permute.xlu2 %1329 }
  0x93   :  { %1122 = vperm.xlu1 %8845, %v934_v18   ;;  %v933_v50 = vpack.c.bf16 %v512_v36, %v512_v36  ;;  %v563_v52 = vadd.f32 %v8980_v26, %v562_v56  ;;  %v546_v15 = vsub.f32 1.0, %v545_v46  ;;  %v620_v53 = vmul.f32 %v8984_v47, %v10029_v12  ;;  %vm10105_vm4 = vmor %vm549_vm10, %vm550_vm5  ;;  %v65_v12 = vld [vmem:[%s16321_s0 + $0xf8] sm:$0xff] }
  0x94   :  { %v582_v54 = vsel %vm10072_vm0, %v8978_v9, %v578_v14  ;;  %vm625_vm2 = vweird.f32 %v8984_v47  ;;  %v10092_v51 = vadd.f32 1.0, %v10008_v62  ;;  %v556_v4 = vor.u32 1.1754944e-38, %v555_v43 }
  0x95   :  { %1113 = vperm.xlu0 %8844, %v933_v50   ;;  %v587_v55 = vsel %vm10031_vm7, %v586_v19, %v582_v54  ;;  %v567_v41 = vsel %vm10082_vm1, %v8980_v26, %v563_v52  ;;  %v547_v58 = vmul.f32 %v8982_v39, %v546_v15  ;;  %v621_v59 = vsub.f32 1.0, %v620_v53  ;;  %vm10116_vm6 = vmor %vm624_vm15, %vm625_vm2 }
  0x96   :  { %v938_v63 = vpack.c.bf16 %v587_v55, %v587_v55  ;;  %v572_v3 = vsel %vm10036_vm9, %v571_v24, %v567_v41  ;;  %8985 = vrcp.f32 %v10092_v51  ;;  %vm554_vm3 = vcmp.eq.f32.partialorder %v553_v13, 8.507059e+37  ;;  %v887_v55 = vld [vmem:[%s16322_s1 + $0x68] sm:$0xff] }
  0x97   :  { %v937_v5 = vpack.c.bf16 %v572_v3, %v572_v3  ;;  %v548_v6 = vadd.f32 %v8982_v39, %v547_v58  ;;  %v622_v1 = vmul.f32 %v8984_v47, %v621_v59  ;;  %v631_v8 = vor.u32 1.1754944e-38, %v630_v61 }
  0x98   :  { %1158 = vperm.xlu2 %8846, %v938_v63   ;;  %8987 = vpow2.f32 %v9979_v45  ;;  %vm629_vm7 = vcmp.eq.f32.partialorder %v628_v57, 8.507059e+37  ;;  %v9210_v19 = vmov 839922192   ;;  %v8047_v2 = vmul.f32 -1.442695, %v61_v0 }
  0x99   :  { %v552_v11 = vsel %vm10105_vm4, %v8982_v39, %v548_v6  ;;  %v623_v16 = vadd.f32 %v8984_v47, %v622_v1  ;;  %8989 = vpow2.f32 %v9989_v48  ;;  %v964_v9 = vunpack.c.l.s4 %v9210_v19 }
  0x9a   :  { %v557_v45 = vsel %vm554_vm3, %v556_v4, %v552_v11  ;;  %v8046_v24 = vmul.f32 -1.442695, %v60_v23  ;;  %8991 = vpow2.f32 %v8047_v2  ;;  %v8051_v25 = vmul.f32 -1.442695, %v65_v12 }
  0x9b   :  { %1149 = vperm.xlu1 %8845, %v937_v5   ;;  %v936_v20 = vpack.c.bf16 %v557_v45, %v557_v45  ;;  %v627_v21 = vsel %vm10116_vm6, %v8984_v47, %v623_v16  ;;  %v8050_v10 = vmul.f32 -1.442695, %v64_v17  ;;  %vm609_vm8 = vweird.f32 %v10092_v51 }
  0x9c   :  { %v8986_v26 = vpop.eup %8985  ;;  %v632_v48 = vsel %vm629_vm7, %v631_v8, %v627_v21  ;;  %v613_v30 = vand.u32 2147483647, %v10092_v51  ;;  %v615_v31 = vand.u32 2147483648, %v10092_v51  ;;  %v10139_v32 = vunpack.c.0.s8 %v964_v9 }
  0x9d   :  { %1140 = vperm.xlu0 %8844, %v936_v20   ;;  %v941_v27 = vpack.c.bf16 %v632_v48, %v632_v48  ;;  %v605_v28 = vmul.f32 %v8986_v26, %v10092_v51  ;;  %8993 = vpow2.f32 %v8046_v24  ;;  %vm610_vm9 = vweird.f32 %v8986_v26 }
  0x9e   :  { %v8988_v29 = vpop.eup %8987  ;;  %8995 = vpow2.f32 %v8051_v25  ;;  %v1326_v33 = vperm.slane %v10098_v60, %v10139_v32  ;;  %v1335_v39 = vperm.slane %v1330_v22, %v10139_v32  ;;  %vm10154_vm14 = vmor %vm609_vm8, %vm610_vm9  ;;  %vm10158_vm10 = vcmp.eq.f32.partialorder %v613_v30, 8.507059e+37 }
  0x9f   :  { %v8990_v35 = vpop.eup %8989  ;;  %v606_v37 = vsub.f32 1.0, %v605_v28  ;;  %v10141_v13 = vadd.f32 1.0, %v8988_v29  ;;  %8997 = vpow2.f32 %v8050_v10  ;;  %v616_v34 = vor.u32 1.1754944e-38, %v615_v31  ;;  %v10224_v10 = vpop.permute.xlu2 %1302 }
  0xa0   :  { %1185 = vperm.xlu2 %8846, %v941_v27   ;;  %v10145_v38 = vadd.f32 1.0, %v8990_v35  ;;  %v8992_v43 = vpop.eup %8991  ;;  %v8049_v14 = vmul.f32 -1.442695, %v63_v40  ;;  %v10167_v57 = vunpack.c.l.bf16 %v1326_v33  ;;  %v10170_v52 = vunpack.c.l.bf16 %v1335_v39  ;;  %v10231_v35 = vpop.permute.xlu0 %1086 }
  0xa1   :  { %v607_v42 = vmul.f32 %v8986_v26, %v606_v37  ;;  %8999 = vrcp.f32 %v10141_v13  ;;  %v598_v56 = vand.u32 2147483647, %v10141_v13  ;;  %v600_v47 = vand.u32 2147483648, %v10141_v13  ;;  %v10233_v37 = vpop.permute.xlu1 %1068 }
  0xa2   :  { %9001 = vrcp.f32 %v10145_v38  ;;  %v10165_v36 = vadd.f32 1.0, %v8992_v43  ;;  %v673_v50 = vand.u32 2147483647, %v10145_v38  ;;  %vm594_vm11 = vweird.f32 %v10141_v13  ;;  %v889_v43 = vld [vmem:[%s16322_s1 + $0x78] sm:$0xff] }
  0xa3   :  { %v608_v46 = vadd.f32 %v8986_v26, %v607_v42  ;;  %v8994_v49 = vpop.eup %8993  ;;  %v675_v54 = vand.u32 2147483648, %v10145_v38  ;;  %vm10179_vm13 = vcmp.eq.f32.partialorder %v598_v56, 8.507059e+37  ;;  %vm669_vm12 = vweird.f32 %v10145_v38 }
  0xa4   :  { %v8996_v15 = vpop.eup %8995  ;;  %9003 = vrcp.f32 %v10165_v36  ;;  %v10184_v41 = vadd.f32 1.0, %v8994_v49  ;;  %v601_v60 = vor.u32 1.1754944e-38, %v600_v47  ;;  %vm10189_vm15 = vcmp.eq.f32.partialorder %v673_v50, 8.507059e+37 }
  0xa5   :  { %v612_v53 = vsel %vm10154_vm14, %v8986_v26, %v608_v46  ;;  %v8998_v61 = vpop.eup %8997  ;;  %v10186_v63 = vadd.f32 1.0, %v8996_v15  ;;  %9005 = vpow2.f32 %v8049_v14  ;;  %v658_v5 = vand.u32 2147483647, %v10165_v36 }
  0xa6   :  { %v617_v51 = vsel %vm10158_vm10, %v616_v34, %v612_v53  ;;  %v660_v6 = vand.u32 2147483648, %v10165_v36  ;;  %v676_v0 = vor.u32 1.1754944e-38, %v675_v54  ;;  %vm654_vm0 = vweird.f32 %v10165_v36 }
  0xa7   :  { %v9000_v58 = vpop.eup %8999  ;;  %v940_v59 = vpack.c.bf16 %v617_v51, %v617_v51  ;;  %9007 = vrcp.f32 %v10184_v41  ;;  %v10199_v8 = vadd.f32 1.0, %v8998_v61  ;;  %v643_v16 = vand.u32 2147483647, %v10184_v41 }
  0xa8   :  { %v9002_v3 = vpop.eup %9001  ;;  %v590_v62 = vmul.f32 %v9000_v58, %v10141_v13  ;;  %vm595_vm1 = vweird.f32 %v9000_v58  ;;  %9009 = vrcp.f32 %v10186_v63  ;;  %v645_v12 = vand.u32 2147483648, %v10184_v41 }
  0xa9   :  { %1176 = vperm.xlu1 %8845, %v940_v59   ;;  %v665_v1 = vmul.f32 %v9002_v3, %v10145_v38  ;;  %vm670_vm5 = vweird.f32 %v9002_v3  ;;  %vm10204_vm2 = vcmp.eq.f32.partialorder %v658_v5, 8.507059e+37  ;;  %v661_v9 = vor.u32 1.1754944e-38, %v660_v6  ;;  %vm10210_vm4 = vmor %vm594_vm11, %vm595_vm1  ;;  %v1096_v6 = vpop.permute.xlu0 %1095 }
  0xaa   :  { %v591_v7 = vsub.f32 1.0, %v590_v62  ;;  %v9004_v23 = vpop.eup %9003  ;;  %vm639_vm3 = vweird.f32 %v10184_v41  ;;  %vm714_vm6 = vweird.f32 %v10186_v63  ;;  %v718_v24 = vand.u32 2147483647, %v10186_v63  ;;  %vm10219_vm7 = vmor %vm669_vm12, %vm670_vm5 }
  0xab   :  { %v666_v11 = vsub.f32 1.0, %v665_v1  ;;  %v650_v45 = vmul.f32 %v9004_v23, %v10165_v36  ;;  %v9006_v2 = vpop.eup %9005  ;;  %vm655_vm8 = vweird.f32 %v9004_v23  ;;  %9011 = vrcp.f32 %v10199_v8  ;;  %v1078_v1 = vpop.permute.xlu1 %1077 }
  0xac   :  { %v592_v17 = vmul.f32 %v9000_v58, %v591_v7  ;;  %vm10226_vm9 = vcmp.eq.f32.partialorder %v643_v16, 8.507059e+37  ;;  %v646_v30 = vor.u32 1.1754944e-38, %v645_v12  ;;  %v720_v31 = vand.u32 2147483648, %v10186_v63  ;;  %vm10247_vm14 = vmor %vm654_vm0, %vm655_vm8 }
  0xad   :  { %v667_v21 = vmul.f32 %v9002_v3, %v666_v11  ;;  %v651_v25 = vsub.f32 1.0, %v650_v45  ;;  %v9008_v27 = vpop.eup %9007  ;;  %v10238_v39 = vadd.f32 1.0, %v9006_v2  ;;  %v703_v49 = vand.u32 2147483647, %v10199_v8  ;;  %v10289_v11 = vpop.permute.xlu2 %1041 }
  0xae   :  { %v593_v26 = vadd.f32 %v9000_v58, %v592_v17  ;;  %v9010_v13 = vpop.eup %9009  ;;  %v635_v38 = vmul.f32 %v9008_v27, %v10184_v41  ;;  %vm640_vm10 = vweird.f32 %v9008_v27  ;;  %v705_v53 = vand.u32 2147483648, %v10199_v8 }
  0xaf   :  { %v668_v28 = vadd.f32 %v9002_v3, %v667_v21  ;;  %v652_v33 = vmul.f32 %v9004_v23, %v651_v25  ;;  %v710_v18 = vmul.f32 %v9010_v13, %v10186_v63  ;;  %vm715_vm11 = vweird.f32 %v9010_v13 }
  0xb0   :  { %v597_v22 = vsel %vm10210_vm4, %v9000_v58, %v593_v26  ;;  %v636_v46 = vsub.f32 1.0, %v635_v38  ;;  %9013 = vrcp.f32 %v10238_v39  ;;  %vm10268_vm12 = vcmp.eq.f32.partialorder %v718_v24, 8.507059e+37  ;;  %v10312_v24 = vld [vmem:[%s16322_s1 + $0x140] sm:$0xff]  ;;  %v10317_v26 = vld [vmem:[%s16322_s1 + $0x148] sm:$0xff] }
  0xb1   :  { %v602_v40 = vsel %vm10179_vm13, %v601_v60, %v597_v22  ;;  %v672_v42 = vsel %vm10219_vm7, %v9002_v3, %v668_v28  ;;  %v653_v56 = vadd.f32 %v9004_v23, %v652_v33  ;;  %v711_v14 = vsub.f32 1.0, %v710_v18  ;;  %v9012_v50 = vpop.eup %9011  ;;  %vm10264_vm13 = vmor %vm639_vm3, %vm640_vm10  ;;  %v888_v22 = vld [vmem:[%s16322_s1 + $0x70] sm:$0xff] }
  0xb2   :  { %v939_v44 = vpack.c.bf16 %v602_v40, %v602_v40  ;;  %v677_v34 = vsel %vm10189_vm15, %v676_v0, %v672_v42  ;;  %v637_v15 = vmul.f32 %v9008_v27, %v636_v46  ;;  %v695_v58 = vmul.f32 %v9012_v50, %v10199_v8  ;;  %vm10276_vm15 = vmor %vm714_vm6, %vm715_vm11 }
  0xb3   :  { %v944_v47 = vpack.c.bf16 %v677_v34, %v677_v34  ;;  %v657_v36 = vsel %vm10247_vm14, %v9004_v23, %v653_v56  ;;  %v712_v51 = vmul.f32 %v9010_v13, %v711_v14  ;;  %v721_v41 = vor.u32 1.1754944e-38, %v720_v31  ;;  %v1060_v46 = vpop.permute.xlu1 %1059 }
  0xb4   :  { %1167 = vperm.xlu0 %8844, %v939_v44   ;;  %v662_v54 = vsel %vm10204_vm2, %v661_v9, %v657_v36  ;;  %v638_v60 = vadd.f32 %v9008_v27, %v637_v15  ;;  %vm699_vm0 = vweird.f32 %v10199_v8  ;;  %v696_v4 = vsub.f32 1.0, %v695_v58  ;;  %v4206_v58 = vld [vmem:[%s16326_s5 + $0x8] sm:$0xff] }
  0xb5   :  { %1212 = vperm.xlu2 %8846, %v944_v47   ;;  %v943_v59 = vpack.c.bf16 %v662_v54, %v662_v54  ;;  %v713_v62 = vadd.f32 %v9010_v13, %v712_v51  ;;  %vm700_vm1 = vweird.f32 %v9012_v50  ;;  %vm10281_vm5 = vcmp.eq.f32.partialorder %v703_v49, 8.507059e+37  ;;  %v1051_v47 = vpop.permute.xlu0 %1050 }
  0xb6   :  { %v642_v63 = vsel %vm10264_vm13, %v9008_v27, %v638_v60  ;;  %v706_v0 = vor.u32 1.1754944e-38, %v705_v53  ;;  %v688_v7 = vand.u32 2147483647, %v10238_v39  ;;  %v690_v23 = vand.u32 2147483648, %v10238_v39  ;;  %v9014_v45 = vpop.eup %9013  ;;  %vm10301_vm4 = vmor %vm699_vm0, %vm700_vm1  ;;  %v10362_v60 = vpop.permute.xlu2 %1014 }
  0xb7   :  { %1203 = vperm.xlu1 %8845, %v943_v59   ;;  %v647_v16 = vsel %vm10226_vm9, %v646_v30, %v642_v63  ;;  %v717_v12 = vsel %vm10276_vm15, %v9010_v13, %v713_v62  ;;  %v697_v17 = vmul.f32 %v9012_v50, %v696_v4  ;;  %vm684_vm2 = vweird.f32 %v10238_v39  ;;  %v884_v63 = vld [vmem:[%s16322_s1 + $0x50] sm:$0xff] }
  0xb8   :  { %v942_v19 = vpack.c.bf16 %v647_v16, %v647_v16  ;;  %v722_v9 = vsel %vm10268_vm12, %v721_v41, %v717_v12  ;;  %v1092_v20 = vperm.slane %v10231_v35, %v10139_v32  ;;  %v1074_v21 = vperm.slane %v10233_v37, %v10139_v32  ;;  %v885_v16 = vld [vmem:[%s16322_s1 + $0x58] sm:$0xff] }
  0xb9   :  { %v947_v8 = vpack.c.bf16 %v722_v9, %v722_v9  ;;  %v698_v48 = vadd.f32 %v9012_v50, %v697_v17  ;;  %v680_v25 = vmul.f32 %v9014_v45, %v10238_v39  ;;  %v1308_v27 = vperm.slane %v10224_v10, %v10139_v32  ;;  %v886_v39 = vld [vmem:[%s16322_s1 + $0x60] sm:$0xff]  ;;  %v4207_v9 = vld [vmem:[%s16326_s5 + $0x10] sm:$0xff]  ;;  %v10403_v10 = vld [vmem:[%s16322_s1 + $0x138] sm:$0xff] }
  0xba   :  { %vm685_vm3 = vweird.f32 %v9014_v45  ;;  %vm10322_vm6 = vcmp.eq.f32.partialorder %v688_v7, 8.507059e+37  ;;  %v691_v29 = vor.u32 1.1754944e-38, %v690_v23  ;;  %v1101_v30 = vperm.slane %v1096_v6, %v10139_v32 }
  0xbb   :  { %v702_v31 = vsel %vm10301_vm4, %v9012_v50, %v698_v48  ;;  %v681_v35 = vsub.f32 1.0, %v680_v25  ;;  %v1458_v37 = vunpack.c.l.bf16 %v10312_v24  ;;  %v1460_v13 = vunpack.c.l.bf16 %v10317_v26  ;;  %vm10344_vm7 = vmor %vm684_vm2, %vm685_vm3 }
  0xbc   :  { %1194 = vperm.xlu0 %8844, %v942_v19   ;;  %v707_v33 = vsel %vm10281_vm5, %v706_v0, %v702_v31  ;;  %v1350_v38 = vunpack.c.l.bf16 %v1092_v20  ;;  %v1348_v40 = vunpack.c.l.bf16 %v1074_v21  ;;  %v1083_v42 = vperm.slane %v1078_v1, %v10139_v32 }
  0xbd   :  { %1239 = vperm.xlu2 %8846, %v947_v8   ;;  %v946_v18 = vpack.c.bf16 %v707_v33, %v707_v33  ;;  %v682_v44 = vmul.f32 %v9014_v45, %v681_v35  ;;  %v1351_v34 = vunpack.c.l.bf16 %v1101_v30  ;;  %v1542_v56 = vmul.f32 %v1458_v37, %v10167_v57  ;;  %v1312_v28 = vpop.permute.xlu0 %1311  ;;  %v883_v33 = vld [vmem:[%s16322_s1 + $0x48] sm:$0xff] }
  0xbe   :  { %v1544_v49 = vmul.f32 %v1460_v13, %v10170_v52  ;;  %v1065_v50 = vperm.slane %v1060_v46, %v10139_v32  ;;  %v1056_v36 = vperm.slane %v1051_v47, %v10139_v32  ;;  %v1406_v15 = vunpack.c.l.bf16 %v888_v22 }
  0xbf   :  { %1230 = vperm.xlu1 %8845, %v946_v18   ;;  %v683_v53 = vadd.f32 %v9014_v45, %v682_v44  ;;  %v1047_v54 = vperm.slane %v10289_v11, %v10139_v32  ;;  %v1408_v61 = vunpack.c.l.bf16 %v889_v43  ;;  %v1407_v51 = vunpack.c.h.bf16 %v888_v22  ;;  %v10385_v44 = vld [vmem:[%s16322_s1 + $0x130] sm:$0xff] }
  0xc0   :  { %v1349_v59 = vunpack.c.l.bf16 %v1083_v42  ;;  %v1586_v3 = vpack.c.bf16 %v1544_v49, %v1542_v56  ;;  %v1347_v41 = vunpack.c.l.bf16 %v1065_v50  ;;  %v1346_v62 = vunpack.c.l.bf16 %v1056_v36  ;;  %v882_v36 = vld [vmem:[%s16322_s1 + $0x40] sm:$0xff] }
  0xc1   :  { %v687_v4 = vsel %vm10344_vm7, %v9014_v45, %v683_v53  ;;  %v1490_v5 = vmul.f32 %v1406_v15, %v1350_v38  ;;  %v1492_v6 = vmul.f32 %v1408_v61, %v1351_v34  ;;  %v1409_v1 = vunpack.c.h.bf16 %v889_v43  ;;  %v1276_v53 = vpop.permute.xlu2 %1275 }
  0xc2   :  { %v692_v0 = vsel %vm10322_vm6, %v691_v29, %v687_v4  ;;  %2282 = vmatpush.bf16.msra.mxu2 %v1586_v3  ;;  %v1491_v7 = vmul.f32 %v1407_v51, %v1350_v38  ;;  %v1402_v23 = vunpack.c.l.bf16 %v886_v39  ;;  %v1404_v11 = vunpack.c.l.bf16 %v887_v55  ;;  %v1033_v29 = vpop.permute.xlu1 %1032  ;;  %v4210_v3 = vld [vmem:[%s16326_s5 + $0x28] sm:$0xff] }
  0xc3   :  { %v945_v12 = vpack.c.bf16 %v692_v0, %v692_v0  ;;  %v1560_v17 = vpack.c.bf16 %v1492_v6, %v1490_v5  ;;  %v1493_v45 = vmul.f32 %v1409_v1, %v1351_v34  ;;  %v1403_v19 = vunpack.c.h.bf16 %v886_v39  ;;  %v4209_v34 = vld [vmem:[%s16326_s5 + $0x20] sm:$0xff] }
  0xc4   :  { %v1345_v2 = vunpack.c.l.bf16 %v1047_v54  ;;  %v1488_v20 = vmul.f32 %v1404_v11, %v1349_v59  ;;  %v1405_v21 = vunpack.c.h.bf16 %v887_v55  ;;  %v1398_v8 = vunpack.c.l.bf16 %v884_v63 }
  0xc5   :  { %4254 = vperm.xlu2 %8846, %v4206_v58   ;;  %1221 = vperm.xlu0 %8844, %v945_v12   ;;  %v1561_v48 = vpack.c.bf16 %v1493_v45, %v1491_v7  ;;  %v1486_v25 = vmul.f32 %v1402_v23, %v1348_v40  ;;  %v1400_v30 = vunpack.c.l.bf16 %v885_v16  ;;  %v1399_v31 = vunpack.c.h.bf16 %v884_v63  ;;  %v1285_v6 = vpop.permute.xlu0 %1284  ;;  %v4236_v12 = vld [vmem:[%s16326_s5 + $0xf8] sm:$0xff] }
  0xc6   :  { %2051 = vmatpush.bf16.msra.mxu0 %v1560_v17  ;;  %v1487_v35 = vmul.f32 %v1403_v19, %v1348_v40  ;;  %v1489_v37 = vmul.f32 %v1405_v21, %v1349_v59  ;;  %v1317_v13 = vperm.slane %v1312_v28, %v10139_v32  ;;  %v1038_v22 = vperm.slane %v1033_v29, %v10139_v32  ;;  %v10427_v19 = vld [vmem:[%s16322_s1 + $0x120] sm:$0xff] }
  0xc7   :  { %4259 = vperm.xlu1 %8845, %v4207_v9   ;;  %2393 = vmatpush.bf16.msra.mxu3 %v1561_v48  ;;  %v1558_v38 = vpack.c.bf16 %v1488_v20, %v1486_v25  ;;  %v1482_v42 = vmul.f32 %v1398_v8, %v1346_v62  ;;  %v1484_v43 = vmul.f32 %v1400_v30, %v1347_v41  ;;  %v1401_v18 = vunpack.c.h.bf16 %v885_v16  ;;  %v10432_v9 = vld [vmem:[%s16322_s1 + $0x128] sm:$0xff]  ;;  %v4219_v25 = vld [vmem:[%s16326_s5 + $0x70] sm:$0xff] }
  0xc8   :  { %v10390_v40 = vunpack.c.l.bf16 %v1308_v27  ;;  %v10395_v56 = vunpack.c.l.bf16 %v1317_v13  ;;  %v1344_v46 = vunpack.c.l.bf16 %v1038_v22  ;;  %v1483_v47 = vmul.f32 %v1399_v31, %v1346_v62  ;;  %v4205_v27 = vld [vmem:[%s16326_s5] sm:$0xff]  ;;  %v880_v31 = vld [vmem:[%s16322_s1 + $0x30] sm:$0xff] }
  0xc9   :  { %v1559_v14 = vpack.c.bf16 %v1489_v37, %v1487_v35  ;;  %v1556_v49 = vpack.c.bf16 %v1484_v43, %v1482_v42  ;;  %v1485_v50 = vmul.f32 %v1401_v18, %v1347_v41  ;;  %v1396_v15 = vunpack.c.l.bf16 %v883_v33  ;;  %v10445_v28 = vpop.permute.xlu2 %1248 }
  0xca   :  { %2052 = vmatpush.bf16.msra.mxu0 %v1558_v38  ;;  %v1394_v54 = vunpack.c.l.bf16 %v882_v36  ;;  %v1454_v61 = vunpack.c.l.bf16 %v10385_v44  ;;  %v1456_v51 = vunpack.c.l.bf16 %v10403_v10  ;;  %v1395_v39 = vunpack.c.h.bf16 %v882_v36  ;;  %v1294_v1 = vpop.permute.xlu1 %1293  ;;  %v4235_v36 = vld [vmem:[%s16326_s5 + $0xf0] sm:$0xff] }
  0xcb   :  { %2394 = vmatpush.bf16.msra.mxu3 %v1559_v14  ;;  %v1557_v55 = vpack.c.bf16 %v1485_v50, %v1483_v47  ;;  %v1480_v58 = vmul.f32 %v1396_v15, %v1345_v2  ;;  %v1397_v59 = vunpack.c.h.bf16 %v883_v33  ;;  %v1290_v0 = vperm.slane %v1285_v6, %v10139_v32  ;;  %v10473_v50 = vld [vmem:[%s16322_s1 + $0x110] sm:$0xff] }
  0xcc   :  { %v1478_v41 = vmul.f32 %v1394_v54, %v1344_v46  ;;  %v1538_v62 = vmul.f32 %v1454_v61, %v10390_v40  ;;  %v1540_v4 = vmul.f32 %v1456_v51, %v10395_v56  ;;  %v1479_v5 = vmul.f32 %v1395_v39, %v1344_v46  ;;  %v4234_v51 = vld [vmem:[%s16326_s5 + $0xe8] sm:$0xff] }
  0xcd   :  { %4269 = vperm.xlu2 %8846, %v4209_v34   ;;  %4249 = vperm.xlu0 %8844, %v4205_v27   ;;  %v1481_v63 = vmul.f32 %v1397_v59, %v1345_v2  ;;  %v1299_v7 = vperm.slane %v1294_v1, %v10139_v32  ;;  %v10420_v17 = vunpack.c.l.bf16 %v1290_v0  ;;  %v4208_v2 = vld [vmem:[%s16326_s5 + $0x18] sm:$0xff]  ;;  %v1450_v20 = vunpack.c.l.bf16 %v10427_v19  ;;  %v1024_v37 = vpop.permute.xlu0 %1023  ;;  %v4233_v34 = vld [vmem:[%s16326_s5 + $0xe0] sm:$0xff] }
  0xce   :  { %2053 = vmatpush.bf16.msra.mxu0 %v1556_v49  ;;  %v1554_v23 = vpack.c.bf16 %v1480_v58, %v1478_v41  ;;  %v1584_v11 = vpack.c.bf16 %v1540_v4, %v1538_v62  ;;  %v1452_v21 = vunpack.c.l.bf16 %v10432_v9  ;;  %v1020_v8 = vperm.slane %v10362_v60, %v10139_v32  ;;  %v10455_v60 = vld [vmem:[%s16322_s1 + $0x118] sm:$0xff]  ;;  %v878_v41 = vld [vmem:[%s16322_s1 + $0x20] sm:$0xff]  ;;  %v879_v62 = vld [vmem:[%s16322_s1 + $0x28] sm:$0xff] }
  0xcf   :  { %4274 = vperm.xlu1 %8845, %v4210_v3   ;;  %2395 = vmatpush.bf16.msra.mxu3 %v1557_v55  ;;  %v1555_v16 = vpack.c.bf16 %v1481_v63, %v1479_v5  ;;  %v10422_v45 = vunpack.c.l.bf16 %v1299_v7  ;;  %v1281_v48 = vperm.slane %v1276_v53, %v10139_v32  ;;  %v1534_v29 = vmul.f32 %v1450_v20, %v10420_v17  ;;  %v881_v49 = vld [vmem:[%s16322_s1 + $0x38] sm:$0xff] }
  0xd0   :  { %2283 = vmatpush.bf16.msra.mxu2 %v1584_v11  ;;  %v1029_v22 = vperm.slane %v1024_v37, %v10139_v32  ;;  %v1342_v38 = vunpack.c.l.bf16 %v1020_v8  ;;  %v1390_v43 = vunpack.c.l.bf16 %v880_v31  ;;  %v1448_v18 = vunpack.c.l.bf16 %v10455_v60  ;;  %v4218_v11 = vld [vmem:[%s16326_s5 + $0x68] sm:$0xff]  ;;  %v4220_v8 = vld [vmem:[%s16326_s5 + $0x78] sm:$0xff]  ;;  %v4231_v37 = vld [vmem:[%s16326_s5 + $0xd0] sm:$0xff] }
  0xd1   :  { %v1536_v30 = vmul.f32 %v1452_v21, %v10422_v45  ;;  %v10459_v42 = vunpack.c.l.bf16 %v1281_v48  ;;  %v1391_v14 = vunpack.c.h.bf16 %v880_v31  ;;  %v1392_v15 = vunpack.c.l.bf16 %v881_v49  ;;  %v988_v4 = vpop.permute.xlu2 %987  ;;  %v877_v31 = vld [vmem:[%s16322_s1 + $0x18] sm:$0xff] }
  0xd2   :  { %2054 = vmatpush.bf16.msra.mxu0 %v1554_v23  ;;  %v1267_v35 = vpop.permute.xlu1 %1266  ;;  %v1343_v47 = vunpack.c.l.bf16 %v1029_v22  ;;  %v1446_v27 = vunpack.c.l.bf16 %v10473_v50  ;;  %v1393_v53 = vunpack.c.h.bf16 %v881_v49  ;;  %v1474_v54 = vmul.f32 %v1390_v43, %v1342_v38 }
  0xd3   :  { %2396 = vmatpush.bf16.msra.mxu3 %v1555_v16  ;;  %v1272_v13 = vperm.slane %v1267_v35, %v10139_v32  ;;  %v1582_v33 = vpack.c.bf16 %v1536_v30, %v1534_v29  ;;  %v1532_v61 = vmul.f32 %v1448_v18, %v10459_v42  ;;  %v1475_v58 = vmul.f32 %v1391_v14, %v1342_v38  ;;  %v876_v30 = vld [vmem:[%s16322_s1 + $0x10] sm:$0xff] }
  0xd4   :  { %v1476_v39 = vmul.f32 %v1392_v15, %v1343_v47  ;;  %v1477_v59 = vmul.f32 %v1393_v53, %v1343_v47  ;;  %v1388_v7 = vunpack.c.l.bf16 %v879_v62  ;;  %v1389_v23 = vunpack.c.h.bf16 %v879_v62 }
  0xd5   :  { %4404 = vperm.xlu2 %8846, %v4236_v12   ;;  %4264 = vperm.xlu0 %8844, %v4208_v2   ;;  %v10465_v46 = vunpack.c.l.bf16 %v1272_v13  ;;  %v1386_v2 = vunpack.c.l.bf16 %v878_v41  ;;  %v1387_v20 = vunpack.c.h.bf16 %v878_v41  ;;  %v993_v21 = vperm.slane %v988_v4, %v10139_v32 }
  0xd6   :  { %2284 = vmatpush.bf16.msra.mxu2 %v1582_v33  ;;  %v1552_v6 = vpack.c.bf16 %v1476_v39, %v1474_v54  ;;  %v1553_v63 = vpack.c.bf16 %v1477_v59, %v1475_v58  ;;  %v1254_v35 = vperm.slane %v10445_v28, %v10139_v32  ;;  %v1382_v43 = vunpack.c.l.bf16 %v876_v30  ;;  %v10518_v28 = vld [vmem:[%s16322_s1 + $0x108] sm:$0xff]  ;;  %v4215_v54 = vld [vmem:[%s16326_s5 + $0x50] sm:$0xff]  ;;  %v4217_v59 = vld [vmem:[%s16326_s5 + $0x60] sm:$0xff] }
  0xd7   :  { %4319 = vperm.xlu1 %8845, %v4219_v25   ;;  %v1530_v55 = vmul.f32 %v1446_v27, %v10465_v46  ;;  %v1339_v33 = vunpack.c.l.bf16 %v993_v21  ;;  %v1384_v18 = vunpack.c.l.bf16 %v877_v31  ;;  %v1385_v47 = vunpack.c.h.bf16 %v877_v31  ;;  %v875_v21 = vld [vmem:[%s16322_s1 + $0x8] sm:$0xff] }
  0xd8   :  { %2055 = vmatpush.bf16.msra.mxu0 %v1552_v6  ;;  %2397 = vmatpush.bf16.msra.mxu3 %v1553_v63  ;;  %v1383_v15 = vunpack.c.h.bf16 %v876_v30  ;;  %v10521_v27 = vunpack.c.l.bf16 %v1254_v35  ;;  %vm1987_vm8 = vcmask 654336   ;;  %v1381_v30 = vunpack.c.h.bf16 %v875_v21 }
  0xd9   :  { %v1580_v1 = vpack.c.bf16 %v1532_v61, %v1530_v55  ;;  %v1444_v55 = vunpack.c.l.bf16 %v10518_v28  ;;  %v1468_v58 = vmul.f32 %v1384_v18, %v1339_v33  ;;  %v1469_v4 = vmul.f32 %v1385_v47, %v1339_v33 }
  0xda   :  { %v1459_v35 = vunpack.c.h.bf16 %v10312_v24 }
  0xdb   :  { %2285 = vmatpush.bf16.msra.mxu2 %v1580_v1 }
  0xdd   :  { %4389 = vperm.xlu2 %8846, %v4233_v34   ;;  %4399 = vperm.xlu0 %8844, %v4235_v36   ;;  %v10513_v34 = vld [vmem:[%s16322_s1 + $0x100] sm:$0xff] }
  0xde   :  { %v1006_v3 = vpop.permute.xlu1 %1005  ;;  %v1442_v39 = vunpack.c.l.bf16 %v10513_v34 }
  0xdf   :  { %v1011_v5 = vperm.slane %v1006_v3, %v10139_v32  ;;  %4394 = vperm.xlu1 %8845, %v4234_v51  }
  0xe0   :  { %v1526_v1 = vmul.f32 %v1442_v39, %v10521_v27 }
  0xe1   :  { %v997_v0 = vpop.permute.xlu0 %996  ;;  %v1341_v16 = vunpack.c.l.bf16 %v1011_v5  ;;  %v4216_v5 = vld [vmem:[%s16326_s5 + $0x58] sm:$0xff] }
  0xe2   :  { %v1002_v12 = vperm.slane %v997_v0, %v10139_v32 }
  0xe3   :  { %v1472_v25 = vmul.f32 %v1388_v7, %v1341_v16  ;;  %v1473_v29 = vmul.f32 %v1389_v23, %v1341_v16  ;;  %v8072_v7 = vld [vmem:[%s16324_s3 + $0x8] sm:$0xf]  ;;  %v8715_v23 = vld [vmem:[%s16324_s3 + $0x10] sm:$0xf0] }
  0xe4   :  { %v1340_v48 = vunpack.c.l.bf16 %v1002_v12  ;;  %v10545_v12 = vor.u32 %v8715_v23, %v8072_v7  ;;  %v8717_v23 = vld [vmem:[%s16324_s3 + $0x20] sm:$0xf0] }
  0xe5   :  { %4314 = vperm.xlu2 %8846, %v4218_v11   ;;  %4324 = vperm.xlu0 %8844, %v4220_v8   ;;  %v874_v8 = vld [vmem:[%s16322_s1] sm:$0xff] }
  0xe6   :  { %v1470_v13 = vmul.f32 %v1386_v2, %v1340_v48  ;;  %v1471_v22 = vmul.f32 %v1387_v20, %v1340_v48  ;;  %v4230_v2 = vld [vmem:[%s16326_s5 + $0xc8] sm:$0xff]  ;;  %v4232_v48 = vld [vmem:[%s16326_s5 + $0xd8] sm:$0xff]  ;;  %v1378_v33 = vunpack.c.l.bf16 %v874_v8 }
  0xe7   :  { %4379 = vperm.xlu1 %8845, %v4231_v37   ;;  %v1461_v37 = vunpack.c.h.bf16 %v10317_v26  ;;  %v10571_v26 = vpop.permute.xlu2 %1104 }
  0xe8   :  { %v979_v38 = vpop.permute.xlu1 %978  ;;  %v1550_v49 = vpack.c.bf16 %v1472_v25, %v1470_v13  ;;  %v1551_v36 = vpack.c.bf16 %v1473_v29, %v1471_v22  ;;  %v1380_v29 = vunpack.c.l.bf16 %v875_v21  ;;  %v4213_v13 = vld [vmem:[%s16326_s5 + $0x40] sm:$0xff] }
  0xe9   :  { %v984_v14 = vperm.slane %v979_v38, %v10139_v32  ;;  %v1258_v53 = vpop.permute.xlu0 %1257  ;;  %v1379_v38 = vunpack.c.h.bf16 %v874_v8  ;;  %v1545_v24 = vmul.f32 %v1461_v37, %v10170_v52  ;;  %v8088_v8 = vld [vmem:[%s16324_s3 + $0x30] sm:$0xf] }
  0xea   :  { %v1263_v61 = vperm.slane %v1258_v53, %v10139_v32  ;;  %2056 = vmatpush.bf16.msra.mxu0 %v1550_v49  ;;  %2398 = vmatpush.bf16.msra.mxu3 %v1551_v36  ;;  %v1543_v49 = vmul.f32 %v1459_v35, %v10167_v57  ;;  %v8064_v53 = vld [vmem:[%s16324_s3] sm:$0xf]  ;;  %v8724_v35 = vld [vmem:[%s16324_s3 + $0x58] sm:$0xf0] }
  0xeb   :  { %v1338_v51 = vunpack.c.l.bf16 %v984_v14  ;;  %v1457_v14 = vunpack.c.h.bf16 %v10403_v10  ;;  %v4229_v57 = vld [vmem:[%s16326_s5 + $0xc0] sm:$0xff] }
  0xec   :  { %v10532_v3 = vunpack.c.l.bf16 %v1263_v61  ;;  %v1455_v61 = vunpack.c.h.bf16 %v10385_v44  ;;  %v1587_v39 = vpack.c.bf16 %v1545_v24, %v1543_v49  ;;  %v8084_v44 = vld [vmem:[%s16324_s3 + $0x20] sm:$0xf]  ;;  %v905_v24 = vld [vmem:[%s16322_s1 + $0xf8] sm:$0xff] }
  0xed   :  { %v1466_v41 = vmul.f32 %v1382_v43, %v1338_v51  ;;  %v1467_v62 = vmul.f32 %v1383_v15, %v1338_v51  ;;  %4299 = vperm.xlu2 %8846, %v4215_v54   ;;  %4309 = vperm.xlu0 %8844, %v4217_v59   ;;  %v8714_v54 = vld [vmem:[%s16324_s3 + $0x8] sm:$0xf0]  ;;  %v1541_v51 = vmul.f32 %v1457_v14, %v10395_v56  ;;  %v1453_v59 = vunpack.c.h.bf16 %v10432_v9 }
  0xee   :  { %v1528_v63 = vmul.f32 %v1444_v55, %v10532_v3  ;;  %v8065_v55 = vor.u32 %v8714_v54, %v8064_v53  ;;  %v8727_v53 = vld [vmem:[%s16324_s3 + $0x70] sm:$0xf0] }
  0xef   :  { %v1548_v6 = vpack.c.bf16 %v1468_v58, %v1466_v41  ;;  %v1549_v0 = vpack.c.bf16 %v1469_v4, %v1467_v62  ;;  %4304 = vperm.xlu1 %8845, %v4216_v5   ;;  %v1451_v58 = vunpack.c.h.bf16 %v10427_v19  ;;  %v1539_v41 = vmul.f32 %v1455_v61, %v10390_v40  ;;  %v8718_v62 = vld [vmem:[%s16324_s3 + $0x28] sm:$0xf0] }
  0xf0   :  { %v1578_v11 = vpack.c.bf16 %v1528_v63, %v1526_v1  ;;  %v1537_v9 = vmul.f32 %v1453_v59, %v10422_v45  ;;  %v10595_v4 = vor.u32 %v8718_v62, %v8084_v44  ;;  %v1447_v40 = vunpack.c.h.bf16 %v10473_v50  ;;  %v903_v44 = vld [vmem:[%s16322_s1 + $0xe8] sm:$0xff] }
  0xf1   :  { %2057 = vmatpush.bf16.msra.mxu0 %v1548_v6  ;;  %2399 = vmatpush.bf16.msra.mxu3 %v1549_v0  ;;  %v1585_v56 = vpack.c.bf16 %v1541_v51, %v1539_v41  ;;  %v1535_v19 = vmul.f32 %v1451_v58, %v10420_v17  ;;  %v1449_v5 = vunpack.c.h.bf16 %v10455_v60  ;;  %v10599_v6 = vpop.permute.xlu2 %1131  ;;  %v1445_v17 = vunpack.c.h.bf16 %v10518_v28  ;;  %v8076_v60 = vld [vmem:[%s16324_s3 + $0x18] sm:$0xf]  ;;  %v902_v41 = vld [vmem:[%s16322_s1 + $0xe0] sm:$0xff] }
  0xf2   :  { %v970_v16 = vpop.permute.xlu1 %969  ;;  %2286 = vmatpush.bf16.msra.mxu2 %v1578_v11  ;;  %v1531_v63 = vmul.f32 %v1447_v40, %v10465_v46  ;;  %v1443_v0 = vunpack.c.h.bf16 %v10513_v34  ;;  %v8096_v34 = vld [vmem:[%s16324_s3 + $0x38] sm:$0xf] }
  0xf3   :  { %v975_v20 = vperm.slane %v970_v16, %v10139_v32  ;;  %v1583_v1 = vpack.c.bf16 %v1537_v9, %v1535_v19  ;;  %v1533_v45 = vmul.f32 %v1449_v5, %v10459_v42  ;;  %v1529_v7 = vmul.f32 %v1445_v17, %v10532_v3  ;;  %v8721_v3 = vld [vmem:[%s16324_s3 + $0x40] sm:$0xf0] }
  0xf4   :  { %v1527_v46 = vmul.f32 %v1443_v0, %v10521_v27  ;;  %v8077_v42 = vor.u32 %v8717_v23, %v8076_v60  ;;  %v10627_v27 = vor.u32 %v8721_v3, %v8096_v34  ;;  %v1436_v0 = vunpack.c.l.bf16 %v903_v44  ;;  %v8112_v34 = vld [vmem:[%s16324_s3 + $0x60] sm:$0xf]  ;;  %v8726_v3 = vld [vmem:[%s16324_s3 + $0x68] sm:$0xf0] }
  0xf5   :  { %v1337_v25 = vunpack.c.l.bf16 %v975_v20  ;;  %4374 = vperm.xlu2 %8846, %v4230_v2   ;;  %v961_v31 = vpop.permute.xlu0 %960  ;;  %8314 = vmatmul.msk.bf16.vlgmr.msra.gmra.mxu2 %vm1987_vm8, %v10545_v12  ;;  %v1581_v50 = vpack.c.bf16 %v1533_v45, %v1531_v63  ;;  %v1434_v45 = vunpack.c.l.bf16 %v902_v41 }
  0xf6   :  { %v966_v22 = vperm.slane %v961_v31, %v10139_v32  ;;  %4384 = vperm.xlu0 %8844, %v4232_v48   ;;  %v1579_v11 = vpack.c.bf16 %v1529_v7, %v1527_v46  ;;  %v8720_v48 = vld [vmem:[%s16324_s3 + $0x38] sm:$0xf0]  ;;  %v8108_v31 = vld [vmem:[%s16324_s3 + $0x50] sm:$0xf] }
  0xf7   :  { %v1464_v18 = vmul.f32 %v1380_v29, %v1337_v25  ;;  %v1465_v47 = vmul.f32 %v1381_v30, %v1337_v25  ;;  %4289 = vperm.xlu1 %8845, %v4213_v13   ;;  %v8089_v29 = vor.u32 %v8720_v48, %v8088_v8  ;;  %v10651_v13 = vor.u32 %v8724_v35, %v8108_v31  ;;  %v900_v7 = vld [vmem:[%s16322_s1 + $0xd0] sm:$0xff] }
  0xf8   :  { %v1336_v43 = vunpack.c.l.bf16 %v966_v22 }
  0xf9   :  { %v10617_v16 = vpop.permute.xlu2 %1158 }
  0xfa   :  { %v1462_v36 = vmul.f32 %v1378_v33, %v1336_v43  ;;  %v1463_v15 = vmul.f32 %v1379_v38, %v1336_v43  ;;  %v8100_v38 = vld [vmem:[%s16324_s3 + $0x48] sm:$0xf]  ;;  %v8723_v43 = vld [vmem:[%s16324_s3 + $0x50] sm:$0xf0] }
  0xfc   :  { %v1546_v10 = vpack.c.bf16 %v1464_v18, %v1462_v36  ;;  %v1547_v52 = vpack.c.bf16 %v1465_v47, %v1463_v15  ;;  %v8101_v47 = vor.u32 %v8723_v43, %v8100_v38  ;;  %v904_v36 = vld [vmem:[%s16322_s1 + $0xf0] sm:$0xff]  ;;  %v8120_v15 = vld [vmem:[%s16324_s3 + $0x68] sm:$0xf]  ;;  %v1431_v38 = vunpack.c.h.bf16 %v900_v7 }
  0xfd   :  { %v10676_v54 = vor.u32 %v8727_v53, %v8120_v15  ;;  %v1438_v51 = vunpack.c.l.bf16 %v904_v36 }
  0xfe   :  { %2058 = vmatpush.bf16.msra.mxu0 %v1546_v10  ;;  %2400 = vmatpush.bf16.msra.mxu3 %v1547_v52  ;;  %v1440_v10 = vunpack.c.l.bf16 %v905_v24 }
  0xff   :  { %4369 = vperm.xlu0 %8844, %v4229_v57  }
 0x101   :  { %2059 = vmatmul.bf16.vlgmr.msra.gmra.mxu0 %v8065_v55  ;;  %2401 = vmatmul.bf16.vlgmr.msra.gmra.mxu3 %v8065_v55  ;;  %v10633_v21 = vpop.permute.xlu2 %1185  ;;  %v1441_v55 = vunpack.c.h.bf16 %v905_v24 }
 0x102   :  { %2624 = vmatpush.bf16.msrb.mxu0 %v1587_v39  ;;  %v1439_v39 = vunpack.c.h.bf16 %v904_v36  ;;  %v1191_v43 = vperm.slane %v10633_v21, %v10139_v32  ;;  %v897_v21 = vld [vmem:[%s16322_s1 + $0xb8] sm:$0xff] }
 0x105   :  { %8315 = vmatmul.msk.bf16.gmra.mxu2 %vm1987_vm8, %v10595_v4  ;;  %v10615_v28 = vpop.permute.xlu1 %1122 }
 0x106   :  { %2625 = vmatpush.bf16.msrb.mxu0 %v1585_v56 }
 0x107   :  { %v10625_v2 = vpop.permute.xlu0 %1113 }
 0x10a   :  { %2626 = vmatpush.bf16.msrb.mxu0 %v1583_v1  ;;  %v901_v1 = vld [vmem:[%s16322_s1 + $0xd8] sm:$0xff] }
 0x10b   :  { %v1433_v31 = vunpack.c.h.bf16 %v901_v1 }
 0x10d   :  { %v10631_v20 = vpop.permute.xlu1 %1149 }
 0x10e   :  { %2627 = vmatpush.bf16.msrb.mxu0 %v1581_v50  ;;  %v1435_v50 = vunpack.c.h.bf16 %v902_v41 }
 0x10f   :  { %v10641_v25 = vpop.permute.xlu0 %1140  ;;  %v1213_v37 = vpop.permute.xlu2 %1212 }
 0x110   :  { %v1218_v58 = vperm.slane %v1213_v37, %v10139_v32 }
 0x111   :  { %2064 = vmatmul.bf16.gmra.mxu0 %v8077_v42  ;;  %2406 = vmatmul.bf16.gmra.mxu3 %v8077_v42  ;;  %v898_v42 = vld [vmem:[%s16322_s1 + $0xc0] sm:$0xff] }
 0x112   :  { %2628 = vmatpush.bf16.msrb.mxu0 %v1579_v11  ;;  %v1364_v63 = vunpack.c.l.bf16 %v1218_v58  ;;  %v1437_v11 = vunpack.c.h.bf16 %v903_v44  ;;  %v1164_v58 = vperm.slane %v10617_v16, %v10139_v32  ;;  %v8730_v44 = vld [vmem:[%s16324_s3 + $0x88] sm:$0xf0]  ;;  %v1424_v16 = vunpack.c.l.bf16 %v897_v21 }
 0x114   :  { %v1519_v36 = vmul.f32 %v1435_v50, %v1364_v63 }
 0x115   :  { %8316 = vmatmul.msk.bf16.gmra.mxu2 %vm1987_vm8, %v10627_v27 }
 0x117   :  { %v1240_v18 = vpop.permute.xlu2 %1239 }
 0x118   :  { %v1245_v14 = vperm.slane %v1240_v18, %v10139_v32  ;;  %v1426_v18 = vunpack.c.l.bf16 %v898_v42 }
 0x11a   :  { %v1367_v61 = vunpack.c.l.bf16 %v1245_v14  ;;  %v8113_v14 = vor.u32 %v8726_v3, %v8112_v34  ;;  %v1128_v3 = vperm.slane %v10615_v28, %v10139_v32 }
 0x11b   :  { %v10643_v30 = vpop.permute.xlu1 %1176 }
 0x11c   :  { %v1524_v56 = vmul.f32 %v1440_v10, %v1367_v61  ;;  %v1525_v5 = vmul.f32 %v1441_v55, %v1367_v61  ;;  %v1182_v8 = vperm.slane %v10643_v30, %v10139_v32  ;;  %v899_v30 = vld [vmem:[%s16322_s1 + $0xc8] sm:$0xff] }
 0x11d   :  { %v1428_v41 = vunpack.c.l.bf16 %v899_v30 }
 0x11e   :  { %v1360_v53 = vunpack.c.l.bf16 %v1182_v8 }
 0x121   :  { %2069 = vmatmul.bf16.gmra.mxu0 %v8089_v29  ;;  %2411 = vmatmul.bf16.gmra.mxu3 %v8089_v29  ;;  %v1432_v29 = vunpack.c.l.bf16 %v901_v1  ;;  %v1425_v1 = vunpack.c.h.bf16 %v897_v21 }
 0x125   :  { %8317 = vmatmul.msk.bf16.gmra.mxu2 %vm1987_vm8, %v10651_v13 }
 0x126   :  { %v10655_v22 = vpop.permute.xlu0 %1167 }
 0x127   :  { %v1173_v61 = vperm.slane %v10655_v22, %v10139_v32  ;;  %v8132_v22 = vld [vmem:[%s16324_s3 + $0x80] sm:$0xf] }
 0x129   :  { %v1204_v33 = vpop.permute.xlu1 %1203 }
 0x12a   :  { %v1209_v62 = vperm.slane %v1204_v33, %v10139_v32  ;;  %v1430_v33 = vunpack.c.l.bf16 %v900_v7 }
 0x12c   :  { %v1363_v48 = vunpack.c.l.bf16 %v1209_v62  ;;  %v1429_v62 = vunpack.c.h.bf16 %v899_v30 }
 0x12e   :  { %v1195_v49 = vpop.permute.xlu0 %1194  ;;  %v1517_v10 = vmul.f32 %v1433_v31, %v1363_v48  ;;  %v892_v31 = vld [vmem:[%s16322_s1 + $0x90] sm:$0xff] }
 0x12f   :  { %v1200_v19 = vperm.slane %v1195_v49, %v10139_v32  ;;  %v1518_v49 = vmul.f32 %v1434_v45, %v1364_v63  ;;  %v894_v63 = vld [vmem:[%s16322_s1 + $0xa0] sm:$0xff]  ;;  %v1359_v45 = vunpack.c.l.bf16 %v1173_v61  ;;  %v1415_v28 = vunpack.c.h.bf16 %v892_v31 }
 0x130   :  { %v1419_v34 = vunpack.c.h.bf16 %v894_v63 }
 0x131   :  { %2074 = vmatmul.bf16.gmra.mxu0 %v8101_v47  ;;  %2416 = vmatmul.bf16.gmra.mxu3 %v8101_v47  ;;  %v1231_v57 = vpop.permute.xlu1 %1230  ;;  %v1362_v35 = vunpack.c.l.bf16 %v1200_v19  ;;  %v1427_v47 = vunpack.c.h.bf16 %v898_v42  ;;  %v10729_v19 = vor.u32 %v8730_v44, %v8132_v22 }
 0x132   :  { %v1236_v52 = vperm.slane %v1231_v57, %v10139_v32  ;;  %v1516_v57 = vmul.f32 %v1432_v29, %v1363_v48 }
 0x133   :  { %v1515_v55 = vmul.f32 %v1431_v38, %v1362_v35  ;;  %v1511_v7 = vmul.f32 %v1427_v47, %v1360_v53  ;;  %v1509_v38 = vmul.f32 %v1425_v1, %v1359_v45 }
 0x134   :  { %v1366_v59 = vunpack.c.l.bf16 %v1236_v52 }
 0x135   :  { %8318 = vmatmul.msk.bf16.gmra.mxu2 %vm1987_vm8, %v10676_v54  ;;  %v1573_v50 = vpack.c.bf16 %v1517_v10, %v1515_v55 }
 0x136   :  { %v1522_v9 = vmul.f32 %v1438_v51, %v1366_v59  ;;  %v1523_v40 = vmul.f32 %v1439_v39, %v1366_v59  ;;  %v1514_v39 = vmul.f32 %v1430_v33, %v1362_v35  ;;  %v1361_v59 = vunpack.c.l.bf16 %v1191_v43 }
 0x137   :  { %v1222_v17 = vpop.permute.xlu0 %1221  ;;  %v1508_v33 = vmul.f32 %v1424_v16, %v1359_v45  ;;  %v1137_v43 = vperm.slane %v10599_v6, %v10139_v32 }
 0x138   :  { %v1227_v60 = vperm.slane %v1222_v17, %v10139_v32  ;;  %v1576_v23 = vpack.c.bf16 %v1524_v56, %v1522_v9  ;;  %v1577_v46 = vpack.c.bf16 %v1525_v5, %v1523_v40  ;;  %v896_v56 = vld [vmem:[%s16322_s1 + $0xb0] sm:$0xff]  ;;  %v1155_v9 = vperm.slane %v10631_v20, %v10139_v32  ;;  %v895_v17 = vld [vmem:[%s16322_s1 + $0xa8] sm:$0xff] }
 0x139   :  { %v1146_v40 = vperm.slane %v10641_v25, %v10139_v32  ;;  %v1510_v5 = vmul.f32 %v1426_v18, %v1360_v53  ;;  %v1422_v20 = vunpack.c.l.bf16 %v896_v56  ;;  %v1513_v25 = vmul.f32 %v1429_v62, %v1361_v59  ;;  %v893_v53 = vld [vmem:[%s16322_s1 + $0x98] sm:$0xff] }
 0x13a   :  { %v1365_v37 = vunpack.c.l.bf16 %v1227_v60  ;;  %2165 = vmatpush.bf16.msra.mxu1 %v1576_v23  ;;  %2507 = vmatpush.bf16.msrb.mxu2 %v1577_v46  ;;  %v1358_v60 = vunpack.c.l.bf16 %v1164_v58  ;;  %v1512_v23 = vmul.f32 %v1428_v41, %v1361_v59  ;;  %v1423_v46 = vunpack.c.h.bf16 %v896_v56  ;;  %v890_v59 = vld [vmem:[%s16322_s1 + $0x80] sm:$0xff] }
 0x13b   :  { %v1420_v42 = vunpack.c.l.bf16 %v895_v17  ;;  %v1357_v8 = vunpack.c.l.bf16 %v1155_v9  ;;  %v1356_v48 = vunpack.c.l.bf16 %v1146_v40  ;;  %v1421_v29 = vunpack.c.h.bf16 %v895_v17 }
 0x13c   :  { %v1520_v24 = vmul.f32 %v1436_v0, %v1365_v37  ;;  %v1521_v15 = vmul.f32 %v1437_v11, %v1365_v37  ;;  %v1572_v0 = vpack.c.bf16 %v1516_v57, %v1514_v39  ;;  %v1418_v11 = vunpack.c.l.bf16 %v894_v63 }
 0x13d   :  { %v1570_v35 = vpack.c.bf16 %v1512_v23, %v1510_v5  ;;  %v1571_v37 = vpack.c.bf16 %v1513_v25, %v1511_v7  ;;  %v1506_v18 = vmul.f32 %v1422_v20, %v1358_v60  ;;  %v1507_v47 = vmul.f32 %v1423_v46, %v1358_v60  ;;  %v8713_v46 = vld [vmem:[%s16324_s3 + $0x4] sm:$0xf]  ;;  %v8066_v25 = vld [vmem:[%s16324_s3 + $0xc] sm:$0xf0] }
 0x13e   :  { %v1574_v52 = vpack.c.bf16 %v1520_v24, %v1518_v49  ;;  %v1575_v51 = vpack.c.bf16 %v1521_v15, %v1519_v36  ;;  %v8124_v49 = vld [vmem:[%s16324_s3 + $0x78] sm:$0xf]  ;;  %v8729_v24 = vld [vmem:[%s16324_s3 + $0x80] sm:$0xf0]  ;;  %v1354_v36 = vunpack.c.l.bf16 %v1128_v3  ;;  %v1119_v15 = vperm.slane %v10625_v2, %v10139_v32  ;;  %v8136_v3 = vld [vmem:[%s16324_s3 + $0x90] sm:$0xf] }
 0x13f   :  { %v1504_v30 = vmul.f32 %v1420_v42, %v1357_v8  ;;  %v1505_v6 = vmul.f32 %v1421_v29, %v1357_v8  ;;  %v1568_v61 = vpack.c.bf16 %v1508_v33, %v1506_v18  ;;  %v1569_v57 = vpack.c.bf16 %v1509_v38, %v1507_v47  ;;  %v8732_v8 = vld [vmem:[%s16324_s3 + $0x98] sm:$0xf0]  ;;  %v8156_v29 = vld [vmem:[%s16324_s3 + $0xb0] sm:$0xf]  ;;  %v8078_v33 = vld [vmem:[%s16324_s3 + $0x24] sm:$0xf0] }
 0x140   :  { %2166 = vmatpush.bf16.msra.mxu1 %v1574_v52  ;;  %2508 = vmatpush.bf16.msrb.mxu2 %v1575_v51  ;;  %v1502_v10 = vmul.f32 %v1418_v11, %v1356_v48  ;;  %v1503_v21 = vmul.f32 %v1419_v34, %v1356_v48  ;;  %v891_v52 = vld [vmem:[%s16322_s1 + $0x88] sm:$0xff]  ;;  %v1110_v51 = vperm.slane %v10571_v26, %v10139_v32  ;;  %v1355_v55 = vunpack.c.l.bf16 %v1137_v43  ;;  %v8144_v32 = vld [vmem:[%s16324_s3 + $0x98] sm:$0xf]  ;;  %v8733_v26 = vld [vmem:[%s16324_s3 + $0xa0] sm:$0xf0] }
 0x141   :  { %2079 = vmatmul.bf16.gmra.mxu0 %v8113_v14  ;;  %2421 = vmatmul.bf16.gmra.mxu3 %v8113_v14  ;;  %v1414_v14 = vunpack.c.l.bf16 %v892_v31  ;;  %v8125_v39 = vor.u32 %v8729_v24, %v8124_v49  ;;  %v1416_v2 = vunpack.c.l.bf16 %v893_v53  ;;  %v1417_v58 = vunpack.c.h.bf16 %v893_v53  ;;  %v8736_v31 = vld [vmem:[%s16324_s3 + $0xb8] sm:$0xf0]  ;;  %v8148_v43 = vld [vmem:[%s16324_s3 + $0xa8] sm:$0xf]  ;;  %v8735_v18 = vld [vmem:[%s16324_s3 + $0xb0] sm:$0xf0] }
 0x142   :  { %v1353_v41 = vunpack.c.l.bf16 %v1119_v15  ;;  %v1412_v22 = vunpack.c.l.bf16 %v891_v52  ;;  %v1413_v44 = vunpack.c.h.bf16 %v891_v52  ;;  %v1566_v62 = vpack.c.bf16 %v1504_v30, %v1502_v10  ;;  %v8719_v24 = vld [vmem:[%s16324_s3 + $0x34] sm:$0xf]  ;;  %v8738_v53 = vld [vmem:[%s16324_s3 + $0xc8] sm:$0xf0]  ;;  %v8180_v10 = vld [vmem:[%s16324_s3 + $0xe0] sm:$0xf] }
 0x143   :  { %v1567_v56 = vpack.c.bf16 %v1505_v6, %v1503_v21  ;;  %v1498_v16 = vmul.f32 %v1414_v14, %v1354_v36  ;;  %v1499_v9 = vmul.f32 %v1415_v28, %v1354_v36  ;;  %v1352_v40 = vunpack.c.l.bf16 %v1110_v51  ;;  %v8168_v14 = vld [vmem:[%s16324_s3 + $0xc8] sm:$0xf]  ;;  %v8739_v28 = vld [vmem:[%s16324_s3 + $0xd0] sm:$0xf0]  ;;  %v8090_v36 = vld [vmem:[%s16324_s3 + $0x3c] sm:$0xf0] }
 0x144   :  { %2167 = vmatpush.bf16.msra.mxu1 %v1572_v0  ;;  %2509 = vmatpush.bf16.msrb.mxu2 %v1573_v50  ;;  %v1410_v5 = vunpack.c.l.bf16 %v890_v59  ;;  %v1500_v1 = vmul.f32 %v1416_v2, %v1355_v55  ;;  %v1501_v63 = vmul.f32 %v1417_v58, %v1355_v55  ;;  %v1411_v17 = vunpack.c.h.bf16 %v890_v59  ;;  %v8160_v6 = vld [vmem:[%s16324_s3 + $0xc0] sm:$0xf]  ;;  %v8742_v21 = vld [vmem:[%s16324_s3 + $0xe8] sm:$0xf0]  ;;  %v8102_v55 = vld [vmem:[%s16324_s3 + $0x54] sm:$0xf0] }
 0x145   :  { %8319 = vmatmul.msk.bf16.gmra.mxu2 %vm1987_vm8, %v10729_v19  ;;  %v10775_v45 = vor.u32 %v8733_v26, %v8144_v32  ;;  %v1496_v7 = vmul.f32 %v1412_v22, %v1353_v41  ;;  %v1497_v60 = vmul.f32 %v1413_v44, %v1353_v41  ;;  %v10785_v34 = vor.u32 %v8713_v46, %v8066_v25  ;;  %v8172_v41 = vld [vmem:[%s16324_s3 + $0xd8] sm:$0xf]  ;;  %v8741_v22 = vld [vmem:[%s16324_s3 + $0xe0] sm:$0xf0]  ;;  %v8114_v32 = vld [vmem:[%s16324_s3 + $0x6c] sm:$0xf0] }
 0x146   :  { %v1564_v0 = vpack.c.bf16 %v1500_v1, %v1498_v16  ;;  %v1565_v50 = vpack.c.bf16 %v1501_v63, %v1499_v9  ;;  %v1494_v23 = vmul.f32 %v1410_v5, %v1352_v40  ;;  %v1495_v20 = vmul.f32 %v1411_v17, %v1352_v40  ;;  %v8745_v16 = vld [vmem:[%s16324_s3 + $0x100] sm:$0xf0]  ;;  %v8184_v17 = vld [vmem:[%s16324_s3 + $0xf0] sm:$0xf]  ;;  %v8728_v25 = vld [vmem:[%s16324_s3 + $0x7c] sm:$0xf] }
 0x147   :  { %v8137_v48 = vor.u32 %v8732_v8, %v8136_v3  ;;  %v8149_v47 = vor.u32 %v8735_v18, %v8148_v43  ;;  %v10825_v49 = vor.u32 %v8739_v28, %v8168_v14  ;;  %v10837_v30 = vor.u32 %v8719_v24, %v8090_v36  ;;  %v8725_v5 = vld [vmem:[%s16324_s3 + $0x64] sm:$0xf]  ;;  %v8751_v43 = vld [vmem:[%s16324_s3 + $0x130] sm:$0xf0]  ;;  %v8138_v28 = vld [vmem:[%s16324_s3 + $0x9c] sm:$0xf0] }
 0x148   :  { %2168 = vmatpush.bf16.msra.mxu1 %v1570_v35  ;;  %2510 = vmatpush.bf16.msrb.mxu2 %v1571_v37  ;;  %v1562_v11 = vpack.c.bf16 %v1496_v7, %v1494_v23  ;;  %v1563_v42 = vpack.c.bf16 %v1497_v60, %v1495_v20  ;;  %v10800_v35 = vor.u32 %v8736_v31, %v8156_v29  ;;  %v8716_v37 = vld [vmem:[%s16324_s3 + $0x1c] sm:$0xf]  ;;  %v8204_v60 = vld [vmem:[%s16324_s3 + $0x110] sm:$0xf]  ;;  %v8747_v29 = vld [vmem:[%s16324_s3 + $0x110] sm:$0xf0] }
 0x149   :  { %v10810_v38 = vor.u32 %v8716_v37, %v8078_v33  ;;  %v10856_v51 = vor.u32 %v8742_v21, %v8180_v10  ;;  %v8173_v44 = vor.u32 %v8741_v22, %v8172_v41  ;;  %v10903_v63 = vor.u32 %v8725_v5, %v8114_v32  ;;  %v8748_v23 = vld [vmem:[%s16324_s3 + $0x118] sm:$0xf0]  ;;  %v8216_v33 = vld [vmem:[%s16324_s3 + $0x128] sm:$0xf]  ;;  %v8731_v14 = vld [vmem:[%s16324_s3 + $0x94] sm:$0xf] }
 0x14a   :  { %v10922_v46 = vor.u32 %v8748_v23, %v8204_v60  ;;  %v8240_v23 = vld [vmem:[%s16324_s3 + $0x158] sm:$0xf] }
 0x14c   :  { %2169 = vmatpush.bf16.msra.mxu1 %v1568_v61  ;;  %2511 = vmatpush.bf16.msrb.mxu2 %v1569_v57  ;;  %v8161_v61 = vor.u32 %v8738_v53, %v8160_v6  ;;  %v10969_v6 = vor.u32 %v8731_v14, %v8138_v28  ;;  %v8208_v53 = vld [vmem:[%s16324_s3 + $0x120] sm:$0xf]  ;;  %v8232_v28 = vld [vmem:[%s16324_s3 + $0x150] sm:$0xf] }
 0x150   :  { %2170 = vmatpush.bf16.msra.mxu1 %v1566_v62  ;;  %2512 = vmatpush.bf16.msrb.mxu2 %v1567_v56  ;;  %v8192_v56 = vld [vmem:[%s16324_s3 + $0xf8] sm:$0xf] }
 0x151   :  { %2084 = vmatmul.bf16.gmra.mxu0 %v8125_v39  ;;  %2426 = vmatmul.bf16.gmra.mxu3 %v8125_v39  ;;  %v8722_v39 = vld [vmem:[%s16324_s3 + $0x4c] sm:$0xf]  ;;  %v10889_v40 = vor.u32 %v8745_v16, %v8192_v56  ;;  %v8150_v56 = vld [vmem:[%s16324_s3 + $0xb4] sm:$0xf0] }
 0x152   :  { %v10870_v59 = vor.u32 %v8722_v39, %v8102_v55  ;;  %v8228_v39 = vld [vmem:[%s16324_s3 + $0x140] sm:$0xf]  ;;  %v8754_v55 = vld [vmem:[%s16324_s3 + $0x148] sm:$0xf0] }
 0x153   :  { %v10991_v22 = vor.u32 %v8754_v55, %v8228_v39  ;;  %v8252_v55 = vld [vmem:[%s16324_s3 + $0x170] sm:$0xf] }
 0x154   :  { %2171 = vmatpush.bf16.msra.mxu1 %v1564_v0  ;;  %2513 = vmatpush.bf16.msrb.mxu2 %v1565_v50  ;;  %v8744_v0 = vld [vmem:[%s16324_s3 + $0xf8] sm:$0xf0] }
 0x155   :  { %8320 = vmatmul.msk.bf16.gmra.mxu2 %vm1987_vm8, %v10775_v45  ;;  %v8185_v50 = vor.u32 %v8744_v0, %v8184_v17  ;;  %16817 = vst [vmem:[#allocation8_spill] sm:$0xff] %v10991_v22  ;;  %v8220_v17 = vld [vmem:[%s16324_s3 + $0x138] sm:$0xf]  ;;  %v8753_v0 = vld [vmem:[%s16324_s3 + $0x140] sm:$0xf0] }
 0x158   :  { %2172 = vmatpush.bf16.msra.mxu1 %v1562_v11  ;;  %2514 = vmatpush.bf16.msrb.mxu2 %v1563_v42  ;;  %v8126_v11 = vld [vmem:[%s16324_s3 + $0x84] sm:$0xf0] }
 0x159   :  { %v10936_v8 = vor.u32 %v8728_v25, %v8126_v11  ;;  %v8757_v25 = vld [vmem:[%s16324_s3 + $0x160] sm:$0xf0] }
 0x15b   :  { %2173 = vmatmul.bf16.vlgmr.msra.gmra.mxu1 %v10785_v34 }
 0x161   :  { %2089 = vmatmul.bf16.gmra.mxu0 %v8137_v48  ;;  %2431 = vmatmul.bf16.gmra.mxu3 %v8137_v48  ;;  %v8196_v48 = vld [vmem:[%s16324_s3 + $0x108] sm:$0xf] }
 0x162   :  { %v8197_v31 = vor.u32 %v8747_v29, %v8196_v48  ;;  %v11027_v48 = vor.u32 %v8757_v25, %v8240_v23  ;;  %v8737_v29 = vld [vmem:[%s16324_s3 + $0xc4] sm:$0xf]  ;;  %v8174_v23 = vld [vmem:[%s16324_s3 + $0xe4] sm:$0xf0] }
 0x164   :  { %16822 = vst [vmem:[#allocation13_spill] sm:$0xff] %v11027_v48 }
 0x165   :  { %8321 = vmatmul.msk.bf16.gmra.mxu2 %vm1987_vm8, %v10800_v35 }
 0x16b   :  { %2178 = vmatmul.bf16.gmra.mxu1 %v10810_v38 }
 0x171   :  { %2094 = vmatmul.bf16.gmra.mxu0 %v8149_v47  ;;  %2436 = vmatmul.bf16.gmra.mxu3 %v8149_v47  ;;  %v10955_v47 = vor.u32 %v8751_v43, %v8216_v33 }
 0x173   :  { %16814 = vst [vmem:[#allocation5_spill] sm:$0xff] %v10955_v47 }
 0x175   :  { %8322 = vmatmul.msk.bf16.gmra.mxu2 %vm1987_vm8, %v10825_v49 }
 0x178   :  { %v10835_v15 = vpop.f32.mrf.mxu2 }
 0x17b   :  { %2183 = vmatmul.bf16.gmra.mxu1 %v10837_v30 }
 0x17e   :  { %v10846_v57 = vpop.f32.mrf.mxu0 }
 0x180   :  { %v10854_v52 = vpop.f32.mrf.mxu2 }
 0x181   :  { %2099 = vmatmul.bf16.gmra.mxu0 %v8161_v61  ;;  %2441 = vmatmul.bf16.gmra.mxu3 %v8161_v61  ;;  %v8750_v61 = vld [vmem:[%s16324_s3 + $0x128] sm:$0xf0] }
 0x182   :  { %v10978_v10 = vor.u32 %v8750_v61, %v8208_v53  ;;  %v8756_v53 = vld [vmem:[%s16324_s3 + $0x158] sm:$0xf0] }
 0x183   :  { %v11050_v61 = vor.u32 %v8756_v53, %v8232_v28  ;;  %v8244_v28 = vld [vmem:[%s16324_s3 + $0x168] sm:$0xf]  ;;  %v8759_v53 = vld [vmem:[%s16324_s3 + $0x170] sm:$0xf0] }
 0x185   :  { %8323 = vmatmul.msk.bf16.gmra.mxu2 %vm1987_vm8, %v10856_v51 }
 0x186   :  { %v10866_v2 = vpop.f32.mrf.mxu0 }
 0x188   :  { %v10868_v58 = vpop.f32.mrf.mxu2 }
 0x18b   :  { %2188 = vmatmul.bf16.gmra.mxu1 %v10870_v59 }
 0x18e   :  { %v10879_v62 = vpop.f32.mrf.mxu0 }
 0x190   :  { %v10887_v9 = vpop.f32.mrf.mxu2 }
 0x191   :  { %2104 = vmatmul.bf16.gmra.mxu0 %v8173_v44  ;;  %2446 = vmatmul.bf16.gmra.mxu3 %v8173_v44  ;;  %v8734_v44 = vld [vmem:[%s16324_s3 + $0xac] sm:$0xf] }
 0x192   :  { %v11005_v32 = vor.u32 %v8734_v44, %v8150_v56  ;;  %v8760_v44 = vld [vmem:[%s16324_s3 + $0x178] sm:$0xf0] }
 0x195   :  { %8324 = vmatmul.msk.bf16.gmra.mxu2 %vm1987_vm8, %v10889_v40 }
 0x196   :  { %v10899_v26 = vpop.f32.mrf.mxu0 }
 0x198   :  { %v10901_v1 = vpop.f32.mrf.mxu2 }
 0x19b   :  { %2193 = vmatmul.bf16.gmra.mxu1 %v10903_v63 }
 0x19e   :  { %v10912_v7 = vpop.f32.mrf.mxu0 }
 0x1a0   :  { %v10920_v20 = vpop.f32.mrf.mxu2 }
 0x1a1   :  { %2109 = vmatmul.bf16.gmra.mxu0 %v8185_v50  ;;  %2451 = vmatmul.bf16.gmra.mxu3 %v8185_v50  ;;  %v11014_v50 = vor.u32 %v8753_v0, %v8220_v17  ;;  %v11063_v17 = vor.u32 %v8760_v44, %v8252_v55  ;;  %v8740_v0 = vld [vmem:[%s16324_s3 + $0xdc] sm:$0xf]  ;;  %v11086_v55 = vor.u32 %v8759_v53, %v8244_v28  ;;  %v8743_v28 = vld [vmem:[%s16324_s3 + $0xf4] sm:$0xf]  ;;  %v8186_v53 = vld [vmem:[%s16324_s3 + $0xfc] sm:$0xf0] }
 0x1a3   :  { %16827 = vst [vmem:[#allocation18_spill] sm:$0xff] %v11063_v17 }
 0x1a5   :  { %8325 = vmatmul.msk.bf16.gmra.mxu2 %vm1987_vm8, %v10922_v46 }
 0x1a6   :  { %v10932_v42 = vpop.f32.mrf.mxu0 }
 0x1a8   :  { %v10934_v3 = vpop.f32.mrf.mxu2 }
 0x1ab   :  { %2198 = vmatmul.bf16.gmra.mxu1 %v10936_v8 }
 0x1ae   :  { %v10945_v37 = vpop.f32.mrf.mxu0 }
 0x1b0   :  { %v10953_v18 = vpop.f32.mrf.mxu2 }
 0x1b1   :  { %2114 = vmatmul.bf16.gmra.mxu0 %v8197_v31  ;;  %2456 = vmatmul.bf16.gmra.mxu3 %v8197_v31  ;;  %v8162_v31 = vld [vmem:[%s16324_s3 + $0xcc] sm:$0xf0] }
 0x1b2   :  { %v11041_v14 = vor.u32 %v8737_v29, %v8162_v31  ;;  %v11077_v31 = vor.u32 %v8740_v0, %v8174_v23  ;;  %v8763_v0 = vld [vmem:[%s16324_s3 + $0x190] sm:$0xf0] }
 0x1b5   :  { %8326 = vmatmul.msk.bf16.gmra.mxu2 %vm1987_vm8, %v10955_v47 }
 0x1b6   :  { %v10965_v24 = vpop.f32.mrf.mxu0 }
 0x1b8   :  { %v10967_v36 = vpop.f32.mrf.mxu2 }
 0x1b9   :  { %16815 = vst [vmem:[#allocation6_spill] sm:$0xff] %v10967_v36 }
 0x1bb   :  { %2203 = vmatmul.bf16.gmra.mxu1 %v10969_v6 }
 0x1be   :  { %v10980_v21 = vpop.f32.mrf.mxu0 }
 0x1c0   :  { %v10988_v41 = vpop.f32.mrf.mxu2 }
 0x1c1   :  { %16816 = vst [vmem:[#allocation7_spill] sm:$0xff] %v10988_v41  ;;  %2119 = vmatmul.bf16.gmra.mxu0 %v10978_v10 }
 0x1c5   :  { %8327 = vmatmul.msk.bf16.gmra.mxu2 %vm1987_vm8, %v10991_v22 }
 0x1c6   :  { %v11001_v16 = vpop.f32.mrf.mxu0 }
 0x1c7   :  { %16818 = vst [vmem:[#allocation9_spill] sm:$0xff] %v11001_v16 }
 0x1c8   :  { %v11003_v5 = vpop.f32.mrf.mxu2 }
 0x1c9   :  { %16819 = vst [vmem:[#allocation10_spill] sm:$0xff] %v11003_v5 }
 0x1cb   :  { %2208 = vmatmul.bf16.gmra.mxu1 %v11005_v32 }
 0x1ce   :  { %v11016_v60 = vpop.f32.mrf.mxu0 }
 0x1cf   :  { %16820 = vst [vmem:[#allocation11_spill] sm:$0xff] %v11016_v60 }
 0x1d0   :  { %v11024_v11 = vpop.f32.mrf.mxu2 }
 0x1d1   :  { %16821 = vst [vmem:[#allocation12_spill] sm:$0xff] %v11024_v11  ;;  %2124 = vmatmul.bf16.gmra.mxu0 %v11014_v50 }
 0x1d5   :  { %8328 = vmatmul.msk.bf16.gmra.mxu2 %vm1987_vm8, %v11027_v48 }
 0x1d6   :  { %v11037_v33 = vpop.f32.mrf.mxu0 }
 0x1d7   :  { %16823 = vst [vmem:[#allocation14_spill] sm:$0xff] %v11037_v33 }
 0x1d8   :  { %v11039_v43 = vpop.f32.mrf.mxu2 }
 0x1d9   :  { %16824 = vst [vmem:[#allocation15_spill] sm:$0xff] %v11039_v43 }
 0x1db   :  { %2213 = vmatmul.bf16.gmra.mxu1 %v11041_v14 }
 0x1de   :  { %v11052_v39 = vpop.f32.mrf.mxu0 }
 0x1df   :  { %16825 = vst [vmem:[#allocation16_spill] sm:$0xff] %v11052_v39 }
 0x1e0   :  { %v11060_v56 = vpop.f32.mrf.mxu2 }
 0x1e1   :  { %16826 = vst [vmem:[#allocation17_spill] sm:$0xff] %v11060_v56  ;;  %2129 = vmatmul.bf16.gmra.mxu0 %v11050_v61  ;;  %v11101_v56 = vpop.f32.mrf.mxu1 }
 0x1e5   :  { %8329 = vmatmul.msk.bf16.gmra.mxu2 %vm1987_vm8, %v11063_v17  ;;  %v8264_v17 = vld [vmem:[%s16324_s3 + $0x188] sm:$0xf] }
 0x1e6   :  { %v11073_v25 = vpop.f32.mrf.mxu0 }
 0x1e7   :  { %16828 = vst [vmem:[#allocation19_spill] sm:$0xff] %v11073_v25  ;;  %v11115_v25 = vor.u32 %v8743_v28, %v8186_v53  ;;  %v8276_v28 = vld [vmem:[%s16324_s3 + $0x1a0] sm:$0xf]  ;;  %v8766_v53 = vld [vmem:[%s16324_s3 + $0x1a8] sm:$0xf0] }
 0x1e8   :  { %v11075_v29 = vpop.f32.mrf.mxu2 }
 0x1e9   :  { %16829 = vst [vmem:[#allocation20_spill] sm:$0xff] %v11075_v29  ;;  %v11099_v29 = vor.u32 %v8763_v0, %v8264_v17  ;;  %v8256_v17 = vld [vmem:[%s16324_s3 + $0x180] sm:$0xf]  ;;  %v8762_v0 = vld [vmem:[%s16324_s3 + $0x188] sm:$0xf0] }
 0x1ea   :  { %v11126_v48 = vor.u32 %v8762_v0, %v8256_v17  ;;  %v8746_v17 = vld [vmem:[%s16324_s3 + $0x10c] sm:$0xf]  ;;  %v8198_v0 = vld [vmem:[%s16324_s3 + $0x114] sm:$0xf0] }
 0x1eb   :  { %2218 = vmatmul.bf16.gmra.mxu1 %v11077_v31  ;;  %16832 = vst [vmem:[#allocation23_spill] sm:$0xff] %v11099_v29  ;;  %v11155_v11 = vor.u32 %v8746_v17, %v8198_v0  ;;  %v8769_v17 = vld [vmem:[%s16324_s3 + $0x1c0] sm:$0xf0] }
 0x1ee   :  { %v11088_v44 = vpop.f32.mrf.mxu0 }
 0x1ef   :  { %16830 = vst [vmem:[#allocation21_spill] sm:$0xff] %v11088_v44 }
 0x1f0   :  { %v11096_v23 = vpop.f32.mrf.mxu2 }
 0x1f1   :  { %16831 = vst [vmem:[#allocation22_spill] sm:$0xff] %v11096_v23  ;;  %2134 = vmatmul.bf16.gmra.mxu0 %v11086_v55 }
 0x1f5   :  { %8330 = vmatmul.msk.bf16.gmra.mxu2 %vm1987_vm8, %v11099_v29  ;;  %v11123_v29 = vpop.f32.mrf.mxu1 }
 0x1f6   :  { %v11111_v44 = vpop.f32.mrf.mxu0 }
 0x1f7   :  { %16833 = vst [vmem:[#allocation24_spill] sm:$0xff] %v11111_v44  ;;  %v11139_v44 = vor.u32 %v8766_v53, %v8276_v28  ;;  %v8268_v28 = vld [vmem:[%s16324_s3 + $0x198] sm:$0xf]  ;;  %v8765_v53 = vld [vmem:[%s16324_s3 + $0x1a0] sm:$0xf0] }
 0x1f8   :  { %v11113_v23 = vpop.f32.mrf.mxu2 }
 0x1f9   :  { %16834 = vst [vmem:[#allocation25_spill] sm:$0xff] %v11113_v23 }
 0x1fa   :  { %16837 = vst [vmem:[#allocation28_spill] sm:$0xff] %v11139_v44 }
 0x1fb   :  { %2223 = vmatmul.bf16.gmra.mxu1 %v11115_v25 }
 0x1fd   :  { %v11151_v39 = vpop.f32.mrf.mxu1 }
 0x1fe   :  { %v11128_v43 = vpop.f32.mrf.mxu0 }
 0x1ff   :  { %16835 = vst [vmem:[#allocation26_spill] sm:$0xff] %v11128_v43 }
 0x200   :  { %v11136_v23 = vpop.f32.mrf.mxu2 }
 0x201   :  { %16836 = vst [vmem:[#allocation27_spill] sm:$0xff] %v11136_v23  ;;  %2139 = vmatmul.bf16.gmra.mxu0 %v11126_v48 }
 0x205   :  { %8331 = vmatmul.msk.bf16.gmra.mxu2 %vm1987_vm8, %v11139_v44  ;;  %v11164_v44 = vor.u32 %v8765_v53, %v8268_v28  ;;  %v8749_v28 = vld [vmem:[%s16324_s3 + $0x124] sm:$0xf]  ;;  %v8210_v53 = vld [vmem:[%s16324_s3 + $0x12c] sm:$0xf0] }
 0x206   :  { %v11149_v43 = vpop.f32.mrf.mxu0  ;;  %v11193_v5 = vor.u32 %v8749_v28, %v8210_v53  ;;  %v8300_v28 = vld [vmem:[%s16324_s3 + $0x1d0] sm:$0xf]  ;;  %v8772_v53 = vld [vmem:[%s16324_s3 + $0x1d8] sm:$0xf0] }
 0x207   :  { %16838 = vst [vmem:[#allocation29_spill] sm:$0xff] %v11149_v43  ;;  %v11176_v43 = vpop.f32.mrf.mxu1 }
 0x208   :  { %v11153_v23 = vpop.f32.mrf.mxu2  ;;  %16840 = vst [vmem:[#allocation31_spill] sm:$0xff] %v11164_v44 }
 0x209   :  { %16839 = vst [vmem:[#allocation30_spill] sm:$0xff] %v11153_v23  ;;  %v8288_v23 = vld [vmem:[%s16324_s3 + $0x1b8] sm:$0xf] }
 0x20a   :  { %v11179_v22 = vor.u32 %v8769_v17, %v8288_v23  ;;  %v8280_v23 = vld [vmem:[%s16324_s3 + $0x1b0] sm:$0xf]  ;;  %v8768_v17 = vld [vmem:[%s16324_s3 + $0x1b8] sm:$0xf0] }
 0x20b   :  { %2228 = vmatmul.bf16.gmra.mxu1 %v11155_v11  ;;  %v11204_v60 = vor.u32 %v8768_v17, %v8280_v23  ;;  %v8752_v23 = vld [vmem:[%s16324_s3 + $0x13c] sm:$0xf]  ;;  %v8222_v17 = vld [vmem:[%s16324_s3 + $0x144] sm:$0xf0] }
 0x20c   :  { %16843 = vst [vmem:[#allocation34_spill] sm:$0xff] %v11179_v22 }
 0x20d   :  { %16846 = vst [vmem:[#allocation37_spill] sm:$0xff] %v11204_v60 }
 0x20e   :  { %v11166_v33 = vpop.f32.mrf.mxu0 }
 0x20f   :  { %16841 = vst [vmem:[#allocation32_spill] sm:$0xff] %v11166_v33 }
 0x210   :  { %v11174_v0 = vpop.f32.mrf.mxu2 }
 0x211   :  { %16842 = vst [vmem:[#allocation33_spill] sm:$0xff] %v11174_v0  ;;  %2144 = vmatmul.bf16.gmra.mxu0 %v11164_v44 }
 0x215   :  { %8332 = vmatmul.msk.bf16.gmra.mxu2 %vm1987_vm8, %v11179_v22  ;;  %v11201_v22 = vpop.f32.mrf.mxu1 }
 0x216   :  { %v11189_v33 = vpop.f32.mrf.mxu0 }
 0x217   :  { %16844 = vst [vmem:[#allocation35_spill] sm:$0xff] %v11189_v33  ;;  %v11217_v33 = vor.u32 %v8772_v53, %v8300_v28  ;;  %v8292_v28 = vld [vmem:[%s16324_s3 + $0x1c8] sm:$0xf]  ;;  %v8771_v53 = vld [vmem:[%s16324_s3 + $0x1d0] sm:$0xf0] }
 0x218   :  { %v11191_v0 = vpop.f32.mrf.mxu2 }
 0x219   :  { %16845 = vst [vmem:[#allocation36_spill] sm:$0xff] %v11191_v0 }
 0x21a   :  { %16849 = vst [vmem:[#allocation40_spill] sm:$0xff] %v11217_v33 }
 0x21b   :  { %2233 = vmatmul.bf16.gmra.mxu1 %v11193_v5 }
 0x21d   :  { %v11219_v44 = vpop.f32.mrf.mxu1 }
 0x21e   :  { %v11206_v41 = vpop.f32.mrf.mxu0 }
 0x21f   :  { %16847 = vst [vmem:[#allocation38_spill] sm:$0xff] %v11206_v41 }
 0x220   :  { %v11214_v0 = vpop.f32.mrf.mxu2 }
 0x221   :  { %16848 = vst [vmem:[#allocation39_spill] sm:$0xff] %v11214_v0  ;;  %2149 = vmatmul.bf16.gmra.mxu0 %v11204_v60  ;;  %v11233_v60 = vor.u32 %v8752_v23, %v8222_v17  ;;  %v8775_v23 = vld [vmem:[%s16324_s3 + $0x1f0] sm:$0xf0] }
 0x223   :  { %16852 = vst [vmem:[#allocation43_spill] sm:$0xff] %v11233_v60 }
 0x225   :  { %8333 = vmatmul.msk.bf16.gmra.mxu2 %vm1987_vm8, %v11217_v33  ;;  %v11242_v33 = vor.u32 %v8771_v53, %v8292_v28  ;;  %v11252_v17 = vpop.f32.mrf.mxu1  ;;  %v8755_v28 = vld [vmem:[%s16324_s3 + $0x154] sm:$0xf]  ;;  %v8234_v53 = vld [vmem:[%s16324_s3 + $0x15c] sm:$0xf0] }
 0x226   :  { %v11229_v41 = vpop.f32.mrf.mxu0 }
 0x227   :  { %16850 = vst [vmem:[#allocation41_spill] sm:$0xff] %v11229_v41 }
 0x228   :  { %v11231_v0 = vpop.f32.mrf.mxu2  ;;  %16853 = vst [vmem:[#allocation44_spill] sm:$0xff] %v11242_v33 }
 0x229   :  { %16851 = vst [vmem:[#allocation42_spill] sm:$0xff] %v11231_v0  ;;  %v8312_v0 = vld [vmem:[%s16324_s3 + $0x1e8] sm:$0xf] }
 0x22a   :  { %v11257_v47 = vor.u32 %v8775_v23, %v8312_v0  ;;  %v8304_v0 = vld [vmem:[%s16324_s3 + $0x1e0] sm:$0xf]  ;;  %v8774_v23 = vld [vmem:[%s16324_s3 + $0x1e8] sm:$0xf0] }
 0x22b   :  { %2238 = vmatmul.bf16.gmra.mxu1 %v11233_v60 }
 0x22c   :  { %16856 = vst [vmem:[#allocation47_spill] sm:$0xff] %v11257_v47 }
 0x22e   :  { %v11244_v16 = vpop.f32.mrf.mxu0 }
 0x22f   :  { %16854 = vst [vmem:[#allocation45_spill] sm:$0xff] %v11244_v16 }
 0x230   :  { %v11254_v41 = vpop.f32.mrf.mxu2 }
 0x231   :  { %16855 = vst [vmem:[#allocation46_spill] sm:$0xff] %v11254_v41  ;;  %2154 = vmatmul.bf16.gmra.mxu0 %v11242_v33  ;;  %v11271_v41 = vpop.f32.mrf.mxu1  ;;  %v11273_v33 = vor.u32 %v8755_v28, %v8234_v53  ;;  %v8758_v53 = vld [vmem:[%s16324_s3 + $0x16c] sm:$0xf] }
 0x235   :  { %8334 = vmatmul.msk.bf16.gmra.mxu2 %vm1987_vm8, %v11257_v47  ;;  %v11282_v47 = vor.u32 %v8774_v23, %v8304_v0 }
 0x236   :  { %v11267_v16 = vpop.f32.mrf.mxu0 }
 0x237   :  { %16857 = vst [vmem:[#allocation48_spill] sm:$0xff] %v11267_v16 }
 0x238   :  { %v11269_v60 = vpop.f32.mrf.mxu2  ;;  %16859 = vst [vmem:[#allocation50_spill] sm:$0xff] %v11282_v47 }
 0x239   :  { %16858 = vst [vmem:[#allocation49_spill] sm:$0xff] %v11269_v60  ;;  %v11289_v28 = vpop.f32.mrf.mxu1  ;;  %v8246_v60 = vld [vmem:[%s16324_s3 + $0x174] sm:$0xf0] }
 0x23b   :  { %2243 = vmatmul.bf16.gmra.mxu1 %v11273_v33 }
 0x23e   :  { %v11284_v36 = vpop.f32.mrf.mxu0 }
 0x23f   :  { %16860 = vst [vmem:[#allocation51_spill] sm:$0xff] %v11284_v36  ;;  %v11302_v36 = vor.u32 %v8758_v53, %v8246_v60  ;;  %v8258_v60 = vld [vmem:[%s16324_s3 + $0x18c] sm:$0xf0] }
 0x240   :  { %v11286_v16 = vpop.f32.mrf.mxu2 }
 0x241   :  { %16861 = vst [vmem:[#allocation52_spill] sm:$0xff] %v11286_v16  ;;  %2159 = vmatmul.bf16.gmra.mxu0 %v11282_v47  ;;  %v11304_v16 = vpop.f32.mrf.mxu1 }
 0x242   :  { %16864 = vst [vmem:[#allocation55_spill] sm:$0xff] %v11302_v36 }
 0x245   :  { %2515 = vmatmul.bf16.vlgmr.msrb.gmra.mxu2 %v10785_v34 }
 0x246   :  { %v11298_v0 = vpop.f32.mrf.mxu0 }
 0x247   :  { %16862 = vst [vmem:[#allocation53_spill] sm:$0xff] %v11298_v0  ;;  %v8761_v0 = vld [vmem:[%s16324_s3 + $0x184] sm:$0xf] }
 0x248   :  { %v11300_v23 = vpop.f32.mrf.mxu2 }
 0x249   :  { %16863 = vst [vmem:[#allocation54_spill] sm:$0xff] %v11300_v23  ;;  %v11322_v23 = vpop.f32.mrf.mxu1 }
 0x24b   :  { %2248 = vmatmul.bf16.gmra.mxu1 %v11302_v36 }
 0x24e   :  { %v11307_v47 = vpop.f32.mrf.mxu0 }
 0x24f   :  { %16865 = vst [vmem:[#allocation56_spill] sm:$0xff] %v11307_v47 }
 0x250   :  { %v11309_v34 = vpop.f32.mrf.mxu2 }
 0x251   :  { %16866 = vst [vmem:[#allocation57_spill] sm:$0xff] %v11309_v34  ;;  %8335 = vmatmul.msk.bf16.vlgmr.msrb.gmra.mxu0 %vm1987_vm8, %v10545_v12  ;;  %v11326_v34 = vor.u32 %v8761_v0, %v8258_v60  ;;  %v11333_v36 = vpop.f32.mrf.mxu1  ;;  %v8270_v0 = vld [vmem:[%s16324_s3 + $0x1a4] sm:$0xf0] }
 0x253   :  { %16869 = vst [vmem:[#allocation60_spill] sm:$0xff] %v11326_v34 }
 0x255   :  { %2520 = vmatmul.bf16.gmra.mxu2 %v10810_v38 }
 0x256   :  { %v11320_v53 = vpop.f32.mrf.mxu0 }
 0x257   :  { %16867 = vst [vmem:[#allocation58_spill] sm:$0xff] %v11320_v53  ;;  %v8764_v53 = vld [vmem:[%s16324_s3 + $0x19c] sm:$0xf] }
 0x258   :  { %v11324_v47 = vpop.f32.mrf.mxu2 }
 0x259   :  { %16868 = vst [vmem:[#allocation59_spill] sm:$0xff] %v11324_v47 }
 0x25b   :  { %2253 = vmatmul.bf16.gmra.mxu1 %v11326_v34 }
 0x25e   :  { %v11329_v12 = vpop.f32.mrf.mxu0 }
 0x25f   :  { %16870 = vst [vmem:[#allocation61_spill] sm:$0xff] %v11329_v12  ;;  %v11350_v12 = vpop.f32.mrf.mxu1 }
 0x260   :  { %v11331_v38 = vpop.f32.mrf.mxu2 }
 0x261   :  { %16871 = vst [vmem:[#allocation62_spill] sm:$0xff] %v11331_v38  ;;  %8336 = vmatmul.msk.bf16.gmra.mxu0 %vm1987_vm8, %v10595_v4  ;;  %v11348_v38 = vor.u32 %v8764_v53, %v8270_v0  ;;  %v8767_v53 = vld [vmem:[%s16324_s3 + $0x1b4] sm:$0xf]  ;;  %v8282_v0 = vld [vmem:[%s16324_s3 + $0x1bc] sm:$0xf0] }
 0x265   :  { %2525 = vmatmul.bf16.gmra.mxu2 %v10837_v30 }
 0x266   :  { %v11344_v60 = vpop.f32.mrf.mxu0 }
 0x267   :  { %16872 = vst [vmem:[#allocation63_spill] sm:$0xff] %v11344_v60  ;;  %v11359_v34 = vpop.f32.mrf.mxu1 }
 0x268   :  { %v11346_v47 = vpop.f32.mrf.mxu2 }
 0x269   :  { %16873 = vst [vmem:[#allocation64_spill] sm:$0xff] %v11346_v47 }
 0x26b   :  { %2258 = vmatmul.bf16.gmra.mxu1 %v11348_v38 }
 0x26e   :  { %v11353_v4 = vpop.f32.mrf.mxu0 }
 0x26f   :  { %16874 = vst [vmem:[#allocation65_spill] sm:$0xff] %v11353_v4  ;;  %v11377_v60 = vpop.f32.mrf.mxu1 }
 0x270   :  { %v11355_v30 = vpop.f32.mrf.mxu2 }
 0x271   :  { %16875 = vst [vmem:[#allocation66_spill] sm:$0xff] %v11355_v30  ;;  %8337 = vmatmul.msk.bf16.gmra.mxu0 %vm1987_vm8, %v10627_v27  ;;  %v11372_v30 = vor.u32 %v8767_v53, %v8282_v0  ;;  %v8294_v53 = vld [vmem:[%s16324_s3 + $0x1d4] sm:$0xf0] }
 0x273   :  { %16878 = vst [vmem:[#allocation69_spill] sm:$0xff] %v11372_v30 }
 0x275   :  { %2530 = vmatmul.bf16.gmra.mxu2 %v10870_v59 }
 0x276   :  { %v11368_v47 = vpop.f32.mrf.mxu0 }
 0x277   :  { %16876 = vst [vmem:[#allocation67_spill] sm:$0xff] %v11368_v47  ;;  %v8770_v47 = vld [vmem:[%s16324_s3 + $0x1cc] sm:$0xf] }
 0x278   :  { %v11370_v4 = vpop.f32.mrf.mxu2 }
 0x279   :  { %16877 = vst [vmem:[#allocation68_spill] sm:$0xff] %v11370_v4 }
 0x27b   :  { %2263 = vmatmul.bf16.gmra.mxu1 %v11372_v30 }
 0x27e   :  { %v11375_v27 = vpop.f32.mrf.mxu0 }
 0x27f   :  { %16879 = vst [vmem:[#allocation70_spill] sm:$0xff] %v11375_v27  ;;  %v11394_v27 = vpop.f32.mrf.mxu1 }
 0x280   :  { %v11379_v59 = vpop.f32.mrf.mxu2 }
 0x281   :  { %16880 = vst [vmem:[#allocation71_spill] sm:$0xff] %v11379_v59  ;;  %8338 = vmatmul.msk.bf16.gmra.mxu0 %vm1987_vm8, %v10651_v13  ;;  %v11396_v59 = vor.u32 %v8770_v47, %v8294_v53  ;;  %v8306_v47 = vld [vmem:[%s16324_s3 + $0x1ec] sm:$0xf0] }
 0x283   :  { %16883 = vst [vmem:[#allocation74_spill] sm:$0xff] %v11396_v59 }
 0x285   :  { %2535 = vmatmul.bf16.gmra.mxu2 %v10903_v63 }
 0x286   :  { %v11390_v0 = vpop.f32.mrf.mxu0 }
 0x287   :  { %16881 = vst [vmem:[#allocation72_spill] sm:$0xff] %v11390_v0  ;;  %v11405_v30 = vpop.f32.mrf.mxu1 }
 0x288   :  { %v11392_v4 = vpop.f32.mrf.mxu2 }
 0x289   :  { %16882 = vst [vmem:[#allocation73_spill] sm:$0xff] %v11392_v4  ;;  %v8773_v4 = vld [vmem:[%s16324_s3 + $0x1e4] sm:$0xf] }
 0x28b   :  { %2268 = vmatmul.bf16.gmra.mxu1 %v11396_v59 }
 0x28e   :  { %v11399_v13 = vpop.f32.mrf.mxu0 }
 0x28f   :  { %16884 = vst [vmem:[#allocation75_spill] sm:$0xff] %v11399_v13  ;;  %v11420_v0 = vpop.f32.mrf.mxu1 }
 0x290   :  { %v11401_v63 = vpop.f32.mrf.mxu2 }
 0x291   :  { %16885 = vst [vmem:[#allocation76_spill] sm:$0xff] %v11401_v63  ;;  %8339 = vmatmul.msk.bf16.gmra.mxu0 %vm1987_vm8, %v10676_v54  ;;  %v11418_v63 = vor.u32 %v8773_v4, %v8306_v47 }
 0x295   :  { %2540 = vmatmul.bf16.gmra.mxu2 %v10936_v8 }
 0x296   :  { %v11414_v53 = vpop.f32.mrf.mxu0 }
 0x297   :  { %16886 = vst [vmem:[#allocation77_spill] sm:$0xff] %v11414_v53 }
 0x298   :  { %v11416_v13 = vpop.f32.mrf.mxu2 }
 0x299   :  { %16887 = vst [vmem:[#allocation78_spill] sm:$0xff] %v11416_v13 }
 0x29b   :  { %2273 = vmatmul.bf16.gmra.mxu1 %v11418_v63 }
 0x29e   :  { %v11423_v54 = vpop.f32.mrf.mxu0 }
 0x29f   :  { %16888 = vst [vmem:[#allocation79_spill] sm:$0xff] %v11423_v54 }
 0x2a0   :  { %v11425_v8 = vpop.f32.mrf.mxu2 }
 0x2a1   :  { %16889 = vst [vmem:[#allocation80_spill] sm:$0xff] %v11425_v8  ;;  %8340 = vmatmul.msk.bf16.gmra.mxu0 %vm1987_vm8, %v10729_v19  ;;  %v2402_v19 = vpop.f32.mrf.mxu3 }
 0x2a5   :  { %2545 = vmatmul.bf16.gmra.mxu2 %v10969_v6 }
 0x2a6   :  { %v11430_v59 = vpop.f32.mrf.mxu0 }
 0x2a7   :  { %16890 = vst [vmem:[#allocation81_spill] sm:$0xff] %v11430_v59 }
 0x2a8   :  { %v11432_v53 = vpop.f32.mrf.mxu2 }
 0x2a9   :  { %16891 = vst [vmem:[#allocation82_spill] sm:$0xff] %v11432_v53 }
 0x2ae   :  { %v11434_v13 = vpop.f32.mrf.mxu0 }
 0x2af   :  { %16892 = vst [vmem:[#allocation83_spill] sm:$0xff] %v11434_v13 }
 0x2b0   :  { %v11436_v4 = vpop.f32.mrf.mxu2 }
 0x2b1   :  { %16893 = vst [vmem:[#allocation84_spill] sm:$0xff] %v11436_v4  ;;  %8341 = vmatmul.msk.bf16.gmra.mxu0 %vm1987_vm8, %v10775_v45  ;;  %v2404_v4 = vpop.f32.mrf.mxu3  ;;  %2461 = vmatmul.bf16.gmra.mxu3 %v10978_v10 }
 0x2b5   :  { %2550 = vmatmul.bf16.gmra.mxu2 %v11005_v32 }
 0x2b6   :  { %v11441_v47 = vpop.f32.mrf.mxu0 }
 0x2b7   :  { %16894 = vst [vmem:[#allocation85_spill] sm:$0xff] %v11441_v47  ;;  %v2175_v47 = vadd.f32 %v11101_v56, %v10846_v57 }
 0x2b8   :  { %v11443_v8 = vpop.f32.mrf.mxu2 }
 0x2b9   :  { %16895 = vst [vmem:[#allocation86_spill] sm:$0xff] %v11443_v8  ;;  %v11458_v53 = vadd.f32 %v10835_v15, %v2175_v47 }
 0x2bb   :  { %v2903_v57 = vmul.f32 %v11458_v53, %v11458_v53 }
 0x2be   :  { %v11445_v54 = vpop.f32.mrf.mxu0 }
 0x2bf   :  { %16896 = vst [vmem:[#allocation87_spill] sm:$0xff] %v11445_v54  ;;  %v2407_v54 = vpop.f32.mrf.mxu3 }
 0x2c0   :  { %v11447_v6 = vpop.f32.mrf.mxu2 }
 0x2c1   :  { %16897 = vst [vmem:[#allocation88_spill] sm:$0xff] %v11447_v6  ;;  %8342 = vmatmul.msk.bf16.gmra.mxu0 %vm1987_vm8, %v10800_v35 }
 0x2c5   :  { %2555 = vmatmul.bf16.gmra.mxu2 %v11041_v14  ;;  %v2177_v14 = vadd.f32 %v11123_v29, %v10866_v2 }
 0x2c6   :  { %v11453_v45 = vpop.f32.mrf.mxu0 }
 0x2c7   :  { %16898 = vst [vmem:[#allocation89_spill] sm:$0xff] %v11453_v45  ;;  %v11473_v47 = vadd.f32 %v10854_v52, %v2177_v14  ;;  %v2409_v2 = vpop.f32.mrf.mxu3  ;;  %2466 = vmatmul.bf16.gmra.mxu3 %v11014_v50 }
 0x2c8   :  { %v2516_v32 = vpop.f32.mrf.mxu2 }
 0x2c9   :  { %v2517_v8 = vadd.f32 %v2516_v32, %v2402_v19  ;;  %v2905_v52 = vmul.f32 %v11473_v47, %v11473_v47 }
 0x2ce   :  { %v2630_v6 = vpop.f32.mrf.mxu0 }
 0x2cf   :  { %v11460_v13 = vadd.f32 %v2630_v6, %v2517_v8  ;;  %v2180_v6 = vadd.f32 %v11151_v39, %v10879_v62  ;;  %v2412_v14 = vpop.f32.mrf.mxu3 }
 0x2d0   :  { %v2518_v35 = vpop.f32.mrf.mxu2 }
 0x2d1   :  { %8343 = vmatmul.msk.bf16.gmra.mxu0 %vm1987_vm8, %v10825_v49  ;;  %v2735_v10 = vadd.f32 %v11460_v13, %v11458_v53  ;;  %v2904_v15 = vmul.f32 %v11460_v13, %v11460_v13  ;;  %v2519_v56 = vadd.f32 %v2518_v35, %v2404_v4  ;;  %v11488_v50 = vadd.f32 %v10868_v58, %v2180_v6 }
 0x2d2   :  { %v2182_v58 = vadd.f32 %v11176_v43, %v10899_v26  ;;  %v2185_v26 = vadd.f32 %v11201_v22, %v10912_v7 }
 0x2d3   :  { %2736 = vadd.xlane.f32.xlu0 %v2735_v10  ;;  %v2987_v8 = vadd.f32 %v2904_v15, %v2903_v57  ;;  %v2907_v15 = vmul.f32 %v11488_v50, %v11488_v50 }
 0x2d5   :  { %2988 = vadd.xlane.f32.xlu2 %v2987_v8  ;;  %2560 = vmatmul.bf16.gmra.mxu2 %v11077_v31 }
 0x2d6   :  { %v2632_v49 = vpop.f32.mrf.mxu0 }
 0x2d7   :  { %v11477_v29 = vadd.f32 %v2632_v49, %v2519_v56  ;;  %v2414_v49 = vpop.f32.mrf.mxu3  ;;  %2471 = vmatmul.bf16.gmra.mxu3 %v11050_v61  ;;  %v11516_v61 = vadd.f32 %v10901_v1, %v2185_v26  ;;  %v2192_v26 = vadd.f32 %v11271_v41, %v10965_v24  ;;  %v11571_v41 = vpop.permute.xlu2 %4254 }
 0x2d8   :  { %v2521_v19 = vpop.f32.mrf.mxu2 }
 0x2d9   :  { %v2738_v4 = vadd.f32 %v11477_v29, %v11473_v47  ;;  %v2906_v32 = vmul.f32 %v11477_v29, %v11477_v29  ;;  %v2522_v31 = vadd.f32 %v2521_v19, %v2407_v54  ;;  %v11505_v19 = vadd.f32 %v10887_v9, %v2182_v58 }
 0x2da   :  { %v2190_v58 = vadd.f32 %v11252_v17, %v10945_v37 }
 0x2db   :  { %2739 = vadd.xlane.f32.xlu1 %v2738_v4  ;;  %v2990_v35 = vadd.f32 %v2906_v32, %v2905_v52 }
 0x2dd   :  { %2991 = vadd.xlane.f32.xlu0 %v2990_v35 }
 0x2de   :  { %v2635_v10 = vpop.f32.mrf.mxu0 }
 0x2df   :  { %v11490_v57 = vadd.f32 %v2635_v10, %v2522_v31  ;;  %v2909_v31 = vmul.f32 %v11505_v19, %v11505_v19 }
 0x2e0   :  { %v2523_v62 = vpop.f32.mrf.mxu2 }
 0x2e1   :  { %8344 = vmatmul.msk.bf16.gmra.mxu0 %vm1987_vm8, %v10856_v51  ;;  %v2741_v39 = vadd.f32 %v11490_v57, %v11488_v50  ;;  %v2908_v54 = vmul.f32 %v11490_v57, %v11490_v57  ;;  %v2524_v56 = vadd.f32 %v2523_v62, %v2409_v2  ;;  %v2417_v2 = vpop.f32.mrf.mxu3 }
 0x2e3   :  { %2742 = vadd.xlane.f32.xlu2 %v2741_v39  ;;  %v2993_v8 = vadd.f32 %v2908_v54, %v2907_v15 }
 0x2e5   :  { %2994 = vadd.xlane.f32.xlu1 %v2993_v8  ;;  %2565 = vmatmul.bf16.gmra.mxu2 %v11115_v25 }
 0x2e6   :  { %v2637_v51 = vpop.f32.mrf.mxu0 }
 0x2e7   :  { %v11507_v6 = vadd.f32 %v2637_v51, %v2524_v56 }
 0x2e8   :  { %v2526_v4 = vpop.f32.mrf.mxu2 }
 0x2e9   :  { %v2744_v52 = vadd.f32 %v11507_v6, %v11505_v19  ;;  %v2527_v43 = vadd.f32 %v2526_v4, %v2412_v14  ;;  %v2910_v25 = vmul.f32 %v11507_v6, %v11507_v6  ;;  %v2187_v14 = vadd.f32 %v11219_v44, %v10932_v42  ;;  %v2419_v62 = vpop.f32.mrf.mxu3  ;;  %2476 = vmatmul.bf16.gmra.mxu3 %v11086_v55 }
 0x2ea   :  { %v2911_v42 = vmul.f32 %v11516_v61, %v11516_v61 }
 0x2eb   :  { %2745 = vadd.xlane.f32.xlu2 %v2744_v52  ;;  %v2996_v7 = vadd.f32 %v2910_v25, %v2909_v31 }
 0x2ee   :  { %v2640_v32 = vpop.f32.mrf.mxu0 }
 0x2ef   :  { %v11518_v9 = vadd.f32 %v2640_v32, %v2527_v43 }
 0x2f0   :  { %v2528_v35 = vpop.f32.mrf.mxu2 }
 0x2f1   :  { %8345 = vmatmul.msk.bf16.gmra.mxu0 %vm1987_vm8, %v10889_v40  ;;  %v2747_v22 = vadd.f32 %v11518_v9, %v11516_v61  ;;  %v2529_v1 = vadd.f32 %v2528_v35, %v2414_v49  ;;  %v2912_v10 = vmul.f32 %v11518_v9, %v11518_v9  ;;  %v11533_v40 = vadd.f32 %v10920_v20, %v2187_v14  ;;  %v2422_v55 = vpop.f32.mrf.mxu3  ;;  %v11573_v35 = vpop.permute.xlu1 %4259 }
 0x2f2   :  { %v11546_v49 = vadd.f32 %v10934_v3, %v2190_v58 }
 0x2f3   :  { %2997 = vadd.xlane.f32.xlu2 %v2996_v7  ;;  %2748 = vadd.xlane.f32.xlu0 %v2747_v22  ;;  %v2913_v4 = vmul.f32 %v11533_v40, %v11533_v40 }
 0x2f4   :  { %16899 = vst [vmem:[#allocation90_spill] sm:$0xff] %v11546_v49  ;;  %v2915_v24 = vmul.f32 %v11546_v49, %v11546_v49 }
 0x2f5   :  { %2570 = vmatmul.bf16.gmra.mxu2 %v11155_v11  ;;  %v2999_v11 = vadd.f32 %v2912_v10, %v2911_v42 }
 0x2f6   :  { %v2642_v39 = vpop.f32.mrf.mxu0 }
 0x2f7   :  { %v11535_v15 = vadd.f32 %v2642_v39, %v2529_v1 }
 0x2f8   :  { %v2531_v44 = vpop.f32.mrf.mxu2 }
 0x2f9   :  { %v2750_v54 = vadd.f32 %v11535_v15, %v11533_v40  ;;  %v2532_v56 = vadd.f32 %v2531_v44, %v2417_v2  ;;  %v2914_v20 = vmul.f32 %v11535_v15, %v11535_v15  ;;  %v2424_v25 = vpop.f32.mrf.mxu3  ;;  %v11561_v2 = vpop.permute.xlu0 %4249  ;;  %2481 = vmatmul.bf16.gmra.mxu3 %v11126_v48  ;;  %v2195_v48 = vadd.f32 %v11289_v28, %v10980_v21  ;;  %v16906_v21 = vld [vmem:[#allocation5_spill] sm:$0xff] }
 0x2fb   :  { %2751 = vadd.xlane.f32.xlu1 %v2750_v54  ;;  %3000 = vadd.xlane.f32.xlu0 %v2999_v11  ;;  %v3002_v37 = vadd.f32 %v2914_v20, %v2913_v4  ;;  %v11596_v20 = vpop.permute.xlu1 %4274 }
 0x2fe   :  { %v2645_v8 = vpop.f32.mrf.mxu0 }
 0x2ff   :  { %v11548_v51 = vadd.f32 %v2645_v8, %v2532_v56  ;;  %v11594_v56 = vpop.permute.xlu2 %4269 }
 0x300   :  { %v2533_v52 = vpop.f32.mrf.mxu2 }
 0x301   :  { %16900 = vst [vmem:[#allocation91_spill] sm:$0xff] %v11548_v51  ;;  %8346 = vmatmul.msk.bf16.gmra.mxu0 %vm1987_vm8, %v10922_v46  ;;  %v2753_v17 = vadd.f32 %v11548_v51, %v11546_v49  ;;  %v2534_v3 = vadd.f32 %v2533_v52, %v2419_v62  ;;  %v2916_v43 = vmul.f32 %v11548_v51, %v11548_v51  ;;  %v2427_v1 = vpop.f32.mrf.mxu3  ;;  %v16903_v62 = vld [vmem:[#allocation6_spill] sm:$0xff]  ;;  %v11588_v54 = vpop.permute.xlu0 %4264  ;;  %v16908_v52 = vld [vmem:[#allocation43_spill] sm:$0xff] }
 0x302   :  { %v11565_v46 = vadd.f32 %v10953_v18, %v2192_v26  ;;  %v11582_v39 = vadd.f32 %v16903_v62, %v2195_v48  ;;  %v16914_v48 = vld [vmem:[#allocation11_spill] sm:$0xff] }
 0x303   :  { %3003 = vadd.xlane.f32.xlu1 %v3002_v37  ;;  %2754 = vadd.xlane.f32.xlu2 %v2753_v17  ;;  %v3005_v7 = vadd.f32 %v2916_v43, %v2915_v24  ;;  %v16910_v43 = vld [vmem:[#allocation7_spill] sm:$0xff]  ;;  %v11619_v62 = vpop.permute.xlu1 %4319 }
 0x304   :  { %16901 = vst [vmem:[#allocation92_spill] sm:$0xff] %v11565_v46  ;;  %v2917_v44 = vmul.f32 %v11565_v46, %v11565_v46  ;;  %v16966_v49 = vld [vmem:[#allocation27_spill] sm:$0xff] }
 0x305   :  { %2575 = vmatmul.bf16.gmra.mxu2 %v11193_v5  ;;  %16904 = vst [vmem:[#allocation6_spill] sm:$0xff] %v11582_v39 }
 0x306   :  { %v2647_v32 = vpop.f32.mrf.mxu0  ;;  %16916 = vst [vmem:[#allocation7_spill] sm:$0xff] %v11619_v62 }
 0x307   :  { %v11567_v31 = vadd.f32 %v2647_v32, %v2534_v3  ;;  %v16909_v3 = vld [vmem:[#allocation31_spill] sm:$0xff] }
 0x308   :  { %v2536_v5 = vpop.f32.mrf.mxu2 }
 0x309   :  { %16902 = vst [vmem:[#allocation93_spill] sm:$0xff] %v11567_v31  ;;  %v2756_v22 = vadd.f32 %v11567_v31, %v11565_v46  ;;  %v2537_v18 = vadd.f32 %v2536_v5, %v2422_v55  ;;  %v2918_v14 = vmul.f32 %v11567_v31, %v11567_v31  ;;  %v16907_v55 = vld [vmem:[#allocation9_spill] sm:$0xff]  ;;  %v2429_v17 = vpop.f32.mrf.mxu3  ;;  %2486 = vmatmul.bf16.gmra.mxu3 %v16909_v3 }
 0x30a   :  { %v2197_v8 = vadd.f32 %v11304_v16, %v16907_v55  ;;  %v2919_v16 = vmul.f32 %v11582_v39, %v11582_v39 }
 0x30b   :  { %3006 = vadd.xlane.f32.xlu2 %v3005_v7  ;;  %2757 = vadd.xlane.f32.xlu0 %v2756_v22  ;;  %v3008_v58 = vadd.f32 %v2918_v14, %v2917_v44  ;;  %v11613_v22 = vpop.permute.xlu0 %4399 }
 0x30c   :  { %v11605_v32 = vadd.f32 %v16910_v43, %v2197_v8  ;;  %16913 = vst [vmem:[#allocation43_spill] sm:$0xff] %v11613_v22 }
 0x30e   :  { %v2650_v10 = vpop.f32.mrf.mxu0  ;;  %16911 = vst [vmem:[#allocation5_spill] sm:$0xff] %v11605_v32 }
 0x30f   :  { %v11584_v42 = vadd.f32 %v2650_v10, %v2537_v18  ;;  %v2200_v18 = vadd.f32 %v11322_v23, %v16914_v48  ;;  %v11617_v10 = vpop.permute.xlu2 %4404  ;;  %v2921_v23 = vmul.f32 %v11605_v32, %v11605_v32 }
 0x310   :  { %v2538_v11 = vpop.f32.mrf.mxu2  ;;  %16915 = vst [vmem:[#allocation31_spill] sm:$0xff] %v11617_v10 }
 0x311   :  { %16905 = vst [vmem:[#allocation94_spill] sm:$0xff] %v11584_v42  ;;  %8347 = vmatmul.msk.bf16.gmra.mxu0 %vm1987_vm8, %v16906_v21  ;;  %v2759_v28 = vadd.f32 %v11584_v42, %v11582_v39  ;;  %v2539_v4 = vadd.f32 %v2538_v11, %v2424_v25  ;;  %v2920_v37 = vmul.f32 %v11584_v42, %v11584_v42  ;;  %v2432_v11 = vpop.f32.mrf.mxu3  ;;  %v16961_v39 = vld [vmem:[#allocation25_spill] sm:$0xff] }
 0x313   :  { %2760 = vadd.xlane.f32.xlu1 %v2759_v28  ;;  %3009 = vadd.xlane.f32.xlu0 %v3008_v58  ;;  %v3011_v7 = vadd.f32 %v2920_v37, %v2919_v16  ;;  %v16917_v28 = vld [vmem:[#allocation10_spill] sm:$0xff]  ;;  %v11636_v43 = vpop.permute.xlu0 %4324 }
 0x314   :  { %v11624_v58 = vadd.f32 %v16917_v28, %v2200_v18  ;;  %v16921_v37 = vld [vmem:[#allocation14_spill] sm:$0xff]  ;;  %v11644_v18 = vpop.permute.xlu1 %4394 }
 0x315   :  { %2580 = vmatmul.bf16.gmra.mxu2 %v16908_v52 }
 0x316   :  { %v2652_v26 = vpop.f32.mrf.mxu0  ;;  %16918 = vst [vmem:[#allocation11_spill] sm:$0xff] %v11624_v58 }
 0x317   :  { %v11607_v24 = vadd.f32 %v2652_v26, %v2539_v4  ;;  %v16920_v4 = vld [vmem:[#allocation8_spill] sm:$0xff]  ;;  %v2202_v26 = vadd.f32 %v11333_v36, %v16921_v37  ;;  %v11642_v48 = vpop.permute.xlu2 %4389 }
 0x318   :  { %v2541_v5 = vpop.f32.mrf.mxu2  ;;  %16922 = vst [vmem:[#allocation8_spill] sm:$0xff] %v11636_v43 }
 0x319   :  { %16912 = vst [vmem:[#allocation9_spill] sm:$0xff] %v11607_v24  ;;  %v2762_v25 = vadd.f32 %v11607_v24, %v11605_v32  ;;  %v2542_v14 = vadd.f32 %v2541_v5, %v2427_v1  ;;  %v2922_v44 = vmul.f32 %v11607_v24, %v11607_v24  ;;  %v2434_v5 = vpop.f32.mrf.mxu3  ;;  %v16950_v24 = vld [vmem:[#allocation18_spill] sm:$0xff] }
 0x31a   :  { %16924 = vst [vmem:[#allocation14_spill] sm:$0xff] %v11642_v48 }
 0x31b   :  { %3012 = vadd.xlane.f32.xlu1 %v3011_v7  ;;  %2763 = vadd.xlane.f32.xlu2 %v2762_v25  ;;  %v3014_v1 = vadd.f32 %v2922_v44, %v2921_v23  ;;  %v16923_v25 = vld [vmem:[#allocation37_spill] sm:$0xff]  ;;  %v16929_v23 = vld [vmem:[#allocation16_spill] sm:$0xff]  ;;  %v11659_v37 = vpop.permute.xlu0 %4309 }
 0x31c   :  { %2491 = vmatmul.bf16.gmra.mxu3 %v16923_v25  ;;  %16925 = vst [vmem:[#allocation37_spill] sm:$0xff] %v11644_v18 }
 0x31d   :  { %16930 = vst [vmem:[#allocation16_spill] sm:$0xff] %v11659_v37 }
 0x31e   :  { %v2655_v21 = vpop.f32.mrf.mxu0 }
 0x31f   :  { %v11626_v55 = vadd.f32 %v2655_v21, %v2542_v14  ;;  %v16926_v14 = vld [vmem:[#allocation12_spill] sm:$0xff] }
 0x320   :  { %v2543_v8 = vpop.f32.mrf.mxu2  ;;  %v11647_v36 = vadd.f32 %v16926_v14, %v2202_v26 }
 0x321   :  { %16919 = vst [vmem:[#allocation10_spill] sm:$0xff] %v11626_v55  ;;  %8348 = vmatmul.msk.bf16.gmra.mxu0 %vm1987_vm8, %v16920_v4  ;;  %v2765_v52 = vadd.f32 %v11626_v55, %v11624_v58  ;;  %v2544_v3 = vadd.f32 %v2543_v8, %v2429_v17  ;;  %v2924_v16 = vmul.f32 %v11626_v55, %v11626_v55 }
 0x322   :  { %16927 = vst [vmem:[#allocation12_spill] sm:$0xff] %v11647_v36  ;;  %v2923_v17 = vmul.f32 %v11624_v58, %v11624_v58  ;;  %v2205_v8 = vadd.f32 %v11350_v12, %v16929_v23  ;;  %v11668_v12 = vpop.permute.xlu2 %4314  ;;  %v17010_v58 = vld [vmem:[#allocation49_spill] sm:$0xff] }
 0x323   :  { %3015 = vadd.xlane.f32.xlu2 %v3014_v1  ;;  %2766 = vadd.xlane.f32.xlu0 %v2765_v52  ;;  %v2437_v52 = vpop.f32.mrf.mxu3  ;;  %16934 = vst [vmem:[#allocation97_spill] sm:$0xff] %v11668_v12 }
 0x324   :  { %v3017_v28 = vadd.f32 %v2924_v16, %v2923_v17  ;;  %v2925_v16 = vmul.f32 %v11647_v36, %v11647_v36  ;;  %v11670_v17 = vpop.permute.xlu1 %4379 }
 0x325   :  { %2585 = vmatmul.bf16.gmra.mxu2 %v11273_v33  ;;  %16935 = vst [vmem:[#allocation98_spill] sm:$0xff] %v11670_v17  ;;  %v16939_v17 = vld [vmem:[#allocation44_spill] sm:$0xff] }
 0x326   :  { %v2657_v7 = vpop.f32.mrf.mxu0 }
 0x327   :  { %v11649_v44 = vadd.f32 %v2657_v7, %v2544_v3  ;;  %v16931_v3 = vld [vmem:[#allocation15_spill] sm:$0xff] }
 0x328   :  { %v2546_v33 = vpop.f32.mrf.mxu2  ;;  %v11662_v7 = vadd.f32 %v16931_v3, %v2205_v8 }
 0x329   :  { %16928 = vst [vmem:[#allocation95_spill] sm:$0xff] %v11649_v44  ;;  %v2768_v21 = vadd.f32 %v11649_v44, %v11647_v36  ;;  %v2547_v4 = vadd.f32 %v2546_v33, %v2432_v11  ;;  %v2926_v1 = vmul.f32 %v11649_v44, %v11649_v44  ;;  %v16936_v11 = vld [vmem:[#allocation13_spill] sm:$0xff] }
 0x32a   :  { %16932 = vst [vmem:[#allocation15_spill] sm:$0xff] %v11662_v7 }
 0x32b   :  { %2769 = vadd.xlane.f32.xlu1 %v2768_v21  ;;  %3018 = vadd.xlane.f32.xlu0 %v3017_v28  ;;  %v3020_v33 = vadd.f32 %v2926_v1, %v2925_v16  ;;  %v16937_v28 = vld [vmem:[#allocation19_spill] sm:$0xff]  ;;  %v2439_v3 = vpop.f32.mrf.mxu3 }
 0x32c   :  { %v2207_v23 = vadd.f32 %v11359_v34, %v16937_v28  ;;  %2496 = vmatmul.bf16.gmra.mxu3 %v16939_v17  ;;  %v2927_v34 = vmul.f32 %v11662_v7, %v11662_v7  ;;  %v11693_v28 = vpop.permute.xlu2 %4299  ;;  %v16946_v17 = vld [vmem:[#allocation21_spill] sm:$0xff] }
 0x32d   :  { %16944 = vst [vmem:[#allocation44_spill] sm:$0xff] %v11693_v28 }
 0x32e   :  { %v2660_v26 = vpop.f32.mrf.mxu0 }
 0x32f   :  { %v11664_v25 = vadd.f32 %v2660_v26, %v2547_v4  ;;  %v16938_v4 = vld [vmem:[#allocation55_spill] sm:$0xff] }
 0x330   :  { %v2548_v14 = vpop.f32.mrf.mxu2 }
 0x331   :  { %16933 = vst [vmem:[#allocation96_spill] sm:$0xff] %v11664_v25  ;;  %8349 = vmatmul.msk.bf16.gmra.mxu0 %vm1987_vm8, %v16936_v11  ;;  %v2771_v21 = vadd.f32 %v11664_v25, %v11662_v7  ;;  %v2549_v8 = vadd.f32 %v2548_v14, %v2434_v5  ;;  %v2928_v26 = vmul.f32 %v11664_v25, %v11664_v25  ;;  %v16940_v11 = vld [vmem:[#allocation17_spill] sm:$0xff] }
 0x332   :  { %v11683_v1 = vadd.f32 %v16940_v11, %v2207_v23  ;;  %v2210_v23 = vadd.f32 %v11377_v60, %v16946_v17 }
 0x333   :  { %3021 = vadd.xlane.f32.xlu1 %v3020_v33  ;;  %2772 = vadd.xlane.f32.xlu2 %v2771_v21  ;;  %v11689_v33 = vpop.permute.xlu0 %4384  ;;  %v3023_v14 = vadd.f32 %v2928_v26, %v2927_v34  ;;  %v2442_v11 = vpop.f32.mrf.mxu3 }
 0x334   :  { %16941 = vst [vmem:[#allocation13_spill] sm:$0xff] %v11683_v1  ;;  %v2929_v10 = vmul.f32 %v11683_v1, %v11683_v1 }
 0x335   :  { %2590 = vmatmul.bf16.gmra.mxu2 %v16938_v4  ;;  %16943 = vst [vmem:[#allocation55_spill] sm:$0xff] %v11689_v33  ;;  %v11695_v4 = vpop.permute.xlu1 %4304  ;;  %v16947_v33 = vld [vmem:[#allocation20_spill] sm:$0xff] }
 0x336   :  { %v2662_v18 = vpop.f32.mrf.mxu0  ;;  %16945 = vst [vmem:[#allocation17_spill] sm:$0xff] %v11695_v4  ;;  %v11702_v26 = vadd.f32 %v16947_v33, %v2210_v23  ;;  %v11716_v33 = vpop.permute.xlu2 %4374  ;;  %v16955_v23 = vld [vmem:[#allocation60_spill] sm:$0xff] }
 0x337   :  { %v11685_v16 = vadd.f32 %v2662_v18, %v2549_v8 }
 0x338   :  { %v2551_v5 = vpop.f32.mrf.mxu2  ;;  %16948 = vst [vmem:[#allocation21_spill] sm:$0xff] %v11702_v26 }
 0x339   :  { %16942 = vst [vmem:[#allocation19_spill] sm:$0xff] %v11685_v16  ;;  %v2774_v21 = vadd.f32 %v11685_v16, %v11683_v1  ;;  %v2552_v18 = vadd.f32 %v2551_v5, %v2437_v52  ;;  %v2930_v8 = vmul.f32 %v11685_v16, %v11685_v16 }
 0x33b   :  { %3024 = vadd.xlane.f32.xlu2 %v3023_v14  ;;  %2775 = vadd.xlane.f32.xlu0 %v2774_v21  ;;  %v3026_v52 = vadd.f32 %v2930_v8, %v2929_v10  ;;  %v11712_v5 = vpop.permute.xlu0 %4369  ;;  %v16952_v14 = vld [vmem:[#allocation24_spill] sm:$0xff]  ;;  %v2444_v42 = vpop.f32.mrf.mxu3  ;;  %v16956_v10 = vld [vmem:[#allocation50_spill] sm:$0xff] }
 0x33c   :  { %16951 = vst [vmem:[#allocation18_spill] sm:$0xff] %v11712_v5  ;;  %v2212_v21 = vadd.f32 %v11394_v27, %v16952_v14  ;;  %2501 = vmatmul.bf16.gmra.mxu3 %v16956_v10  ;;  %v16957_v8 = vld [vmem:[#allocation22_spill] sm:$0xff] }
 0x33d   :  { %16953 = vst [vmem:[#allocation24_spill] sm:$0xff] %v11716_v33  ;;  %v11718_v17 = vpop.permute.xlu1 %4289 }
 0x33e   :  { %v2665_v48 = vpop.f32.mrf.mxu0  ;;  %16954 = vst [vmem:[#allocation99_spill] sm:$0xff] %v11718_v17  ;;  %v11725_v5 = vadd.f32 %v16957_v8, %v2212_v21 }
 0x33f   :  { %v11704_v34 = vadd.f32 %v2665_v48, %v2552_v18 }
 0x340   :  { %v2553_v22 = vpop.f32.mrf.mxu2  ;;  %16958 = vst [vmem:[#allocation60_spill] sm:$0xff] %v11725_v5  ;;  %v2933_v32 = vmul.f32 %v11725_v5, %v11725_v5 }
 0x341   :  { %16949 = vst [vmem:[#allocation20_spill] sm:$0xff] %v11704_v34  ;;  %8350 = vmatmul.msk.bf16.gmra.mxu0 %vm1987_vm8, %v16950_v24  ;;  %v2777_v60 = vadd.f32 %v11704_v34, %v11702_v26  ;;  %v2554_v48 = vadd.f32 %v2553_v22, %v2439_v3  ;;  %v2932_v24 = vmul.f32 %v11704_v34, %v11704_v34 }
 0x342   :  { %v2931_v22 = vmul.f32 %v11702_v26, %v11702_v26  ;;  %v16980_v26 = vld [vmem:[#allocation36_spill] sm:$0xff] }
 0x343   :  { %2778 = vadd.xlane.f32.xlu1 %v2777_v60  ;;  %3027 = vadd.xlane.f32.xlu0 %v3026_v52  ;;  %v2447_v51 = vpop.f32.mrf.mxu3 }
 0x344   :  { %v3029_v60 = vadd.f32 %v2932_v24, %v2931_v22 }
 0x345   :  { %2595 = vmatmul.bf16.gmra.mxu2 %v16955_v23  ;;  %v16960_v23 = vld [vmem:[#allocation26_spill] sm:$0xff] }
 0x346   :  { %v2667_v18 = vpop.f32.mrf.mxu0  ;;  %v2737_v14 = vpop.xlane.xlu0 %2736  ;;  %v2215_v33 = vadd.f32 %v11405_v30, %v16960_v23  ;;  %v16965_v23 = vld [vmem:[#allocation29_spill] sm:$0xff] }
 0x347   :  { %v11727_v27 = vadd.f32 %v2667_v18, %v2554_v48  ;;  %v11735_v17 = vmul.f32 0.0051020407, %v2737_v14 }
 0x348   :  { %v2556_v3 = vpop.f32.mrf.mxu2  ;;  %v2989_v21 = vpop.xlane.xlu2 %2988  ;;  %v11740_v24 = vadd.f32 %v16961_v39, %v2215_v33 }
 0x349   :  { %16959 = vst [vmem:[#allocation50_spill] sm:$0xff] %v11727_v27  ;;  %v2780_v52 = vadd.f32 %v11727_v27, %v11725_v5  ;;  %v2557_v10 = vadd.f32 %v2556_v3, %v2442_v11  ;;  %v2934_v48 = vmul.f32 %v11727_v27, %v11727_v27  ;;  %v3113_v30 = vmul.f32 0.0051020407, %v2989_v21 }
 0x34a   :  { %16962 = vst [vmem:[#allocation22_spill] sm:$0xff] %v11740_v24  ;;  %v3155_v11 = vmul.f32 %v11735_v17, %v11735_v17 }
 0x34b   :  { %3030 = vadd.xlane.f32.xlu1 %v3029_v60  ;;  %2781 = vadd.xlane.f32.xlu2 %v2780_v52  ;;  %v16964_v52 = vld [vmem:[#allocation23_spill] sm:$0xff]  ;;  %v3032_v14 = vadd.f32 %v2934_v48, %v2933_v32 }
 0x34c   :  { %v3197_v31 = vsub.f32 %v3113_v30, %v3155_v11 }
 0x34e   :  { %v2670_v18 = vpop.f32.mrf.mxu0  ;;  %v2740_v8 = vpop.xlane.xlu1 %2739 }
 0x34f   :  { %v11742_v22 = vadd.f32 %v2670_v18, %v2557_v10  ;;  %v11748_v3 = vmul.f32 0.0051020407, %v2740_v8  ;;  %v2217_v10 = vadd.f32 %v11420_v0, %v16965_v23  ;;  %v2219_v18 = vpop.f32.mrf.mxu1 }
 0x350   :  { %v2558_v60 = vpop.f32.mrf.mxu2  ;;  %v2992_v33 = vpop.xlane.xlu0 %2991 }
 0x351   :  { %16963 = vst [vmem:[#allocation26_spill] sm:$0xff] %v11742_v22  ;;  %8351 = vmatmul.msk.bf16.gmra.mxu0 %vm1987_vm8, %v16964_v52  ;;  %v2783_v39 = vadd.f32 %v11742_v22, %v11740_v24  ;;  %v2559_v21 = vadd.f32 %v2558_v60, %v2444_v42  ;;  %v3156_v8 = vmul.f32 %v11748_v3, %v11748_v3  ;;  %v3114_v46 = vmul.f32 0.0051020407, %v2992_v33 }
 0x352   :  { %v2936_v32 = vmul.f32 %v11742_v22, %v11742_v22  ;;  %v11762_v45 = vadd.f32 %v16966_v49, %v2217_v10  ;;  %v2935_v42 = vmul.f32 %v11740_v24, %v11740_v24  ;;  %v3239_v60 = vmax.f32 %v3197_v31, 0.0 }
 0x353   :  { %3033 = vadd.xlane.f32.xlu2 %v3032_v14  ;;  %2784 = vadd.xlane.f32.xlu0 %v2783_v39  ;;  %v3198_v11 = vsub.f32 %v3114_v46, %v3156_v8  ;;  %v16969_v39 = vld [vmem:[#allocation32_spill] sm:$0xff]  ;;  %v16970_v8 = vld [vmem:[#allocation30_spill] sm:$0xff] }
 0x354   :  { %16967 = vst [vmem:[#allocation25_spill] sm:$0xff] %v11762_v45  ;;  %v2220_v33 = vadd.f32 %v2219_v18, %v16969_v39  ;;  %v11771_v49 = vadd.f32 1e-05, %v3239_v60  ;;  %v2449_v18 = vpop.f32.mrf.mxu3 }
 0x355   :  { %2600 = vmatmul.bf16.gmra.mxu2 %v11348_v38  ;;  %v3035_v38 = vadd.f32 %v2936_v32, %v2935_v42  ;;  %v3240_v10 = vmax.f32 %v3198_v11, 0.0  ;;  %v16973_v11 = vld [vmem:[#allocation28_spill] sm:$0xff] }
 0x356   :  { %v2672_v48 = vpop.f32.mrf.mxu0  ;;  %v2743_v52 = vpop.xlane.xlu2 %2742  ;;  %v11778_v24 = vadd.f32 %v16970_v8, %v2220_v33  ;;  %9015 = vrsqrt.f32 %v11771_v49  ;;  %v16974_v33 = vld [vmem:[#allocation35_spill] sm:$0xff]  ;;  %vm3413_vm14 = vweird.f32 %v11771_v49 }
 0x357   :  { %v11764_v0 = vadd.f32 %v2672_v48, %v2559_v21  ;;  %v2221_v22 = vpop.f32.mrf.mxu1  ;;  %v11775_v48 = vmul.f32 0.0051020407, %v2743_v52  ;;  %v11785_v60 = vadd.f32 1e-05, %v3240_v10  ;;  %v16975_v10 = vld [vmem:[#allocation69_spill] sm:$0xff] }
 0x358   :  { %v2561_v30 = vpop.f32.mrf.mxu2  ;;  %16971 = vst [vmem:[#allocation29_spill] sm:$0xff] %v11778_v24  ;;  %v2995_v32 = vpop.xlane.xlu1 %2994 }
 0x359   :  { %16968 = vst [vmem:[#allocation23_spill] sm:$0xff] %v11764_v0  ;;  %v2786_v14 = vadd.f32 %v11764_v0, %v11762_v45  ;;  %v2562_v23 = vadd.f32 %v2561_v30, %v2447_v51  ;;  %v2938_v21 = vmul.f32 %v11764_v0, %v11764_v0  ;;  %v2937_v51 = vmul.f32 %v11762_v45, %v11762_v45 }
 0x35a   :  { %v3157_v39 = vmul.f32 %v11775_v48, %v11775_v48  ;;  %9017 = vrsqrt.f32 %v11785_v60  ;;  %v2939_v0 = vmul.f32 %v11778_v24, %v11778_v24  ;;  %vm3423_vm13 = vweird.f32 %v11785_v60 }
 0x35b   :  { %2787 = vadd.xlane.f32.xlu1 %v2786_v14  ;;  %3036 = vadd.xlane.f32.xlu0 %v3035_v38  ;;  %v3038_v52 = vadd.f32 %v2938_v21, %v2937_v51  ;;  %v3115_v38 = vmul.f32 0.0051020407, %v2995_v32 }
 0x35c   :  { %v11802_v45 = vpop.eup %9015  ;;  %v2452_v62 = vpop.f32.mrf.mxu3 }
 0x35d   :  { %v3199_v51 = vsub.f32 %v3115_v38, %v3157_v39  ;;  %vm3414_vm9 = vweird.f32 %v11802_v45 }
 0x35e   :  { %v2675_v31 = vpop.f32.mrf.mxu0  ;;  %v2746_v46 = vpop.xlane.xlu2 %2745  ;;  %vm3415_vm10 = vmor %vm3413_vm14, %vm3414_vm9 }
 0x35f   :  { %v11780_v42 = vadd.f32 %v2675_v31, %v2562_v23  ;;  %v2222_v23 = vadd.f32 %v2221_v22, %v16974_v33  ;;  %v11794_v31 = vmul.f32 0.0051020407, %v2746_v46  ;;  %v16976_v22 = vld [vmem:[#allocation33_spill] sm:$0xff] }
 0x360   :  { %v2563_v30 = vpop.f32.mrf.mxu2 }
 0x361   :  { %16972 = vst [vmem:[#allocation27_spill] sm:$0xff] %v11780_v42  ;;  %8352 = vmatmul.msk.bf16.gmra.mxu0 %vm1987_vm8, %v16973_v11  ;;  %v2789_v14 = vadd.f32 %v11780_v42, %v11778_v24  ;;  %v2564_v8 = vadd.f32 %v2563_v30, %v2449_v18  ;;  %v2940_v21 = vmul.f32 %v11780_v42, %v11780_v42  ;;  %v3241_v24 = vmax.f32 %v3199_v51, 0.0 }
 0x362   :  { %v11805_v46 = vadd.f32 %v16976_v22, %v2222_v23  ;;  %v3158_v18 = vmul.f32 %v11794_v31, %v11794_v31  ;;  %v3408_v42 = vmul.f32 %v11802_v45, %v11771_v49  ;;  %v9018_v23 = vpop.eup %9017  ;;  %v16979_v22 = vld [vmem:[#allocation38_spill] sm:$0xff] }
 0x363   :  { %3039 = vadd.xlane.f32.xlu1 %v3038_v52  ;;  %2790 = vadd.xlane.f32.xlu2 %v2789_v14  ;;  %v2224_v14 = vpop.f32.mrf.mxu1  ;;  %v3041_v38 = vadd.f32 %v2940_v21, %v2939_v0  ;;  %v3418_v21 = vmul.f32 %v9018_v23, %v11785_v60  ;;  %vm3424_vm11 = vweird.f32 %v9018_v23  ;;  %v3828_v49 = vld [vmem:[%s16325_s4 + $0x8] sm:$0xff] }
 0x364   :  { %16977 = vst [vmem:[#allocation32_spill] sm:$0xff] %v11805_v46  ;;  %v3409_v0 = vmul.f32 %v11802_v45, %v3408_v42  ;;  %vm3425_vm12 = vmor %vm3423_vm13, %vm3424_vm11 }
 0x365   :  { %2605 = vmatmul.bf16.gmra.mxu2 %v16975_v10 }
 0x366   :  { %v2677_v11 = vpop.f32.mrf.mxu0  ;;  %v2998_v32 = vpop.xlane.xlu2 %2997 }
 0x367   :  { %v11807_v52 = vadd.f32 %v2677_v11, %v2564_v8  ;;  %v3116_v30 = vmul.f32 0.0051020407, %v2998_v32  ;;  %v2225_v8 = vadd.f32 %v2224_v14, %v16979_v22  ;;  %v2941_v14 = vmul.f32 %v11805_v46, %v11805_v46 }
 0x368   :  { %v2566_v33 = vpop.f32.mrf.mxu2 }
 0x369   :  { %16978 = vst [vmem:[#allocation30_spill] sm:$0xff] %v11807_v52  ;;  %v3200_v10 = vsub.f32 %v3116_v30, %v3158_v18  ;;  %v2792_v39 = vadd.f32 %v11807_v52, %v11805_v46  ;;  %v2567_v43 = vadd.f32 %v2566_v33, %v2452_v62  ;;  %v2942_v18 = vmul.f32 %v11807_v52, %v11807_v52  ;;  %v16983_v62 = vld [vmem:[#allocation34_spill] sm:$0xff] }
 0x36a   :  { %v3367_v30 = vadd.f32 1e-05, %v3241_v24  ;;  %v11821_v51 = vadd.f32 %v16980_v26, %v2225_v8  ;;  %v16984_v24 = vld [vmem:[#allocation74_spill] sm:$0xff] }
 0x36b   :  { %v3242_v11 = vmax.f32 %v3200_v10, 0.0  ;;  %3042 = vadd.xlane.f32.xlu2 %v3041_v38  ;;  %2793 = vadd.xlane.f32.xlu0 %v2792_v39  ;;  %v3044_v42 = vadd.f32 %v2942_v18, %v2941_v14  ;;  %v3410_v10 = vmul.f32 0.5, %v3409_v0  ;;  %v3419_v38 = vmul.f32 %v9018_v23, %v3418_v21 }
 0x36c   :  { %16981 = vst [vmem:[#allocation28_spill] sm:$0xff] %v11821_v51  ;;  %v2943_v8 = vmul.f32 %v11821_v51, %v11821_v51  ;;  %vm3433_vm2 = vweird.f32 %v3367_v30 }
 0x36d   :  { %v3368_v32 = vadd.f32 1e-05, %v3242_v11  ;;  %v3411_v22 = vsub.f32 1.5, %v3410_v10  ;;  %v3827_v10 = vld [vmem:[%s16325_s4] sm:$0xff] }
 0x36e   :  { %v2680_v34 = vpop.f32.mrf.mxu0 }
 0x36f   :  { %9019 = vrsqrt.f32 %v3368_v32  ;;  %v11823_v27 = vadd.f32 %v2680_v34, %v2567_v43  ;;  %v3420_v34 = vmul.f32 0.5, %v3419_v38  ;;  %v3412_v0 = vmul.f32 %v11802_v45, %v3411_v22 }
 0x370   :  { %9021 = vrsqrt.f32 %v3367_v30  ;;  %vm3443_vm0 = vweird.f32 %v3368_v32 }
 0x371   :  { %16982 = vst [vmem:[#allocation35_spill] sm:$0xff] %v11823_v27  ;;  %8353 = vmatmul.msk.bf16.gmra.mxu0 %vm1987_vm8, %v16983_v62  ;;  %v2795_v33 = vadd.f32 %v11823_v27, %v11821_v51  ;;  %v2944_v43 = vmul.f32 %v11823_v27, %v11823_v27  ;;  %v3421_v21 = vsub.f32 1.5, %v3420_v34 }
 0x373   :  { %2796 = vadd.xlane.f32.xlu1 %v2795_v33  ;;  %3045 = vadd.xlane.f32.xlu0 %v3044_v42  ;;  %v3047_v62 = vadd.f32 %v2944_v43, %v2943_v8  ;;  %v3416_v42 = vsel %vm3415_vm10, %v11802_v45, %v3412_v0  ;;  %v3422_v38 = vmul.f32 %v9018_v23, %v3421_v21  ;;  %v16985_v43 = vld [vmem:[#allocation40_spill] sm:$0xff]  ;;  %v2749_v21 = vpop.xlane.xlu0 %2748 }
 0x374   :  { %v3869_v34 = vmul.f32 %v3827_v10, %v3416_v42  ;;  %v16986_v42 = vld [vmem:[#allocation47_spill] sm:$0xff] }
 0x375   :  { %v9020_v26 = vpop.eup %9019  ;;  %2610 = vmatmul.bf16.gmra.mxu2 %v16984_v24 }
 0x376   :  { %v3438_v39 = vmul.f32 %v9020_v26, %v3368_v32  ;;  %v9022_v11 = vpop.eup %9021  ;;  %vm3444_vm15 = vweird.f32 %v9020_v26 }
 0x377   :  { %v3428_v14 = vmul.f32 %v9022_v11, %v3367_v30  ;;  %vm3445_vm1 = vmor %vm3443_vm0, %vm3444_vm15  ;;  %vm3434_vm5 = vweird.f32 %v9022_v11 }
 0x378   :  { %v3439_v18 = vmul.f32 %v9020_v26, %v3438_v39  ;;  %v3426_v39 = vsel %vm3425_vm12, %v9018_v23, %v3422_v38  ;;  %v3830_v23 = vld [vmem:[%s16325_s4 + $0x18] sm:$0xff]  ;;  %vm3435_vm4 = vmor %vm3433_vm2, %vm3434_vm5  ;;  %v11858_v38 = vmul.f32 0.0051020407, %v2749_v21 }
 0x379   :  { %v3429_v24 = vmul.f32 %v9022_v11, %v3428_v14  ;;  %v3870_v8 = vmul.f32 %v3828_v49, %v3426_v39  ;;  %v2454_v49 = vpop.f32.mrf.mxu3 }
 0x37a   :  { %v3440_v33 = vmul.f32 0.5, %v3439_v18  ;;  %v3159_v30 = vmul.f32 %v11858_v38, %v11858_v38 }
 0x37b   :  { %3048 = vadd.xlane.f32.xlu1 %v3047_v62  ;;  %v3430_v22 = vmul.f32 0.5, %v3429_v24  ;;  %v3001_v10 = vpop.xlane.xlu0 %3000  ;;  %v2752_v24 = vpop.xlane.xlu1 %2751 }
 0x37c   :  { %v3441_v45 = vsub.f32 1.5, %v3440_v33 }
 0x37d   :  { %v3431_v60 = vsub.f32 1.5, %v3430_v22 }
 0x37e   :  { %v3442_v62 = vmul.f32 %v9020_v26, %v3441_v45 }
 0x37f   :  { %v3432_v0 = vmul.f32 %v9022_v11, %v3431_v60 }
 0x380   :  { %v3446_v18 = vsel %vm3445_vm1, %v9020_v26, %v3442_v62  ;;  %v2755_v26 = vpop.xlane.xlu2 %2754 }
 0x381   :  { %8354 = vmatmul.msk.bf16.gmra.mxu0 %vm1987_vm8, %v16985_v43  ;;  %v3872_v14 = vmul.f32 %v3830_v23, %v3446_v18  ;;  %v3436_v33 = vsel %vm3435_vm4, %v9022_v11, %v3432_v0  ;;  %v3117_v43 = vmul.f32 0.0051020407, %v3001_v10  ;;  %v2226_v11 = vpop.f32.mrf.mxu1  ;;  %v11864_v62 = vmul.f32 0.0051020407, %v2755_v26  ;;  %v16988_v0 = vld [vmem:[#allocation41_spill] sm:$0xff]  ;;  %v16990_v26 = vld [vmem:[#allocation39_spill] sm:$0xff] }
 0x382   :  { %v2227_v21 = vadd.f32 %v2226_v11, %v16988_v0 }
 0x383   :  { %3913 = vperm.xlu2 %8846, %v3869_v34   ;;  %v2568_v34 = vpop.f32.mrf.mxu2  ;;  %v3201_v39 = vsub.f32 %v3117_v43, %v3159_v30  ;;  %v11862_v22 = vpop.xlane.xlu0 %2757  ;;  %16987 = vst [vmem:[#allocation69_spill] sm:$0xff] %v11864_v62 }
 0x384   :  { %v2569_v18 = vadd.f32 %v2568_v34, %v2454_v49  ;;  %v11876_v27 = vadd.f32 %v16990_v26, %v2227_v21  ;;  %v11883_v49 = vmul.f32 0.0051020407, %v2752_v24 }
 0x385   :  { %2615 = vmatmul.bf16.gmra.mxu2 %v11418_v63  ;;  %v3829_v63 = vld [vmem:[%s16325_s4 + $0x10] sm:$0xff]  ;;  %v3243_v60 = vmax.f32 %v3201_v39, 0.0 }
 0x386   :  { %v3871_v32 = vmul.f32 %v3829_v63, %v3436_v33  ;;  %v3161_v33 = vmul.f32 %v11864_v62, %v11864_v62  ;;  %16991 = vst [vmem:[#allocation38_spill] sm:$0xff] %v11876_v27  ;;  %v3160_v0 = vmul.f32 %v11883_v49, %v11883_v49  ;;  %v2945_v24 = vmul.f32 %v11876_v27, %v11876_v27 }
 0x387   :  { %3918 = vperm.xlu0 %8844, %v3870_v8   ;;  %v2682_v8 = vpop.f32.mrf.mxu0  ;;  %v11869_v63 = vadd.f32 1e-05, %v3243_v60 }
 0x388   :  { %v3007_v45 = vpop.xlane.xlu2 %3006 }
 0x389   :  { %v3119_v23 = vmul.f32 0.0051020407, %v3007_v45  ;;  %v2229_v34 = vpop.f32.mrf.mxu1  ;;  %9023 = vrsqrt.f32 %v11869_v63  ;;  %vm3453_vm6 = vweird.f32 %v11869_v63 }
 0x38b   :  { %v2571_v10 = vpop.f32.mrf.mxu2  ;;  %v3203_v43 = vsub.f32 %v3119_v23, %v3161_v33  ;;  %v11878_v39 = vpop.xlane.xlu0 %3009 }
 0x38f   :  { %3928 = vperm.xlu0 %8844, %v3872_v14   ;;  %v3004_v14 = vpop.xlane.xlu1 %3003  ;;  %v2685_v45 = vpop.f32.mrf.mxu0 }
 0x390   :  { %v11873_v30 = vpop.xlane.xlu2 %2763  ;;  %v9024_v26 = vpop.eup %9023 }
 0x391   :  { %8355 = vmatmul.msk.bf16.gmra.mxu0 %vm1987_vm8, %v16986_v42  ;;  %v11871_v42 = vadd.f32 %v2682_v8, %v2569_v18  ;;  %v3245_v8 = vmax.f32 %v3203_v43, 0.0  ;;  %v3118_v18 = vmul.f32 0.0051020407, %v3004_v14  ;;  %v16992_v43 = vld [vmem:[#allocation45_spill] sm:$0xff]  ;;  %v2231_v5 = vpop.f32.mrf.mxu1  ;;  %v3448_v59 = vmul.f32 %v9024_v26, %v11869_v63 }
 0x392   :  { %v2230_v46 = vadd.f32 %v2229_v34, %v16992_v43  ;;  %vm3454_vm3 = vweird.f32 %v9024_v26 }
 0x393   :  { %16989 = vst [vmem:[#allocation33_spill] sm:$0xff] %v11871_v42  ;;  %v2798_v11 = vadd.f32 %v11871_v42, %v11876_v27  ;;  %v2946_v23 = vmul.f32 %v11871_v42, %v11871_v42  ;;  %v11891_v33 = vadd.f32 1e-05, %v3245_v8  ;;  %v2573_v52 = vpop.f32.mrf.mxu2  ;;  %v3202_v62 = vsub.f32 %v3118_v18, %v3160_v0  ;;  %v16994_v8 = vld [vmem:[#allocation42_spill] sm:$0xff]  ;;  %v16996_v18 = vld [vmem:[#allocation48_spill] sm:$0xff]  ;;  %vm3455_vm7 = vmor %vm3453_vm6, %vm3454_vm3 }
 0x394   :  { %3923 = vperm.xlu1 %8845, %v3871_v32   ;;  %v2457_v32 = vpop.f32.mrf.mxu3  ;;  %v11905_v12 = vadd.f32 %v16994_v8, %v2230_v46  ;;  %v2232_v0 = vadd.f32 %v2231_v5, %v16996_v18  ;;  %v3449_v16 = vmul.f32 %v9024_v26, %v3448_v59 }
 0x395   :  { %v2572_v21 = vadd.f32 %v2571_v10, %v2457_v32  ;;  %v3050_v42 = vadd.f32 %v2946_v23, %v2945_v24  ;;  %9025 = vrsqrt.f32 %v11891_v33  ;;  %v3244_v27 = vmax.f32 %v3202_v62, 0.0 }
 0x396   :  { %v11898_v14 = vpop.xlane.xlu0 %2766  ;;  %16995 = vst [vmem:[#allocation34_spill] sm:$0xff] %v11905_v12  ;;  %vm3473_vm14 = vweird.f32 %v11891_v33 }
 0x397   :  { %v11885_v60 = vpop.xlane.xlu1 %2760  ;;  %v11901_v32 = vadd.f32 %v2685_v45, %v2572_v21  ;;  %v2687_v34 = vpop.f32.mrf.mxu0  ;;  %v3370_v21 = vadd.f32 1e-05, %v3244_v27  ;;  %v2947_v27 = vmul.f32 %v11905_v12, %v11905_v12 }
 0x399   :  { %16993 = vst [vmem:[#allocation36_spill] sm:$0xff] %v11901_v32  ;;  %v2801_v23 = vadd.f32 %v11901_v32, %v11905_v12  ;;  %v2948_v5 = vmul.f32 %v11901_v32, %v11901_v32  ;;  %9027 = vrsqrt.f32 %v3370_v21  ;;  %vm3463_vm13 = vweird.f32 %v3370_v21 }
 0x39b   :  { %v9026_v45 = vpop.eup %9025  ;;  %v3053_v8 = vadd.f32 %v2948_v5, %v2947_v27 }
 0x39c   :  { %v2459_v51 = vpop.f32.mrf.mxu3  ;;  %v3468_v59 = vmul.f32 %v9026_v45, %v11891_v33  ;;  %vm3474_vm9 = vweird.f32 %v9026_v45 }
 0x39d   :  { %v2574_v10 = vadd.f32 %v2573_v52, %v2459_v51  ;;  %v16998_v52 = vld [vmem:[#allocation46_spill] sm:$0xff]  ;;  %v3450_v51 = vmul.f32 0.5, %v3449_v16  ;;  %vm3475_vm10 = vmor %vm3473_vm14, %vm3474_vm9 }
 0x39e   :  { %v11917_v46 = vadd.f32 %v16998_v52, %v2232_v0  ;;  %v11919_v62 = vpop.xlane.xlu0 %3018  ;;  %v3469_v16 = vmul.f32 %v9026_v45, %v3468_v59  ;;  %v3831_v59 = vld [vmem:[%s16325_s4 + $0x20] sm:$0xff] }
 0x39f   :  { %v11908_v43 = vpop.xlane.xlu1 %3012  ;;  %v11912_v24 = vadd.f32 %v2687_v34, %v2574_v10  ;;  %v3451_v34 = vsub.f32 1.5, %v3450_v51 }
 0x3a0   :  { %16999 = vst [vmem:[#allocation40_spill] sm:$0xff] %v11917_v46  ;;  %v2949_v0 = vmul.f32 %v11917_v46, %v11917_v46  ;;  %v3470_v12 = vmul.f32 0.5, %v3469_v16 }
 0x3a1   :  { %16997 = vst [vmem:[#allocation74_spill] sm:$0xff] %v11912_v24  ;;  %v2950_v18 = vmul.f32 %v11912_v24, %v11912_v24  ;;  %v3452_v1 = vmul.f32 %v9024_v26, %v3451_v34 }
 0x3a2   :  { %v3471_v27 = vsub.f32 1.5, %v3470_v12  ;;  %v3833_v12 = vld [vmem:[%s16325_s4 + $0x30] sm:$0xff] }
 0x3a3   :  { %v3056_v25 = vadd.f32 %v2950_v18, %v2949_v0  ;;  %v3456_v5 = vsel %vm3455_vm7, %v9024_v26, %v3452_v1 }
 0x3a4   :  { %v3472_v34 = vmul.f32 %v9026_v45, %v3471_v27 }
 0x3a6   :  { %v3476_v1 = vsel %vm3475_vm10, %v9026_v45, %v3472_v34  ;;  %v3832_v45 = vld [vmem:[%s16325_s4 + $0x28] sm:$0xff]  ;;  %v11968_v34 = vmul.f32 0.0051020407, %v11862_v22 }
 0x3a7   :  { %v11928_v10 = vpop.xlane.xlu1 %2769  ;;  %v3875_v18 = vmul.f32 %v3833_v12, %v3476_v1  ;;  %v2234_v1 = vpop.f32.mrf.mxu1 }
 0x3a8   :  { %17002 = vst [vmem:[#allocation39_spill] sm:$0xff] %v11968_v34  ;;  %v2462_v12 = vpop.f32.mrf.mxu3 }
 0x3ac   :  { %2799 = vadd.xlane.f32.xlu2 %v2798_v11  ;;  %v11896_v11 = vpop.xlane.xlu2 %3015 }
 0x3ad   :  { %v3122_v22 = vmul.f32 0.0051020407, %v11896_v11 }
 0x3ae   :  { %v11936_v32 = vpop.xlane.xlu0 %2775 }
 0x3b0   :  { %v2464_v55 = vpop.f32.mrf.mxu3 }
 0x3b4   :  { %3051 = vadd.xlane.f32.xlu2 %v3050_v42  ;;  %v11914_v37 = vpop.xlane.xlu2 %2772  ;;  %v2804_v42 = vadd.f32 %v11912_v24, %v11917_v46  ;;  %v3873_v24 = vmul.f32 %v3831_v59, %v3456_v5 }
 0x3b6   :  { %v11946_v16 = vpop.xlane.xlu0 %3027 }
 0x3b9   :  { %2802 = vadd.xlane.f32.xlu0 %v2801_v23  ;;  %v9028_v23 = vpop.eup %9027 }
 0x3ba   :  { %v3458_v51 = vmul.f32 %v9028_v23, %v3370_v21  ;;  %vm3464_vm11 = vweird.f32 %v9028_v23  ;;  %v3120_v21 = vmul.f32 0.0051020407, %v11878_v39 }
 0x3bb   :  { %vm3465_vm12 = vmor %vm3463_vm13, %vm3464_vm11 }
 0x3bc   :  { %v11934_v52 = vpop.xlane.xlu2 %3024 }
 0x3be   :  { %2805 = vadd.xlane.f32.xlu1 %v2804_v42  ;;  %v11942_v42 = vpop.xlane.xlu1 %3021 }
 0x3c1   :  { %3054 = vadd.xlane.f32.xlu0 %v3053_v8  ;;  %v3459_v8 = vmul.f32 %v9028_v23, %v3458_v51 }
 0x3c3   :  { %v3460_v63 = vmul.f32 0.5, %v3459_v8 }
 0x3c4   :  { %v11944_v46 = vpop.xlane.xlu2 %2781 }
 0x3c5   :  { %v3461_v26 = vsub.f32 1.5, %v3460_v63 }
 0x3c6   :  { %3057 = vadd.xlane.f32.xlu1 %v3056_v25  ;;  %v11949_v25 = vpop.xlane.xlu1 %2778 }
 0x3c7   :  { %v3462_v51 = vmul.f32 %v9028_v23, %v3461_v26  ;;  %v2576_v26 = vpop.f32.mrf.mxu2 }
 0x3c8   :  { %v2577_v4 = vadd.f32 %v2576_v26, %v2462_v12 }
 0x3c9   :  { %v3466_v5 = vsel %vm3465_vm12, %v9028_v23, %v3462_v51  ;;  %v3162_v23 = vmul.f32 %v11968_v34, %v11968_v34  ;;  %v11976_v51 = vmul.f32 0.0051020407, %v11873_v30  ;;  %v17008_v34 = vld [vmem:[#allocation51_spill] sm:$0xff] }
 0x3ca   :  { %v3874_v27 = vmul.f32 %v3832_v45, %v3466_v5  ;;  %v2235_v44 = vadd.f32 %v2234_v1, %v17008_v34 }
 0x3cb   :  { %17004 = vst [vmem:[#allocation42_spill] sm:$0xff] %v11976_v51  ;;  %v3164_v39 = vmul.f32 %v11976_v51, %v11976_v51  ;;  %v3281_v51 = vsub.f32 %v11458_v53, %v11735_v17  ;;  %v3282_v53 = vsub.f32 %v11460_v13, %v11735_v17 }
 0x3cc   :  { %3933 = vperm.xlu2 %8846, %v3873_v24   ;;  %v11954_v0 = vpop.xlane.xlu2 %3033  ;;  %v11956_v24 = vpop.xlane.xlu0 %2784  ;;  %v11993_v11 = vadd.f32 %v17010_v58, %v2235_v44  ;;  %v17015_v44 = vld [vmem:[#allocation53_spill] sm:$0xff] }
 0x3cd   :  { %17000 = vst [vmem:[#allocation47_spill] sm:$0xff] %v11956_v24 }
 0x3ce   :  { %v11958_v33 = vpop.xlane.xlu1 %3030  ;;  %17011 = vst [vmem:[#allocation49_spill] sm:$0xff] %v11993_v11 }
 0x3d4   :  { %v11965_v8 = vpop.xlane.xlu0 %3036 }
 0x3d5   :  { %3943 = vperm.xlu0 %8844, %v3875_v18   ;;  %17001 = vst [vmem:[#allocation41_spill] sm:$0xff] %v11965_v8  ;;  %v3204_v18 = vsub.f32 %v3120_v21, %v3162_v23  ;;  %v3206_v21 = vsub.f32 %v3122_v22, %v3164_v39  ;;  %v2236_v23 = vpop.f32.mrf.mxu1 }
 0x3d6   :  { %v11963_v59 = vpop.xlane.xlu2 %2790  ;;  %v11970_v63 = vpop.xlane.xlu1 %2787  ;;  %v2237_v22 = vadd.f32 %v2236_v23, %v17015_v44 }
 0x3d7   :  { %17003 = vst [vmem:[#allocation45_spill] sm:$0xff] %v11970_v63  ;;  %v3246_v7 = vmax.f32 %v3204_v18, 0.0  ;;  %v3248_v18 = vmax.f32 %v3206_v21, 0.0  ;;  %v4541_v21 = vld [vmem:[%s16323_s2] sm:$0xff] }
 0x3d8   :  { %v4583_v23 = vunpack.c.l.bf16 %v4541_v21  ;;  %v4584_v63 = vunpack.c.h.bf16 %v4541_v21 }
 0x3d9   :  { %v11988_v30 = vadd.f32 1e-05, %v3246_v7  ;;  %v12008_v39 = vadd.f32 1e-05, %v3248_v18 }
 0x3db   :  { %9029 = vrsqrt.f32 %v11988_v30  ;;  %vm3483_vm0 = vweird.f32 %v11988_v30  ;;  %vm3503_vm2 = vweird.f32 %v12008_v39 }
 0x3dc   :  { %9031 = vrsqrt.f32 %v12008_v39 }
 0x3de   :  { %v11978_v5 = vpop.xlane.xlu2 %3042  ;;  %v11980_v45 = vpop.xlane.xlu0 %2793 }
 0x3df   :  { %3938 = vperm.xlu1 %8845, %v3874_v27   ;;  %17005 = vst [vmem:[#allocation48_spill] sm:$0xff] %v11978_v5  ;;  %v2690_v27 = vpop.f32.mrf.mxu0  ;;  %v11985_v28 = vpop.xlane.xlu1 %3039  ;;  %v17019_v5 = vld [vmem:[#allocation56_spill] sm:$0xff] }
 0x3e0   :  { %17006 = vst [vmem:[#allocation46_spill] sm:$0xff] %v11980_v45  ;;  %v11990_v36 = vadd.f32 %v2690_v27, %v2577_v4  ;;  %v2578_v45 = vpop.f32.mrf.mxu2  ;;  %v12003_v4 = vmul.f32 0.0051020407, %v11885_v60  ;;  %v3121_v60 = vmul.f32 0.0051020407, %v11908_v43  ;;  %v4542_v43 = vld [vmem:[%s16323_s2 + $0x8] sm:$0xff] }
 0x3e1   :  { %17007 = vst [vmem:[#allocation100_spill] sm:$0xff] %v11985_v28  ;;  %v2579_v27 = vadd.f32 %v2578_v45, %v2464_v55  ;;  %v2951_v55 = vmul.f32 %v11993_v11, %v11993_v11  ;;  %v3284_v45 = vsub.f32 %v11477_v29, %v11748_v3  ;;  %v12030_v18 = vpop.eup %9029  ;;  %v4585_v8 = vunpack.c.l.bf16 %v4542_v43 }
 0x3e2   :  { %17009 = vst [vmem:[#allocation51_spill] sm:$0xff] %v11990_v36  ;;  %v2807_v7 = vadd.f32 %v11990_v36, %v11993_v11  ;;  %v3163_v13 = vmul.f32 %v12003_v4, %v12003_v4  ;;  %v4586_v24 = vunpack.c.h.bf16 %v4542_v43  ;;  %vm3484_vm15 = vweird.f32 %v12030_v18 }
 0x3e3   :  { %17013 = vst [vmem:[#allocation102_spill] sm:$0xff] %v12003_v4  ;;  %vm3485_vm1 = vmor %vm3483_vm0, %vm3484_vm15 }
 0x3e6   :  { %v3914_v12 = vpop.permute.xlu2 %3913  ;;  %v11995_v26 = vpop.xlane.xlu0 %3045 }
 0x3e7   :  { %17012 = vst [vmem:[#allocation101_spill] sm:$0xff] %v11995_v26  ;;  %v2692_v34 = vpop.f32.mrf.mxu0  ;;  %v12005_v1 = vpop.xlane.xlu1 %2796  ;;  %v4121_v58 = vmul.f32 %v3914_v12, %v3281_v51  ;;  %v2952_v26 = vmul.f32 %v11990_v36, %v11990_v36  ;;  %v3283_v51 = vsub.f32 %v11473_v47, %v11748_v3 }
 0x3e8   :  { %17014 = vst [vmem:[#allocation103_spill] sm:$0xff] %v12005_v1  ;;  %v4122_v1 = vmul.f32 %v3914_v12, %v3282_v53  ;;  %v17016_v12 = vld [vmem:[#allocation52_spill] sm:$0xff]  ;;  %v12035_v44 = vadd.f32 %v2692_v34, %v2579_v27  ;;  %v2467_v36 = vpop.f32.mrf.mxu3  ;;  %v2581_v11 = vpop.f32.mrf.mxu2 }
 0x3e9   :  { %v4457_v17 = vadd.f32 %v11561_v2, %v4121_v58  ;;  %v12033_v47 = vadd.f32 %v17016_v12, %v2237_v22  ;;  %v3205_v58 = vsub.f32 %v3121_v60, %v3163_v13  ;;  %v3059_v4 = vadd.f32 %v2952_v26, %v2951_v55  ;;  %v12050_v55 = vpop.eup %9031 }
 0x3ea   :  { %17018 = vst [vmem:[#allocation52_spill] sm:$0xff] %v12035_v44  ;;  %v4458_v28 = vadd.f32 %v11561_v2, %v4122_v1  ;;  %v3478_v22 = vmul.f32 %v12030_v18, %v11988_v30  ;;  %v2582_v13 = vadd.f32 %v2581_v11, %v2467_v36  ;;  %v3287_v1 = vsub.f32 %v11505_v19, %v11794_v31 }
 0x3eb   :  { %17017 = vst [vmem:[#allocation53_spill] sm:$0xff] %v12033_v47  ;;  %v4667_v12 = vadd.f32 %v4583_v23, %v4457_v17  ;;  %v2810_v26 = vadd.f32 %v12035_v44, %v12033_v47  ;;  %v17020_v23 = vld [vmem:[#allocation54_spill] sm:$0xff]  ;;  %vm3504_vm5 = vweird.f32 %v12050_v55 }
 0x3ec   :  { %v3479_v11 = vmul.f32 %v12030_v18, %v3478_v22  ;;  %vm3505_vm4 = vmor %vm3503_vm2, %vm3504_vm5 }
 0x3ed   :  { %v4751_v17 = vmax.f32 %v4667_v12, 0.0 }
 0x3ef   :  { %v12046_v2 = vpop.xlane.xlu1 %3048 }
 0x3f5   :  { %2808 = vadd.xlane.f32.xlu2 %v2807_v7  ;;  %v2239_v7 = vpop.f32.mrf.mxu1 }
 0x3f6   :  { %v2240_v60 = vadd.f32 %v2239_v7, %v17019_v5  ;;  %v4668_v5 = vadd.f32 %v4584_v63, %v4458_v28  ;;  %v3498_v28 = vmul.f32 %v12050_v55, %v12008_v39  ;;  %v3835_v39 = vld [vmem:[%s16325_s4 + $0x40] sm:$0xff] }
 0x3f8   :  { %v12058_v7 = vadd.f32 %v17020_v23, %v2240_v60  ;;  %v4543_v60 = vld [vmem:[%s16323_s2 + $0x10] sm:$0xff] }
 0x3f9   :  { %v3919_v53 = vpop.permute.xlu0 %3918 }
 0x3fa   :  { %v4123_v29 = vmul.f32 %v3919_v53, %v3283_v51  ;;  %v4124_v3 = vmul.f32 %v3919_v53, %v3284_v45  ;;  %v2695_v51 = vpop.f32.mrf.mxu0  ;;  %v3247_v45 = vmax.f32 %v3205_v58, 0.0  ;;  %17021 = vst [vmem:[#allocation56_spill] sm:$0xff] %v12058_v7  ;;  %v2953_v53 = vmul.f32 %v12033_v47, %v12033_v47 }
 0x3fb   :  { %v12060_v19 = vadd.f32 %v2695_v51, %v2582_v13  ;;  %v3285_v58 = vsub.f32 %v11488_v50, %v11775_v48  ;;  %v3499_v50 = vmul.f32 %v12050_v55, %v3498_v28  ;;  %v2955_v28 = vmul.f32 %v12058_v7, %v12058_v7 }
 0x3fc   :  { %v4459_v34 = vadd.f32 %v11571_v41, %v4123_v29  ;;  %v4460_v27 = vadd.f32 %v11571_v41, %v4124_v3  ;;  %v3288_v41 = vsub.f32 %v11507_v6, %v11794_v31  ;;  %v4544_v6 = vld [vmem:[%s16323_s2 + $0x18] sm:$0xff]  ;;  %v3286_v29 = vsub.f32 %v11490_v57, %v11775_v48 }
 0x3fd   :  { %3060 = vadd.xlane.f32.xlu2 %v3059_v4  ;;  %v2954_v4 = vmul.f32 %v12035_v44, %v12035_v44  ;;  %17022 = vst [vmem:[#allocation54_spill] sm:$0xff] %v12060_v19  ;;  %v4752_v3 = vmax.f32 %v4668_v5, 0.0  ;;  %v4589_v13 = vunpack.c.l.bf16 %v4544_v6  ;;  %v2813_v48 = vadd.f32 %v12060_v19, %v12058_v7 }
 0x3fe   :  { %v4669_v21 = vadd.f32 %v4585_v8, %v4459_v34  ;;  %v4670_v36 = vadd.f32 %v4586_v24, %v4460_v27  ;;  %v3480_v34 = vmul.f32 0.5, %v3479_v11  ;;  %v3373_v27 = vadd.f32 1e-05, %v3247_v45 }
 0x3ff   :  { %2811 = vadd.xlane.f32.xlu0 %v2810_v26  ;;  %v3062_v12 = vadd.f32 %v2954_v4, %v2953_v53  ;;  %v4587_v5 = vunpack.c.l.bf16 %v4543_v60  ;;  %v3500_v23 = vmul.f32 0.5, %v3499_v50 }
 0x400   :  { %v4753_v43 = vmax.f32 %v4669_v21, 0.0  ;;  %v4754_v22 = vmax.f32 %v4670_v36, 0.0  ;;  %v4588_v36 = vunpack.c.h.bf16 %v4543_v60  ;;  %9033 = vrsqrt.f32 %v3373_v27 }
 0x401   :  { %v3929_v8 = vpop.permute.xlu0 %3928  ;;  %v3481_v11 = vsub.f32 1.5, %v3480_v34  ;;  %vm3493_vm6 = vweird.f32 %v3373_v27 }
 0x402   :  { %v4127_v31 = vmul.f32 %v3929_v8, %v3287_v1  ;;  %v4128_v24 = vmul.f32 %v3929_v8, %v3288_v41  ;;  %v12069_v63 = vpack.c.bf16 %v4753_v43, %v4751_v17  ;;  %v4590_v1 = vunpack.c.h.bf16 %v4544_v6 }
 0x403   :  { %v12080_v21 = vpack.c.bf16 %v4754_v22, %v4752_v3  ;;  %v2956_v8 = vmul.f32 %v12060_v19, %v12060_v19  ;;  %v3501_v22 = vsub.f32 1.5, %v3500_v23  ;;  %v3125_v23 = vmul.f32 0.0051020407, %v11934_v52 }
 0x404   :  { %17023 = vst [vmem:[#allocation104_spill] sm:$0xff] %v12069_v63  ;;  %v4463_v26 = vadd.f32 %v11588_v54, %v4127_v31  ;;  %v4464_v51 = vadd.f32 %v11588_v54, %v4128_v24  ;;  %v3482_v31 = vmul.f32 %v12030_v18, %v3481_v11 }
 0x405   :  { %17024 = vst [vmem:[#allocation105_spill] sm:$0xff] %v12080_v21  ;;  %v3065_v34 = vadd.f32 %v2956_v8, %v2955_v28  ;;  %v2241_v8 = vpop.f32.mrf.mxu1 }
 0x406   :  { %v3924_v57 = vpop.permute.xlu1 %3923  ;;  %v4673_v17 = vadd.f32 %v4589_v13, %v4463_v26  ;;  %v4674_v43 = vadd.f32 %v4590_v1, %v4464_v51  ;;  %v9034_v3 = vpop.eup %9033  ;;  %v3486_v13 = vsel %vm3485_vm1, %v12030_v18, %v3482_v31  ;;  %v3834_v26 = vld [vmem:[%s16325_s4 + $0x38] sm:$0xff]  ;;  %v3502_v1 = vmul.f32 %v12050_v55, %v3501_v22  ;;  %v3836_v18 = vld [vmem:[%s16325_s4 + $0x48] sm:$0xff] }
 0x407   :  { %v4125_v45 = vmul.f32 %v3924_v57, %v3285_v58  ;;  %v4126_v41 = vmul.f32 %v3924_v57, %v3286_v29  ;;  %3063 = vadd.xlane.f32.xlu0 %v3062_v12  ;;  %v3488_v51 = vmul.f32 %v9034_v3, %v3373_v27  ;;  %v3876_v30 = vmul.f32 %v3834_v26, %v3486_v13  ;;  %v2469_v27 = vpop.f32.mrf.mxu3 }
 0x408   :  { %v4757_v58 = vmax.f32 %v4673_v17, 0.0  ;;  %v3506_v57 = vsel %vm3505_vm4, %v12050_v55, %v3502_v1  ;;  %vm3494_vm3 = vweird.f32 %v9034_v3  ;;  %v12113_v55 = vmul.f32 0.0051020407, %v11898_v14  ;;  %v2697_v14 = vpop.f32.mrf.mxu0 }
 0x409   :  { %v4461_v4 = vadd.f32 %v11573_v35, %v4125_v45  ;;  %v4462_v54 = vadd.f32 %v11573_v35, %v4126_v41  ;;  %2814 = vadd.xlane.f32.xlu1 %v2813_v48  ;;  %v4758_v35 = vmax.f32 %v4674_v43, 0.0  ;;  %v3489_v50 = vmul.f32 %v9034_v3, %v3488_v51  ;;  %vm3495_vm7 = vmor %vm3493_vm6, %vm3494_vm3  ;;  %v2583_v43 = vpop.f32.mrf.mxu2 }
 0x40a   :  { %v3878_v45 = vmul.f32 %v3836_v18, %v3506_v57  ;;  %v3165_v17 = vmul.f32 %v12113_v55, %v12113_v55  ;;  %v17031_v57 = vld [vmem:[#allocation61_spill] sm:$0xff] }
 0x40b   :  { %v4671_v53 = vadd.f32 %v4587_v5, %v4461_v4  ;;  %v4672_v6 = vadd.f32 %v4588_v36, %v4462_v54  ;;  %v3490_v48 = vmul.f32 0.5, %v3489_v50  ;;  %v3123_v4 = vmul.f32 0.0051020407, %v11919_v62 }
 0x40c   :  { %v12117_v54 = vmul.f32 0.0051020407, %v11914_v37  ;;  %v17027_v37 = vld [vmem:[#allocation58_spill] sm:$0xff] }
 0x40d   :  { %v4755_v24 = vmax.f32 %v4671_v53, 0.0  ;;  %v4756_v29 = vmax.f32 %v4672_v6, 0.0  ;;  %v3491_v41 = vsub.f32 1.5, %v3490_v48  ;;  %v3207_v53 = vsub.f32 %v3123_v4, %v3165_v17  ;;  %v2244_v26 = vpop.f32.mrf.mxu1 }
 0x40e   :  { %v3167_v6 = vmul.f32 %v12117_v54, %v12117_v54  ;;  %v2245_v18 = vadd.f32 %v2244_v26, %v17031_v57 }
 0x40f   :  { %v12094_v12 = vpack.c.bf16 %v4757_v58, %v4755_v24  ;;  %v12096_v60 = vpack.c.bf16 %v4758_v35, %v4756_v29  ;;  %v3492_v5 = vmul.f32 %v9034_v3, %v3491_v41  ;;  %v3249_v31 = vmax.f32 %v3207_v53, 0.0  ;;  %v2472_v22 = vpop.f32.mrf.mxu3 }
 0x410   :  { %v3209_v28 = vsub.f32 %v3125_v23, %v3167_v6  ;;  %v2584_v24 = vadd.f32 %v2583_v43, %v2469_v27  ;;  %v2242_v58 = vadd.f32 %v2241_v8, %v17027_v37  ;;  %v3124_v27 = vmul.f32 0.0051020407, %v11942_v42 }
 0x411   :  { %17025 = vst [vmem:[#allocation106_spill] sm:$0xff] %v12094_v12  ;;  %3066 = vadd.xlane.f32.xlu1 %v3065_v34  ;;  %v3496_v36 = vsel %vm3495_vm7, %v9034_v3, %v3492_v5  ;;  %v12127_v35 = vadd.f32 1e-05, %v3249_v31  ;;  %v2586_v52 = vpop.f32.mrf.mxu2  ;;  %v17029_v34 = vld [vmem:[#allocation57_spill] sm:$0xff] }
 0x412   :  { %17026 = vst [vmem:[#allocation107_spill] sm:$0xff] %v12096_v60  ;;  %v3877_v11 = vmul.f32 %v3835_v39, %v3496_v36  ;;  %v3251_v29 = vmax.f32 %v3209_v28, 0.0  ;;  %v12129_v3 = vadd.f32 %v2697_v14, %v2584_v24  ;;  %v12132_v13 = vadd.f32 %v17029_v34, %v2242_v58  ;;  %v17033_v36 = vld [vmem:[#allocation59_spill] sm:$0xff] }
 0x413   :  { %v2587_v1 = vadd.f32 %v2586_v52, %v2472_v22  ;;  %9035 = vrsqrt.f32 %v12127_v35  ;;  %v12150_v39 = vadd.f32 %v17033_v36, %v2245_v18  ;;  %v17035_v34 = vld [vmem:[#allocation63_spill] sm:$0xff]  ;;  %vm3513_vm14 = vweird.f32 %v12127_v35 }
 0x414   :  { %17028 = vst [vmem:[#allocation58_spill] sm:$0xff] %v12129_v3  ;;  %v12134_v51 = vadd.f32 1e-05, %v3251_v29  ;;  %v2816_v50 = vadd.f32 %v12129_v3, %v12132_v13  ;;  %v2958_v5 = vmul.f32 %v12129_v3, %v12129_v3  ;;  %v2957_v17 = vmul.f32 %v12132_v13, %v12132_v13 }
 0x415   :  { %3948 = vperm.xlu2 %8846, %v3876_v30   ;;  %17030 = vst [vmem:[#allocation57_spill] sm:$0xff] %v12132_v13  ;;  %v2700_v30 = vpop.f32.mrf.mxu0  ;;  %v2246_v28 = vpop.f32.mrf.mxu1  ;;  %v2959_v52 = vmul.f32 %v12150_v39, %v12150_v39 }
 0x416   :  { %9037 = vrsqrt.f32 %v12134_v51  ;;  %v12141_v48 = vadd.f32 %v2700_v30, %v2587_v1  ;;  %17034 = vst [vmem:[#allocation59_spill] sm:$0xff] %v12150_v39  ;;  %v3068_v8 = vadd.f32 %v2958_v5, %v2957_v17  ;;  %v2247_v26 = vadd.f32 %v2246_v28, %v17035_v34 }
 0x417   :  { %v2474_v6 = vpop.f32.mrf.mxu3  ;;  %v3289_v30 = vsub.f32 %v11516_v61, %v11858_v38  ;;  %vm3533_vm13 = vweird.f32 %v12134_v51 }
 0x418   :  { %17032 = vst [vmem:[#allocation61_spill] sm:$0xff] %v12141_v48  ;;  %v2819_v43 = vadd.f32 %v12141_v48, %v12150_v39  ;;  %v2960_v24 = vmul.f32 %v12141_v48, %v12141_v48 }
 0x419   :  { %v12155_v4 = vpop.eup %9035  ;;  %v2588_v14 = vpop.f32.mrf.mxu2 }
 0x41a   :  { %v3508_v53 = vmul.f32 %v12155_v4, %v12127_v35  ;;  %v2589_v58 = vadd.f32 %v2588_v14, %v2474_v6  ;;  %v3071_v5 = vadd.f32 %v2960_v24, %v2959_v52  ;;  %v4546_v14 = vld [vmem:[%s16323_s2 + $0x28] sm:$0xff]  ;;  %vm3514_vm9 = vweird.f32 %v12155_v4 }
 0x41b   :  { %3958 = vperm.xlu0 %8844, %v3878_v45   ;;  %v4593_v34 = vunpack.c.l.bf16 %v4546_v14  ;;  %vm3515_vm11 = vmor %vm3513_vm14, %vm3514_vm9 }
 0x41c   :  { %v12162_v23 = vpop.eup %9037  ;;  %v3509_v37 = vmul.f32 %v12155_v4, %v3508_v53  ;;  %v17037_v53 = vld [vmem:[#allocation62_spill] sm:$0xff] }
 0x41d   :  { %v3528_v42 = vmul.f32 %v12162_v23, %v12134_v51  ;;  %v2702_v1 = vpop.f32.mrf.mxu0  ;;  %vm3534_vm10 = vweird.f32 %v12162_v23 }
 0x41e   :  { %vm3535_vm12 = vmor %vm3533_vm13, %vm3534_vm10 }
 0x41f   :  { %v12124_v62 = vpop.xlane.xlu2 %2799  ;;  %v3529_v18 = vmul.f32 %v12162_v23, %v3528_v42 }
 0x421   :  { %v3530_v6 = vmul.f32 0.5, %v3529_v18 }
 0x427   :  { %v12143_v45 = vpop.xlane.xlu2 %3051 }
 0x42a   :  { %3953 = vperm.xlu1 %8845, %v3877_v11   ;;  %v12153_v11 = vmul.f32 0.0051020407, %v11928_v10 }
 0x42c   :  { %v3166_v10 = vmul.f32 %v12153_v11, %v12153_v11 }
 0x42e   :  { %v3208_v31 = vsub.f32 %v3124_v27, %v3166_v10  ;;  %v3510_v27 = vmul.f32 0.5, %v3509_v37  ;;  %v12189_v10 = vadd.f32 %v17037_v53, %v2247_v26  ;;  %v4594_v26 = vunpack.c.h.bf16 %v4546_v14 }
 0x42f   :  { %v3934_v29 = vpop.permute.xlu2 %3933 }
 0x430   :  { %v3250_v57 = vmax.f32 %v3208_v31, 0.0  ;;  %v4129_v36 = vmul.f32 %v3934_v29, %v3289_v30  ;;  %17038 = vst [vmem:[#allocation62_spill] sm:$0xff] %v12189_v10 }
 0x431   :  { %v12145_v41 = vpop.xlane.xlu1 %2805 }
 0x432   :  { %v3376_v61 = vadd.f32 1e-05, %v3250_v57  ;;  %v4465_v28 = vadd.f32 %v11594_v56, %v4129_v36  ;;  %v2961_v36 = vmul.f32 %v12189_v10, %v12189_v10 }
 0x434   :  { %9039 = vrsqrt.f32 %v3376_v61  ;;  %vm3523_vm0 = vweird.f32 %v3376_v61 }
 0x439   :  { %v12173_v22 = vpop.xlane.xlu1 %3057 }
 0x43e   :  { %2817 = vadd.xlane.f32.xlu2 %v2816_v50  ;;  %v3290_v50 = vsub.f32 %v11518_v9, %v11858_v38  ;;  %v3291_v9 = vsub.f32 %v11533_v40, %v11883_v49  ;;  %v3292_v38 = vsub.f32 %v11535_v15, %v11883_v49  ;;  %v3531_v15 = vsub.f32 1.5, %v3530_v6  ;;  %v9040_v6 = vpop.eup %9039 }
 0x43f   :  { %vm3524_vm15 = vweird.f32 %v9040_v6 }
 0x440   :  { %v4130_v17 = vmul.f32 %v3934_v29, %v3290_v50  ;;  %v3511_v29 = vsub.f32 1.5, %v3510_v27  ;;  %vm3525_vm1 = vmor %vm3523_vm0, %vm3524_vm15 }
 0x442   :  { %v4466_v31 = vadd.f32 %v11594_v56, %v4130_v17  ;;  %v3512_v50 = vmul.f32 %v12155_v4, %v3511_v29  ;;  %v3532_v17 = vmul.f32 %v12162_v23, %v3531_v15  ;;  %v12233_v15 = vmul.f32 0.0051020407, %v11936_v32 }
 0x445   :  { %2820 = vadd.xlane.f32.xlu0 %v2819_v43  ;;  %v12183_v43 = vadd.f32 %v2702_v1, %v2589_v58 }
 0x446   :  { %3069 = vadd.xlane.f32.xlu2 %v3068_v8  ;;  %v4545_v8 = vld [vmem:[%s16323_s2 + $0x20] sm:$0xff] }
 0x447   :  { %17036 = vst [vmem:[#allocation63_spill] sm:$0xff] %v12183_v43  ;;  %v4591_v42 = vunpack.c.l.bf16 %v4545_v8  ;;  %v4592_v24 = vunpack.c.h.bf16 %v4545_v8  ;;  %v2822_v58 = vadd.f32 %v12183_v43, %v12189_v10  ;;  %v2962_v57 = vmul.f32 %v12183_v43, %v12183_v43 }
 0x449   :  { %v4675_v30 = vadd.f32 %v4591_v42, %v4465_v28  ;;  %v4676_v56 = vadd.f32 %v4592_v24, %v4466_v31  ;;  %v3074_v14 = vadd.f32 %v2962_v57, %v2961_v36  ;;  %v3518_v31 = vmul.f32 %v9040_v6, %v3376_v61 }
 0x44a   :  { %v3536_v24 = vsel %vm3535_vm12, %v12162_v23, %v3532_v17  ;;  %v12230_v23 = vmul.f32 0.0051020407, %v11944_v46  ;;  %v3126_v61 = vmul.f32 0.0051020407, %v11946_v16  ;;  %v3168_v57 = vmul.f32 %v12233_v15, %v12233_v15  ;;  %v2705_v46 = vpop.f32.mrf.mxu0 }
 0x44b   :  { %v4760_v8 = vmax.f32 %v4676_v56, 0.0  ;;  %v2249_v56 = vpop.f32.mrf.mxu1 }
 0x44d   :  { %3072 = vadd.xlane.f32.xlu0 %v3071_v5 }
 0x451   :  { %v3939_v37 = vpop.permute.xlu1 %3938 }
 0x452   :  { %v4131_v52 = vmul.f32 %v3939_v37, %v3291_v9  ;;  %v4132_v40 = vmul.f32 %v3939_v37, %v3292_v38  ;;  %v3516_v9 = vsel %vm3515_vm11, %v12155_v4, %v3512_v50  ;;  %v3837_v38 = vld [vmem:[%s16325_s4 + $0x50] sm:$0xff]  ;;  %v3839_v4 = vld [vmem:[%s16325_s4 + $0x60] sm:$0xff]  ;;  %v3170_v50 = vmul.f32 %v12230_v23, %v12230_v23 }
 0x453   :  { %v3879_v42 = vmul.f32 %v3837_v38, %v3516_v9  ;;  %v3881_v37 = vmul.f32 %v3839_v4, %v3536_v24  ;;  %v17045_v24 = vld [vmem:[#allocation67_spill] sm:$0xff] }
 0x454   :  { %v4467_v49 = vadd.f32 %v11596_v20, %v4131_v52  ;;  %v4468_v1 = vadd.f32 %v11596_v20, %v4132_v40  ;;  %2823 = vadd.xlane.f32.xlu1 %v2822_v58  ;;  %v4759_v20 = vmax.f32 %v4675_v30, 0.0  ;;  %v3519_v58 = vmul.f32 %v9040_v6, %v3518_v31  ;;  %v17043_v31 = vld [vmem:[#allocation64_spill] sm:$0xff] }
 0x455   :  { %v3128_v30 = vmul.f32 0.0051020407, %v11954_v0 }
 0x456   :  { %v4677_v18 = vadd.f32 %v4593_v34, %v4467_v49  ;;  %v4678_v5 = vadd.f32 %v4594_v26, %v4468_v1  ;;  %v3520_v29 = vmul.f32 0.5, %v3519_v58  ;;  %v3838_v34 = vld [vmem:[%s16325_s4 + $0x58] sm:$0xff]  ;;  %v2477_v49 = vpop.f32.mrf.mxu3  ;;  %v2591_v1 = vpop.f32.mrf.mxu2 }
 0x457   :  { %v2592_v36 = vadd.f32 %v2591_v1, %v2477_v49  ;;  %v12262_v1 = vmul.f32 0.0051020407, %v11949_v25 }
 0x458   :  { %v4761_v27 = vmax.f32 %v4677_v18, 0.0  ;;  %v4762_v53 = vmax.f32 %v4678_v5, 0.0  ;;  %v3521_v51 = vsub.f32 1.5, %v3520_v29  ;;  %v3212_v18 = vsub.f32 %v3128_v30, %v3170_v50  ;;  %v17047_v29 = vld [vmem:[#allocation66_spill] sm:$0xff] }
 0x459   :  { %v3210_v5 = vsub.f32 %v3126_v61, %v3168_v57  ;;  %v3127_v61 = vmul.f32 0.0051020407, %v11958_v33 }
 0x45a   :  { %v12218_v35 = vpack.c.bf16 %v4761_v27, %v4759_v20  ;;  %v12220_v28 = vpack.c.bf16 %v4762_v53, %v4760_v8  ;;  %v3522_v52 = vmul.f32 %v9040_v6, %v3521_v51  ;;  %v3254_v32 = vmax.f32 %v3212_v18, 0.0  ;;  %v17041_v8 = vld [vmem:[#allocation65_spill] sm:$0xff]  ;;  %v2251_v53 = vpop.f32.mrf.mxu1 }
 0x45b   :  { %v3252_v17 = vmax.f32 %v3210_v5, 0.0  ;;  %v2250_v0 = vadd.f32 %v2249_v56, %v17041_v8  ;;  %v2252_v4 = vadd.f32 %v2251_v53, %v17045_v24  ;;  %v3169_v18 = vmul.f32 %v12262_v1, %v12262_v1 }
 0x45c   :  { %17039 = vst [vmem:[#allocation108_spill] sm:$0xff] %v12218_v35  ;;  %3075 = vadd.xlane.f32.xlu1 %v3074_v14  ;;  %v3526_v40 = vsel %vm3525_vm1, %v9040_v6, %v3522_v52  ;;  %v12242_v6 = vadd.f32 %v2705_v46, %v2592_v36  ;;  %v3380_v9 = vadd.f32 1e-05, %v3254_v32  ;;  %v2707_v14 = vpop.f32.mrf.mxu0 }
 0x45d   :  { %17040 = vst [vmem:[#allocation109_spill] sm:$0xff] %v12220_v28  ;;  %v3880_v26 = vmul.f32 %v3838_v34, %v3526_v40  ;;  %v3378_v38 = vadd.f32 1e-05, %v3252_v17  ;;  %v12253_v51 = vadd.f32 %v17047_v29, %v2252_v4  ;;  %v3211_v36 = vsub.f32 %v3127_v61, %v3169_v18  ;;  %v17051_v29 = vld [vmem:[#allocation68_spill] sm:$0xff] }
 0x45e   :  { %3963 = vperm.xlu2 %8846, %v3879_v42   ;;  %v2479_v20 = vpop.f32.mrf.mxu3  ;;  %v2593_v27 = vpop.f32.mrf.mxu2  ;;  %17042 = vst [vmem:[#allocation65_spill] sm:$0xff] %v12242_v6  ;;  %v12245_v42 = vadd.f32 %v17043_v31, %v2250_v0  ;;  %9041 = vrsqrt.f32 %v3380_v9  ;;  %v2964_v40 = vmul.f32 %v12242_v6, %v12242_v6  ;;  %vm3563_vm4 = vweird.f32 %v3380_v9 }
 0x45f   :  { %v2594_v16 = vadd.f32 %v2593_v27, %v2479_v20  ;;  %9043 = vrsqrt.f32 %v3378_v38  ;;  %17048 = vst [vmem:[#allocation66_spill] sm:$0xff] %v12253_v51  ;;  %v2965_v46 = vmul.f32 %v12253_v51, %v12253_v51  ;;  %v3253_v0 = vmax.f32 %v3211_v36, 0.0 }
 0x460   :  { %17044 = vst [vmem:[#allocation64_spill] sm:$0xff] %v12245_v42  ;;  %v2825_v58 = vadd.f32 %v12242_v6, %v12245_v42  ;;  %vm3543_vm6 = vweird.f32 %v3378_v38 }
 0x461   :  { %3973 = vperm.xlu0 %8844, %v3881_v37   ;;  %v12248_v37 = vadd.f32 %v2707_v14, %v2594_v16  ;;  %v17049_v16 = vld [vmem:[#allocation70_spill] sm:$0xff]  ;;  %v3379_v4 = vadd.f32 1e-05, %v3253_v0 }
 0x462   :  { %v2254_v27 = vpop.f32.mrf.mxu1 }
 0x463   :  { %17046 = vst [vmem:[#allocation67_spill] sm:$0xff] %v12248_v37  ;;  %v2828_v52 = vadd.f32 %v12248_v37, %v12253_v51  ;;  %v2966_v56 = vmul.f32 %v12248_v37, %v12248_v37  ;;  %v2255_v14 = vadd.f32 %v2254_v27, %v17049_v16  ;;  %9045 = vrsqrt.f32 %v3379_v4  ;;  %v17053_v16 = vld [vmem:[#allocation48_spill] sm:$0xff] }
 0x464   :  { %v9042_v34 = vpop.eup %9041  ;;  %v2710_v53 = vpop.f32.mrf.mxu0  ;;  %vm3553_vm14 = vweird.f32 %v3379_v4 }
 0x465   :  { %v9044_v49 = vpop.eup %9043  ;;  %v3558_v50 = vmul.f32 %v9042_v34, %v3380_v9  ;;  %v3080_v5 = vadd.f32 %v2966_v56, %v2965_v46  ;;  %vm3564_vm5 = vweird.f32 %v9042_v34 }
 0x466   :  { %v3538_v57 = vmul.f32 %v9044_v49, %v3378_v38  ;;  %v2482_v25 = vpop.f32.mrf.mxu3  ;;  %v2596_v17 = vpop.f32.mrf.mxu2  ;;  %vm3544_vm2 = vweird.f32 %v9044_v49  ;;  %vm3565_vm3 = vmor %vm3563_vm4, %vm3564_vm5 }
 0x467   :  { %v3559_v32 = vmul.f32 %v9042_v34, %v3558_v50  ;;  %v2597_v8 = vadd.f32 %v2596_v17, %v2482_v25  ;;  %vm3545_vm7 = vmor %vm3543_vm6, %vm3544_vm2 }
 0x468   :  { %v3539_v20 = vmul.f32 %v9044_v49, %v3538_v57  ;;  %v3842_v57 = vld [vmem:[%s16325_s4 + $0x78] sm:$0xff] }
 0x469   :  { %v3560_v33 = vmul.f32 0.5, %v3559_v32  ;;  %v12272_v24 = vadd.f32 %v2710_v53, %v2597_v8  ;;  %v9046_v9 = vpop.eup %9045 }
 0x46a   :  { %v3540_v31 = vmul.f32 0.5, %v3539_v20  ;;  %v3548_v17 = vmul.f32 %v9046_v9, %v3379_v4  ;;  %v12289_v20 = vpop.xlane.xlu2 %2808  ;;  %vm3554_vm9 = vweird.f32 %v9046_v9  ;;  %v12307_v4 = vpop.xlane.xlu0 %2802 }
 0x46b   :  { %17050 = vst [vmem:[#allocation70_spill] sm:$0xff] %v12272_v24  ;;  %v2968_v61 = vmul.f32 %v12272_v24, %v12272_v24  ;;  %vm3555_vm10 = vmor %vm3553_vm14, %vm3554_vm9 }
 0x46c   :  { %v3549_v38 = vmul.f32 %v9046_v9, %v3548_v17 }
 0x46e   :  { %v2598_v53 = vpop.f32.mrf.mxu2 }
 0x472   :  { %v12294_v0 = vpop.xlane.xlu2 %3060 }
 0x475   :  { %3968 = vperm.xlu1 %8845, %v3880_v26   ;;  %v2963_v26 = vmul.f32 %v12245_v42, %v12245_v42 }
 0x477   :  { %v3077_v30 = vadd.f32 %v2964_v40, %v2963_v26  ;;  %v3541_v40 = vsub.f32 1.5, %v3540_v31 }
 0x479   :  { %v3542_v56 = vmul.f32 %v9044_v49, %v3541_v40  ;;  %v2256_v40 = vpop.f32.mrf.mxu1 }
 0x47b   :  { %v3546_v18 = vsel %vm3545_vm7, %v9044_v49, %v3542_v56  ;;  %v12292_v49 = vmul.f32 0.0051020407, %v11963_v59  ;;  %v17055_v56 = vld [vmem:[#allocation41_spill] sm:$0xff] }
 0x47c   :  { %v12297_v31 = vpop.xlane.xlu1 %2814 }
 0x47d   :  { %v3173_v59 = vmul.f32 %v12292_v49, %v12292_v49 }
 0x484   :  { %v12314_v17 = vpop.xlane.xlu1 %3066 }
 0x487   :  { %2826 = vadd.xlane.f32.xlu2 %v2825_v58  ;;  %v3561_v58 = vsub.f32 1.5, %v3560_v33  ;;  %v2484_v33 = vpop.f32.mrf.mxu3 }
 0x48b   :  { %2829 = vadd.xlane.f32.xlu0 %v2828_v52  ;;  %v12275_v52 = vadd.f32 %v17051_v29, %v2255_v14  ;;  %v3131_v14 = vmul.f32 0.0051020407, %v17053_v16  ;;  %v3841_v29 = vld [vmem:[%s16325_s4 + $0x70] sm:$0xff]  ;;  %v2599_v16 = vadd.f32 %v2598_v53, %v2484_v33  ;;  %v17063_v33 = vld [vmem:[#allocation73_spill] sm:$0xff] }
 0x48d   :  { %17052 = vst [vmem:[#allocation68_spill] sm:$0xff] %v12275_v52  ;;  %v2831_v26 = vadd.f32 %v12272_v24, %v12275_v52  ;;  %v2967_v46 = vmul.f32 %v12275_v52, %v12275_v52 }
 0x48f   :  { %3078 = vadd.xlane.f32.xlu2 %v3077_v30  ;;  %v3562_v30 = vmul.f32 %v9042_v34, %v3561_v58  ;;  %v3083_v36 = vadd.f32 %v2968_v61, %v2967_v46  ;;  %v3129_v61 = vmul.f32 0.0051020407, %v17055_v56 }
 0x491   :  { %v3566_v50 = vsel %vm3565_vm3, %v9042_v34, %v3562_v30  ;;  %v3550_v34 = vmul.f32 0.5, %v3549_v38  ;;  %v2259_v38 = vpop.f32.mrf.mxu1 }
 0x492   :  { %v3884_v32 = vmul.f32 %v3842_v57, %v3566_v50  ;;  %v2712_v50 = vpop.f32.mrf.mxu0  ;;  %v3215_v57 = vsub.f32 %v3131_v14, %v3173_v59  ;;  %v17058_v59 = vld [vmem:[#allocation75_spill] sm:$0xff] }
 0x493   :  { %3081 = vadd.xlane.f32.xlu0 %v3080_v5  ;;  %v3840_v5 = vld [vmem:[%s16325_s4 + $0x68] sm:$0xff]  ;;  %v3551_v27 = vsub.f32 1.5, %v3550_v34  ;;  %v2260_v56 = vadd.f32 %v2259_v38, %v17058_v59 }
 0x494   :  { %v3882_v25 = vmul.f32 %v3840_v5, %v3546_v18 }
 0x495   :  { %v3552_v8 = vmul.f32 %v9046_v9, %v3551_v27  ;;  %v12335_v53 = vadd.f32 %v17063_v33, %v2260_v56 }
 0x497   :  { %v3556_v58 = vsel %vm3555_vm10, %v9046_v9, %v3552_v8  ;;  %v3257_v9 = vmax.f32 %v3215_v57, 0.0  ;;  %v12318_v8 = vpop.xlane.xlu0 %3054  ;;  %v12325_v57 = vadd.f32 %v2712_v50, %v2599_v16  ;;  %17064 = vst [vmem:[#allocation75_spill] sm:$0xff] %v12335_v53  ;;  %v2971_v56 = vmul.f32 %v12335_v53, %v12335_v53 }
 0x498   :  { %v3883_v46 = vmul.f32 %v3841_v29, %v3556_v58  ;;  %v17057_v29 = vld [vmem:[#allocation72_spill] sm:$0xff] }
 0x499   :  { %v12316_v27 = vadd.f32 1e-05, %v3257_v9  ;;  %v2261_v12 = vpop.f32.mrf.mxu1 }
 0x49a   :  { %v2715_v58 = vpop.f32.mrf.mxu0 }
 0x49b   :  { %9047 = vrsqrt.f32 %v12316_v27  ;;  %vm3593_vm13 = vweird.f32 %v12316_v27 }
 0x49f   :  { %2832 = vadd.xlane.f32.xlu1 %v2831_v26  ;;  %v17054_v26 = vld [vmem:[#allocation47_spill] sm:$0xff] }
 0x4a0   :  { %v12303_v30 = vmul.f32 0.0051020407, %v17054_v26  ;;  %v2257_v26 = vadd.f32 %v2256_v40, %v17057_v29  ;;  %17059 = vst [vmem:[#allocation47_spill] sm:$0xff] %v12325_v57  ;;  %v12340_v40 = vpop.permute.xlu0 %3943 }
 0x4a1   :  { %v12346_v38 = vpop.eup %9047 }
 0x4a2   :  { %v3171_v18 = vmul.f32 %v12303_v30, %v12303_v30  ;;  %v3588_v16 = vmul.f32 %v12346_v38, %v12316_v27  ;;  %vm3594_vm11 = vweird.f32 %v12346_v38 }
 0x4a3   :  { %vm12405_vm12 = vmor %vm3593_vm13, %vm3594_vm11 }
 0x4a4   :  { %v3213_v5 = vsub.f32 %v3129_v61, %v3171_v18 }
 0x4a6   :  { %v3255_v34 = vmax.f32 %v3213_v5, 0.0  ;;  %v17061_v5 = vld [vmem:[#allocation71_spill] sm:$0xff] }
 0x4a7   :  { %3084 = vadd.xlane.f32.xlu1 %v3083_v36  ;;  %3988 = vperm.xlu0 %8844, %v3884_v32   ;;  %v12312_v36 = vpop.permute.xlu2 %3948  ;;  %v2487_v32 = vpop.f32.mrf.mxu3  ;;  %v12332_v9 = vadd.f32 %v17061_v5, %v2257_v26  ;;  %17065 = vst [vmem:[#allocation71_spill] sm:$0xff] %v12340_v40  ;;  %v17066_v5 = vld [vmem:[#allocation45_spill] sm:$0xff] }
 0x4a8   :  { %3978 = vperm.xlu2 %8846, %v3882_v25   ;;  %17056 = vst [vmem:[#allocation48_spill] sm:$0xff] %v12312_v36  ;;  %v2601_v25 = vpop.f32.mrf.mxu2  ;;  %v12322_v61 = vadd.f32 1e-05, %v3255_v34  ;;  %v12365_v33 = vmul.f32 0.0051020407, %v17066_v5 }
 0x4a9   :  { %v2602_v14 = vadd.f32 %v2601_v25, %v2487_v32  ;;  %17062 = vst [vmem:[#allocation72_spill] sm:$0xff] %v12332_v9  ;;  %v12337_v32 = vpop.permute.xlu1 %3953  ;;  %v2834_v50 = vadd.f32 %v12325_v57, %v12332_v9  ;;  %v2969_v59 = vmul.f32 %v12332_v9, %v12332_v9 }
 0x4aa   :  { %9049 = vrsqrt.f32 %v12322_v61  ;;  %vm3573_vm0 = vweird.f32 %v12322_v61 }
 0x4af   :  { %v2489_v63 = vpop.f32.mrf.mxu3 }
 0x4b0   :  { %v2603_v60 = vpop.f32.mrf.mxu2 }
 0x4b1   :  { %v12329_v18 = vpop.xlane.xlu2 %2817  ;;  %v2604_v10 = vadd.f32 %v2603_v60, %v2489_v63 }
 0x4b9   :  { %v12356_v29 = vpop.xlane.xlu2 %3069 }
 0x4c0   :  { %3983 = vperm.xlu1 %8845, %v3883_v46   ;;  %v12327_v46 = vadd.f32 %v2715_v58, %v2602_v14  ;;  %v2970_v14 = vmul.f32 %v12325_v57, %v12325_v57  ;;  %v12354_v58 = vpop.eup %9049  ;;  %v17067_v57 = vld [vmem:[#allocation100_spill] sm:$0xff] }
 0x4c1   :  { %v3130_v21 = vmul.f32 0.0051020407, %v17067_v57  ;;  %vm3574_vm15 = vweird.f32 %v12354_v58 }
 0x4c2   :  { %17060 = vst [vmem:[#allocation41_spill] sm:$0xff] %v12327_v46  ;;  %v2837_v25 = vadd.f32 %v12327_v46, %v12335_v53  ;;  %v2972_v34 = vmul.f32 %v12327_v46, %v12327_v46  ;;  %v3589_v46 = vmul.f32 %v12346_v38, %v3588_v16  ;;  %v3086_v24 = vadd.f32 %v2970_v14, %v2969_v59  ;;  %v3964_v16 = vpop.permute.xlu2 %3963  ;;  %v17069_v59 = vld [vmem:[#allocation11_spill] sm:$0xff]  ;;  %vm3575_vm1 = vmor %vm3573_vm0, %vm3574_vm15 }
 0x4c3   :  { %v3172_v53 = vmul.f32 %v12365_v33, %v12365_v33 }
 0x4c4   :  { %v3089_v52 = vadd.f32 %v2972_v34, %v2971_v56  ;;  %v3590_v5 = vmul.f32 0.5, %v3589_v46  ;;  %v17068_v34 = vld [vmem:[#allocation77_spill] sm:$0xff]  ;;  %v3301_v56 = vsub.f32 %v17069_v59, %v12113_v55  ;;  %v17070_v46 = vld [vmem:[#allocation10_spill] sm:$0xff] }
 0x4c5   :  { %v3214_v28 = vsub.f32 %v3130_v21, %v3172_v53  ;;  %v2262_v57 = vadd.f32 %v2261_v12, %v17068_v34  ;;  %v4551_v12 = vld [vmem:[%s16323_s2 + $0x50] sm:$0xff]  ;;  %v17072_v53 = vld [vmem:[#allocation76_spill] sm:$0xff] }
 0x4c6   :  { %v3591_v43 = vsub.f32 1.5, %v3590_v5  ;;  %v4141_v39 = vmul.f32 %v3964_v16, %v3301_v56  ;;  %v4603_v59 = vunpack.c.l.bf16 %v4551_v12  ;;  %v4604_v27 = vunpack.c.h.bf16 %v4551_v12 }
 0x4c7   :  { %v12358_v26 = vpop.xlane.xlu1 %2823  ;;  %v3256_v48 = vmax.f32 %v3214_v28, 0.0  ;;  %v12393_v5 = vadd.f32 %v17072_v53, %v2262_v57  ;;  %v17075_v28 = vld [vmem:[#allocation95_spill] sm:$0xff]  ;;  %v17078_v57 = vld [vmem:[#allocation44_spill] sm:$0xff] }
 0x4c8   :  { %v3592_v60 = vmul.f32 %v12346_v38, %v3591_v43  ;;  %v4552_v43 = vld [vmem:[%s16323_s2 + $0x58] sm:$0xff] }
 0x4c9   :  { %17073 = vst [vmem:[#allocation45_spill] sm:$0xff] %v12393_v5  ;;  %v12395_v34 = vadd.f32 1e-05, %v3256_v48  ;;  %v4605_v12 = vunpack.c.l.bf16 %v4552_v43 }
 0x4cb   :  { %9051 = vrsqrt.f32 %v12395_v34  ;;  %vm3583_vm2 = vweird.f32 %v12395_v34 }
 0x4cf   :  { %v12376_v14 = vpop.xlane.xlu1 %3075 }
 0x4d1   :  { %2835 = vadd.xlane.f32.xlu2 %v2834_v50  ;;  %2838 = vadd.xlane.f32.xlu0 %v2837_v25  ;;  %v12367_v50 = vpop.xlane.xlu0 %2811  ;;  %v3568_v25 = vmul.f32 %v12354_v58, %v12322_v61 }
 0x4d3   :  { %v3569_v9 = vmul.f32 %v12354_v58, %v3568_v25  ;;  %v3302_v25 = vsub.f32 %v17070_v46, %v12113_v55  ;;  %v17074_v55 = vld [vmem:[#allocation12_spill] sm:$0xff]  ;;  %v3596_v46 = vsel %vm12405_vm12, %v12346_v38, %v3592_v60 }
 0x4d5   :  { %v3570_v35 = vmul.f32 0.5, %v3569_v9  ;;  %v4142_v21 = vmul.f32 %v3964_v16, %v3302_v25 }
 0x4d7   :  { %v3571_v9 = vsub.f32 1.5, %v3570_v35  ;;  %v3303_v35 = vsub.f32 %v17074_v55, %v12153_v11  ;;  %v4478_v48 = vadd.f32 %v17078_v57, %v4142_v21  ;;  %v3845_v21 = vld [vmem:[%s16325_s4 + $0x90] sm:$0xff] }
 0x4d9   :  { %3087 = vadd.xlane.f32.xlu2 %v3086_v24  ;;  %3090 = vadd.xlane.f32.xlu0 %v3089_v52  ;;  %v2717_v24 = vpop.f32.mrf.mxu0  ;;  %v12379_v52 = vpop.xlane.xlu0 %3063  ;;  %v3572_v25 = vmul.f32 %v12354_v58, %v3571_v9  ;;  %v4688_v60 = vadd.f32 %v4604_v27, %v4478_v48 }
 0x4da   :  { %v12386_v63 = vadd.f32 %v2717_v24, %v2604_v10  ;;  %v3304_v10 = vsub.f32 %v17075_v28, %v12153_v11  ;;  %v4477_v24 = vadd.f32 %v17078_v57, %v4141_v39  ;;  %v4606_v28 = vunpack.c.h.bf16 %v4552_v43  ;;  %v17080_v57 = vld [vmem:[#allocation17_spill] sm:$0xff] }
 0x4db   :  { %v3843_v43 = vld [vmem:[%s16325_s4 + $0x80] sm:$0xff]  ;;  %v4772_v27 = vmax.f32 %v4688_v60, 0.0  ;;  %v12449_v60 = vmul.f32 0.0051020407, %v12124_v62 }
 0x4dc   :  { %17071 = vst [vmem:[#allocation73_spill] sm:$0xff] %v12386_v63  ;;  %v2840_v11 = vadd.f32 %v12386_v63, %v12393_v5  ;;  %v4687_v9 = vadd.f32 %v4603_v59, %v4477_v24  ;;  %v2974_v61 = vmul.f32 %v12386_v63, %v12386_v63  ;;  %v2973_v24 = vmul.f32 %v12393_v5, %v12393_v5 }
 0x4dd   :  { %17081 = vst [vmem:[#allocation77_spill] sm:$0xff] %v12449_v60 }
 0x4de   :  { %v4771_v48 = vmax.f32 %v4687_v9, 0.0 }
 0x4e1   :  { %v12418_v53 = vpop.permute.xlu0 %3958  ;;  %v2720_v62 = vpop.f32.mrf.mxu0 }
 0x4e2   :  { %17079 = vst [vmem:[#allocation100_spill] sm:$0xff] %v12418_v53 }
 0x4e7   :  { %v3969_v56 = vpop.permute.xlu1 %3968 }
 0x4e8   :  { %v4143_v55 = vmul.f32 %v3969_v56, %v3303_v35  ;;  %v4144_v39 = vmul.f32 %v3969_v56, %v3304_v10  ;;  %v3887_v35 = vmul.f32 %v3845_v21, %v3596_v46  ;;  %v3576_v10 = vsel %vm3575_vm1, %v12354_v58, %v3572_v25  ;;  %v9052_v46 = vpop.eup %9051 }
 0x4e9   :  { %v12437_v58 = vpop.xlane.xlu0 %2820  ;;  %v3092_v25 = vadd.f32 %v2974_v61, %v2973_v24  ;;  %v2264_v61 = vpop.f32.mrf.mxu1  ;;  %vm3584_vm5 = vweird.f32 %v9052_v46 }
 0x4ea   :  { %v4479_v37 = vadd.f32 %v17080_v57, %v4143_v55  ;;  %v4480_v38 = vadd.f32 %v17080_v57, %v4144_v39  ;;  %2841 = vadd.xlane.f32.xlu1 %v2840_v11  ;;  %v3885_v55 = vmul.f32 %v3843_v43, %v3576_v10  ;;  %v2606_v10 = vpop.f32.mrf.mxu2  ;;  %v3134_v43 = vmul.f32 0.0051020407, %v12143_v45  ;;  %vm3585_vm4 = vmor %vm3583_vm2, %vm3584_vm5  ;;  %v17084_v45 = vld [vmem:[#allocation46_spill] sm:$0xff]  ;;  %v2722_v40 = vpop.f32.mrf.mxu0 }
 0x4ec   :  { %v4689_v16 = vadd.f32 %v4605_v12, %v4479_v37  ;;  %v4690_v56 = vadd.f32 %v4606_v28, %v4480_v38  ;;  %v3578_v37 = vmul.f32 %v9052_v46, %v12395_v34  ;;  %v4553_v34 = vld [vmem:[%s16323_s2 + $0x60] sm:$0xff] }
 0x4ed   :  { %4003 = vperm.xlu0 %8844, %v3887_v35   ;;  %v2492_v35 = vpop.f32.mrf.mxu3  ;;  %v4607_v5 = vunpack.c.l.bf16 %v4553_v34 }
 0x4ee   :  { %v4773_v59 = vmax.f32 %v4689_v16, 0.0  ;;  %v4774_v11 = vmax.f32 %v4690_v56, 0.0  ;;  %v3579_v12 = vmul.f32 %v9052_v46, %v3578_v37  ;;  %v3176_v16 = vmul.f32 %v12449_v60, %v12449_v60  ;;  %v17175_v60 = vld [vmem:[#allocation48_spill] sm:$0xff] }
 0x4ef   :  { %v12462_v37 = vmul.f32 0.0051020407, %v17084_v45 }
 0x4f0   :  { %v12439_v39 = vpack.c.bf16 %v4773_v59, %v4771_v48  ;;  %v12441_v21 = vpack.c.bf16 %v4774_v11, %v4772_v27  ;;  %v3580_v28 = vmul.f32 0.5, %v3579_v12  ;;  %v17082_v59 = vld [vmem:[#allocation15_spill] sm:$0xff]  ;;  %v3218_v11 = vsub.f32 %v3134_v43, %v3176_v16 }
 0x4f1   :  { %3993 = vperm.xlu2 %8846, %v3885_v55   ;;  %v12444_v57 = vpop.xlane.xlu0 %3072  ;;  %v3305_v27 = vsub.f32 %v17082_v59, %v12117_v54  ;;  %v17083_v55 = vld [vmem:[#allocation96_spill] sm:$0xff]  ;;  %17085 = vst [vmem:[#allocation11_spill] sm:$0xff] %v12462_v37  ;;  %v17086_v59 = vld [vmem:[#allocation101_spill] sm:$0xff]  ;;  %v2266_v19 = vpop.f32.mrf.mxu1 }
 0x4f2   :  { %3093 = vadd.xlane.f32.xlu1 %v3092_v25  ;;  %v3581_v9 = vsub.f32 1.5, %v3580_v28  ;;  %v3306_v25 = vsub.f32 %v17083_v55, %v12117_v54  ;;  %v3132_v43 = vmul.f32 0.0051020407, %v17086_v59  ;;  %v3260_v16 = vmax.f32 %v3218_v11, 0.0  ;;  %v17087_v54 = vld [vmem:[#allocation13_spill] sm:$0xff]  ;;  %v2608_v51 = vpop.f32.mrf.mxu2  ;;  %v17089_v11 = vld [vmem:[#allocation19_spill] sm:$0xff] }
 0x4f3   :  { %v3307_v55 = vsub.f32 %v17087_v54, %v12233_v15  ;;  %v3308_v59 = vsub.f32 %v17089_v11, %v12233_v15  ;;  %v4608_v54 = vunpack.c.h.bf16 %v4553_v34  ;;  %v17091_v15 = vld [vmem:[#allocation81_spill] sm:$0xff] }
 0x4f4   :  { %v3582_v48 = vmul.f32 %v9052_v46, %v3581_v9  ;;  %v3844_v9 = vld [vmem:[%s16325_s4 + $0x88] sm:$0xff]  ;;  %v12482_v7 = vadd.f32 1e-05, %v3260_v16  ;;  %v2267_v11 = vadd.f32 %v2266_v19, %v17091_v15 }
 0x4f6   :  { %v3586_v63 = vsel %vm3585_vm4, %v9052_v46, %v3582_v48  ;;  %v3174_v46 = vmul.f32 %v12462_v37, %v12462_v37  ;;  %v17088_v48 = vld [vmem:[#allocation16_spill] sm:$0xff]  ;;  %9053 = vrsqrt.f32 %v12482_v7  ;;  %vm3623_vm6 = vweird.f32 %v12482_v7  ;;  %v17172_v37 = vld [vmem:[#allocation53_spill] sm:$0xff] }
 0x4f7   :  { %v3886_v45 = vmul.f32 %v3844_v9, %v3586_v63  ;;  %v17090_v63 = vld [vmem:[#allocation97_spill] sm:$0xff] }
 0x4f8   :  { %v3216_v3 = vsub.f32 %v3132_v43, %v3174_v46 }
 0x4f9   :  { %v3974_v56 = vpop.permute.xlu0 %3973 }
 0x4fa   :  { %v12446_v38 = vpop.xlane.xlu2 %2826  ;;  %v4145_v12 = vmul.f32 %v3974_v56, %v3305_v27  ;;  %v4146_v28 = vmul.f32 %v3974_v56, %v3306_v25  ;;  %v4554_v27 = vld [vmem:[%s16323_s2 + $0x68] sm:$0xff]  ;;  %v2494_v56 = vpop.f32.mrf.mxu3  ;;  %v3258_v34 = vmax.f32 %v3216_v3, 0.0 }
 0x4fb   :  { %v4609_v53 = vunpack.c.l.bf16 %v4554_v27  ;;  %v4610_v44 = vunpack.c.h.bf16 %v4554_v27 }
 0x4fc   :  { %v4481_v25 = vadd.f32 %v17088_v48, %v4145_v12  ;;  %v4482_v6 = vadd.f32 %v17088_v48, %v4146_v28  ;;  %v2609_v12 = vadd.f32 %v2608_v51, %v2494_v56  ;;  %v17093_v51 = vld [vmem:[#allocation79_spill] sm:$0xff] }
 0x4fd   :  { %v2265_v56 = vadd.f32 %v2264_v61, %v17093_v51 }
 0x4fe   :  { %v4691_v47 = vadd.f32 %v4607_v5, %v4481_v25  ;;  %v4692_v48 = vadd.f32 %v4608_v54, %v4482_v6  ;;  %v12488_v16 = vadd.f32 %v2722_v40, %v2609_v12  ;;  %v17094_v25 = vld [vmem:[#allocation80_spill] sm:$0xff]  ;;  %v12494_v6 = vadd.f32 1e-05, %v3258_v34  ;;  %v17097_v40 = vld [vmem:[#allocation78_spill] sm:$0xff]  ;;  %v17099_v34 = vld [vmem:[#allocation103_spill] sm:$0xff] }
 0x500   :  { %17092 = vst [vmem:[#allocation10_spill] sm:$0xff] %v12488_v16  ;;  %9055 = vrsqrt.f32 %v12494_v6  ;;  %vm3603_vm14 = vweird.f32 %v12494_v6 }
 0x502   :  { %v12454_v24 = vpop.xlane.xlu2 %3078 }
 0x50a   :  { %v3979_v42 = vpop.permute.xlu2 %3978 }
 0x50b   :  { %v4147_v13 = vmul.f32 %v3979_v42, %v3307_v55  ;;  %3998 = vperm.xlu1 %8845, %v3886_v45   ;;  %v4148_v36 = vmul.f32 %v3979_v42, %v3308_v59  ;;  %v2607_v55 = vadd.f32 %v2606_v10, %v2492_v35  ;;  %v4775_v42 = vmax.f32 %v4691_v47, 0.0  ;;  %v9054_v47 = vpop.eup %9053  ;;  %v12508_v35 = vpop.xlane.xlu0 %2829 }
 0x50c   :  { %v12492_v45 = vadd.f32 %v17094_v25, %v2267_v11  ;;  %v3618_v61 = vmul.f32 %v9054_v47, %v12482_v7  ;;  %v12519_v12 = vpop.eup %9055  ;;  %v2497_v25 = vpop.f32.mrf.mxu3  ;;  %vm3624_vm3 = vweird.f32 %v9054_v47  ;;  %v4556_v7 = vld [vmem:[%s16323_s2 + $0x78] sm:$0xff] }
 0x50d   :  { %v4483_v9 = vadd.f32 %v17090_v63, %v4147_v13  ;;  %v4484_v28 = vadd.f32 %v17090_v63, %v4148_v36  ;;  %v4776_v13 = vmax.f32 %v4692_v48, 0.0  ;;  %v12498_v3 = vadd.f32 %v2720_v62, %v2607_v55  ;;  %vm3625_vm7 = vmor %vm3623_vm6, %vm3624_vm3 }
 0x50e   :  { %17095 = vst [vmem:[#allocation76_spill] sm:$0xff] %v12492_v45  ;;  %v2978_v62 = vmul.f32 %v12488_v16, %v12488_v16  ;;  %v2977_v59 = vmul.f32 %v12492_v45, %v12492_v45  ;;  %v3619_v63 = vmul.f32 %v9054_v47, %v3618_v61  ;;  %v3598_v48 = vmul.f32 %v12519_v12, %v12494_v6  ;;  %v17101_v61 = vld [vmem:[#allocation83_spill] sm:$0xff] }
 0x50f   :  { %v4693_v43 = vadd.f32 %v4609_v53, %v4483_v9  ;;  %v4694_v46 = vadd.f32 %v4610_v44, %v4484_v28  ;;  %17096 = vst [vmem:[#allocation12_spill] sm:$0xff] %v12498_v3  ;;  %v2846_v44 = vadd.f32 %v12488_v16, %v12492_v45  ;;  %v12505_v53 = vadd.f32 %v17097_v40, %v2265_v56 }
 0x510   :  { %v2976_v54 = vmul.f32 %v12498_v3, %v12498_v3  ;;  %v3098_v9 = vadd.f32 %v2978_v62, %v2977_v59  ;;  %v3620_v55 = vmul.f32 0.5, %v3619_v63  ;;  %vm3604_vm9 = vweird.f32 %v12519_v12 }
 0x511   :  { %v4777_v27 = vmax.f32 %v4693_v43, 0.0  ;;  %v4778_v5 = vmax.f32 %v4694_v46, 0.0  ;;  %17098 = vst [vmem:[#allocation95_spill] sm:$0xff] %v12505_v53  ;;  %v2843_v10 = vadd.f32 %v12498_v3, %v12505_v53  ;;  %v2975_v28 = vmul.f32 %v12505_v53, %v12505_v53  ;;  %vm12571_vm10 = vmor %vm3603_vm14, %vm3604_vm9  ;;  %v17157_v3 = vld [vmem:[#allocation25_spill] sm:$0xff] }
 0x512   :  { %v12525_v15 = vpop.xlane.xlu1 %2832  ;;  %v12528_v43 = vmul.f32 0.0051020407, %v17099_v34  ;;  %v3621_v56 = vsub.f32 1.5, %v3620_v55 }
 0x513   :  { %v12496_v19 = vpack.c.bf16 %v4777_v27, %v4775_v42  ;;  %v12500_v36 = vpack.c.bf16 %v4778_v5, %v4776_v13  ;;  %v3095_v11 = vadd.f32 %v2976_v54, %v2975_v28  ;;  %v12530_v46 = vpop.xlane.xlu0 %3081  ;;  %v3133_v42 = vmul.f32 0.0051020407, %v12046_v2  ;;  %v2269_v13 = vpop.f32.mrf.mxu1  ;;  %v17102_v28 = vld [vmem:[#allocation60_spill] sm:$0xff] }
 0x514   :  { %17100 = vst [vmem:[#allocation44_spill] sm:$0xff] %v12528_v43  ;;  %v3599_v27 = vmul.f32 %v12519_v12, %v3598_v48  ;;  %v3175_v51 = vmul.f32 %v12528_v43, %v12528_v43  ;;  %v2270_v62 = vadd.f32 %v2269_v13, %v17101_v61  ;;  %v3311_v48 = vsub.f32 %v17102_v28, %v12230_v23  ;;  %v3848_v13 = vld [vmem:[%s16325_s4 + $0xa8] sm:$0xff] }
 0x516   :  { %v3217_v5 = vsub.f32 %v3133_v42, %v3175_v51  ;;  %v3600_v40 = vmul.f32 0.5, %v3599_v27  ;;  %v4835_v42 = vlaneseq }
 0x517   :  { %2847 = vadd.xlane.f32.xlu0 %v2846_v44  ;;  %v2611_v44 = vpop.f32.mrf.mxu2 }
 0x518   :  { %v2612_v59 = vadd.f32 %v2611_v44, %v2497_v25  ;;  %v3259_v2 = vmax.f32 %v3217_v5, 0.0  ;;  %v3601_v55 = vsub.f32 1.5, %v3600_v40  ;;  %v17105_v25 = vld [vmem:[#allocation82_spill] sm:$0xff]  ;;  %v17107_v40 = vld [vmem:[#allocation21_spill] sm:$0xff]  ;;  %v4836_v28 = vand.u32 127, %v4835_v42 }
 0x519   :  { %v12553_v44 = vadd.f32 %v17105_v25, %v2270_v62  ;;  %v3309_v61 = vsub.f32 %v17107_v40, %v12262_v1  ;;  %v17109_v62 = vld [vmem:[#allocation8_spill] sm:$0xff] }
 0x51a   :  { %2844 = vadd.xlane.f32.xlu2 %v2843_v10  ;;  %v3622_v10 = vmul.f32 %v9054_v47, %v3621_v56  ;;  %v12537_v63 = vpop.xlane.xlu1 %3084  ;;  %v4837_v6 = vadd.s32 128, %v4836_v28 }
 0x51b   :  { %v3989_v54 = vpop.permute.xlu0 %3988  ;;  %17106 = vst [vmem:[#allocation15_spill] sm:$0xff] %v12553_v44 }
 0x51c   :  { %v4151_v27 = vmul.f32 %v3989_v54, %v3311_v48  ;;  %v3626_v56 = vsel %vm3625_vm7, %v9054_v47, %v3622_v10  ;;  %v17108_v47 = vld [vmem:[#allocation20_spill] sm:$0xff]  ;;  %vm4839_vm11 = vcmp.lt.s32.totalorder %v4837_v6, 196  ;;  %v2271_v6 = vpop.f32.mrf.mxu1 }
 0x51d   :  { %v3310_v10 = vsub.f32 %v17108_v47, %v12262_v1  ;;  %vm12588_vm13 = vmpackc.low %vm4839_vm11, %vm4839_vm11 }
 0x51e   :  { %v4487_v48 = vadd.f32 %v17109_v62, %v4151_v27 }
 0x51f   :  { %3099 = vadd.xlane.f32.xlu0 %v3098_v9  ;;  %v2725_v9 = vpop.f32.mrf.mxu0 }
 0x520   :  { %v12547_v5 = vadd.f32 %v2725_v9, %v2612_v59  ;;  %v3602_v59 = vmul.f32 %v12519_v12, %v3601_v55  ;;  %v4555_v9 = vld [vmem:[%s16323_s2 + $0x70] sm:$0xff] }
 0x521   :  { %v4611_v42 = vunpack.c.l.bf16 %v4555_v9  ;;  %v4612_v40 = vunpack.c.h.bf16 %v4555_v9 }
 0x522   :  { %3096 = vadd.xlane.f32.xlu2 %v3095_v11  ;;  %v17103_v11 = vld [vmem:[#allocation50_spill] sm:$0xff]  ;;  %17104 = vst [vmem:[#allocation17_spill] sm:$0xff] %v12547_v5  ;;  %v2849_v1 = vadd.f32 %v12547_v5, %v12553_v44  ;;  %v3606_v27 = vsel %vm12571_vm10, %v12519_v12, %v3602_v59  ;;  %v2980_v9 = vmul.f32 %v12547_v5, %v12547_v5 }
 0x523   :  { %v3312_v34 = vsub.f32 %v17103_v11, %v12230_v23  ;;  %v12555_v23 = vadd.f32 1e-05, %v3259_v2  ;;  %v4613_v11 = vunpack.c.l.bf16 %v4556_v7  ;;  %v2979_v12 = vmul.f32 %v12553_v44, %v12553_v44  ;;  %v17152_v44 = vld [vmem:[#allocation9_spill] sm:$0xff] }
 0x525   :  { %v4152_v51 = vmul.f32 %v3989_v54, %v3312_v34  ;;  %v3890_v54 = vmul.f32 %v3848_v13, %v3626_v56  ;;  %v4614_v34 = vunpack.c.h.bf16 %v4556_v7  ;;  %9057 = vrsqrt.f32 %v12555_v23 }
 0x526   :  { %vm3613_vm15 = vweird.f32 %v12555_v23 }
 0x527   :  { %v4488_v2 = vadd.f32 %v17109_v62, %v4152_v51  ;;  %v17112_v51 = vld [vmem:[#allocation7_spill] sm:$0xff] }
 0x532   :  { %v3984_v25 = vpop.permute.xlu1 %3983 }
 0x533   :  { %v4149_v55 = vmul.f32 %v3984_v25, %v3309_v61  ;;  %v4150_v13 = vmul.f32 %v3984_v25, %v3310_v10  ;;  %4018 = vperm.xlu0 %8844, %v3890_v54   ;;  %v3846_v61 = vld [vmem:[%s16325_s4 + $0x98] sm:$0xff]  ;;  %v4697_v10 = vadd.f32 %v4613_v11, %v4487_v48  ;;  %v4698_v54 = vadd.f32 %v4614_v34, %v4488_v2  ;;  %v8504_v48 = vld [vmem:[%s16327_s6 + $0x12c] sm:$0xf0] }
 0x534   :  { %v3888_v16 = vmul.f32 %v3846_v61, %v3606_v27  ;;  %v12600_v27 = vmul.f32 0.0051020407, %v12289_v20 }
 0x535   :  { %v4485_v7 = vadd.f32 %v17112_v51, %v4149_v55  ;;  %v4486_v47 = vadd.f32 %v17112_v51, %v4150_v13  ;;  %2850 = vadd.xlane.f32.xlu1 %v2849_v1  ;;  %v4781_v56 = vmax.f32 %v4697_v10, 0.0  ;;  %v4782_v1 = vmax.f32 %v4698_v54, 0.0  ;;  %v9058_v55 = vpop.eup %9057 }
 0x536   :  { %v3101_v13 = vadd.f32 %v2980_v9, %v2979_v12  ;;  %v3608_v11 = vmul.f32 %v9058_v55, %v12555_v23  ;;  %vm3614_vm12 = vweird.f32 %v9058_v55  ;;  %v12610_v10 = vmul.f32 0.0051020407, %v12329_v18  ;;  %v3847_v23 = vld [vmem:[%s16325_s4 + $0xa0] sm:$0xff] }
 0x537   :  { %v4695_v62 = vadd.f32 %v4611_v42, %v4485_v7  ;;  %v4696_v25 = vadd.f32 %v4612_v40, %v4486_v47  ;;  %v2499_v42 = vpop.f32.mrf.mxu3  ;;  %v2613_v40 = vpop.f32.mrf.mxu2  ;;  %v3137_v7 = vmul.f32 0.0051020407, %v12294_v0  ;;  %v3140_v0 = vmul.f32 0.0051020407, %v12356_v29  ;;  %vm3615_vm0 = vmor %vm3613_vm15, %vm3614_vm12 }
 0x538   :  { %v3609_v34 = vmul.f32 %v9058_v55, %v3608_v11  ;;  %v2727_v47 = vpop.f32.mrf.mxu0  ;;  %v3182_v12 = vmul.f32 %v12610_v10, %v12610_v10  ;;  %v12635_v11 = vmul.f32 0.0051020407, %v12367_v50 }
 0x539   :  { %v4779_v59 = vmax.f32 %v4695_v62, 0.0  ;;  %v4780_v28 = vmax.f32 %v4696_v25, 0.0  ;;  %v2274_v62 = vpop.f32.mrf.mxu1  ;;  %v3135_v25 = vmul.f32 0.0051020407, %v12318_v8 }
 0x53a   :  { %4008 = vperm.xlu2 %8846, %v3888_v16   ;;  %v3610_v16 = vmul.f32 0.5, %v3609_v34  ;;  %v3224_v29 = vsub.f32 %v3140_v0, %v3182_v12 }
 0x53b   :  { %v5022_v51 = vpack.c.bf16 %v4781_v56, %v4779_v59  ;;  %v8630_v2 = vpack.c.bf16 %v4782_v1, %v4780_v28  ;;  %v17116_v1 = vld [vmem:[#allocation87_spill] sm:$0xff] }
 0x53c   :  { %v3266_v34 = vmax.f32 %v3224_v29, 0.0 }
 0x53d   :  { %3102 = vadd.xlane.f32.xlu1 %v3101_v13  ;;  %5428 = vmatpush.bf16.msrb.mxu1 %v5022_v51  ;;  %v2275_v13 = vadd.f32 %v2274_v62, %v17116_v1 }
 0x53e   :  { %8631 = vmatpush.bf16.msk.msra.mxu0 %vm12588_vm13, %v8630_v2  ;;  %v12629_v2 = vmul.f32 0.0051020407, %v12446_v38  ;;  %v12647_v50 = vadd.f32 1e-05, %v3266_v34 }
 0x53f   :  { %v2616_v54 = vpop.f32.mrf.mxu2 }
 0x540   :  { %v2730_v28 = vpop.f32.mrf.mxu0  ;;  %v3185_v38 = vmul.f32 %v12629_v2, %v12629_v2  ;;  %vm3683_vm6 = vweird.f32 %v12647_v50 }
 0x541   :  { %5429 = vmatpush.bf16.msrb.mxu1 %v12496_v19  ;;  %v3611_v19 = vsub.f32 1.5, %v3610_v16  ;;  %v3143_v16 = vmul.f32 0.0051020407, %v12454_v24 }
 0x542   :  { %8634 = vmatpush.bf16.msk.msra.mxu0 %vm12588_vm13, %v12500_v36  ;;  %v3179_v36 = vmul.f32 %v12600_v27, %v12600_v27 }
 0x543   :  { %v3612_v20 = vmul.f32 %v9058_v55, %v3611_v19  ;;  %v3227_v0 = vsub.f32 %v3143_v16, %v3185_v38 }
 0x544   :  { %v3221_v61 = vsub.f32 %v3137_v7, %v3179_v36  ;;  %v17118_v7 = vld [vmem:[#allocation86_spill] sm:$0xff]  ;;  %v2614_v36 = vadd.f32 %v2613_v40, %v2499_v42 }
 0x545   :  { %5430 = vmatpush.bf16.msrb.mxu1 %v12439_v39  ;;  %v2502_v39 = vpop.f32.mrf.mxu3  ;;  %v3616_v18 = vsel %vm3615_vm0, %v9058_v55, %v3612_v20  ;;  %v12639_v19 = vadd.f32 %v17118_v7, %v2275_v13  ;;  %v3138_v20 = vmul.f32 0.0051020407, %v12379_v52 }
 0x546   :  { %8637 = vmatpush.bf16.msk.msra.mxu0 %vm12588_vm13, %v12441_v21  ;;  %v12614_v21 = vmul.f32 0.0051020407, %v12307_v4  ;;  %v3263_v9 = vmax.f32 %v3221_v61, 0.0  ;;  %v2617_v59 = vadd.f32 %v2616_v54, %v2502_v39  ;;  %v3889_v51 = vmul.f32 %v3847_v23, %v3616_v18  ;;  %v17120_v39 = vld [vmem:[#allocation85_spill] sm:$0xff] }
 0x547   :  { %17119 = vst [vmem:[#allocation101_spill] sm:$0xff] %v12639_v19  ;;  %v2272_v54 = vadd.f32 %v2271_v6, %v17120_v39  ;;  %v12653_v42 = vadd.f32 %v2727_v47, %v2614_v36  ;;  %v12663_v18 = vmul.f32 0.0051020407, %v12437_v58  ;;  %v3269_v23 = vmax.f32 %v3227_v0, 0.0 }
 0x548   :  { %17115 = vst [vmem:[#allocation96_spill] sm:$0xff] %v12614_v21  ;;  %v3177_v4 = vmul.f32 %v12614_v21, %v12614_v21  ;;  %v12625_v56 = vadd.f32 1e-05, %v3263_v9  ;;  %v12631_v55 = vadd.f32 %v2730_v28, %v2617_v59  ;;  %v3180_v9 = vmul.f32 %v12635_v11, %v12635_v11 }
 0x549   :  { %17121 = vst [vmem:[#allocation13_spill] sm:$0xff] %v12653_v42  ;;  %v2983_v59 = vmul.f32 %v12639_v19, %v12639_v19  ;;  %v3183_v58 = vmul.f32 %v12663_v18, %v12663_v18  ;;  %v12676_v1 = vadd.f32 1e-05, %v3269_v23  ;;  %v12688_v36 = vmul.f32 0.0051020407, %v12508_v35 }
 0x54a   :  { %v3219_v8 = vsub.f32 %v3135_v25, %v3177_v4  ;;  %17117 = vst [vmem:[#allocation46_spill] sm:$0xff] %v12631_v55  ;;  %9059 = vrsqrt.f32 %v12625_v56  ;;  %v2855_v24 = vadd.f32 %v12631_v55, %v12639_v19  ;;  %v3222_v52 = vsub.f32 %v3138_v20, %v3180_v9  ;;  %v17122_v25 = vld [vmem:[#allocation84_spill] sm:$0xff] }
 0x54b   :  { %v12658_v12 = vadd.f32 %v17122_v25, %v2272_v54  ;;  %v2984_v6 = vmul.f32 %v12631_v55, %v12631_v55  ;;  %17124 = vst [vmem:[#allocation19_spill] sm:$0xff] %v12663_v18  ;;  %9061 = vrsqrt.f32 %v12647_v50  ;;  %v3141_v4 = vmul.f32 0.0051020407, %v12444_v57  ;;  %v17150_v55 = vld [vmem:[#allocation94_spill] sm:$0xff] }
 0x54c   :  { %v3261_v61 = vmax.f32 %v3219_v8, 0.0  ;;  %v3264_v28 = vmax.f32 %v3222_v52, 0.0  ;;  %v2982_v57 = vmul.f32 %v12653_v42, %v12653_v42  ;;  %v3144_v54 = vmul.f32 0.0051020407, %v12530_v46 }
 0x54d   :  { %17123 = vst [vmem:[#allocation16_spill] sm:$0xff] %v12658_v12  ;;  %v2852_v29 = vadd.f32 %v12653_v42, %v12658_v12  ;;  %v3107_v13 = vadd.f32 %v2984_v6, %v2983_v59  ;;  %v3225_v16 = vsub.f32 %v3141_v4, %v3183_v58  ;;  %v3186_v35 = vmul.f32 %v12688_v36, %v12688_v36 }
 0x54e   :  { %v12655_v40 = vadd.f32 1e-05, %v3261_v61  ;;  %v12681_v34 = vadd.f32 1e-05, %v3264_v28  ;;  %v2981_v61 = vmul.f32 %v12658_v12, %v12658_v12  ;;  %v12705_v6 = vmul.f32 0.0051020407, %v12145_v41 }
 0x54f   :  { %v3267_v39 = vmax.f32 %v3225_v16, 0.0  ;;  %v3136_v28 = vmul.f32 0.0051020407, %v12173_v22  ;;  %v2618_v16 = vpop.f32.mrf.mxu2  ;;  %vm3653_vm5 = vweird.f32 %v12625_v56  ;;  %vm3713_vm12 = vweird.f32 %v12676_v1 }
 0x550   :  { %v12651_v62 = vpop.eup %9059  ;;  %9063 = vrsqrt.f32 %v12655_v40  ;;  %v3104_v9 = vadd.f32 %v2982_v57, %v2981_v61  ;;  %17125 = vst [vmem:[#allocation97_spill] sm:$0xff] %v12705_v6  ;;  %v3178_v41 = vmul.f32 %v12705_v6, %v12705_v6  ;;  %vm3633_vm9 = vweird.f32 %v12655_v40 }
 0x551   :  { %v3648_v47 = vmul.f32 %v12651_v62, %v12625_v56  ;;  %v12679_v8 = vpop.eup %9061  ;;  %9065 = vrsqrt.f32 %v12676_v1  ;;  %v12707_v23 = vadd.f32 1e-05, %v3267_v39  ;;  %vm3654_vm1 = vweird.f32 %v12651_v62 }
 0x552   :  { %v3678_v38 = vmul.f32 %v12679_v8, %v12647_v50  ;;  %9067 = vrsqrt.f32 %v12681_v34  ;;  %v3220_v61 = vsub.f32 %v3136_v28, %v3178_v41  ;;  %vm3655_vm2 = vmor %vm3653_vm5, %vm3654_vm1  ;;  %vm3684_vm4 = vweird.f32 %v12679_v8 }
 0x553   :  { %9069 = vrsqrt.f32 %v12707_v23  ;;  %vm12752_vm7 = vmor %vm3683_vm6, %vm3684_vm4  ;;  %vm3663_vm0 = vweird.f32 %v12681_v34 }
 0x554   :  { %v3679_v52 = vmul.f32 %v12679_v8, %v3678_v38  ;;  %v3262_v28 = vmax.f32 %v3220_v61, 0.0 }
 0x556   :  { %4013 = vperm.xlu1 %8845, %v3889_v51   ;;  %v3649_v51 = vmul.f32 %v12651_v62, %v3648_v47  ;;  %v12685_v7 = vpop.eup %9063  ;;  %v3228_v47 = vsub.f32 %v3144_v54, %v3186_v35  ;;  %v3680_v4 = vmul.f32 0.5, %v3679_v52  ;;  %v3851_v54 = vld [vmem:[%s16325_s4 + $0xc0] sm:$0xff]  ;;  %v12729_v35 = vmul.f32 0.0051020407, %v12297_v31 }
 0x557   :  { %v3628_v0 = vmul.f32 %v12685_v7, %v12655_v40  ;;  %v12702_v25 = vpop.eup %9065  ;;  %vm3634_vm3 = vweird.f32 %v12685_v7 }
 0x558   :  { %v3650_v20 = vmul.f32 0.5, %v3649_v51  ;;  %v12710_v59 = vpop.eup %9067  ;;  %v2504_v51 = vpop.f32.mrf.mxu3  ;;  %17126 = vst [vmem:[#allocation81_spill] sm:$0xff] %v12729_v35  ;;  %vm12768_vm14 = vmor %vm3633_vm9, %vm3634_vm3  ;;  %vm3714_vm10 = vweird.f32 %v12702_v25 }
 0x559   :  { %v3629_v46 = vmul.f32 %v12685_v7, %v3628_v0  ;;  %v3658_v22 = vmul.f32 %v12710_v59, %v12681_v34  ;;  %v2619_v0 = vadd.f32 %v2618_v16, %v2504_v51  ;;  %vm3664_vm11 = vweird.f32 %v12710_v59  ;;  %vm3715_vm15 = vmor %vm3713_vm12, %vm3714_vm10  ;;  %v3852_v34 = vld [vmem:[%s16325_s4 + $0xc8] sm:$0xff] }
 0x55a   :  { %vm3665_vm1 = vmor %vm3663_vm0, %vm3664_vm11 }
 0x55b   :  { %v3630_v57 = vmul.f32 0.5, %v3629_v46  ;;  %v12734_v46 = vpop.eup %9069 }
 0x55c   :  { %vm3694_vm5 = vweird.f32 %v12734_v46 }
 0x55d   :  { %2856 = vadd.xlane.f32.xlu0 %v2855_v24  ;;  %v3651_v24 = vsub.f32 1.5, %v3650_v20  ;;  %v3681_v20 = vsub.f32 1.5, %v3680_v4  ;;  %v3631_v52 = vsub.f32 1.5, %v3630_v57 }
 0x55f   :  { %v3652_v58 = vmul.f32 %v12651_v62, %v3651_v24  ;;  %v2732_v24 = vpop.f32.mrf.mxu0  ;;  %v3682_v31 = vmul.f32 %v12679_v8, %v3681_v20  ;;  %v3632_v57 = vmul.f32 %v12685_v7, %v3631_v52 }
 0x560   :  { %v12740_v51 = vadd.f32 %v2732_v24, %v2619_v0  ;;  %v12773_v24 = vmul.f32 0.0051020407, %v12358_v26 }
 0x561   :  { %v3656_v39 = vsel %vm3655_vm2, %v12651_v62, %v3652_v58  ;;  %v3139_v62 = vmul.f32 0.0051020407, %v12314_v17  ;;  %v3688_v17 = vmul.f32 %v12734_v46, %v12707_v23  ;;  %v3686_v50 = vsel %vm12752_vm7, %v12679_v8, %v3682_v31 }
 0x562   :  { %v3893_v4 = vmul.f32 %v3851_v54, %v3656_v39  ;;  %17128 = vst [vmem:[#allocation79_spill] sm:$0xff] %v12740_v51  ;;  %v3636_v8 = vsel %vm12768_vm14, %v12685_v7, %v3632_v57  ;;  %v3184_v7 = vmul.f32 %v12773_v24, %v12773_v24  ;;  %v2986_v31 = vmul.f32 %v12740_v51, %v12740_v51 }
 0x563   :  { %2853 = vadd.xlane.f32.xlu2 %v2852_v29  ;;  %v3708_v29 = vmul.f32 %v12702_v25, %v12676_v1  ;;  %v3689_v40 = vmul.f32 %v12734_v46, %v3688_v17  ;;  %v3857_v1 = vld [vmem:[%s16325_s4 + $0xf0] sm:$0xff]  ;;  %vm3693_vm2 = vweird.f32 %v12707_v23 }
 0x564   :  { %vm3695_vm4 = vmor %vm3693_vm2, %vm3694_vm5 }
 0x565   :  { %3108 = vadd.xlane.f32.xlu0 %v3107_v13  ;;  %v3270_v13 = vmax.f32 %v3228_v47, 0.0  ;;  %v3709_v38 = vmul.f32 %v12702_v25, %v3708_v29  ;;  %v3659_v47 = vmul.f32 %v12710_v59, %v3658_v22  ;;  %v17127_v29 = vld [vmem:[#allocation89_spill] sm:$0xff]  ;;  %v12750_v22 = vadd.f32 1e-05, %v3262_v28  ;;  %v3849_v28 = vld [vmem:[%s16325_s4 + $0xb0] sm:$0xff] }
 0x567   :  { %v12731_v56 = vadd.f32 1e-05, %v3270_v13  ;;  %v3710_v41 = vmul.f32 0.5, %v3709_v38  ;;  %v3181_v13 = vmul.f32 %v12729_v35, %v12729_v35  ;;  %v3660_v16 = vmul.f32 0.5, %v3659_v47  ;;  %v17131_v38 = vld [vmem:[#allocation88_spill] sm:$0xff] }
 0x568   :  { %vm3643_vm14 = vweird.f32 %v12750_v22 }
 0x569   :  { %9071 = vrsqrt.f32 %v12731_v56  ;;  %v3223_v61 = vsub.f32 %v3139_v62, %v3181_v13  ;;  %v3711_v54 = vsub.f32 1.5, %v3710_v41  ;;  %v3661_v52 = vsub.f32 1.5, %v3660_v16 }
 0x56a   :  { %9073 = vrsqrt.f32 %v12750_v22  ;;  %v3891_v41 = vmul.f32 %v3849_v28, %v3636_v8  ;;  %v3690_v13 = vmul.f32 0.5, %v3689_v40  ;;  %vm3723_vm6 = vweird.f32 %v12731_v56 }
 0x56b   :  { %3105 = vadd.xlane.f32.xlu2 %v3104_v9  ;;  %v2276_v9 = vpop.f32.mrf.mxu1  ;;  %v3265_v26 = vmax.f32 %v3223_v61, 0.0  ;;  %v3662_v16 = vmul.f32 %v12710_v59, %v3661_v52 }
 0x56c   :  { %v2277_v58 = vadd.f32 %v2276_v9, %v17127_v29  ;;  %v3854_v9 = vld [vmem:[%s16325_s4 + $0xd8] sm:$0xff] }
 0x56d   :  { %v3896_v29 = vmul.f32 %v3854_v9, %v3686_v50  ;;  %v12799_v17 = vadd.f32 1e-05, %v3265_v26  ;;  %v3666_v0 = vsel %vm3665_vm1, %v12710_v59, %v3662_v16 }
 0x56e   :  { %v12757_v39 = vadd.f32 %v17131_v38, %v2277_v58  ;;  %v3712_v58 = vmul.f32 %v12702_v25, %v3711_v54  ;;  %v3691_v54 = vsub.f32 1.5, %v3690_v13 }
 0x56f   :  { %v12784_v62 = vpop.eup %9071  ;;  %9075 = vrsqrt.f32 %v12799_v17  ;;  %vm3673_vm12 = vweird.f32 %v12799_v17 }
 0x570   :  { %17132 = vst [vmem:[#allocation80_spill] sm:$0xff] %v12757_v39  ;;  %v2858_v47 = vadd.f32 %v12740_v51, %v12757_v39  ;;  %v2985_v61 = vmul.f32 %v12757_v39, %v12757_v39  ;;  %v3716_v20 = vsel %vm3715_vm15, %v12702_v25, %v3712_v58  ;;  %v9074_v38 = vpop.eup %9073  ;;  %v3692_v28 = vmul.f32 %v12734_v46, %v3691_v54  ;;  %v4214_v58 = vld [vmem:[%s16326_s5 + $0x48] sm:$0xff] }
 0x571   :  { %v3899_v52 = vmul.f32 %v3857_v1, %v3716_v20  ;;  %v3638_v40 = vmul.f32 %v9074_v38, %v12750_v22  ;;  %vm3724_vm3 = vweird.f32 %v12784_v62  ;;  %v3858_v1 = vld [vmem:[%s16325_s4 + $0xf8] sm:$0xff]  ;;  %vm3644_vm9 = vweird.f32 %v9074_v38  ;;  %v4227_v22 = vld [vmem:[%s16326_s5 + $0xb0] sm:$0xff]  ;;  %v17149_v51 = vld [vmem:[#allocation6_spill] sm:$0xff] }
 0x572   :  { %v3110_v9 = vadd.f32 %v2986_v31, %v2985_v61  ;;  %vm3725_vm7 = vmor %vm3723_vm6, %vm3724_vm3  ;;  %v4211_v61 = vld [vmem:[%s16326_s5 + $0x30] sm:$0xff] }
 0x573   :  { %v3639_v59 = vmul.f32 %v9074_v38, %v3638_v40  ;;  %vm3645_vm10 = vmor %vm3643_vm14, %vm3644_vm9  ;;  %v4226_v40 = vld [vmem:[%s16326_s5 + $0xa8] sm:$0xff] }
 0x575   :  { %v3640_v31 = vmul.f32 0.5, %v3639_v59 }
 0x577   :  { %v3641_v16 = vsub.f32 1.5, %v3640_v31 }
 0x579   :  { %4033 = vperm.xlu0 %8844, %v3893_v4   ;;  %v3142_v4 = vmul.f32 0.0051020407, %v12376_v14  ;;  %v3718_v14 = vmul.f32 %v12784_v62, %v12731_v56 }
 0x57b   :  { %v3226_v57 = vsub.f32 %v3142_v4, %v3184_v7  ;;  %v3719_v50 = vmul.f32 %v12784_v62, %v3718_v14  ;;  %v9076_v4 = vpop.eup %9075  ;;  %v3696_v7 = vsel %vm3695_vm4, %v12734_v46, %v3692_v28 }
 0x57c   :  { %v3668_v13 = vmul.f32 %v9076_v4, %v12799_v17  ;;  %vm3674_vm11 = vweird.f32 %v9076_v4  ;;  %v4212_v17 = vld [vmem:[%s16326_s5 + $0x38] sm:$0xff] }
 0x57d   :  { %v3268_v25 = vmax.f32 %v3226_v57, 0.0  ;;  %v3720_v8 = vmul.f32 0.5, %v3719_v50  ;;  %vm3675_vm15 = vmor %vm3673_vm12, %vm3674_vm11 }
 0x57e   :  { %v3669_v57 = vmul.f32 %v9076_v4, %v3668_v13 }
 0x57f   :  { %v12819_v26 = vadd.f32 1e-05, %v3268_v25 }
 0x580   :  { %2859 = vadd.xlane.f32.xlu1 %v2858_v47  ;;  %v3894_v47 = vmul.f32 %v3852_v34, %v3666_v0  ;;  %v3670_v54 = vmul.f32 0.5, %v3669_v57 }
 0x581   :  { %4048 = vperm.xlu0 %8844, %v3896_v29   ;;  %v3721_v29 = vsub.f32 1.5, %v3720_v8  ;;  %9077 = vrsqrt.f32 %v12819_v26  ;;  %vm3703_vm1 = vweird.f32 %v12819_v26 }
 0x582   :  { %v3671_v56 = vsub.f32 1.5, %v3670_v54  ;;  %v4222_v54 = vld [vmem:[%s16326_s5 + $0x88] sm:$0xff] }
 0x583   :  { %4023 = vperm.xlu2 %8846, %v3891_v41   ;;  %v3855_v41 = vld [vmem:[%s16325_s4 + $0xe0] sm:$0xff]  ;;  %v3722_v14 = vmul.f32 %v12784_v62, %v3721_v29  ;;  %v3853_v29 = vld [vmem:[%s16325_s4 + $0xd0] sm:$0xff] }
 0x584   :  { %v3897_v23 = vmul.f32 %v3855_v41, %v3696_v7  ;;  %v3672_v28 = vmul.f32 %v9076_v4, %v3671_v56  ;;  %v4221_v7 = vld [vmem:[%s16326_s5 + $0x80] sm:$0xff] }
 0x585   :  { %v3726_v20 = vsel %vm3725_vm7, %v12784_v62, %v3722_v14  ;;  %v3850_v62 = vld [vmem:[%s16325_s4 + $0xb8] sm:$0xff]  ;;  %v4238_v14 = vld [vmem:[%s16326_s5 + $0x108] sm:$0xff] }
 0x586   :  { %v3900_v0 = vmul.f32 %v3858_v1, %v3726_v20  ;;  %v3676_v59 = vsel %vm3675_vm15, %v9076_v4, %v3672_v28  ;;  %v4241_v20 = vld [vmem:[%s16326_s5 + $0x120] sm:$0xff] }
 0x587   :  { %v9078_v46 = vpop.eup %9077  ;;  %v3895_v41 = vmul.f32 %v3853_v29, %v3676_v59  ;;  %v7587_v59 = vld [vmem:[%s16329_s8 + $0x28] sm:$0xff]  ;;  %v4245_v29 = vld [vmem:[%s16326_s5 + $0x140] sm:$0xff] }
 0x588   :  { %3111 = vadd.xlane.f32.xlu1 %v3110_v9  ;;  %v3698_v50 = vmul.f32 %v9078_v46, %v12819_v26  ;;  %v3642_v9 = vmul.f32 %v9074_v38, %v3641_v16  ;;  %vm3704_vm0 = vweird.f32 %v9078_v46 }
 0x589   :  { %4063 = vperm.xlu0 %8844, %v3899_v52   ;;  %v12846_v52 = vpop.xlane.xlu2 %2835  ;;  %vm3705_vm5 = vmor %vm3703_vm1, %vm3704_vm0 }
 0x58a   :  { %v3699_v34 = vmul.f32 %v9078_v46, %v3698_v50  ;;  %v3646_v25 = vsel %vm3645_vm10, %v9074_v38, %v3642_v9  ;;  %v4225_v9 = vld [vmem:[%s16326_s5 + $0xa0] sm:$0xff] }
 0x58b   :  { %4038 = vperm.xlu2 %8846, %v3894_v47   ;;  %v3892_v47 = vmul.f32 %v3850_v62, %v3646_v25  ;;  %v4224_v62 = vld [vmem:[%s16326_s5 + $0x98] sm:$0xff] }
 0x58c   :  { %v3700_v8 = vmul.f32 0.5, %v3699_v34  ;;  %v4239_v34 = vld [vmem:[%s16326_s5 + $0x110] sm:$0xff] }
 0x58e   :  { %v3701_v38 = vsub.f32 1.5, %v3700_v8 }
 0x590   :  { %v3702_v13 = vmul.f32 %v9078_v46, %v3701_v38  ;;  %v4237_v38 = vld [vmem:[%s16326_s5 + $0x100] sm:$0xff] }
 0x591   :  { %4294 = vperm.xlu0 %8844, %v4214_v58   ;;  %v12858_v58 = vpop.xlane.xlu0 %2838  ;;  %v12863_v31 = vpop.xlane.xlu2 %3087 }
 0x592   :  { %v3706_v4 = vsel %vm3705_vm5, %v9078_v46, %v3702_v13  ;;  %v4228_v46 = vld [vmem:[%s16326_s5 + $0xb8] sm:$0xff]  ;;  %v7590_v13 = vld [vmem:[%s16329_s8 + $0x40] sm:$0xff] }
 0x593   :  { %4053 = vperm.xlu2 %8846, %v3897_v23   ;;  %v3856_v23 = vld [vmem:[%s16325_s4 + $0xe8] sm:$0xff] }
 0x594   :  { %v3898_v57 = vmul.f32 %v3856_v23, %v3706_v4  ;;  %v7583_v23 = vld [vmem:[%s16329_s8 + $0x8] sm:$0xff] }
 0x599   :  { %4279 = vperm.xlu0 %8844, %v4211_v61   ;;  %v12875_v16 = vpop.xlane.xlu0 %3090  ;;  %v4223_v61 = vld [vmem:[%s16326_s5 + $0x90] sm:$0xff]  ;;  %v12880_v26 = vpop.permute.xlu2 %3993 }
 0x59b   :  { %4068 = vperm.xlu2 %8846, %v3900_v0   ;;  %v4244_v0 = vld [vmem:[%s16326_s5 + $0x138] sm:$0xff] }
 0x5a1   :  { %4028 = vperm.xlu1 %8845, %v3892_v47   ;;  %4354 = vperm.xlu0 %8844, %v4226_v40   ;;  %v12888_v1 = vpop.permute.xlu0 %4003  ;;  %v12893_v50 = vpop.xlane.xlu2 %2844  ;;  %v7584_v40 = vld [vmem:[%s16329_s8 + $0x10] sm:$0xff]  ;;  %v4242_v47 = vld [vmem:[%s16326_s5 + $0x128] sm:$0xff] }
 0x5a3   :  { %4359 = vperm.xlu2 %8846, %v4227_v22   ;;  %v12919_v22 = vpop.xlane.xlu1 %2841 }
 0x5a9   :  { %4043 = vperm.xlu1 %8845, %v3895_v41   ;;  %4329 = vperm.xlu0 %8844, %v4221_v7   ;;  %v12901_v56 = vpop.xlane.xlu0 %2847  ;;  %v12906_v25 = vpop.xlane.xlu2 %3096 }
 0x5ab   :  { %4284 = vperm.xlu2 %8846, %v4212_v17   ;;  %v4240_v17 = vld [vmem:[%s16326_s5 + $0x118] sm:$0xff]  ;;  %v12942_v4 = vpop.xlane.xlu1 %3093 }
 0x5b1   :  { %4058 = vperm.xlu1 %8845, %v3898_v57   ;;  %4414 = vperm.xlu0 %8844, %v4238_v14   ;;  %v12917_v8 = vpop.xlane.xlu0 %3099  ;;  %v12921_v28 = vpop.permute.xlu2 %4008 }
 0x5b2   :  { %17135 = vst [vmem:[#allocation78_spill] sm:$0xff] %v12921_v28 }
 0x5b3   :  { %4339 = vperm.xlu2 %8846, %v4223_v61   ;;  %v4243_v61 = vld [vmem:[%s16326_s5 + $0x130] sm:$0xff] }
 0x5b9   :  { %4364 = vperm.xlu1 %8845, %v4228_v46   ;;  %4429 = vperm.xlu0 %8844, %v4241_v20   ;;  %v12932_v7 = vpop.permute.xlu0 %4018  ;;  %v7593_v46 = vld [vmem:[%s16329_s8 + $0x58] sm:$0xff]  ;;  %v12957_v20 = vpop.permute.xlu1 %3998 }
 0x5ba   :  { %17136 = vst [vmem:[#allocation103_spill] sm:$0xff] %v12932_v7  ;;  %v17169_v7 = vld [vmem:[#allocation49_spill] sm:$0xff] }
 0x5bb   :  { %4334 = vperm.xlu2 %8846, %v4222_v54   ;;  %17137 = vst [vmem:[#allocation83_spill] sm:$0xff] %v12957_v20  ;;  %v7586_v54 = vld [vmem:[%s16329_s8 + $0x20] sm:$0xff]  ;;  %v3329_v45 = vsub.f32 %v17169_v7, %v12600_v27  ;;  %v7599_v7 = vld [vmem:[%s16329_s8 + $0x88] sm:$0xff] }
 0x5c1   :  { %4349 = vperm.xlu1 %8845, %v4225_v9   ;;  %4444 = vperm.xlu0 %8844, %v4244_v0   ;;  %v12963_v9 = vmul.f32 0.0051020407, %v12846_v52  ;;  %v4246_v52 = vld [vmem:[%s16326_s5 + $0x148] sm:$0xff]  ;;  %v12992_v5 = vpop.xlane.xlu1 %2850 }
 0x5c2   :  { %17151 = vst [vmem:[#allocation82_spill] sm:$0xff] %v12992_v5 }
 0x5c3   :  { %4419 = vperm.xlu2 %8846, %v4239_v34   ;;  %17138 = vst [vmem:[#allocation60_spill] sm:$0xff] %v12963_v9  ;;  %v3146_v34 = vmul.f32 0.0051020407, %v12863_v31  ;;  %v7596_v31 = vld [vmem:[%s16329_s8 + $0x70] sm:$0xff] }
 0x5c9   :  { %4344 = vperm.xlu1 %8845, %v4224_v62   ;;  %7636 = vperm.xlu0 %8844, %v7584_v40   ;;  %v17139_v62 = vld [vmem:[#allocation69_spill] sm:$0xff]  ;;  %v17140_v40 = vld [vmem:[#allocation90_spill] sm:$0xff] }
 0x5cb   :  { %4434 = vperm.xlu2 %8846, %v4242_v47   ;;  %v3293_v47 = vsub.f32 %v17140_v40, %v17139_v62  ;;  %v17147_v40 = vld [vmem:[#allocation5_spill] sm:$0xff] }
 0x5d0   :  { %v12947_v14 = vpop.xlane.xlu0 %2856 }
 0x5d1   :  { %4409 = vperm.xlu1 %8845, %v4237_v38   ;;  %7651 = vperm.xlu0 %8844, %v7587_v59   ;;  %v17141_v38 = vld [vmem:[#allocation91_spill] sm:$0xff] }
 0x5d2   :  { %v3294_v59 = vsub.f32 %v17141_v38, %v17139_v62  ;;  %v17146_v62 = vld [vmem:[#allocation42_spill] sm:$0xff]  ;;  %v7589_v38 = vld [vmem:[%s16329_s8 + $0x38] sm:$0xff] }
 0x5d3   :  { %4449 = vperm.xlu2 %8846, %v4245_v29   ;;  %v17142_v29 = vld [vmem:[#allocation39_spill] sm:$0xff] }
 0x5d6   :  { %v12934_v41 = vpop.xlane.xlu2 %2853 }
 0x5d8   :  { %v12965_v0 = vpop.xlane.xlu0 %3108 }
 0x5d9   :  { %4424 = vperm.xlu1 %8845, %v4240_v17   ;;  %7666 = vperm.xlu0 %8844, %v7590_v13   ;;  %v17143_v17 = vld [vmem:[#allocation92_spill] sm:$0xff] }
 0x5da   :  { %v3295_v13 = vsub.f32 %v17143_v17, %v17142_v29  ;;  %v17148_v17 = vld [vmem:[#allocation102_spill] sm:$0xff] }
 0x5db   :  { %7631 = vperm.xlu2 %8846, %v7583_v23   ;;  %v3188_v23 = vmul.f32 %v12963_v9, %v12963_v9  ;;  %v3297_v39 = vsub.f32 %v17149_v51, %v17148_v17  ;;  %v3298_v19 = vsub.f32 %v17150_v55, %v17148_v17  ;;  %v17153_v9 = vld [vmem:[#allocation22_spill] sm:$0xff]  ;;  %v13004_v51 = vmul.f32 0.0051020407, %v12858_v58  ;;  %v17156_v55 = vld [vmem:[#allocation29_spill] sm:$0xff] }
 0x5dc   :  { %v13063_v42 = vmul.f32 %v17175_v60, %v3295_v13 }
 0x5dd   :  { %v3230_v12 = vsub.f32 %v3146_v34, %v3188_v23  ;;  %17155 = vst [vmem:[#allocation21_spill] sm:$0xff] %v13004_v51  ;;  %v4137_v20 = vmul.f32 %v12337_v32, %v3297_v39  ;;  %v17171_v23 = vld [vmem:[#allocation71_spill] sm:$0xff]  ;;  %v4138_v17 = vmul.f32 %v12337_v32, %v3298_v19  ;;  %v3331_v39 = vsub.f32 %v17172_v37, %v12635_v11  ;;  %v17174_v37 = vld [vmem:[#allocation52_spill] sm:$0xff] }
 0x5de   :  { %v12949_v57 = vpop.xlane.xlu2 %3105  ;;  %v13041_v43 = vmul.f32 %v17171_v23, %v3293_v47  ;;  %v13044_v28 = vmul.f32 %v17171_v23, %v3294_v59  ;;  %v4549_v47 = vld [vmem:[%s16323_s2 + $0x40] sm:$0xff]  ;;  %v17173_v23 = vld [vmem:[#allocation51_spill] sm:$0xff] }
 0x5df   :  { %v3272_v5 = vmax.f32 %v3230_v12, 0.0  ;;  %v3330_v32 = vsub.f32 %v17173_v23, %v12600_v27  ;;  %v3332_v12 = vsub.f32 %v17174_v37, %v12635_v11  ;;  %v17176_v27 = vld [vmem:[#allocation99_spill] sm:$0xff]  ;;  %v13077_v11 = vpop.xlane.xlu1 %3102  ;;  %v4599_v13 = vunpack.c.l.bf16 %v4549_v47  ;;  %v4566_v23 = vld [vmem:[%s16323_s2 + $0xc8] sm:$0xff] }
 0x5e0   :  { %17177 = vst [vmem:[#allocation20_spill] sm:$0xff] %v13077_v11  ;;  %v4474_v37 = vadd.f32 %v17176_v27, %v4138_v17  ;;  %v17184_v17 = vld [vmem:[#allocation24_spill] sm:$0xff] }
 0x5e1   :  { %4439 = vperm.xlu1 %8845, %v4243_v61   ;;  %7681 = vperm.xlu0 %8844, %v7593_v46   ;;  %v17145_v46 = vld [vmem:[#allocation93_spill] sm:$0xff]  ;;  %v13068_v6 = vadd.f32 1e-05, %v3272_v5 }
 0x5e3   :  { %7646 = vperm.xlu2 %8846, %v7586_v54   ;;  %v3296_v54 = vsub.f32 %v17145_v46, %v17142_v29  ;;  %v17154_v29 = vld [vmem:[#allocation26_spill] sm:$0xff]  ;;  %v17159_v46 = vld [vmem:[#allocation27_spill] sm:$0xff]  ;;  %9079 = vrsqrt.f32 %v13068_v6  ;;  %vm3743_vm2 = vweird.f32 %v13068_v6 }
 0x5e6   :  { %v12976_v61 = vpop.permute.xlu2 %4023 }
 0x5e7   :  { %17144 = vst [vmem:[#allocation50_spill] sm:$0xff] %v12976_v61  ;;  %v3147_v61 = vmul.f32 0.0051020407, %v12875_v16 }
 0x5e9   :  { %4454 = vperm.xlu1 %8845, %v4246_v52   ;;  %7696 = vperm.xlu0 %8844, %v7596_v31   ;;  %v3189_v31 = vmul.f32 %v13004_v51, %v13004_v51  ;;  %v7582_v51 = vld [vmem:[%s16329_s8] sm:$0xff] }
 0x5eb   :  { %7661 = vperm.xlu2 %8846, %v7589_v38   ;;  %v4034_v34 = vpop.permute.xlu0 %4033  ;;  %v3231_v59 = vsub.f32 %v3147_v61, %v3189_v31  ;;  %v13066_v38 = vmul.f32 %v17175_v60, %v3296_v54  ;;  %v7592_v61 = vld [vmem:[%s16329_s8 + $0x50] sm:$0xff]  ;;  %v4473_v31 = vadd.f32 %v17176_v27, %v4137_v20  ;;  %v4600_v20 = vunpack.c.h.bf16 %v4549_v47  ;;  %v17183_v54 = vld [vmem:[#allocation100_spill] sm:$0xff] }
 0x5ec   :  { %v4169_v19 = vmul.f32 %v4034_v34, %v3329_v45  ;;  %v4565_v45 = vld [vmem:[%s16323_s2 + $0xc0] sm:$0xff]  ;;  %v4170_v58 = vmul.f32 %v4034_v34, %v3330_v32  ;;  %v13108_v47 = vmul.f32 0.0051020407, %v12525_v15 }
 0x5ed   :  { %v3273_v53 = vmax.f32 %v3231_v59, 0.0  ;;  %v4631_v60 = vunpack.c.l.bf16 %v4565_v45  ;;  %v3149_v59 = vmul.f32 0.0051020407, %v12906_v25  ;;  %v4632_v15 = vunpack.c.h.bf16 %v4565_v45  ;;  %v7595_v45 = vld [vmem:[%s16329_s8 + $0x68] sm:$0xff] }
 0x5ee   :  { %v4039_v52 = vpop.permute.xlu2 %4038  ;;  %17186 = vst [vmem:[#allocation7_spill] sm:$0xff] %v13108_v47 }
 0x5ef   :  { %v4171_v16 = vmul.f32 %v4039_v52, %v3331_v39  ;;  %v4172_v21 = vmul.f32 %v4039_v52, %v3332_v12  ;;  %v17182_v39 = vsub.f32 %v17147_v40, %v17146_v62  ;;  %v4633_v52 = vunpack.c.l.bf16 %v4566_v23 }
 0x5f0   :  { %v13111_v40 = vadd.f32 %v4599_v13, %v4473_v31  ;;  %v13123_v27 = vadd.f32 1e-05, %v3273_v53  ;;  %v3145_v31 = vmul.f32 0.0051020407, %v12537_v63  ;;  %v17188_v13 = vld [vmem:[#allocation57_spill] sm:$0xff] }
 0x5f1   :  { %7626 = vperm.xlu1 %8845, %v7582_v51   ;;  %7711 = vperm.xlu0 %8844, %v7599_v7   ;;  %v13088_v51 = vmul.f32 0.0051020407, %v12893_v50  ;;  %v17181_v7 = vld [vmem:[#allocation18_spill] sm:$0xff]  ;;  %v13097_v35 = vmul.f32 %v17183_v54, %v17182_v39  ;;  %v4507_v34 = vadd.f32 %v17184_v17, %v4171_v16  ;;  %v17185_v50 = vsub.f32 %v17152_v44, %v17146_v62  ;;  %v7585_v44 = vld [vmem:[%s16329_s8 + $0x18] sm:$0xff]  ;;  %v7602_v62 = vld [vmem:[%s16329_s8 + $0xa0] sm:$0xff] }
 0x5f2   :  { %v4505_v11 = vadd.f32 %v17181_v7, %v4169_v19  ;;  %v4506_v32 = vadd.f32 %v17181_v7, %v4170_v58  ;;  %v4508_v19 = vadd.f32 %v17184_v17, %v4172_v21  ;;  %v4634_v16 = vunpack.c.h.bf16 %v4566_v23  ;;  %v17189_v39 = vld [vmem:[#allocation58_spill] sm:$0xff]  ;;  %v13137_v17 = vpop.permute.xlu1 %4013  ;;  %v17192_v63 = vld [vmem:[#allocation65_spill] sm:$0xff]  ;;  %v13147_v7 = vpop.eup %9079 }
 0x5f3   :  { %17180 = vst [vmem:[#allocation8_spill] sm:$0xff] %v13088_v51  ;;  %7676 = vperm.xlu2 %8846, %v7592_v61   ;;  %v13091_v5 = vpop.permute.xlu0 %4048  ;;  %v13105_v12 = vmul.f32 %v17183_v54, %v17185_v50  ;;  %v3191_v25 = vmul.f32 %v13088_v51, %v13088_v51  ;;  %v13127_v58 = vadd.f32 %v4600_v20, %v4474_v37  ;;  %v4571_v20 = vld [vmem:[%s16323_s2 + $0xf0] sm:$0xff]  ;;  %9081 = vrsqrt.f32 %v13123_v27 }
 0x5f4   :  { %v4715_v21 = vadd.f32 %v4631_v60, %v4505_v11  ;;  %v4717_v53 = vadd.f32 %v4633_v52, %v4507_v34  ;;  %17190 = vst [vmem:[#allocation86_spill] sm:$0xff] %v13137_v17  ;;  %v17191_v11 = vld [vmem:[#allocation64_spill] sm:$0xff]  ;;  %v3342_v37 = vsub.f32 %v17192_v63, %v12629_v2  ;;  %v3187_v34 = vmul.f32 %v13108_v47, %v13108_v47 }
 0x5f5   :  { %v3233_v23 = vsub.f32 %v3149_v59, %v3191_v25  ;;  %v3341_v60 = vsub.f32 %v17191_v11, %v12629_v2  ;;  %v4716_v59 = vadd.f32 %v4632_v15, %v4506_v32  ;;  %v17193_v2 = vld [vmem:[#allocation66_spill] sm:$0xff]  ;;  %v17194_v11 = vld [vmem:[#allocation67_spill] sm:$0xff]  ;;  %v4643_v32 = vunpack.c.l.bf16 %v4571_v20 }
 0x5f6   :  { %v13115_v61 = vpop.permute.xlu2 %4053  ;;  %v4801_v52 = vmax.f32 %v4717_v53, 0.0  ;;  %v3343_v25 = vsub.f32 %v17193_v2, %v12688_v36  ;;  %v3344_v63 = vsub.f32 %v17194_v11, %v12688_v36  ;;  %v4799_v54 = vmax.f32 %v4715_v21, 0.0  ;;  %v4572_v53 = vld [vmem:[%s16323_s2 + $0xf8] sm:$0xff]  ;;  %v17196_v2 = vld [vmem:[#allocation43_spill] sm:$0xff] }
 0x5f7   :  { %17187 = vst [vmem:[#allocation87_spill] sm:$0xff] %v13115_v61  ;;  %v3229_v50 = vsub.f32 %v3145_v31, %v3187_v34  ;;  %v3275_v15 = vmax.f32 %v3233_v23, 0.0  ;;  %v7588_v31 = vld [vmem:[%s16329_s8 + $0x30] sm:$0xff]  ;;  %vm3744_vm4 = vweird.f32 %v13147_v7  ;;  %vm3753_vm15 = vweird.f32 %v13123_v27 }
 0x5f8   :  { %vm13285_vm3 = vmor %vm3743_vm2, %vm3744_vm4 }
 0x5f9   :  { %7641 = vperm.xlu1 %8845, %v7585_v44   ;;  %7726 = vperm.xlu0 %8844, %v7602_v62   ;;  %v4718_v44 = vadd.f32 %v4634_v16, %v4508_v19  ;;  %v3738_v19 = vmul.f32 %v13147_v7, %v13068_v6  ;;  %v4644_v16 = vunpack.c.h.bf16 %v4571_v20  ;;  %v4646_v20 = vunpack.c.h.bf16 %v4572_v53 }
 0x5fa   :  { %v3271_v11 = vmax.f32 %v3229_v50, 0.0 }
 0x5fb   :  { %7691 = vperm.xlu2 %8846, %v7595_v45   ;;  %v4064_v62 = vpop.permute.xlu0 %4063  ;;  %v13161_v45 = vpack.c.bf16 %v4801_v52, %v4799_v54  ;;  %v4802_v34 = vmax.f32 %v4718_v44, 0.0  ;;  %v4550_v54 = vld [vmem:[%s16323_s2 + $0x48] sm:$0xff]  ;;  %v3739_v18 = vmul.f32 %v13147_v7, %v3738_v19 }
 0x5fc   :  { %v4181_v51 = vmul.f32 %v4064_v62, %v3341_v60  ;;  %v4182_v17 = vmul.f32 %v4064_v62, %v3342_v37  ;;  %v7605_v60 = vld [vmem:[%s16329_s8 + $0xb8] sm:$0xff]  ;;  %v4800_v37 = vmax.f32 %v4716_v59, 0.0 }
 0x5fd   :  { %17195 = vst [vmem:[#allocation85_spill] sm:$0xff] %v13161_v45  ;;  %v7598_v45 = vld [vmem:[%s16329_s8 + $0x80] sm:$0xff] }
 0x5fe   :  { %v4517_v47 = vadd.f32 %v17196_v2, %v4181_v51  ;;  %v4518_v36 = vadd.f32 %v17196_v2, %v4182_v17  ;;  %v4069_v21 = vpop.permute.xlu2 %4068  ;;  %v4645_v51 = vunpack.c.l.bf16 %v4572_v53  ;;  %v13181_v44 = vpack.c.bf16 %v4802_v34, %v4800_v37 }
 0x5ff   :  { %v4183_v62 = vmul.f32 %v4069_v21, %v3343_v25  ;;  %v4184_v23 = vmul.f32 %v4069_v21, %v3344_v63  ;;  %v13183_v25 = vpop.eup %9081  ;;  %v13185_v63 = vpop.xlane.xlu1 %2859  ;;  %v17200_v21 = vld [vmem:[#allocation31_spill] sm:$0xff]  ;;  %v4768_v2 = vmax.f32 %v13127_v58, 0.0  ;;  %v4602_v17 = vunpack.c.h.bf16 %v4550_v54 }
 0x600   :  { %v4727_v59 = vadd.f32 %v4643_v32, %v4517_v47  ;;  %17199 = vst [vmem:[#allocation84_spill] sm:$0xff] %v13185_v63  ;;  %v4728_v52 = vadd.f32 %v4644_v16, %v4518_v36  ;;  %v4601_v47 = vunpack.c.l.bf16 %v4550_v54  ;;  %v13191_v32 = vadd.f32 1e-05, %v3275_v15  ;;  %v7591_v54 = vld [vmem:[%s16329_s8 + $0x48] sm:$0xff] }
 0x601   :  { %v4519_v61 = vadd.f32 %v17200_v21, %v4183_v62  ;;  %v4520_v53 = vadd.f32 %v17200_v21, %v4184_v23  ;;  %7656 = vperm.xlu1 %8845, %v7588_v31   ;;  %7741 = vperm.xlu0 %8844, %v7605_v60   ;;  %v13194_v37 = vmul.f32 0.0051020407, %v12934_v41  ;;  %v3748_v31 = vmul.f32 %v13183_v25, %v13123_v27 }
 0x602   :  { %v3152_v16 = vmul.f32 0.0051020407, %v12949_v57  ;;  %v4811_v19 = vmax.f32 %v4727_v59, 0.0  ;;  %v4812_v36 = vmax.f32 %v4728_v52, 0.0  ;;  %v3740_v23 = vmul.f32 0.5, %v3739_v18  ;;  %v7608_v18 = vld [vmem:[%s16329_s8 + $0xd0] sm:$0xff] }
 0x603   :  { %17201 = vst [vmem:[#allocation89_spill] sm:$0xff] %v13194_v37  ;;  %7706 = vperm.xlu2 %8846, %v7598_v45   ;;  %v4295_v34 = vpop.permute.xlu0 %4294  ;;  %v4729_v62 = vadd.f32 %v4645_v51, %v4519_v61  ;;  %v4730_v63 = vadd.f32 %v4646_v20, %v4520_v53  ;;  %v13202_v41 = vmul.f32 0.0051020407, %v12901_v56  ;;  %9083 = vrsqrt.f32 %v13191_v32  ;;  %v4547_v52 = vld [vmem:[%s16323_s2 + $0x30] sm:$0xff] }
 0x604   :  { %v4475_v58 = vadd.f32 %v4295_v34, %v13097_v35  ;;  %v4476_v50 = vadd.f32 %v4295_v34, %v13105_v12  ;;  %v3194_v35 = vmul.f32 %v13194_v37, %v13194_v37  ;;  %v3150_v51 = vmul.f32 0.0051020407, %v12917_v8  ;;  %v17204_v8 = vld [vmem:[#allocation63_spill] sm:$0xff] }
 0x605   :  { %v4813_v15 = vmax.f32 %v4729_v62, 0.0  ;;  %v4814_v60 = vmax.f32 %v4730_v63, 0.0  ;;  %17202 = vst [vmem:[#allocation88_spill] sm:$0xff] %v13202_v41  ;;  %v17203_v63 = vld [vmem:[#allocation62_spill] sm:$0xff]  ;;  %v3749_v53 = vmul.f32 %v13183_v25, %v3748_v31  ;;  %v3741_v62 = vsub.f32 1.5, %v3740_v23 }
 0x606   :  { %v4686_v45 = vadd.f32 %v4602_v17, %v4476_v50  ;;  %v13204_v61 = vpop.permute.xlu2 %4359  ;;  %v4685_v57 = vadd.f32 %v4601_v47, %v4475_v58  ;;  %v7601_v17 = vld [vmem:[%s16329_s8 + $0x98] sm:$0xff]  ;;  %v3236_v47 = vsub.f32 %v3152_v16, %v3194_v35  ;;  %v3192_v58 = vmul.f32 %v13202_v41, %v13202_v41 }
 0x607   :  { %v5038_v12 = vpack.c.bf16 %v4813_v15, %v4811_v19  ;;  %v13215_v56 = vpack.c.bf16 %v4814_v60, %v4812_v36  ;;  %v17205_v50 = vmax.f32 %v13111_v40, 0.0  ;;  %v4548_v15 = vld [vmem:[%s16323_s2 + $0x38] sm:$0xff]  ;;  %v13236_v31 = vadd.f32 1e-05, %v3271_v11  ;;  %v13244_v23 = vpop.xlane.xlu1 %3111 }
 0x608   :  { %v4770_v20 = vmax.f32 %v4686_v45, 0.0  ;;  %v4769_v59 = vmax.f32 %v4685_v57, 0.0  ;;  %v17206_v16 = vsub.f32 %v17153_v9, %v12303_v30  ;;  %17207 = vst [vmem:[#allocation69_spill] sm:$0xff] %v13244_v23  ;;  %v4596_v45 = vunpack.c.h.bf16 %v4547_v52 }
 0x609   :  { %5542 = vmatpush.bf16.msrb.mxu3 %v5038_v12  ;;  %7671 = vperm.xlu1 %8845, %v7591_v54   ;;  %v4595_v40 = vunpack.c.l.bf16 %v4547_v52  ;;  %v13251_v9 = vpop.eup %9083  ;;  %v17208_v35 = vsub.f32 %v17154_v29, %v12303_v30  ;;  %v7594_v52 = vld [vmem:[%s16329_s8 + $0x60] sm:$0xff]  ;;  %vm3773_vm6 = vweird.f32 %v13191_v32  ;;  %vm3754_vm14 = vweird.f32 %v13183_v25 }
 0x60a   :  { %7756 = vperm.xlu0 %8844, %v7608_v18   ;;  %v5016_v19 = vpack.c.bf16 %v4769_v59, %v17205_v50  ;;  %v8639_v36 = vpack.c.bf16 %v4770_v20, %v4768_v2  ;;  %v13242_v60 = vmul.f32 %v12880_v26, %v17206_v16  ;;  %v3234_v2 = vsub.f32 %v3150_v51, %v3192_v58  ;;  %vm13655_vm0 = vmor %vm3753_vm15, %vm3754_vm14 }
 0x60b   :  { %7721 = vperm.xlu2 %8846, %v7601_v17   ;;  %v4280_v54 = vpop.permute.xlu0 %4279  ;;  %v13257_v12 = vmul.f32 %v12880_v26, %v17208_v35  ;;  %v3278_v18 = vmax.f32 %v3236_v47, 0.0  ;;  %v4598_v20 = vunpack.c.h.bf16 %v4548_v15  ;;  %v4597_v17 = vunpack.c.l.bf16 %v4548_v15  ;;  %v7611_v47 = vld [vmem:[%s16329_s8 + $0xe8] sm:$0xff] }
 0x60c   :  { %v4469_v57 = vadd.f32 %v4280_v54, %v13041_v43  ;;  %v4470_v11 = vadd.f32 %v4280_v54, %v13044_v28  ;;  %5431 = vmatpush.bf16.msrb.mxu1 %v5016_v19  ;;  %8640 = vmatpush.bf16.msk.msra.mxu0 %vm12588_vm13, %v8639_v36  ;;  %v3750_v43 = vmul.f32 0.5, %v3749_v53  ;;  %v13261_v28 = vmul.f32 0.0051020407, %v12947_v14 }
 0x60d   :  { %v3742_v59 = vmul.f32 %v13147_v7, %v3741_v62  ;;  %v13273_v14 = vmul.f32 0.0051020407, %v12919_v22  ;;  %v3276_v58 = vmax.f32 %v3234_v2, 0.0  ;;  %v3768_v50 = vmul.f32 %v13251_v9, %v13191_v32  ;;  %v17269_v32 = vld [vmem:[#allocation86_spill] sm:$0xff] }
 0x60e   :  { %17209 = vst [vmem:[#allocation90_spill] sm:$0xff] %v13261_v28  ;;  %v4285_v51 = vpop.permute.xlu2 %4284  ;;  %v4680_v30 = vadd.f32 %v4596_v45, %v4470_v11  ;;  %v4679_v53 = vadd.f32 %v4595_v40, %v4469_v57  ;;  %v3153_v19 = vmul.f32 0.0051020407, %v12965_v0  ;;  %v17213_v22 = vsub.f32 %v17156_v55, %v12292_v49 }
 0x60f   :  { %v4471_v26 = vadd.f32 %v4285_v51, %v13063_v42  ;;  %v4472_v29 = vadd.f32 %v4285_v51, %v13066_v38  ;;  %17210 = vst [vmem:[#allocation91_spill] sm:$0xff] %v13273_v14  ;;  %v7604_v42 = vld [vmem:[%s16329_s8 + $0xb0] sm:$0xff]  ;;  %v13295_v36 = vadd.f32 1e-05, %v3278_v18  ;;  %v3751_v16 = vsub.f32 1.5, %v3750_v43  ;;  %v7614_v38 = vld [vmem:[%s16329_s8 + $0x100] sm:$0xff] }
 0x610   :  { %v13293_v62 = vmul.f32 %v12888_v1, %v17213_v22  ;;  %v13298_v45 = vmul.f32 0.0051020407, %v12942_v4  ;;  %v3195_v6 = vmul.f32 %v13261_v28, %v13261_v28  ;;  %v3746_v55 = vsel %vm13285_vm3, %v13147_v7, %v3742_v59  ;;  %v3860_v4 = vld [vmem:[%s16325_s4 + $0x108] sm:$0xff]  ;;  %v13366_v22 = vld [vmem:[%s16323_s2 + $0xe0] sm:$0xff] }
 0x611   :  { %v4682_v0 = vadd.f32 %v4598_v20, %v4472_v29  ;;  %7686 = vperm.xlu1 %8845, %v7594_v52   ;;  %v4681_v15 = vadd.f32 %v4597_v17, %v4471_v26  ;;  %v4764_v54 = vmax.f32 %v4680_v30, 0.0  ;;  %v4763_v11 = vmax.f32 %v4679_v53, 0.0 }
 0x612   :  { %7771 = vperm.xlu0 %8844, %v7611_v47   ;;  %v13314_v18 = vmul.f32 %v13273_v14, %v13273_v14  ;;  %v13316_v20 = vadd.f32 1e-05, %v3276_v58  ;;  %v3769_v7 = vmul.f32 %v13251_v9, %v3768_v50  ;;  %v3237_v17 = vsub.f32 %v3153_v19, %v3195_v6  ;;  %v17220_v50 = vld [vmem:[#allocation23_spill] sm:$0xff]  ;;  %v17225_v6 = vld [vmem:[#allocation50_spill] sm:$0xff] }
 0x613   :  { %v4766_v40 = vmax.f32 %v4682_v0, 0.0  ;;  %7736 = vperm.xlu2 %8846, %v7604_v42   ;;  %v13305_v2 = vpop.permute.xlu1 %4028  ;;  %v13307_v57 = vpop.permute.xlu0 %4354  ;;  %v4765_v35 = vmax.f32 %v4681_v15, 0.0  ;;  %9085 = vrsqrt.f32 %v13295_v36  ;;  %v17214_v43 = vsub.f32 %v17188_v13, %v12610_v10  ;;  %v7597_v13 = vld [vmem:[%s16329_s8 + $0x78] sm:$0xff]  ;;  %v17222_v0 = vld [vmem:[#allocation34_spill] sm:$0xff] }
 0x614   :  { %v17215_v30 = vsub.f32 %v17159_v46, %v12292_v49  ;;  %v17216_v29 = vsub.f32 %v17189_v39, %v12610_v10  ;;  %v13339_v58 = vmul.f32 %v3860_v4, %v3746_v55  ;;  %v4568_v49 = vld [vmem:[%s16323_s2 + $0xd8] sm:$0xff]  ;;  %9087 = vrsqrt.f32 %v13236_v31 }
 0x615   :  { %v4175_v51 = vmul.f32 %v13091_v5, %v17214_v43  ;;  %v5014_v52 = vpack.c.bf16 %v4765_v35, %v4763_v11  ;;  %v8642_v59 = vpack.c.bf16 %v4766_v40, %v4764_v54  ;;  %v17218_v46 = vsub.f32 %v17157_v3, %v12365_v33  ;;  %v17223_v15 = vld [vmem:[#allocation96_spill] sm:$0xff]  ;;  %v7607_v54 = vld [vmem:[%s16329_s8 + $0xc8] sm:$0xff]  ;;  %v4557_v40 = vld [vmem:[%s16323_s2 + $0x80] sm:$0xff] }
 0x616   :  { %v13328_v26 = vmul.f32 %v12888_v1, %v17215_v30  ;;  %v4176_v47 = vmul.f32 %v13091_v5, %v17216_v29  ;;  %v13334_v53 = vpop.permute.xlu2 %4339  ;;  %v13345_v1 = vmul.f32 %v13183_v25, %v3751_v16  ;;  %v17219_v5 = vld [vmem:[#allocation83_spill] sm:$0xff]  ;;  %v17221_v19 = vsub.f32 %v17220_v50, %v12365_v33  ;;  %v17226_v35 = vld [vmem:[#allocation36_spill] sm:$0xff] }
 0x617   :  { %v4155_v39 = vmul.f32 %v17219_v5, %v17218_v46  ;;  %5432 = vmatpush.bf16.msrb.mxu1 %v5014_v52  ;;  %8643 = vmatpush.bf16.msk.msra.mxu0 %vm12588_vm13, %v8642_v59  ;;  %9089 = vrsqrt.f32 %v13316_v20  ;;  %v13369_v3 = vmul.f32 0.5, %v3769_v7  ;;  %v13371_v33 = vmax.f32 %v3237_v17, 0.0  ;;  %v4567_v11 = vld [vmem:[%s16323_s2 + $0xd0] sm:$0xff] }
 0x618   :  { %17217 = vst [vmem:[#allocation39_spill] sm:$0xff] %v13345_v1  ;;  %v4156_v42 = vmul.f32 %v17219_v5, %v17221_v19  ;;  %v17224_v16 = vsub.f32 %v17222_v0, %v17223_v15  ;;  %v17227_v4 = vsub.f32 %v17226_v35, %v17223_v15  ;;  %v17228_v17 = vld [vmem:[#allocation55_spill] sm:$0xff]  ;;  %v4637_v5 = vunpack.c.l.bf16 %v4568_v49  ;;  %v17233_v19 = vld [vmem:[#allocation61_spill] sm:$0xff]  ;;  %v4558_v15 = vld [vmem:[%s16323_s2 + $0x88] sm:$0xff] }
 0x619   :  { %v4511_v43 = vadd.f32 %v17228_v17, %v4175_v51  ;;  %v17229_v52 = vld [vmem:[#allocation59_spill] sm:$0xff]  ;;  %7701 = vperm.xlu1 %8845, %v7597_v13   ;;  %v4512_v50 = vadd.f32 %v17228_v17, %v4176_v47  ;;  %v4639_v51 = vunpack.c.l.bf16 %v13366_v22  ;;  %v13408_v35 = vpop.eup %9085  ;;  %v17235_v13 = vld [vmem:[#allocation108_spill] sm:$0xff]  ;;  %v4616_v47 = vunpack.c.h.bf16 %v4557_v40 }
 0x61a   :  { %v13377_v55 = vmul.f32 %v17225_v6, %v17224_v16  ;;  %v13392_v7 = vmul.f32 %v17225_v6, %v17227_v4  ;;  %v17230_v59 = vld [vmem:[#allocation19_spill] sm:$0xff]  ;;  %7786 = vperm.xlu0 %8844, %v7614_v38   ;;  %v4638_v6 = vunpack.c.h.bf16 %v4568_v49  ;;  %v17237_v38 = vld [vmem:[#allocation56_spill] sm:$0xff]  ;;  %v17240_v49 = vld [vmem:[#allocation54_spill] sm:$0xff]  ;;  %v13422_v28 = vpop.eup %9087  ;;  %v4618_v37 = vunpack.c.h.bf16 %v4558_v15 }
 0x61b   :  { %v17231_v30 = vsub.f32 %v17229_v52, %v17230_v59  ;;  %v17232_v29 = vld [vmem:[#allocation87_spill] sm:$0xff]  ;;  %v17234_v0 = vsub.f32 %v17233_v19, %v17230_v59  ;;  %7751 = vperm.xlu2 %8846, %v7607_v54   ;;  %5433 = vmatpush.bf16.msrb.mxu1 %v17235_v13  ;;  %v4044_v4 = vpop.permute.xlu1 %4043  ;;  %v4330_v17 = vpop.permute.xlu0 %4329  ;;  %v4635_v52 = vunpack.c.l.bf16 %v4567_v11  ;;  %v4636_v59 = vunpack.c.h.bf16 %v4567_v11  ;;  %v17238_v19 = vld [vmem:[#allocation81_spill] sm:$0xff]  ;;  %17242 = vst [vmem:[#allocation92_spill] sm:$0xff] %v13422_v28  ;;  %v17243_v11 = vld [vmem:[#allocation14_spill] sm:$0xff] }
 0x61c   :  { %v17241_v34 = vsub.f32 %v17240_v49, %v17238_v19  ;;  %v4489_v13 = vadd.f32 %v4330_v17, %v13242_v60  ;;  %v4490_v21 = vadd.f32 %v4330_v17, %v13257_v12  ;;  %v4721_v14 = vadd.f32 %v4637_v5, %v4511_v43  ;;  %v7600_v60 = vld [vmem:[%s16329_s8 + $0x90] sm:$0xff]  ;;  %v17245_v43 = vld [vmem:[#allocation106_spill] sm:$0xff]  ;;  %v7617_v5 = vld [vmem:[%s16329_s8 + $0x118] sm:$0xff] }
 0x61d   :  { %v4177_v46 = vmul.f32 %v17232_v29, %v17231_v30  ;;  %v4178_v16 = vmul.f32 %v17232_v29, %v17234_v0  ;;  %v4615_v30 = vunpack.c.l.bf16 %v4557_v40  ;;  %v17236_v29 = vld [vmem:[#allocation109_spill] sm:$0xff]  ;;  %v17239_v0 = vsub.f32 %v17237_v38, %v17238_v19  ;;  %v17247_v1 = vld [vmem:[#allocation104_spill] sm:$0xff] }
 0x61e   :  { %8646 = vmatpush.bf16.msk.msra.mxu0 %vm12588_vm13, %v17236_v29  ;;  %v4174_v54 = vmul.f32 %v4044_v4, %v17241_v34  ;;  %v4617_v41 = vunpack.c.l.bf16 %v4558_v15  ;;  %v13425_v29 = vpop.eup %9089  ;;  %v3798_v38 = vmul.f32 %v13408_v35, %v13295_v36  ;;  %v4722_v12 = vadd.f32 %v4638_v6, %v4512_v50 }
 0x61f   :  { %v4173_v10 = vmul.f32 %v4044_v4, %v17239_v0  ;;  %v4513_v40 = vadd.f32 %v17243_v11, %v4177_v46  ;;  %v17244_v0 = vld [vmem:[#allocation98_spill] sm:$0xff]  ;;  %v4335_v4 = vpop.permute.xlu2 %4334  ;;  %v4700_v17 = vadd.f32 %v4616_v47, %v4490_v21  ;;  %5434 = vmatpush.bf16.msrb.mxu1 %v17245_v43  ;;  %v4699_v15 = vadd.f32 %v4615_v30, %v4489_v13  ;;  %v7610_v21 = vld [vmem:[%s16329_s8 + $0xe0] sm:$0xff] }
 0x620   :  { %v4510_v34 = vadd.f32 %v17244_v0, %v4174_v54  ;;  %v4491_v46 = vadd.f32 %v4335_v4, %v4155_v39  ;;  %v4492_v19 = vadd.f32 %v4335_v4, %v4156_v42  ;;  %v4514_v49 = vadd.f32 %v17243_v11, %v4178_v16  ;;  %v17246_v54 = vld [vmem:[#allocation107_spill] sm:$0xff] }
 0x621   :  { %v4509_v23 = vadd.f32 %v17244_v0, %v4173_v10  ;;  %v4570_v10 = vld [vmem:[%s16323_s2 + $0xe8] sm:$0xff]  ;;  %v4640_v39 = vunpack.c.h.bf16 %v13366_v22  ;;  %7716 = vperm.xlu1 %8845, %v7600_v60   ;;  %v13449_v47 = vadd.f32 %v4639_v51, %v4513_v40  ;;  %v4805_v0 = vmax.f32 %v4721_v14, 0.0  ;;  %v4563_v14 = vld [vmem:[%s16323_s2 + $0xb0] sm:$0xff] }
 0x622   :  { %8649 = vmatpush.bf16.msk.msra.mxu0 %vm12588_vm13, %v17246_v54  ;;  %v4720_v50 = vadd.f32 %v4636_v59, %v4510_v34  ;;  %v4702_v6 = vadd.f32 %v4618_v37, %v4492_v19  ;;  %v4701_v30 = vadd.f32 %v4617_v41, %v4491_v46  ;;  %7801 = vperm.xlu0 %8844, %v7617_v5   ;;  %v4641_v16 = vunpack.c.l.bf16 %v4570_v10  ;;  %v17248_v41 = vld [vmem:[#allocation105_spill] sm:$0xff] }
 0x623   :  { %v4719_v42 = vadd.f32 %v4635_v52, %v4509_v23  ;;  %v4806_v4 = vmax.f32 %v4722_v12, 0.0  ;;  %v4784_v43 = vmax.f32 %v4700_v17, 0.0  ;;  %7766 = vperm.xlu2 %8846, %v7610_v21   ;;  %5435 = vmatpush.bf16.msrb.mxu1 %v17247_v1  ;;  %v4059_v28 = vpop.permute.xlu1 %4058  ;;  %v13452_v22 = vpop.permute.xlu0 %4414  ;;  %v4783_v23 = vmax.f32 %v4699_v15, 0.0  ;;  %v4564_v15 = vld [vmem:[%s16323_s2 + $0xb8] sm:$0xff] }
 0x624   :  { %v4804_v11 = vmax.f32 %v4720_v50, 0.0  ;;  %v4786_v54 = vmax.f32 %v4702_v6, 0.0  ;;  %v4785_v37 = vmax.f32 %v4701_v30, 0.0  ;;  %v17249_v51 = vsub.f32 %v17203_v63, %v12773_v24  ;;  %v7613_v50 = vld [vmem:[%s16329_s8 + $0xf8] sm:$0xff]  ;;  %v17254_v30 = vld [vmem:[#allocation97_spill] sm:$0xff] }
 0x625   :  { %v4803_v13 = vmax.f32 %v4719_v42, 0.0  ;;  %v17250_v1 = vsub.f32 %v17204_v8, %v12773_v24  ;;  %v4642_v40 = vunpack.c.h.bf16 %v4570_v10  ;;  %v4724_v60 = vadd.f32 %v4640_v39, %v4514_v49  ;;  %v17252_v8 = vld [vmem:[#allocation37_spill] sm:$0xff]  ;;  %v7603_v10 = vld [vmem:[%s16329_s8 + $0xa8] sm:$0xff]  ;;  %v7620_v49 = vld [vmem:[%s16329_s8 + $0x130] sm:$0xff] }
 0x626   :  { %8652 = vmatpush.bf16.msk.msra.mxu0 %vm12588_vm13, %v17248_v41  ;;  %v4179_v52 = vmul.f32 %v4059_v28, %v17249_v51  ;;  %v13471_v12 = vpack.c.bf16 %v4806_v4, %v4804_v11  ;;  %v13473_v17 = vpack.c.bf16 %v4785_v37, %v4783_v23  ;;  %v13475_v46 = vpack.c.bf16 %v4786_v54, %v4784_v43 }
 0x627   :  { %v4180_v59 = vmul.f32 %v4059_v28, %v17250_v1  ;;  %8655 = vmatpush.bf16.msk.msra.mxu1 %vm12588_vm13, %v13215_v56  ;;  %v13469_v34 = vpack.c.bf16 %v4805_v0, %v4803_v13  ;;  %v17251_v63 = vsub.f32 %v13298_v45, %v13314_v18  ;;  %v3771_v24 = vsub.f32 1.5, %v13369_v3  ;;  %v13485_v5 = vpop.permute.xlu2 %4419 }
 0x628   :  { %v4515_v28 = vadd.f32 %v17252_v8, %v4179_v52  ;;  %v4628_v45 = vunpack.c.h.bf16 %v4563_v14  ;;  %v4501_v18 = vadd.f32 %v13204_v61, %v13377_v55  ;;  %v4502_v3 = vadd.f32 %v13204_v61, %v13392_v7  ;;  %v17253_v55 = vld [vmem:[#allocation40_spill] sm:$0xff] }
 0x629   :  { %v13480_v19 = vmax.f32 %v17251_v63, 0.0  ;;  %v4516_v56 = vadd.f32 %v17252_v8, %v4180_v59  ;;  %v4627_v21 = vunpack.c.l.bf16 %v4563_v14  ;;  %v13502_v39 = vadd.f32 1e-05, %v13371_v33  ;;  %7731 = vperm.xlu1 %8845, %v7603_v10   ;;  %v17256_v33 = vld [vmem:[#allocation74_spill] sm:$0xff]  ;;  %v17259_v63 = vld [vmem:[#allocation77_spill] sm:$0xff] }
 0x62a   :  { %v3799_v42 = vmul.f32 %v13408_v35, %v3798_v38  ;;  %v4725_v6 = vadd.f32 %v4641_v16, %v4515_v28  ;;  %v17255_v13 = vsub.f32 %v17253_v55, %v17254_v30  ;;  %v4630_v7 = vunpack.c.h.bf16 %v4564_v15  ;;  %7816 = vperm.xlu0 %8844, %v7620_v49   ;;  %v17261_v28 = vld [vmem:[#allocation103_spill] sm:$0xff]  ;;  %v17262_v10 = vld [vmem:[#allocation33_spill] sm:$0xff] }
 0x62b   :  { %v4726_v0 = vadd.f32 %v4642_v40, %v4516_v56  ;;  %v4807_v11 = vmax.f32 %v13449_v47, 0.0  ;;  %v4808_v4 = vmax.f32 %v4724_v60, 0.0  ;;  %v17257_v43 = vsub.f32 %v17256_v33, %v17254_v30  ;;  %v4562_v47 = vld [vmem:[%s16323_s2 + $0xa8] sm:$0xff]  ;;  %7781 = vperm.xlu2 %8846, %v7613_v50   ;;  %v4365_v41 = vpop.permute.xlu1 %4364  ;;  %v13525_v51 = vpop.permute.xlu0 %4429  ;;  %v8358_v55 = vld [vmem:[%s16327_s6] sm:$0xf] }
 0x62c   :  { %v4167_v61 = vmul.f32 %v13305_v2, %v17255_v13  ;;  %v4809_v54 = vmax.f32 %v4725_v6, 0.0  ;;  %v4629_v16 = vunpack.c.l.bf16 %v4564_v15  ;;  %v13519_v37 = vmul.f32 %v13425_v29, %v13316_v20  ;;  %v17258_v60 = vld [vmem:[#allocation38_spill] sm:$0xff]  ;;  %v7606_v6 = vld [vmem:[%s16329_s8 + $0xc0] sm:$0xff] }
 0x62d   :  { %v4168_v38 = vmul.f32 %v13305_v2, %v17257_v43  ;;  %v4810_v23 = vmax.f32 %v4726_v0, 0.0  ;;  %vm3774_vm7 = vweird.f32 %v13251_v9  ;;  %v4712_v14 = vadd.f32 %v4628_v45, %v4502_v3  ;;  %v4561_v30 = vld [vmem:[%s16323_s2 + $0xa0] sm:$0xff] }
 0x62e   :  { %v4711_v2 = vadd.f32 %v4627_v21, %v4501_v18  ;;  %v4503_v52 = vadd.f32 %v4365_v41, %v4167_v61  ;;  %v5036_v59 = vpack.c.bf16 %v4809_v54, %v4807_v11  ;;  %v17260_v8 = vsub.f32 %v17258_v60, %v17259_v63  ;;  %vm13559_vm9 = vmor %vm3773_vm6, %vm3774_vm7 }
 0x62f   :  { %v4504_v1 = vadd.f32 %v4365_v41, %v4168_v38  ;;  %v8657_v40 = vpack.c.bf16 %v4810_v23, %v4808_v4  ;;  %v17263_v15 = vsub.f32 %v17262_v10, %v17259_v63  ;;  %9091 = vrsqrt.f32 %v13502_v39  ;;  %v13539_v50 = vpop.permute.xlu2 %4434  ;;  %v7616_v38 = vld [vmem:[%s16329_s8 + $0x110] sm:$0xff]  ;;  %v17266_v23 = vld [vmem:[#allocation28_spill] sm:$0xff] }
 0x630   :  { %v4163_v56 = vmul.f32 %v17261_v28, %v17260_v8  ;;  %v3772_v3 = vmul.f32 %v13251_v9, %v3771_v24  ;;  %v13537_v49 = vmul.f32 0.5, %v3799_v42  ;;  %v4626_v18 = vunpack.c.h.bf16 %v4562_v47  ;;  %5543 = vmatpush.bf16.msrb.mxu3 %v5036_v59  ;;  %v8777_v24 = vld [vmem:[%s16327_s6 + $0x8] sm:$0xf0]  ;;  %v17270_v41 = vld [vmem:[#allocation35_spill] sm:$0xff]  ;;  %v3863_v59 = vld [vmem:[%s16325_s4 + $0x120] sm:$0xff] }
 0x631   :  { %v4164_v45 = vmul.f32 %v17261_v28, %v17263_v15  ;;  %v4714_v21 = vadd.f32 %v4630_v7, %v4504_v1  ;;  %8658 = vmatpush.bf16.msk.msra.mxu1 %vm12588_vm13, %v8657_v40  ;;  %v4713_v0 = vadd.f32 %v4629_v16, %v4503_v52  ;;  %v4796_v42 = vmax.f32 %v4712_v14, 0.0  ;;  %v17267_v16 = vld [vmem:[#allocation44_spill] sm:$0xff]  ;;  %7746 = vperm.xlu1 %8845, %v7606_v6   ;;  %v17275_v15 = vld [vmem:[#allocation78_spill] sm:$0xff]  ;;  %v4559_v6 = vld [vmem:[%s16323_s2 + $0x90] sm:$0xff] }
 0x632   :  { %v4795_v13 = vmax.f32 %v4711_v2, 0.0  ;;  %v4625_v61 = vunpack.c.l.bf16 %v4562_v47  ;;  %v8359_v7 = vor.u32 %v8777_v24, %v8358_v55  ;;  %v4499_v4 = vadd.f32 %v13307_v57, %v4163_v56  ;;  %4078 = vperm.xlu0 %8844, %v13339_v58   ;;  %v17272_v56 = vld [vmem:[#allocation32_spill] sm:$0xff] }
 0x633   :  { %v4500_v33 = vadd.f32 %v13307_v57, %v4164_v45  ;;  %v4798_v43 = vmax.f32 %v4714_v21, 0.0  ;;  %v4797_v54 = vmax.f32 %v4713_v0, 0.0  ;;  %v17268_v14 = vsub.f32 %v17266_v23, %v17267_v16  ;;  %v17276_v45 = vld [vmem:[#allocation30_spill] sm:$0xff]  ;;  %7796 = vperm.xlu2 %8846, %v7616_v38   ;;  %v13605_v0 = vpop.permute.xlu0 %4444 }
 0x634   :  { %v17271_v2 = vsub.f32 %v17270_v41, %v17267_v16  ;;  %v3776_v57 = vsel %vm13559_vm9, %v13251_v9, %v3772_v3  ;;  %5436 = vmatmul.bf16.vlgmr.msrb.gmra.mxu1 %v8359_v7  ;;  %5544 = vmatpush.bf16.msrb.mxu3 %v13469_v34  ;;  %v4624_v1 = vunpack.c.h.bf16 %v4561_v30  ;;  %v4623_v63 = vunpack.c.l.bf16 %v4561_v30  ;;  %v17273_v9 = vld [vmem:[#allocation11_spill] sm:$0xff] }
 0x635   :  { %v4161_v47 = vmul.f32 %v17269_v32, %v17268_v14  ;;  %v5030_v40 = vpack.c.bf16 %v4797_v54, %v4795_v13  ;;  %v8666_v60 = vpack.c.bf16 %v4798_v43, %v4796_v42  ;;  %v13585_v8 = vpop.eup %9091  ;;  %v13588_v28 = vadd.f32 1e-05, %v13480_v19  ;;  %8661 = vmatpush.bf16.msk.msra.mxu1 %vm12588_vm13, %v13471_v12  ;;  %v4350_v19 = vpop.permute.xlu1 %4349  ;;  %5778 = vmatmul.bf16.vlgmr.msra.gmra.mxu0 %v8359_v7  ;;  %v17278_v13 = vld [vmem:[#allocation82_spill] sm:$0xff]  ;;  %v17279_v43 = vld [vmem:[#allocation20_spill] sm:$0xff] }
 0x636   :  { %v4162_v52 = vmul.f32 %v17269_v32, %v17271_v2  ;;  %v17274_v10 = vsub.f32 %v17272_v56, %v17273_v9  ;;  %v17277_v34 = vsub.f32 %v17276_v45, %v17273_v9  ;;  %v3801_v21 = vsub.f32 1.5, %v13537_v49 }
 0x637   :  { %v4710_v55 = vadd.f32 %v4626_v18, %v4500_v33  ;;  %v4497_v24 = vadd.f32 %v4350_v19, %v4161_v47  ;;  %v4709_v30 = vadd.f32 %v4625_v61, %v4499_v4  ;;  %v3779_v49 = vmul.f32 %v13425_v29, %v13519_v37  ;;  %v13614_v16 = vpop.permute.xlu2 %4449  ;;  %v17280_v18 = vld [vmem:[#allocation85_spill] sm:$0xff]  ;;  %v7609_v61 = vld [vmem:[%s16329_s8 + $0xd8] sm:$0xff] }
 0x638   :  { %v4159_v58 = vmul.f32 %v17275_v15, %v17274_v10  ;;  %v4160_v3 = vmul.f32 %v17275_v15, %v17277_v34  ;;  %v4498_v42 = vadd.f32 %v4350_v19, %v4162_v52  ;;  %v13610_v11 = vmul.f32 0.0051020407, %v17278_v13  ;;  %5545 = vmatpush.bf16.msrb.mxu3 %v17280_v18  ;;  %v4560_v33 = vld [vmem:[%s16323_s2 + $0x98] sm:$0xff] }
 0x639   :  { %v3151_v38 = vmul.f32 0.0051020407, %v17279_v43  ;;  %v3905_v54 = vmul.f32 %v3863_v59, %v3776_v57  ;;  %vm3804_vm10 = vweird.f32 %v13408_v35  ;;  %v4620_v12 = vunpack.c.h.bf16 %v4559_v6  ;;  %8664 = vmatpush.bf16.msk.msra.mxu1 %vm12588_vm13, %v13181_v44  ;;  %7761 = vperm.xlu1 %8845, %v7609_v61   ;;  %v7612_v43 = vld [vmem:[%s16329_s8 + $0xf0] sm:$0xff] }
 0x63a   :  { %v4708_v23 = vadd.f32 %v4624_v1, %v4498_v42  ;;  %v4707_v7 = vadd.f32 %v4623_v63, %v4497_v24  ;;  %v4493_v37 = vadd.f32 %v13334_v53, %v13293_v62  ;;  %v4494_v4 = vadd.f32 %v13334_v53, %v13328_v26  ;;  %v7619_v62 = vld [vmem:[%s16329_s8 + $0x128] sm:$0xff]  ;;  %v17288_v24 = vld [vmem:[#allocation39_spill] sm:$0xff] }
 0x63b   :  { %v3802_v14 = vmul.f32 %v13408_v35, %v3801_v21  ;;  %v4619_v32 = vunpack.c.l.bf16 %v4559_v6  ;;  %v4794_v47 = vmax.f32 %v4710_v55, 0.0  ;;  %v4793_v52 = vmax.f32 %v4709_v30, 0.0  ;;  %4093 = vperm.xlu0 %8844, %v3905_v54   ;;  %7811 = vperm.xlu2 %8846, %v7619_v62   ;;  %v13648_v10 = vpop.permute.xlu0 %7636  ;;  %v17286_v6 = vld [vmem:[#allocation92_spill] sm:$0xff]  ;;  %v8780_v54 = vld [vmem:[%s16327_s6 + $0x20] sm:$0xf0] }
 0x63c   :  { %v4792_v41 = vmax.f32 %v4708_v23, 0.0  ;;  %v4791_v2 = vmax.f32 %v4707_v7, 0.0  ;;  %v3780_v26 = vmul.f32 0.5, %v3779_v49  ;;  %v3193_v53 = vmul.f32 %v13610_v11, %v13610_v11  ;;  %5546 = vmatpush.bf16.msrb.mxu3 %v5030_v40  ;;  %17283 = vst [vmem:[#allocation93_spill] sm:$0xff] %v13648_v10  ;;  %v17290_v23 = vld [vmem:[#allocation69_spill] sm:$0xff]  ;;  %v3864_v40 = vld [vmem:[%s16325_s4 + $0x128] sm:$0xff] }
 0x63d   :  { %v3808_v44 = vmul.f32 %v13585_v8, %v13502_v39  ;;  %vm3803_vm11 = vweird.f32 %v13295_v36  ;;  %v4622_v1 = vunpack.c.h.bf16 %v4560_v33  ;;  %v4621_v56 = vunpack.c.l.bf16 %v4560_v33  ;;  %8667 = vmatpush.bf16.msk.msra.mxu1 %vm12588_vm13, %v8666_v60  ;;  %v4345_v36 = vpop.permute.xlu1 %4344  ;;  %v3866_v60 = vld [vmem:[%s16325_s4 + $0x138] sm:$0xff] }
 0x63e   :  { %vm13641_vm12 = vmor %vm3803_vm11, %vm3804_vm10  ;;  %v5028_v59 = vpack.c.bf16 %v4793_v52, %v4791_v2  ;;  %v8669_v63 = vpack.c.bf16 %v4794_v47, %v4792_v41  ;;  %v3235_v9 = vsub.f32 %v3151_v38, %v3193_v53  ;;  %v4704_v45 = vadd.f32 %v4620_v12, %v4494_v4 }
 0x63f   :  { %v3806_v15 = vsel %vm13641_vm12, %v13408_v35, %v3802_v14  ;;  %v4495_v27 = vadd.f32 %v4345_v36, %v4159_v58  ;;  %v4496_v34 = vadd.f32 %v4345_v36, %v4160_v3  ;;  %v4703_v21 = vadd.f32 %v4619_v32, %v4493_v37  ;;  %v17287_v35 = vld [vmem:[#allocation84_spill] sm:$0xff]  ;;  %v3861_v58 = vld [vmem:[%s16325_s4 + $0x110] sm:$0xff]  ;;  %v13676_v13 = vpop.permute.xlu2 %7631 }
 0x640   :  { %v3728_v19 = vmul.f32 %v17286_v6, %v13236_v31  ;;  %9093 = vrsqrt.f32 %v13588_v28  ;;  %v13666_v55 = vmul.f32 0.0051020407, %v17287_v35  ;;  %v3756_v42 = vsel %vm13655_vm0, %v13183_v25, %v17288_v24  ;;  %17289 = vst [vmem:[#allocation42_spill] sm:$0xff] %v13676_v13  ;;  %5547 = vmatpush.bf16.msrb.mxu3 %v5028_v59  ;;  %v8370_v25 = vld [vmem:[%s16327_s6 + $0x18] sm:$0xf] }
 0x641   :  { %v3781_v3 = vsub.f32 1.5, %v3780_v26  ;;  %v3809_v30 = vmul.f32 %v13585_v8, %v3808_v44  ;;  %v4706_v49 = vadd.f32 %v4622_v1, %v4496_v34  ;;  %v4705_v38 = vadd.f32 %v4621_v56, %v4495_v27  ;;  %8670 = vmatpush.bf16.msk.msra.mxu1 %vm12588_vm13, %v8669_v63  ;;  %7776 = vperm.xlu1 %8845, %v7612_v43   ;;  %v8776_v63 = vld [vmem:[%s16327_s6 + $0x4] sm:$0xf]  ;;  %v8360_v56 = vld [vmem:[%s16327_s6 + $0xc] sm:$0xf0] }
 0x642   :  { %v3277_v12 = vmax.f32 %v3235_v9, 0.0  ;;  %v3154_v18 = vmul.f32 0.0051020407, %v17290_v23  ;;  %v3908_v61 = vmul.f32 %v3866_v60, %v3806_v15  ;;  %v8371_v7 = vor.u32 %v8780_v54, %v8370_v25  ;;  %v8382_v43 = vld [vmem:[%s16327_s6 + $0x30] sm:$0xf] }
 0x643   :  { %v4788_v37 = vmax.f32 %v4704_v45, 0.0  ;;  %v4790_v4 = vmax.f32 %v4706_v49, 0.0  ;;  %v4787_v33 = vmax.f32 %v4703_v21, 0.0  ;;  %v4789_v14 = vmax.f32 %v4705_v38, 0.0  ;;  %v13700_v1 = vpop.permute.xlu0 %7651  ;;  %v8450_v13 = vld [vmem:[%s16327_s6 + $0xb0] sm:$0xf] }
 0x644   :  { %vm3784_vm1 = vweird.f32 %v13425_v29  ;;  %v3196_v32 = vmul.f32 %v13666_v55, %v13666_v55  ;;  %v3903_v47 = vmul.f32 %v3861_v58, %v3756_v42  ;;  %5441 = vmatmul.bf16.gmra.mxu1 %v8371_v7  ;;  %v3810_v41 = vmul.f32 0.5, %v3809_v30  ;;  %4108 = vperm.xlu0 %8844, %v3908_v61   ;;  %17291 = vst [vmem:[#allocation5_spill] sm:$0xff] %v13700_v1  ;;  %v3867_v58 = vld [vmem:[%s16325_s4 + $0x140] sm:$0xff]  ;;  %v8438_v1 = vld [vmem:[%s16327_s6 + $0x98] sm:$0xf] }
 0x645   :  { %v5026_v62 = vpack.c.bf16 %v4789_v14, %v4787_v33  ;;  %v8672_v2 = vpack.c.bf16 %v4790_v4, %v4788_v37  ;;  %v3782_v52 = vmul.f32 %v13425_v29, %v3781_v3  ;;  %v13696_v53 = vadd.f32 1e-05, %v3277_v12  ;;  %v13698_v57 = vpop.permute.xlu1 %4409  ;;  %5783 = vmatmul.bf16.gmra.mxu0 %v8371_v7  ;;  %v7618_v30 = vld [vmem:[%s16329_s8 + $0x120] sm:$0xff]  ;;  %v8779_v33 = vld [vmem:[%s16327_s6 + $0x1c] sm:$0xf] }
 0x646   :  { %v13694_v26 = vpop.eup %9093  ;;  %v3238_v44 = vsub.f32 %v3154_v18, %v3196_v32  ;;  %4083 = vperm.xlu2 %8846, %v3903_v47   ;;  %v3729_v59 = vmul.f32 %v17286_v6, %v3728_v19  ;;  %vm3783_vm5 = vweird.f32 %v13316_v20  ;;  %v3811_v9 = vsub.f32 1.5, %v3810_v41  ;;  %v7615_v20 = vld [vmem:[%s16329_s8 + $0x108] sm:$0xff]  ;;  %v3859_v4 = vld [vmem:[%s16325_s4 + $0x100] sm:$0xff] }
 0x647   :  { %5548 = vmatpush.bf16.msrb.mxu3 %v5026_v62  ;;  %8673 = vmatpush.bf16.msk.msra.mxu1 %vm12588_vm13, %v8672_v2  ;;  %vm3785_vm2 = vmor %vm3783_vm5, %vm3784_vm1  ;;  %v13714_v36 = vpop.permute.xlu2 %7646  ;;  %9095 = vrsqrt.f32 %v13696_v53  ;;  %v13724_v27 = vor.u32 %v8776_v63, %v8360_v56  ;;  %v3758_v60 = vmul.f32 %v13694_v26, %v13588_v28  ;;  %vm3814_vm4 = vweird.f32 %v13585_v8 }
 0x648   :  { %17292 = vst [vmem:[#allocation102_spill] sm:$0xff] %v13714_v36  ;;  %v3786_v15 = vsel %vm3785_vm2, %v13425_v29, %v3782_v52  ;;  %v3280_v45 = vmax.f32 %v3238_v44, 0.0  ;;  %v3730_v34 = vmul.f32 0.5, %v3729_v59  ;;  %v3812_v21 = vmul.f32 %v13585_v8, %v3811_v9  ;;  %v3862_v9 = vld [vmem:[%s16325_s4 + $0x118] sm:$0xff]  ;;  %v8796_v36 = vld [vmem:[%s16327_s6 + $0xa0] sm:$0xf0] }
 0x649   :  { %7791 = vperm.xlu1 %8845, %v7615_v20   ;;  %v3906_v29 = vmul.f32 %v3864_v40, %v3786_v15  ;;  %v3759_v42 = vmul.f32 %v13694_v26, %v3758_v60  ;;  %vm3813_vm3 = vweird.f32 %v13502_v39  ;;  %v8783_v39 = vld [vmem:[%s16327_s6 + $0x38] sm:$0xf0]  ;;  %vm3734_vm7 = vweird.f32 %v17286_v6  ;;  %v8786_v15 = vld [vmem:[%s16327_s6 + $0x50] sm:$0xf0] }
 0x64a   :  { %v13734_v19 = vadd.f32 1e-05, %v3280_v45  ;;  %vm3815_vm6 = vmor %vm3813_vm3, %vm3814_vm4  ;;  %v8383_v38 = vor.u32 %v8783_v39, %v8382_v43  ;;  %vm3733_vm9 = vweird.f32 %v13236_v31  ;;  %v8372_v31 = vld [vmem:[%s16327_s6 + $0x24] sm:$0xf0]  ;;  %vm3764_vm10 = vweird.f32 %v13694_v26 }
 0x64b   :  { %5549 = vmatpush.bf16.msrb.mxu3 %v13473_v17  ;;  %8676 = vmatpush.bf16.msk.msra.mxu1 %vm12588_vm13, %v13475_v46  ;;  %v13739_v24 = vpop.permute.xlu0 %7666  ;;  %v3731_v17 = vsub.f32 1.5, %v3730_v34  ;;  %v3816_v49 = vsel %vm3815_vm6, %v13585_v8, %v3812_v21  ;;  %v3760_v25 = vmul.f32 0.5, %v3759_v42  ;;  %vm3735_vm14 = vmor %vm3733_vm9, %vm3734_vm7  ;;  %v13783_v41 = vor.u32 %v8779_v33, %v8372_v31  ;;  %v3865_v42 = vld [vmem:[%s16325_s4 + $0x130] sm:$0xff]  ;;  %v8785_v33 = vld [vmem:[%s16327_s6 + $0x4c] sm:$0xf] }
 0x64c   :  { %17293 = vst [vmem:[#allocation6_spill] sm:$0xff] %v13739_v24  ;;  %9097 = vrsqrt.f32 %v13734_v19  ;;  %v3909_v8 = vmul.f32 %v3867_v58, %v3816_v49  ;;  %vm3763_vm11 = vweird.f32 %v13588_v28  ;;  %v8394_v28 = vld [vmem:[%s16327_s6 + $0x48] sm:$0xf]  ;;  %vm3793_vm0 = vweird.f32 %v13696_v53  ;;  %v8782_v58 = vld [vmem:[%s16327_s6 + $0x34] sm:$0xf] }
 0x64d   :  { %v13736_v35 = vpop.permute.xlu1 %4424  ;;  %v13743_v46 = vpop.eup %9095  ;;  %v3732_v12 = vmul.f32 %v17286_v6, %v3731_v17  ;;  %v3761_v61 = vsub.f32 1.5, %v3760_v25  ;;  %vm3765_vm12 = vmor %vm3763_vm11, %vm3764_vm10  ;;  %v8395_v45 = vor.u32 %v8786_v15, %v8394_v28  ;;  %vm3823_vm2 = vweird.f32 %v13734_v19  ;;  %v8396_v31 = vld [vmem:[%s16327_s6 + $0x54] sm:$0xf0]  ;;  %v8788_v15 = vld [vmem:[%s16327_s6 + $0x64] sm:$0xf] }
 0x64e   :  { %4098 = vperm.xlu2 %8846, %v3906_v29   ;;  %5550 = vmatmul.bf16.vlgmr.msrb.gmra.mxu3 %v13724_v27  ;;  %v3788_v54 = vmul.f32 %v13743_v46, %v13696_v53  ;;  %vm3794_vm15 = vweird.f32 %v13743_v46  ;;  %v8384_v53 = vld [vmem:[%s16327_s6 + $0x3c] sm:$0xf0] }
 0x64f   :  { %v13748_v3 = vpop.permute.xlu2 %7661  ;;  %v3736_v37 = vsel %vm3735_vm14, %v17286_v6, %v3732_v12  ;;  %v3762_v2 = vmul.f32 %v13694_v26, %v3761_v61  ;;  %vm3795_vm1 = vmor %vm3793_vm0, %vm3794_vm15  ;;  %v13825_v43 = vor.u32 %v8782_v58, %v8384_v53  ;;  %v8791_v53 = vld [vmem:[%s16327_s6 + $0x7c] sm:$0xf] }
 0x650   :  { %17294 = vst [vmem:[#allocation94_spill] sm:$0xff] %v13748_v3  ;;  %v3789_v7 = vmul.f32 %v13743_v46, %v3788_v54  ;;  %v3901_v47 = vmul.f32 %v3859_v4, %v3736_v37  ;;  %v3868_v54 = vld [vmem:[%s16325_s4 + $0x148] sm:$0xff] }
 0x651   :  { %7806 = vperm.xlu1 %8845, %v7618_v30   ;;  %v3766_v56 = vsel %vm3765_vm12, %v13694_v26, %v3762_v2 }
 0x652   :  { %v9098_v14 = vpop.eup %9097  ;;  %v3790_v6 = vmul.f32 0.5, %v3789_v7  ;;  %v3904_v40 = vmul.f32 %v3862_v9, %v3766_v56 }
 0x653   :  { %v13768_v18 = vpop.permute.xlu0 %7681  ;;  %v3818_v62 = vmul.f32 %v9098_v14, %v13734_v19  ;;  %vm3824_vm5 = vweird.f32 %v9098_v14  ;;  %v8789_v19 = vld [vmem:[%s16327_s6 + $0x68] sm:$0xf0] }
 0x654   :  { %5446 = vmatmul.bf16.gmra.mxu1 %v8383_v38  ;;  %17295 = vst [vmem:[#allocation9_spill] sm:$0xff] %v13768_v18  ;;  %v3791_v59 = vsub.f32 1.5, %v3790_v6  ;;  %vm3825_vm4 = vmor %vm3823_vm2, %vm3824_vm5 }
 0x655   :  { %v13766_v23 = vpop.permute.xlu1 %4439  ;;  %5788 = vmatmul.bf16.gmra.mxu0 %v8383_v38  ;;  %v3819_v63 = vmul.f32 %v9098_v14, %v3818_v62 }
 0x656   :  { %4113 = vperm.xlu2 %8846, %v3909_v8   ;;  %v3792_v26 = vmul.f32 %v13743_v46, %v3791_v59  ;;  %v8406_v8 = vld [vmem:[%s16327_s6 + $0x60] sm:$0xf]  ;;  %v8418_v59 = vld [vmem:[%s16327_s6 + $0x78] sm:$0xf] }
 0x657   :  { %v13781_v32 = vpop.permute.xlu2 %7676  ;;  %v3820_v34 = vmul.f32 0.5, %v3819_v63  ;;  %v8407_v7 = vor.u32 %v8789_v19, %v8406_v8  ;;  %v8792_v63 = vld [vmem:[%s16327_s6 + $0x80] sm:$0xf0] }
 0x658   :  { %17296 = vst [vmem:[#allocation22_spill] sm:$0xff] %v13781_v32  ;;  %v3796_v17 = vsel %vm3795_vm1, %v13743_v46, %v3792_v26  ;;  %v8419_v56 = vor.u32 %v8792_v63, %v8418_v59  ;;  %v8798_v59 = vld [vmem:[%s16327_s6 + $0xb0] sm:$0xf0] }
 0x659   :  { %4073 = vperm.xlu1 %8845, %v3901_v47   ;;  %v3821_v21 = vsub.f32 1.5, %v3820_v34  ;;  %v3907_v49 = vmul.f32 %v3865_v42, %v3796_v17  ;;  %v13856_v47 = vor.u32 %v8785_v33, %v8396_v31  ;;  %v8442_v31 = vld [vmem:[%s16327_s6 + $0xa8] sm:$0xf] }
 0x65b   :  { %v13792_v44 = vpop.permute.xlu0 %7696  ;;  %v3822_v46 = vmul.f32 %v9098_v14, %v3821_v21 }
 0x65c   :  { %17297 = vst [vmem:[#allocation26_spill] sm:$0xff] %v13792_v44 }
 0x65d   :  { %v13789_v52 = vpop.permute.xlu1 %4454  ;;  %v3826_v25 = vsel %vm3825_vm4, %v9098_v14, %v3822_v46  ;;  %v8430_v46 = vld [vmem:[%s16327_s6 + $0x90] sm:$0xf] }
 0x65e   :  { %5555 = vmatmul.bf16.gmra.mxu3 %v13783_v41  ;;  %v3910_v61 = vmul.f32 %v3868_v54, %v3826_v25  ;;  %v8795_v25 = vld [vmem:[%s16327_s6 + $0x98] sm:$0xf0] }
 0x65f   :  { %v13798_v20 = vpop.permute.xlu2 %7691  ;;  %v8431_v8 = vor.u32 %v8795_v25, %v8430_v46 }
 0x660   :  { %17298 = vst [vmem:[#allocation29_spill] sm:$0xff] %v13798_v20 }
 0x661   :  { %4088 = vperm.xlu1 %8845, %v3904_v40   ;;  %v8408_v40 = vld [vmem:[%s16327_s6 + $0x6c] sm:$0xf0] }
 0x662   :  { %v13883_v34 = vor.u32 %v8788_v15, %v8408_v40  ;;  %v8794_v15 = vld [vmem:[%s16327_s6 + $0x94] sm:$0xf]  ;;  %v8432_v40 = vld [vmem:[%s16327_s6 + $0x9c] sm:$0xf0] }
 0x663   :  { %v13811_v29 = vpop.permute.xlu0 %7711  ;;  %v13937_v46 = vor.u32 %v8794_v15, %v8432_v40 }
 0x664   :  { %5451 = vmatmul.bf16.gmra.mxu1 %v8395_v45  ;;  %17300 = vst [vmem:[#allocation27_spill] sm:$0xff] %v13811_v29 }
 0x665   :  { %v13809_v60 = vpop.permute.xlu1 %7626  ;;  %5793 = vmatmul.bf16.gmra.mxu0 %v8395_v45 }
 0x666   :  { %17299 = vst [vmem:[#allocation25_spill] sm:$0xff] %v13809_v60 }
 0x667   :  { %v13823_v30 = vpop.permute.xlu2 %7706 }
 0x668   :  { %17301 = vst [vmem:[#allocation49_spill] sm:$0xff] %v13823_v30 }
 0x669   :  { %4103 = vperm.xlu1 %8845, %v3907_v49   ;;  %v8420_v49 = vld [vmem:[%s16327_s6 + $0x84] sm:$0xf0] }
 0x66a   :  { %v13910_v19 = vor.u32 %v8791_v53, %v8420_v49  ;;  %v8443_v53 = vor.u32 %v8798_v59, %v8442_v31  ;;  %v4577_v31 = vld [vmem:[%s16323_s2 + $0x120] sm:$0xff]  ;;  %v4578_v59 = vld [vmem:[%s16323_s2 + $0x128] sm:$0xff] }
 0x66b   :  { %v13831_v38 = vpop.permute.xlu0 %7726 }
 0x66c   :  { %17303 = vst [vmem:[#allocation53_spill] sm:$0xff] %v13831_v38 }
 0x66d   :  { %v13828_v39 = vpop.permute.xlu1 %7641 }
 0x66e   :  { %17302 = vst [vmem:[#allocation71_spill] sm:$0xff] %v13828_v39  ;;  %5560 = vmatmul.bf16.gmra.mxu3 %v13825_v43 }
 0x66f   :  { %v13836_v12 = vpop.permute.xlu2 %7721 }
 0x670   :  { %17304 = vst [vmem:[#allocation51_spill] sm:$0xff] %v13836_v12 }
 0x671   :  { %4118 = vperm.xlu1 %8845, %v3910_v61  }
 0x673   :  { %v13846_v4 = vpop.permute.xlu0 %7741 }
 0x674   :  { %5456 = vmatmul.bf16.gmra.mxu1 %v8407_v7  ;;  %17306 = vst [vmem:[#allocation48_spill] sm:$0xff] %v13846_v4 }
 0x675   :  { %v13844_v37 = vpop.permute.xlu1 %7656  ;;  %5798 = vmatmul.bf16.gmra.mxu0 %v8407_v7 }
 0x676   :  { %17305 = vst [vmem:[#allocation52_spill] sm:$0xff] %v13844_v37 }
 0x677   :  { %v13854_v14 = vpop.permute.xlu2 %7736 }
 0x678   :  { %17307 = vst [vmem:[#allocation99_spill] sm:$0xff] %v13854_v14 }
 0x67c   :  { %v13861_v62 = vpop.permute.xlu0 %7756 }
 0x67d   :  { %v13858_v6 = vpop.permute.xlu1 %7671  ;;  %17309 = vst [vmem:[#allocation100_spill] sm:$0xff] %v13861_v62 }
 0x67e   :  { %17308 = vst [vmem:[#allocation18_spill] sm:$0xff] %v13858_v6  ;;  %5565 = vmatmul.bf16.gmra.mxu3 %v13856_v47 }
 0x67f   :  { %v13863_v2 = vpop.permute.xlu2 %7751 }
 0x680   :  { %17310 = vst [vmem:[#allocation24_spill] sm:$0xff] %v13863_v2  ;;  %v4656_v2 = vunpack.c.h.bf16 %v4577_v31 }
 0x684   :  { %5461 = vmatmul.bf16.gmra.mxu1 %v8419_v56  ;;  %v13873_v28 = vpop.permute.xlu0 %7771 }
 0x685   :  { %v13871_v9 = vpop.permute.xlu1 %7686  ;;  %17312 = vst [vmem:[#allocation58_spill] sm:$0xff] %v13873_v28  ;;  %5803 = vmatmul.bf16.gmra.mxu0 %v8419_v56 }
 0x686   :  { %17311 = vst [vmem:[#allocation57_spill] sm:$0xff] %v13871_v9 }
 0x687   :  { %v13881_v45 = vpop.permute.xlu2 %7766 }
 0x688   :  { %17313 = vst [vmem:[#allocation64_spill] sm:$0xff] %v13881_v45  ;;  %v17330_v45 = vld [vmem:[#allocation10_spill] sm:$0xff] }
 0x68c   :  { %v13888_v21 = vpop.permute.xlu0 %7786 }
 0x68d   :  { %v13885_v26 = vpop.permute.xlu1 %7701  ;;  %17315 = vst [vmem:[#allocation66_spill] sm:$0xff] %v13888_v21  ;;  %v4655_v21 = vunpack.c.l.bf16 %v4577_v31 }
 0x68e   :  { %17314 = vst [vmem:[#allocation65_spill] sm:$0xff] %v13885_v26  ;;  %5570 = vmatmul.bf16.gmra.mxu3 %v13883_v34  ;;  %v17345_v26 = vld [vmem:[#allocation89_spill] sm:$0xff] }
 0x68f   :  { %v13890_v17 = vpop.permute.xlu2 %7781 }
 0x690   :  { %17316 = vst [vmem:[#allocation67_spill] sm:$0xff] %v13890_v17  ;;  %v17329_v17 = vld [vmem:[#allocation76_spill] sm:$0xff] }
 0x694   :  { %v13894_v58 = vpop.permute.xlu0 %7801  ;;  %5466 = vmatmul.bf16.gmra.mxu1 %v8431_v8 }
 0x695   :  { %v13892_v42 = vpop.permute.xlu1 %7716  ;;  %17318 = vst [vmem:[#allocation31_spill] sm:$0xff] %v13894_v58  ;;  %5808 = vmatmul.bf16.gmra.mxu0 %v8431_v8  ;;  %v17325_v8 = vld [vmem:[#allocation8_spill] sm:$0xff] }
 0x696   :  { %17317 = vst [vmem:[#allocation43_spill] sm:$0xff] %v13892_v42 }
 0x697   :  { %v13908_v54 = vpop.permute.xlu2 %7796 }
 0x698   :  { %17319 = vst [vmem:[#allocation62_spill] sm:$0xff] %v13908_v54 }
 0x69c   :  { %v13915_v7 = vpop.permute.xlu0 %7816 }
 0x69d   :  { %v13912_v61 = vpop.permute.xlu1 %7731  ;;  %17321 = vst [vmem:[#allocation83_spill] sm:$0xff] %v13915_v7  ;;  %v17326_v7 = vld [vmem:[#allocation95_spill] sm:$0xff] }
 0x69e   :  { %17320 = vst [vmem:[#allocation63_spill] sm:$0xff] %v13912_v61  ;;  %5575 = vmatmul.bf16.gmra.mxu3 %v13910_v19 }
 0x69f   :  { %v13917_v33 = vpop.permute.xlu2 %7811 }
 0x6a0   :  { %17322 = vst [vmem:[#allocation23_spill] sm:$0xff] %v13917_v33  ;;  %v3353_v33 = vsub.f32 %v17326_v7, %v17325_v8 }
 0x6a4   :  { %v13927_v56 = vpop.permute.xlu0 %4078  ;;  %5471 = vmatmul.bf16.gmra.mxu1 %v8443_v53 }
 0x6a5   :  { %v13925_v63 = vpop.permute.xlu1 %7746  ;;  %5813 = vmatmul.bf16.gmra.mxu0 %v8443_v53 }
 0x6a6   :  { %17323 = vst [vmem:[#allocation34_spill] sm:$0xff] %v13925_v63  ;;  %v17327_v63 = vld [vmem:[#allocation12_spill] sm:$0xff] }
 0x6a7   :  { %v13935_v49 = vpop.permute.xlu2 %4083  ;;  %v3354_v54 = vsub.f32 %v17327_v63, %v17325_v8  ;;  %v4657_v63 = vunpack.c.l.bf16 %v4578_v59  ;;  %v4658_v8 = vunpack.c.h.bf16 %v4578_v59 }
 0x6ad   :  { %v13939_v25 = vpop.permute.xlu1 %7761  ;;  %v4094_v15 = vpop.permute.xlu0 %4093 }
 0x6ae   :  { %17324 = vst [vmem:[#allocation96_spill] sm:$0xff] %v13939_v25  ;;  %5580 = vmatmul.bf16.gmra.mxu3 %v13937_v46  ;;  %v4193_v40 = vmul.f32 %v4094_v15, %v3353_v33  ;;  %v4194_v53 = vmul.f32 %v4094_v15, %v3354_v54  ;;  %v17328_v25 = vld [vmem:[#allocation88_spill] sm:$0xff] }
 0x6af   :  { %v3355_v58 = vsub.f32 %v17329_v17, %v17328_v25  ;;  %v3356_v7 = vsub.f32 %v17330_v45, %v17328_v25  ;;  %v4099_v28 = vpop.permute.xlu2 %4098  ;;  %v8454_v45 = vld [vmem:[%s16327_s6 + $0xc0] sm:$0xf] }
 0x6b0   :  { %v4529_v14 = vadd.f32 %v13525_v51, %v4193_v40  ;;  %v4530_v62 = vadd.f32 %v13525_v51, %v4194_v53  ;;  %v8801_v51 = vld [vmem:[%s16327_s6 + $0xc8] sm:$0xf0] }
 0x6b1   :  { %v4195_v4 = vmul.f32 %v4099_v28, %v3355_v58  ;;  %v4196_v61 = vmul.f32 %v4099_v28, %v3356_v7  ;;  %v5437_v12 = vpop.f32.mrf.mxu1 }
 0x6b2   :  { %v4739_v15 = vadd.f32 %v4655_v21, %v4529_v14  ;;  %v4740_v17 = vadd.f32 %v4656_v2, %v4530_v62  ;;  %v8455_v14 = vor.u32 %v8801_v51, %v8454_v45  ;;  %v8800_v51 = vld [vmem:[%s16327_s6 + $0xc4] sm:$0xf] }
 0x6b3   :  { %v4531_v33 = vadd.f32 %v13539_v50, %v4195_v4  ;;  %v4532_v54 = vadd.f32 %v13539_v50, %v4196_v61  ;;  %v8797_v4 = vld [vmem:[%s16327_s6 + $0xac] sm:$0xf]  ;;  %v8444_v50 = vld [vmem:[%s16327_s6 + $0xb4] sm:$0xf0] }
 0x6b4   :  { %v4824_v28 = vmax.f32 %v4740_v17, 0.0  ;;  %v4823_v21 = vmax.f32 %v4739_v15, 0.0  ;;  %v13974_v58 = vor.u32 %v8797_v4, %v8444_v50  ;;  %5476 = vmatmul.bf16.gmra.mxu1 %v8455_v14  ;;  %v17334_v15 = vld [vmem:[#allocation60_spill] sm:$0xff]  ;;  %v8456_v4 = vld [vmem:[%s16327_s6 + $0xcc] sm:$0xf0] }
 0x6b5   :  { %v4741_v25 = vadd.f32 %v4657_v63, %v4531_v33  ;;  %v4742_v31 = vadd.f32 %v4658_v8, %v4532_v54  ;;  %v13963_v59 = vpop.permute.xlu1 %7776  ;;  %5818 = vmatmul.bf16.gmra.mxu0 %v8455_v14  ;;  %v8466_v8 = vld [vmem:[%s16327_s6 + $0xd8] sm:$0xf]  ;;  %v8804_v54 = vld [vmem:[%s16327_s6 + $0xe0] sm:$0xf0] }
 0x6b6   :  { %17331 = vst [vmem:[#allocation50_spill] sm:$0xff] %v13963_v59  ;;  %v17335_v17 = vld [vmem:[#allocation72_spill] sm:$0xff]  ;;  %v8467_v50 = vor.u32 %v8804_v54, %v8466_v8  ;;  %v4573_v8 = vld [vmem:[%s16323_s2 + $0x100] sm:$0xff] }
 0x6b7   :  { %v4826_v62 = vmax.f32 %v4742_v31, 0.0  ;;  %v4825_v2 = vmax.f32 %v4741_v25, 0.0  ;;  %v3347_v45 = vsub.f32 %v17335_v17, %v17334_v15  ;;  %v17336_v25 = vld [vmem:[#allocation47_spill] sm:$0xff] }
 0x6b8   :  { %v3348_v31 = vsub.f32 %v17336_v25, %v17334_v15  ;;  %v17338_v15 = vld [vmem:[#allocation68_spill] sm:$0xff]  ;;  %v17339_v25 = vld [vmem:[#allocation70_spill] sm:$0xff] }
 0x6b9   :  { %v13976_v61 = vpack.c.bf16 %v4825_v2, %v4823_v21  ;;  %v13978_v40 = vpack.c.bf16 %v4826_v62, %v4824_v28  ;;  %v13980_v53 = vpop.f32.mrf.mxu1  ;;  %v4187_v14 = vmul.f32 %v13927_v56, %v3347_v45  ;;  %v4574_v2 = vld [vmem:[%s16323_s2 + $0x108] sm:$0xff]  ;;  %v14010_v28 = vor.u32 %v8800_v51, %v8456_v4  ;;  %v17337_v21 = vld [vmem:[#allocation7_spill] sm:$0xff]  ;;  %v17340_v51 = vld [vmem:[#allocation21_spill] sm:$0xff] }
 0x6ba   :  { %v4188_v62 = vmul.f32 %v13927_v56, %v3348_v31  ;;  %v3345_v17 = vsub.f32 %v17338_v15, %v17337_v21  ;;  %v4649_v54 = vunpack.c.l.bf16 %v4574_v2  ;;  %v4650_v56 = vunpack.c.h.bf16 %v4574_v2  ;;  %v17341_v4 = vld [vmem:[#allocation75_spill] sm:$0xff] }
 0x6bb   :  { %v4523_v45 = vadd.f32 %v13452_v22, %v4187_v14 }
 0x6bc   :  { %v4524_v31 = vadd.f32 %v13452_v22, %v4188_v62 }
 0x6bd   :  { %v13982_v7 = vpop.permute.xlu1 %7791  ;;  %v4733_v22 = vadd.f32 %v4649_v54, %v4523_v45  ;;  %v17347_v54 = vld [vmem:[#allocation73_spill] sm:$0xff] }
 0x6be   :  { %17332 = vst [vmem:[#allocation36_spill] sm:$0xff] %v13982_v7  ;;  %5585 = vmatmul.bf16.gmra.mxu3 %v13974_v58  ;;  %v3349_v7 = vsub.f32 %v17341_v4, %v17340_v51  ;;  %v4734_v62 = vadd.f32 %v4650_v56, %v4524_v31  ;;  %v4575_v4 = vld [vmem:[%s16323_s2 + $0x110] sm:$0xff] }
 0x6c0   :  { %v4189_v2 = vmul.f32 %v13935_v49, %v3349_v7  ;;  %v17346_v7 = vld [vmem:[#allocation16_spill] sm:$0xff] }
 0x6c1   :  { %v13985_v63 = vpop.f32.mrf.mxu1  ;;  %v3359_v20 = vsub.f32 %v17346_v7, %v17345_v26  ;;  %v4109_v7 = vpop.permute.xlu0 %4108 }
 0x6c2   :  { %v4525_v45 = vadd.f32 %v13485_v5, %v4189_v2  ;;  %v8803_v2 = vld [vmem:[%s16327_s6 + $0xdc] sm:$0xf] }
 0x6c4   :  { %5481 = vmatmul.bf16.gmra.mxu1 %v8467_v50 }
 0x6c5   :  { %v13990_v33 = vpop.permute.xlu1 %7806  ;;  %5823 = vmatmul.bf16.gmra.mxu0 %v8467_v50  ;;  %v17342_v50 = vld [vmem:[#allocation41_spill] sm:$0xff] }
 0x6c6   :  { %17333 = vst [vmem:[#allocation55_spill] sm:$0xff] %v13990_v33  ;;  %v3346_v33 = vsub.f32 %v17339_v25, %v17337_v21  ;;  %v3350_v59 = vsub.f32 %v17342_v50, %v17340_v51  ;;  %v4647_v21 = vunpack.c.l.bf16 %v4573_v8  ;;  %v4648_v25 = vunpack.c.h.bf16 %v4573_v8 }
 0x6c8   :  { %v4190_v14 = vmul.f32 %v13935_v49, %v3350_v59 }
 0x6c9   :  { %v14026_v30 = vpop.f32.mrf.mxu1 }
 0x6ca   :  { %v4526_v31 = vadd.f32 %v13485_v5, %v4190_v14  ;;  %v8468_v5 = vld [vmem:[%s16327_s6 + $0xe4] sm:$0xf0] }
 0x6cd   :  { %v4074_v15 = vpop.permute.xlu1 %4073 }
 0x6ce   :  { %5590 = vmatmul.bf16.gmra.mxu3 %v14010_v28  ;;  %v4185_v38 = vmul.f32 %v4074_v15, %v3345_v17  ;;  %v4186_v42 = vmul.f32 %v4074_v15, %v3346_v33  ;;  %v17343_v33 = vld [vmem:[#allocation91_spill] sm:$0xff]  ;;  %v17344_v17 = vld [vmem:[#allocation45_spill] sm:$0xff] }
 0x6cf   :  { %v3351_v15 = vsub.f32 %v17344_v17, %v17343_v33  ;;  %v3352_v56 = vsub.f32 %v17347_v54, %v17343_v33  ;;  %v17348_v33 = vld [vmem:[#allocation13_spill] sm:$0xff] }
 0x6d0   :  { %v4521_v51 = vadd.f32 %v13698_v57, %v4185_v38  ;;  %v4522_v50 = vadd.f32 %v13698_v57, %v4186_v42  ;;  %v4576_v38 = vld [vmem:[%s16323_s2 + $0x118] sm:$0xff]  ;;  %v8478_v57 = vld [vmem:[%s16327_s6 + $0xf0] sm:$0xf]  ;;  %v4652_v42 = vunpack.c.h.bf16 %v4575_v4  ;;  %v3360_v17 = vsub.f32 %v17348_v33, %v17345_v26  ;;  %v4114_v33 = vpop.permute.xlu2 %4113 }
 0x6d1   :  { %v5551_v29 = vpop.f32.mrf.mxu3  ;;  %v4653_v54 = vunpack.c.l.bf16 %v4576_v38  ;;  %v4654_v44 = vunpack.c.h.bf16 %v4576_v38  ;;  %v14062_v14 = vpop.f32.mrf.mxu1 }
 0x6d2   :  { %v14035_v8 = vadd.f32 %v5551_v29, %v5437_v12  ;;  %v4731_v49 = vadd.f32 %v4647_v21, %v4521_v51  ;;  %v4732_v59 = vadd.f32 %v4648_v25, %v4522_v50  ;;  %v8807_v29 = vld [vmem:[%s16327_s6 + $0xf8] sm:$0xf0]  ;;  %v4651_v12 = vunpack.c.l.bf16 %v4575_v4 }
 0x6d3   :  { %v4818_v21 = vmax.f32 %v4734_v62, 0.0  ;;  %v4817_v50 = vmax.f32 %v4733_v22, 0.0  ;;  %v8479_v18 = vor.u32 %v8807_v29, %v8478_v57  ;;  %v4736_v4 = vadd.f32 %v4652_v42, %v4526_v31  ;;  %v17349_v29 = vld [vmem:[#allocation15_spill] sm:$0xff] }
 0x6d4   :  { %v4816_v25 = vmax.f32 %v4732_v59, 0.0  ;;  %v4815_v51 = vmax.f32 %v4731_v49, 0.0  ;;  %v4735_v62 = vadd.f32 %v4651_v12, %v4525_v45  ;;  %v4200_v49 = vmul.f32 %v4109_v7, %v3360_v17  ;;  %v17350_v45 = vld [vmem:[#allocation17_spill] sm:$0xff] }
 0x6d5   :  { %v4089_v9 = vpop.permute.xlu1 %4088  ;;  %v3358_v31 = vsub.f32 %v17350_v45, %v13610_v11  ;;  %5486 = vmatmul.bf16.gmra.mxu1 %v8479_v18  ;;  %5828 = vmatmul.bf16.gmra.mxu0 %v8479_v18 }
 0x6d6   :  { %v4191_v32 = vmul.f32 %v4089_v9, %v3351_v15  ;;  %v4192_v6 = vmul.f32 %v4089_v9, %v3352_v56  ;;  %v14064_v22 = vpack.c.bf16 %v4817_v50, %v4815_v51  ;;  %v14066_v26 = vpack.c.bf16 %v4818_v21, %v4816_v25  ;;  %v4580_v9 = vld [vmem:[%s16323_s2 + $0x138] sm:$0xff] }
 0x6d7   :  { %v4199_v15 = vmul.f32 %v4109_v7, %v3359_v20  ;;  %v3357_v21 = vsub.f32 %v17349_v29, %v13610_v11  ;;  %v14078_v25 = vor.u32 %v8803_v2, %v8468_v5  ;;  %v4661_v20 = vunpack.c.l.bf16 %v4580_v9  ;;  %v17351_v7 = vld [vmem:[#allocation90_spill] sm:$0xff] }
 0x6d8   :  { %v4527_v59 = vadd.f32 %v13736_v35, %v4191_v32  ;;  %v4528_v56 = vadd.f32 %v13736_v35, %v4192_v6  ;;  %v4579_v32 = vld [vmem:[%s16323_s2 + $0x130] sm:$0xff]  ;;  %v4820_v35 = vmax.f32 %v4736_v4, 0.0  ;;  %v4662_v6 = vunpack.c.h.bf16 %v4580_v9  ;;  %v17353_v2 = vld [vmem:[#allocation46_spill] sm:$0xff] }
 0x6d9   :  { %v5553_v38 = vpop.f32.mrf.mxu3  ;;  %v4535_v51 = vadd.f32 %v13605_v0, %v4199_v15  ;;  %v4536_v50 = vadd.f32 %v13605_v0, %v4200_v49  ;;  %v3362_v5 = vsub.f32 %v17353_v2, %v17351_v7  ;;  %v14092_v9 = vpop.f32.mrf.mxu1 }
 0x6da   :  { %v14074_v57 = vadd.f32 %v5553_v38, %v13980_v53  ;;  %v4737_v12 = vadd.f32 %v4653_v54, %v4527_v59  ;;  %v4738_v42 = vadd.f32 %v4654_v44, %v4528_v56  ;;  %v4819_v53 = vmax.f32 %v4735_v62, 0.0  ;;  %v17352_v54 = vld [vmem:[#allocation101_spill] sm:$0xff] }
 0x6db   :  { %v3361_v11 = vsub.f32 %v17352_v54, %v17351_v7  ;;  %v4659_v59 = vunpack.c.l.bf16 %v4579_v32  ;;  %v4660_v56 = vunpack.c.h.bf16 %v4579_v32  ;;  %v4202_v38 = vmul.f32 %v4114_v33, %v3362_v5 }
 0x6dc   :  { %v4822_v17 = vmax.f32 %v4738_v42, 0.0  ;;  %v4821_v44 = vmax.f32 %v4737_v12, 0.0  ;;  %v4745_v29 = vadd.f32 %v4661_v20, %v4535_v51  ;;  %v4746_v12 = vadd.f32 %v4662_v6, %v4536_v50  ;;  %v4581_v42 = vld [vmem:[%s16323_s2 + $0x140] sm:$0xff]  ;;  %v17355_v20 = vld [vmem:[#allocation79_spill] sm:$0xff]  ;;  %v4582_v51 = vld [vmem:[%s16323_s2 + $0x148] sm:$0xff] }
 0x6dd   :  { %v4104_v18 = vpop.permute.xlu1 %4103  ;;  %v4201_v49 = vmul.f32 %v4114_v33, %v3361_v11  ;;  %v3364_v6 = vsub.f32 %v17355_v20, %v13666_v55  ;;  %v4663_v50 = vunpack.c.l.bf16 %v4581_v42  ;;  %v4664_v33 = vunpack.c.h.bf16 %v4581_v42 }
 0x6de   :  { %5595 = vmatmul.bf16.gmra.mxu3 %v14078_v25  ;;  %v4197_v4 = vmul.f32 %v4104_v18, %v3357_v21  ;;  %v4198_v62 = vmul.f32 %v4104_v18, %v3358_v31  ;;  %v14094_v15 = vpack.c.bf16 %v4821_v44, %v4819_v53  ;;  %v14096_v0 = vpack.c.bf16 %v4822_v17, %v4820_v35  ;;  %v17354_v35 = vld [vmem:[#allocation80_spill] sm:$0xff] }
 0x6df   :  { %v3363_v17 = vsub.f32 %v17354_v35, %v13666_v55  ;;  %v4537_v7 = vadd.f32 %v13614_v16, %v4201_v49  ;;  %v4538_v54 = vadd.f32 %v13614_v16, %v4202_v38  ;;  %v4830_v11 = vmax.f32 %v4746_v12, 0.0  ;;  %v8480_v49 = vld [vmem:[%s16327_s6 + $0xfc] sm:$0xf0] }
 0x6e0   :  { %v4533_v45 = vadd.f32 %v13766_v23, %v4197_v4  ;;  %v4534_v32 = vadd.f32 %v13766_v23, %v4198_v62  ;;  %v8490_v23 = vld [vmem:[%s16327_s6 + $0x108] sm:$0xf]  ;;  %v4829_v5 = vmax.f32 %v4745_v29, 0.0 }
 0x6e1   :  { %v5556_v21 = vpop.f32.mrf.mxu3  ;;  %v5452_v38 = vpop.f32.mrf.mxu1  ;;  %v4747_v12 = vadd.f32 %v4663_v50, %v4537_v7 }
 0x6e2   :  { %v14104_v31 = vadd.f32 %v5556_v21, %v13985_v63  ;;  %v4743_v53 = vadd.f32 %v4659_v59, %v4533_v45  ;;  %v4744_v44 = vadd.f32 %v4660_v56, %v4534_v32  ;;  %v8810_v63 = vld [vmem:[%s16327_s6 + $0x110] sm:$0xf0]  ;;  %v4665_v59 = vunpack.c.l.bf16 %v4582_v51 }
 0x6e3   :  { %v4666_v56 = vunpack.c.h.bf16 %v4582_v51  ;;  %v8491_v4 = vor.u32 %v8810_v63, %v8490_v23  ;;  %v8806_v32 = vld [vmem:[%s16327_s6 + $0xf4] sm:$0xf]  ;;  %v4748_v21 = vadd.f32 %v4664_v33, %v4538_v54  ;;  %v4831_v51 = vmax.f32 %v4747_v12, 0.0  ;;  %v8502_v54 = vld [vmem:[%s16327_s6 + $0x120] sm:$0xf] }
 0x6e4   :  { %v4828_v55 = vmax.f32 %v4744_v44, 0.0  ;;  %v4827_v2 = vmax.f32 %v4743_v53, 0.0  ;;  %v8378_v12 = vld [vmem:[%s16327_s6 + $0x20] sm:$0xf] }
 0x6e5   :  { %v4119_v18 = vpop.permute.xlu1 %4118  ;;  %5491 = vmatmul.bf16.gmra.mxu1 %v8491_v4  ;;  %5833 = vmatmul.bf16.gmra.mxu0 %v8491_v4  ;;  %v4832_v23 = vmax.f32 %v4748_v21, 0.0  ;;  %v8781_v21 = vld [vmem:[%s16327_s6 + $0x28] sm:$0xf0] }
 0x6e6   :  { %v4203_v62 = vmul.f32 %v4119_v18, %v3363_v17  ;;  %v4204_v45 = vmul.f32 %v4119_v18, %v3364_v6  ;;  %v5046_v42 = vpack.c.bf16 %v4829_v5, %v4827_v2  ;;  %v8681_v16 = vpack.c.bf16 %v4830_v11, %v4828_v55  ;;  %v8813_v55 = vld [vmem:[%s16327_s6 + $0x128] sm:$0xf0] }
 0x6e7   :  { %v14132_v17 = vor.u32 %v8806_v32, %v8480_v49  ;;  %v8809_v2 = vld [vmem:[%s16327_s6 + $0x10c] sm:$0xf]  ;;  %v8816_v32 = vld [vmem:[%s16327_s6 + $0x140] sm:$0xf0] }
 0x6e8   :  { %v4539_v29 = vadd.f32 %v13789_v52, %v4203_v62  ;;  %v4540_v53 = vadd.f32 %v13789_v52, %v4204_v45 }
 0x6e9   :  { %v5558_v44 = vpop.f32.mrf.mxu3  ;;  %v5454_v7 = vpop.f32.mrf.mxu1 }
 0x6ea   :  { %v14130_v35 = vadd.f32 %v5558_v44, %v14026_v30  ;;  %v4749_v20 = vadd.f32 %v4665_v59, %v4539_v29  ;;  %v4750_v6 = vadd.f32 %v4666_v56, %v4540_v53  ;;  %v14154_v59 = vor.u32 %v8813_v55, %v8502_v54  ;;  %v8390_v54 = vld [vmem:[%s16327_s6 + $0x38] sm:$0xf]  ;;  %v8784_v55 = vld [vmem:[%s16327_s6 + $0x40] sm:$0xf0] }
 0x6eb   :  { %v14213_v53 = vor.u32 %v8781_v21, %v8378_v12  ;;  %v8787_v12 = vld [vmem:[%s16327_s6 + $0x58] sm:$0xf0] }
 0x6ec   :  { %v4833_v63 = vmax.f32 %v4749_v20, 0.0  ;;  %v4834_v11 = vmax.f32 %v4750_v6, 0.0  ;;  %v8526_v6 = vld [vmem:[%s16327_s6 + $0x150] sm:$0xf] }
 0x6ee   :  { %5600 = vmatmul.bf16.gmra.mxu3 %v14132_v17  ;;  %v8678_v50 = vpack.c.bf16 %v4834_v11, %v4832_v23  ;;  %v5048_v33 = vpack.c.bf16 %v4833_v63, %v4831_v51  ;;  %v8819_v51 = vld [vmem:[%s16327_s6 + $0x158] sm:$0xf0]  ;;  %v8516_v63 = vld [vmem:[%s16327_s6 + $0x144] sm:$0xf0] }
 0x6ef   :  { %v8815_v23 = vld [vmem:[%s16327_s6 + $0x13c] sm:$0xf]  ;;  %v14231_v11 = vor.u32 %v8819_v51, %v8526_v6  ;;  %v8550_v51 = vld [vmem:[%s16327_s6 + $0x180] sm:$0xf] }
 0x6f0   :  { %5659 = vmatpush.bf16.msra.mxu2 %v5048_v33  ;;  %8679 = vmatpush.bf16.msk.msra.mxu3 %vm12588_vm13, %v8678_v50 }
 0x6f1   :  { %v5561_v52 = vpop.f32.mrf.mxu3  ;;  %v5457_v5 = vpop.f32.mrf.mxu1 }
 0x6f2   :  { %v14138_v30 = vadd.f32 %v5561_v52, %v14062_v14  ;;  %v8492_v14 = vld [vmem:[%s16327_s6 + $0x114] sm:$0xf0]  ;;  %v14235_v52 = vor.u32 %v8815_v23, %v8516_v63  ;;  %v8825_v23 = vld [vmem:[%s16327_s6 + $0x188] sm:$0xf0] }
 0x6f3   :  { %v14163_v4 = vor.u32 %v8809_v2, %v8492_v14  ;;  %v14245_v14 = vor.u32 %v8784_v55, %v8390_v54  ;;  %v8821_v63 = vld [vmem:[%s16327_s6 + $0x16c] sm:$0xf] }
 0x6f4   :  { %5660 = vmatpush.bf16.msra.mxu2 %v5046_v42  ;;  %8682 = vmatpush.bf16.msk.msra.mxu3 %vm12588_vm13, %v8681_v16 }
 0x6f5   :  { %5496 = vmatmul.bf16.gmra.mxu1 %v14154_v59 }
 0x6f8   :  { %5661 = vmatpush.bf16.msra.mxu2 %v13976_v61  ;;  %8685 = vmatpush.bf16.msk.msra.mxu3 %vm12588_vm13, %v13978_v40  ;;  %v8366_v61 = vld [vmem:[%s16327_s6 + $0x8] sm:$0xf]  ;;  %v8778_v40 = vld [vmem:[%s16327_s6 + $0x10] sm:$0xf0] }
 0x6f9   :  { %v5563_v56 = vpop.f32.mrf.mxu3  ;;  %v14177_v62 = vor.u32 %v8778_v40, %v8366_v61  ;;  %v8538_v61 = vld [vmem:[%s16327_s6 + $0x168] sm:$0xf]  ;;  %v8822_v40 = vld [vmem:[%s16327_s6 + $0x170] sm:$0xf0] }
 0x6fa   :  { %v14161_v18 = vadd.f32 %v5563_v56, %v14092_v9  ;;  %v5459_v9 = vpop.f32.mrf.mxu1 }
 0x6fc   :  { %5662 = vmatpush.bf16.msra.mxu2 %v14094_v15  ;;  %8688 = vmatpush.bf16.msk.msra.mxu3 %vm12588_vm13, %v14096_v0  ;;  %v8514_v0 = vld [vmem:[%s16327_s6 + $0x138] sm:$0xf] }
 0x6fd   :  { %v14199_v49 = vor.u32 %v8816_v32, %v8514_v0  ;;  %v14263_v0 = vor.u32 %v8822_v40, %v8538_v61  ;;  %v8414_v40 = vld [vmem:[%s16327_s6 + $0x68] sm:$0xf] }
 0x6fe   :  { %5605 = vmatmul.bf16.gmra.mxu3 %v14163_v4 }
 0x700   :  { %5663 = vmatpush.bf16.msra.mxu2 %v14064_v22  ;;  %8691 = vmatpush.bf16.msk.msra.mxu3 %vm12588_vm13, %v14066_v26  ;;  %v8812_v22 = vld [vmem:[%s16327_s6 + $0x124] sm:$0xf] }
 0x701   :  { %v5566_v45 = vpop.f32.mrf.mxu3 }
 0x702   :  { %v14183_v15 = vadd.f32 %v5566_v45, %v5452_v38  ;;  %v5462_v26 = vpop.f32.mrf.mxu1  ;;  %v14203_v38 = vor.u32 %v8812_v22, %v8504_v48  ;;  %v8528_v45 = vld [vmem:[%s16327_s6 + $0x15c] sm:$0xf0] }
 0x703   :  { %8608 = vmatmul.msk.bf16.vlgmr.msra.gmra.mxu2 %vm1987_vm8, %v14177_v62 }
 0x705   :  { %5501 = vmatmul.bf16.gmra.mxu1 %v14199_v49 }
 0x709   :  { %v5568_v42 = vpop.f32.mrf.mxu3 }
 0x70a   :  { %v14201_v16 = vadd.f32 %v5568_v42, %v5454_v7  ;;  %v5464_v29 = vpop.f32.mrf.mxu1  ;;  %v8402_v42 = vld [vmem:[%s16327_s6 + $0x50] sm:$0xf] }
 0x70e   :  { %5610 = vmatmul.bf16.gmra.mxu3 %v14203_v38 }
 0x711   :  { %v5571_v44 = vpop.f32.mrf.mxu3 }
 0x712   :  { %v14215_v20 = vadd.f32 %v5571_v44, %v5457_v5  ;;  %v5467_v50 = vpop.f32.mrf.mxu1  ;;  %v14277_v44 = vor.u32 %v8787_v12, %v8402_v42  ;;  %v8562_v12 = vld [vmem:[%s16327_s6 + $0x198] sm:$0xf] }
 0x713   :  { %8609 = vmatmul.msk.bf16.gmra.mxu2 %vm1987_vm8, %v14213_v53 }
 0x715   :  { %5506 = vmatmul.bf16.gmra.mxu1 %v14231_v11 }
 0x719   :  { %v5573_v33 = vpop.f32.mrf.mxu3 }
 0x71a   :  { %v14233_v7 = vadd.f32 %v5573_v33, %v5459_v9  ;;  %v5469_v2 = vpop.f32.mrf.mxu1  ;;  %v8818_v9 = vld [vmem:[%s16327_s6 + $0x154] sm:$0xf]  ;;  %v14295_v33 = vor.u32 %v8825_v23, %v8550_v51  ;;  %v8824_v51 = vld [vmem:[%s16327_s6 + $0x184] sm:$0xf] }
 0x71e   :  { %5615 = vmatmul.bf16.gmra.mxu3 %v14235_v52 }
 0x721   :  { %v5576_v5 = vpop.f32.mrf.mxu3 }
 0x722   :  { %v14247_v56 = vadd.f32 %v5576_v5, %v5462_v26  ;;  %v5472_v32 = vpop.f32.mrf.mxu1  ;;  %v14267_v26 = vor.u32 %v8818_v9, %v8528_v45  ;;  %v8790_v9 = vld [vmem:[%s16327_s6 + $0x70] sm:$0xf0] }
 0x723   :  { %8610 = vmatmul.msk.bf16.gmra.mxu2 %vm1987_vm8, %v14245_v14 }
 0x725   :  { %5511 = vmatmul.bf16.gmra.mxu1 %v14263_v0 }
 0x729   :  { %v5578_v22 = vpop.f32.mrf.mxu3 }
 0x72a   :  { %v14265_v48 = vadd.f32 %v5578_v22, %v5464_v29  ;;  %v5474_v21 = vpop.f32.mrf.mxu1  ;;  %v14309_v22 = vor.u32 %v8790_v9, %v8414_v40  ;;  %v8426_v9 = vld [vmem:[%s16327_s6 + $0x80] sm:$0xf] }
 0x72e   :  { %5620 = vmatmul.bf16.gmra.mxu3 %v14267_v26 }
 0x731   :  { %v5581_v6 = vpop.f32.mrf.mxu3 }
 0x732   :  { %v14279_v29 = vadd.f32 %v5581_v6, %v5467_v50  ;;  %v8540_v50 = vld [vmem:[%s16327_s6 + $0x174] sm:$0xf0]  ;;  %v5477_v54 = vpop.f32.mrf.mxu1  ;;  %v8828_v6 = vld [vmem:[%s16327_s6 + $0x1a0] sm:$0xf0] }
 0x733   :  { %8611 = vmatmul.msk.bf16.gmra.mxu2 %vm1987_vm8, %v14277_v44  ;;  %v14299_v61 = vor.u32 %v8821_v63, %v8540_v50  ;;  %v14327_v23 = vor.u32 %v8828_v6, %v8562_v12 }
 0x735   :  { %17356 = vst [vmem:[#allocation59_spill] sm:$0xff] %v14299_v61  ;;  %5516 = vmatmul.bf16.gmra.mxu1 %v14295_v33 }
 0x739   :  { %v5583_v55 = vpop.f32.mrf.mxu3 }
 0x73a   :  { %v14297_v5 = vadd.f32 %v5583_v55, %v5469_v2  ;;  %v5479_v45 = vpop.f32.mrf.mxu1 }
 0x73e   :  { %5625 = vmatmul.bf16.gmra.mxu3 %v14299_v61 }
 0x741   :  { %v5586_v42 = vpop.f32.mrf.mxu3 }
 0x742   :  { %v14311_v2 = vadd.f32 %v5586_v42, %v5472_v32  ;;  %v8552_v32 = vld [vmem:[%s16327_s6 + $0x18c] sm:$0xf0]  ;;  %v5482_v63 = vpop.f32.mrf.mxu1  ;;  %v8793_v42 = vld [vmem:[%s16327_s6 + $0x88] sm:$0xf0] }
 0x743   :  { %8612 = vmatmul.msk.bf16.gmra.mxu2 %vm1987_vm8, %v14309_v22  ;;  %v14331_v40 = vor.u32 %v8824_v51, %v8552_v32  ;;  %v14341_v6 = vor.u32 %v8793_v42, %v8426_v9  ;;  %v8574_v51 = vld [vmem:[%s16327_s6 + $0x1b0] sm:$0xf]  ;;  %v8831_v32 = vld [vmem:[%s16327_s6 + $0x1b8] sm:$0xf0] }
 0x745   :  { %17357 = vst [vmem:[#allocation19_spill] sm:$0xff] %v14331_v40  ;;  %5521 = vmatmul.bf16.gmra.mxu1 %v14327_v23 }
 0x749   :  { %v5588_v50 = vpop.f32.mrf.mxu3 }
 0x74a   :  { %v14329_v55 = vadd.f32 %v5588_v50, %v5474_v21  ;;  %v5484_v12 = vpop.f32.mrf.mxu1  ;;  %v8827_v50 = vld [vmem:[%s16327_s6 + $0x19c] sm:$0xf] }
 0x74e   :  { %5630 = vmatmul.bf16.gmra.mxu3 %v14331_v40  ;;  %v8802_v40 = vld [vmem:[%s16327_s6 + $0xd0] sm:$0xf0] }
 0x751   :  { %v5591_v24 = vpop.f32.mrf.mxu3 }
 0x752   :  { %v14343_v21 = vadd.f32 %v5591_v24, %v5477_v54  ;;  %v8564_v24 = vld [vmem:[%s16327_s6 + $0x1a4] sm:$0xf0]  ;;  %v14359_v54 = vor.u32 %v8831_v32, %v8574_v51  ;;  %v5487_v9 = vpop.f32.mrf.mxu1  ;;  %v14373_v32 = vor.u32 %v8796_v36, %v8438_v1  ;;  %v8576_v1 = vld [vmem:[%s16327_s6 + $0x1bc] sm:$0xf0] }
 0x753   :  { %8613 = vmatmul.msk.bf16.gmra.mxu2 %vm1987_vm8, %v14341_v6  ;;  %v14363_v37 = vor.u32 %v8827_v50, %v8564_v24  ;;  %v8586_v50 = vld [vmem:[%s16327_s6 + $0x1c8] sm:$0xf]  ;;  %v8834_v24 = vld [vmem:[%s16327_s6 + $0x1d0] sm:$0xf0] }
 0x754   :  { %v14391_v36 = vor.u32 %v8834_v24, %v8586_v50 }
 0x755   :  { %17358 = vst [vmem:[#allocation87_spill] sm:$0xff] %v14363_v37  ;;  %5526 = vmatmul.bf16.gmra.mxu1 %v14359_v54 }
 0x756   :  { %17360 = vst [vmem:[#allocation108_spill] sm:$0xff] %v14391_v36 }
 0x759   :  { %v5593_v42 = vpop.f32.mrf.mxu3 }
 0x75a   :  { %v14361_v3 = vadd.f32 %v5593_v42, %v5479_v45  ;;  %v5489_v51 = vpop.f32.mrf.mxu1  ;;  %v8830_v42 = vld [vmem:[%s16327_s6 + $0x1b4] sm:$0xf] }
 0x75b   :  { %v14395_v60 = vor.u32 %v8830_v42, %v8576_v1  ;;  %v8598_v42 = vld [vmem:[%s16327_s6 + $0x1e0] sm:$0xf]  ;;  %v8837_v1 = vld [vmem:[%s16327_s6 + $0x1e8] sm:$0xf0] }
 0x75d   :  { %17362 = vst [vmem:[#allocation56_spill] sm:$0xff] %v14395_v60 }
 0x75e   :  { %5635 = vmatmul.bf16.gmra.mxu3 %v14363_v37 }
 0x761   :  { %v5596_v39 = vpop.f32.mrf.mxu3 }
 0x762   :  { %v14375_v45 = vadd.f32 %v5596_v39, %v5482_v63  ;;  %v5492_v39 = vpop.f32.mrf.mxu1 }
 0x763   :  { %8614 = vmatmul.msk.bf16.gmra.mxu2 %vm1987_vm8, %v14373_v32 }
 0x764   :  { %17359 = vst [vmem:[#allocation61_spill] sm:$0xff] %v14375_v45  ;;  %v8799_v45 = vld [vmem:[%s16327_s6 + $0xb8] sm:$0xf0] }
 0x765   :  { %5531 = vmatmul.bf16.gmra.mxu1 %v14391_v36  ;;  %v14405_v24 = vor.u32 %v8799_v45, %v8450_v13  ;;  %v8588_v13 = vld [vmem:[%s16327_s6 + $0x1d4] sm:$0xf0] }
 0x769   :  { %v5598_v63 = vpop.f32.mrf.mxu3 }
 0x76a   :  { %v14393_v10 = vadd.f32 %v5598_v63, %v5484_v12  ;;  %v5494_v50 = vpop.f32.mrf.mxu1  ;;  %v8833_v63 = vld [vmem:[%s16327_s6 + $0x1cc] sm:$0xf] }
 0x76c   :  { %17361 = vst [vmem:[#allocation109_spill] sm:$0xff] %v14393_v10  ;;  %v14427_v10 = vor.u32 %v8833_v63, %v8588_v13  ;;  %v8836_v63 = vld [vmem:[%s16327_s6 + $0x1e4] sm:$0xf]  ;;  %v8600_v13 = vld [vmem:[%s16327_s6 + $0x1ec] sm:$0xf0] }
 0x76e   :  { %5640 = vmatmul.bf16.gmra.mxu3 %v14395_v60  ;;  %17366 = vst [vmem:[#allocation98_spill] sm:$0xff] %v14427_v10  ;;  %v8462_v60 = vld [vmem:[%s16327_s6 + $0xc8] sm:$0xf] }
 0x771   :  { %v5601_v37 = vpop.f32.mrf.mxu3 }
 0x772   :  { %v14407_v12 = vadd.f32 %v5601_v37, %v5487_v9  ;;  %v14423_v37 = vor.u32 %v8837_v1, %v8598_v42  ;;  %v5497_v9 = vpop.f32.mrf.mxu1  ;;  %v14437_v1 = vor.u32 %v8802_v40, %v8462_v60 }
 0x773   :  { %8615 = vmatmul.msk.bf16.gmra.mxu2 %vm1987_vm8, %v14405_v24 }
 0x774   :  { %17363 = vst [vmem:[#allocation81_spill] sm:$0xff] %v14407_v12 }
 0x775   :  { %17364 = vst [vmem:[#allocation54_spill] sm:$0xff] %v14423_v37  ;;  %5536 = vmatmul.bf16.gmra.mxu1 %v14423_v37 }
 0x779   :  { %v5603_v45 = vpop.f32.mrf.mxu3 }
 0x77a   :  { %v14425_v12 = vadd.f32 %v5603_v45, %v5489_v51  ;;  %v5499_v42 = vpop.f32.mrf.mxu1 }
 0x77c   :  { %17365 = vst [vmem:[#allocation14_spill] sm:$0xff] %v14425_v12 }
 0x77e   :  { %5645 = vmatmul.bf16.gmra.mxu3 %v14427_v10 }
 0x781   :  { %v5606_v61 = vpop.f32.mrf.mxu3 }
 0x782   :  { %v14439_v51 = vadd.f32 %v5606_v61, %v5492_v39  ;;  %v5502_v12 = vpop.f32.mrf.mxu1  ;;  %v14454_v61 = vor.u32 %v8836_v63, %v8600_v13  ;;  %v8474_v39 = vld [vmem:[%s16327_s6 + $0xe0] sm:$0xf] }
 0x783   :  { %8616 = vmatmul.msk.bf16.gmra.mxu2 %vm1987_vm8, %v14437_v1 }
 0x784   :  { %17367 = vst [vmem:[#allocation106_spill] sm:$0xff] %v14439_v51  ;;  %v8805_v51 = vld [vmem:[%s16327_s6 + $0xe8] sm:$0xf0] }
 0x785   :  { %17369 = vst [vmem:[#allocation104_spill] sm:$0xff] %v14454_v61  ;;  %5892 = vmatmul.bf16.vlgmr.msra.gmra.mxu1 %v13724_v27 }
 0x786   :  { %v5665_v45 = vpop.f32.mrf.mxu2 }
 0x787   :  { %v14450_v10 = vadd.f32 %v5665_v45, %v14035_v8 }
 0x789   :  { %v5608_v60 = vpop.f32.mrf.mxu3 }
 0x78a   :  { %v14452_v40 = vadd.f32 %v5608_v60, %v5494_v50  ;;  %v5504_v8 = vpop.f32.mrf.mxu1  ;;  %v14467_v50 = vor.u32 %v8805_v51, %v8474_v39 }
 0x78c   :  { %17368 = vst [vmem:[#allocation107_spill] sm:$0xff] %v14452_v40 }
 0x78e   :  { %5650 = vmatmul.bf16.gmra.mxu3 %v14454_v61  ;;  %v5667_v37 = vpop.f32.mrf.mxu2 }
 0x78f   :  { %v14465_v45 = vadd.f32 %v5667_v37, %v14074_v57  ;;  %v8486_v57 = vld [vmem:[%s16327_s6 + $0xf8] sm:$0xf]  ;;  %v8808_v37 = vld [vmem:[%s16327_s6 + $0x100] sm:$0xf0] }
 0x791   :  { %v5611_v63 = vpop.f32.mrf.mxu3 }
 0x792   :  { %v14469_v13 = vadd.f32 %v5611_v63, %v5497_v9  ;;  %v5507_v60 = vpop.f32.mrf.mxu1 }
 0x793   :  { %8617 = vmatmul.msk.bf16.gmra.mxu2 %vm1987_vm8, %v14467_v50 }
 0x795   :  { %5897 = vmatmul.bf16.gmra.mxu1 %v13783_v41 }
 0x796   :  { %v5670_v27 = vpop.f32.mrf.mxu2 }
 0x797   :  { %v14474_v40 = vadd.f32 %v5670_v27, %v14104_v31 }
 0x799   :  { %v5613_v36 = vpop.f32.mrf.mxu3 }
 0x79a   :  { %v14476_v61 = vadd.f32 %v5613_v36, %v5499_v42  ;;  %v5509_v51 = vpop.f32.mrf.mxu1  ;;  %v14490_v36 = vor.u32 %v8808_v37, %v8486_v57 }
 0x79c   :  { %17370 = vst [vmem:[#allocation105_spill] sm:$0xff] %v14476_v61 }
 0x79e   :  { %8692 = vmatmul.msk.bf16.vlgmr.msra.gmra.mxu3 %vm1987_vm8, %v14177_v62  ;;  %v5672_v9 = vpop.f32.mrf.mxu2 }
 0x79f   :  { %v14488_v31 = vadd.f32 %v5672_v9, %v14130_v35  ;;  %v8498_v35 = vld [vmem:[%s16327_s6 + $0x110] sm:$0xf] }
 0x7a1   :  { %v5616_v42 = vpop.f32.mrf.mxu3 }
 0x7a2   :  { %v14492_v41 = vadd.f32 %v5616_v42, %v5502_v12  ;;  %v5512_v63 = vpop.f32.mrf.mxu1  ;;  %v8811_v12 = vld [vmem:[%s16327_s6 + $0x118] sm:$0xf0] }
 0x7a3   :  { %8618 = vmatmul.msk.bf16.gmra.mxu2 %vm1987_vm8, %v14490_v36 }
 0x7a5   :  { %5902 = vmatmul.bf16.gmra.mxu1 %v13825_v43 }
 0x7a6   :  { %v5675_v39 = vpop.f32.mrf.mxu2 }
 0x7a7   :  { %v14497_v27 = vadd.f32 %v5675_v39, %v14138_v30 }
 0x7a9   :  { %v5618_v61 = vpop.f32.mrf.mxu3 }
 0x7aa   :  { %v14499_v62 = vadd.f32 %v5618_v61, %v5504_v8  ;;  %v5514_v37 = vpop.f32.mrf.mxu1  ;;  %v14513_v61 = vor.u32 %v8811_v12, %v8498_v35 }
 0x7ac   :  { %17371 = vst [vmem:[#allocation37_spill] sm:$0xff] %v14499_v62 }
 0x7ae   :  { %8693 = vmatmul.msk.bf16.gmra.mxu3 %vm1987_vm8, %v14213_v53  ;;  %v5677_v57 = vpop.f32.mrf.mxu2 }
 0x7af   :  { %v14511_v30 = vadd.f32 %v5677_v57, %v14161_v18  ;;  %v8510_v18 = vld [vmem:[%s16327_s6 + $0x128] sm:$0xf] }
 0x7b1   :  { %v5621_v8 = vpop.f32.mrf.mxu3 }
 0x7b2   :  { %v14515_v43 = vadd.f32 %v5621_v8, %v5507_v60  ;;  %v5517_v42 = vpop.f32.mrf.mxu1  ;;  %v8814_v60 = vld [vmem:[%s16327_s6 + $0x130] sm:$0xf0] }
 0x7b3   :  { %8619 = vmatmul.msk.bf16.gmra.mxu2 %vm1987_vm8, %v14513_v61 }
 0x7b5   :  { %5907 = vmatmul.bf16.gmra.mxu1 %v13856_v47 }
 0x7b6   :  { %v5680_v9 = vpop.f32.mrf.mxu2 }
 0x7b7   :  { %v14520_v39 = vadd.f32 %v5680_v9, %v14183_v15 }
 0x7b9   :  { %v5623_v62 = vpop.f32.mrf.mxu3 }
 0x7ba   :  { %v14522_v53 = vadd.f32 %v5623_v62, %v5509_v51  ;;  %v5519_v12 = vpop.f32.mrf.mxu1  ;;  %v14536_v51 = vor.u32 %v8814_v60, %v8510_v18 }
 0x7bc   :  { %17372 = vst [vmem:[#allocation40_spill] sm:$0xff] %v14522_v53 }
 0x7be   :  { %8694 = vmatmul.msk.bf16.gmra.mxu3 %vm1987_vm8, %v14245_v14  ;;  %v5682_v35 = vpop.f32.mrf.mxu2 }
 0x7bf   :  { %v14534_v15 = vadd.f32 %v5682_v35, %v14201_v16  ;;  %v8522_v16 = vld [vmem:[%s16327_s6 + $0x140] sm:$0xf] }
 0x7c1   :  { %17373 = vst [vmem:[#allocation97_spill] sm:$0xff] %v14534_v15  ;;  %v5626_v62 = vpop.f32.mrf.mxu3 }
 0x7c2   :  { %v14538_v47 = vadd.f32 %v5626_v62, %v5512_v63  ;;  %v5522_v8 = vpop.f32.mrf.mxu1  ;;  %v8817_v63 = vld [vmem:[%s16327_s6 + $0x148] sm:$0xf0] }
 0x7c3   :  { %8620 = vmatmul.msk.bf16.gmra.mxu2 %vm1987_vm8, %v14536_v51 }
 0x7c5   :  { %5912 = vmatmul.bf16.gmra.mxu1 %v13883_v34 }
 0x7c6   :  { %v5685_v57 = vpop.f32.mrf.mxu2 }
 0x7c7   :  { %v14543_v9 = vadd.f32 %v5685_v57, %v14215_v20 }
 0x7c9   :  { %17374 = vst [vmem:[#allocation74_spill] sm:$0xff] %v14543_v9  ;;  %v5628_v53 = vpop.f32.mrf.mxu3 }
 0x7ca   :  { %v14545_v14 = vadd.f32 %v5628_v53, %v5514_v37  ;;  %v5524_v60 = vpop.f32.mrf.mxu1  ;;  %v14559_v37 = vor.u32 %v8817_v63, %v8522_v16 }
 0x7cc   :  { %17375 = vst [vmem:[#allocation38_spill] sm:$0xff] %v14545_v14 }
 0x7ce   :  { %8695 = vmatmul.msk.bf16.gmra.mxu3 %vm1987_vm8, %v14277_v44  ;;  %v5687_v18 = vpop.f32.mrf.mxu2 }
 0x7cf   :  { %v14557_v20 = vadd.f32 %v5687_v18, %v14233_v7  ;;  %v8534_v7 = vld [vmem:[%s16327_s6 + $0x158] sm:$0xf] }
 0x7d1   :  { %17376 = vst [vmem:[#allocation77_spill] sm:$0xff] %v14557_v20  ;;  %v5631_v53 = vpop.f32.mrf.mxu3 }
 0x7d2   :  { %v14561_v34 = vadd.f32 %v5631_v53, %v5517_v42  ;;  %v5527_v62 = vpop.f32.mrf.mxu1  ;;  %v8820_v42 = vld [vmem:[%s16327_s6 + $0x160] sm:$0xf0] }
 0x7d3   :  { %8621 = vmatmul.msk.bf16.gmra.mxu2 %vm1987_vm8, %v14559_v37 }
 0x7d4   :  { %17377 = vst [vmem:[#allocation103_spill] sm:$0xff] %v14561_v34 }
 0x7d5   :  { %5917 = vmatmul.bf16.gmra.mxu1 %v13910_v19 }
 0x7d6   :  { %v5690_v35 = vpop.f32.mrf.mxu2 }
 0x7d7   :  { %v14566_v57 = vadd.f32 %v5690_v35, %v14247_v56 }
 0x7d9   :  { %17378 = vst [vmem:[#allocation33_spill] sm:$0xff] %v14566_v57  ;;  %v5633_v14 = vpop.f32.mrf.mxu3 }
 0x7da   :  { %v14568_v44 = vadd.f32 %v5633_v14, %v5519_v12  ;;  %v5529_v63 = vpop.f32.mrf.mxu1  ;;  %v14582_v12 = vor.u32 %v8820_v42, %v8534_v7 }
 0x7dc   :  { %17379 = vst [vmem:[#allocation28_spill] sm:$0xff] %v14568_v44 }
 0x7de   :  { %8696 = vmatmul.msk.bf16.gmra.mxu3 %vm1987_vm8, %v14309_v22  ;;  %v5692_v16 = vpop.f32.mrf.mxu2 }
 0x7df   :  { %v14580_v56 = vadd.f32 %v5692_v16, %v14265_v48  ;;  %v8546_v48 = vld [vmem:[%s16327_s6 + $0x170] sm:$0xf] }
 0x7e1   :  { %17380 = vst [vmem:[#allocation44_spill] sm:$0xff] %v14580_v56  ;;  %v5636_v14 = vpop.f32.mrf.mxu3 }
 0x7e2   :  { %v14584_v19 = vadd.f32 %v5636_v14, %v5522_v8  ;;  %v5532_v53 = vpop.f32.mrf.mxu1  ;;  %v8823_v8 = vld [vmem:[%s16327_s6 + $0x178] sm:$0xf0] }
 0x7e3   :  { %8622 = vmatmul.msk.bf16.gmra.mxu2 %vm1987_vm8, %v14582_v12 }
 0x7e4   :  { %17381 = vst [vmem:[#allocation86_spill] sm:$0xff] %v14584_v19 }
 0x7e5   :  { %5922 = vmatmul.bf16.gmra.mxu1 %v13937_v46 }
 0x7e6   :  { %v5695_v18 = vpop.f32.mrf.mxu2 }
 0x7e7   :  { %v14589_v35 = vadd.f32 %v5695_v18, %v14279_v29 }
 0x7e9   :  { %17382 = vst [vmem:[#allocation35_spill] sm:$0xff] %v14589_v35  ;;  %v5638_v44 = vpop.f32.mrf.mxu3 }
 0x7ea   :  { %v14591_v22 = vadd.f32 %v5638_v44, %v5524_v60  ;;  %v5534_v42 = vpop.f32.mrf.mxu1  ;;  %v14605_v60 = vor.u32 %v8823_v8, %v8546_v48  ;;  %v5779_v48 = vpop.f32.mrf.mxu0 }
 0x7ec   :  { %17383 = vst [vmem:[#allocation32_spill] sm:$0xff] %v14591_v22 }
 0x7ee   :  { %8697 = vmatmul.msk.bf16.gmra.mxu3 %vm1987_vm8, %v14341_v6  ;;  %v5697_v7 = vpop.f32.mrf.mxu2 }
 0x7ef   :  { %v14603_v29 = vadd.f32 %v5697_v7, %v14297_v5  ;;  %v8558_v5 = vld [vmem:[%s16327_s6 + $0x188] sm:$0xf] }
 0x7f1   :  { %17384 = vst [vmem:[#allocation11_spill] sm:$0xff] %v14603_v29  ;;  %v5641_v44 = vpop.f32.mrf.mxu3 }
 0x7f2   :  { %v14607_v46 = vadd.f32 %v5641_v44, %v5527_v62  ;;  %v5537_v14 = vpop.f32.mrf.mxu1  ;;  %v8826_v62 = vld [vmem:[%s16327_s6 + $0x190] sm:$0xf0]  ;;  %v5781_v44 = vpop.f32.mrf.mxu0  ;;  %5838 = vmatmul.bf16.gmra.mxu0 %v14154_v59 }
 0x7f3   :  { %8623 = vmatmul.msk.bf16.gmra.mxu2 %vm1987_vm8, %v14605_v60 }
 0x7f4   :  { %17385 = vst [vmem:[#allocation78_spill] sm:$0xff] %v14607_v46 }
 0x7f5   :  { %5927 = vmatmul.bf16.gmra.mxu1 %v13974_v58 }
 0x7f6   :  { %v5700_v16 = vpop.f32.mrf.mxu2 }
 0x7f7   :  { %v14612_v18 = vadd.f32 %v5700_v16, %v14311_v2 }
 0x7f9   :  { %17386 = vst [vmem:[#allocation30_spill] sm:$0xff] %v14612_v18  ;;  %v5643_v22 = vpop.f32.mrf.mxu3 }
 0x7fa   :  { %v14614_v6 = vadd.f32 %v5643_v22, %v5529_v63  ;;  %v5539_v2 = vpop.f32.mrf.mxu1  ;;  %v14628_v63 = vor.u32 %v8826_v62, %v8558_v5  ;;  %v5784_v59 = vpop.f32.mrf.mxu0 }
 0x7fc   :  { %17387 = vst [vmem:[#allocation82_spill] sm:$0xff] %v14614_v6 }
 0x7fe   :  { %8698 = vmatmul.msk.bf16.gmra.mxu3 %vm1987_vm8, %v14373_v32  ;;  %v5702_v8 = vpop.f32.mrf.mxu2 }
 0x7ff   :  { %v14626_v7 = vadd.f32 %v5702_v8, %v14329_v55  ;;  %v8570_v55 = vld [vmem:[%s16327_s6 + $0x1a0] sm:$0xf] }
 0x801   :  { %17388 = vst [vmem:[#allocation20_spill] sm:$0xff] %v14626_v7  ;;  %v5646_v58 = vpop.f32.mrf.mxu3 }
 0x802   :  { %v14630_v22 = vadd.f32 %v5646_v58, %v5532_v53  ;;  %v5893_v6 = vpop.f32.mrf.mxu1  ;;  %v8829_v53 = vld [vmem:[%s16327_s6 + $0x1a8] sm:$0xf0]  ;;  %v5786_v8 = vpop.f32.mrf.mxu0  ;;  %5843 = vmatmul.bf16.gmra.mxu0 %v14199_v49 }
 0x803   :  { %8624 = vmatmul.msk.bf16.gmra.mxu2 %vm1987_vm8, %v14628_v63 }
 0x804   :  { %17389 = vst [vmem:[#allocation85_spill] sm:$0xff] %v14630_v22 }
 0x805   :  { %5932 = vmatmul.bf16.gmra.mxu1 %v14010_v28 }
 0x806   :  { %v5705_v16 = vpop.f32.mrf.mxu2 }
 0x807   :  { %v14636_v32 = vadd.f32 %v5705_v16, %v14343_v21 }
 0x809   :  { %17390 = vst [vmem:[#allocation92_spill] sm:$0xff] %v14636_v32  ;;  %v5648_v46 = vpop.f32.mrf.mxu3 }
 0x80a   :  { %v14638_v19 = vadd.f32 %v5648_v46, %v5534_v42  ;;  %v5895_v21 = vpop.f32.mrf.mxu1  ;;  %v14652_v42 = vor.u32 %v8829_v53, %v8570_v55  ;;  %v5894_v55 = vadd.f32 %v5893_v6, %v5779_v48  ;;  %v5789_v53 = vpop.f32.mrf.mxu0 }
 0x80c   :  { %17391 = vst [vmem:[#allocation84_spill] sm:$0xff] %v14638_v19 }
 0x80e   :  { %8699 = vmatmul.msk.bf16.gmra.mxu3 %vm1987_vm8, %v14405_v24  ;;  %v5707_v5 = vpop.f32.mrf.mxu2 }
 0x80f   :  { %v14650_v62 = vadd.f32 %v5707_v5, %v14361_v3  ;;  %v8582_v3 = vld [vmem:[%s16327_s6 + $0x1b8] sm:$0xf] }
 0x811   :  { %17392 = vst [vmem:[#allocation39_spill] sm:$0xff] %v14650_v62  ;;  %v5651_v28 = vpop.f32.mrf.mxu3 }
 0x812   :  { %v14654_v46 = vadd.f32 %v5651_v28, %v5537_v14  ;;  %v5898_v58 = vpop.f32.mrf.mxu1  ;;  %v8832_v14 = vld [vmem:[%s16327_s6 + $0x1c0] sm:$0xf0] }
 0x813   :  { %8625 = vmatmul.msk.bf16.gmra.mxu2 %vm1987_vm8, %v14652_v42  ;;  %v14670_v5 = vor.u32 %v8832_v14, %v8582_v3  ;;  %v6280_v14 = vmul.f32 %v14450_v10, %v14450_v10 }
 0x814   :  { %17393 = vst [vmem:[#allocation69_spill] sm:$0xff] %v14654_v46  ;;  %v6282_v46 = vmul.f32 %v14465_v45, %v14465_v45 }
 0x815   :  { %5937 = vmatmul.bf16.gmra.mxu1 %v14078_v25 }
 0x816   :  { %v5710_v22 = vpop.f32.mrf.mxu2 }
 0x819   :  { %v5653_v16 = vpop.f32.mrf.mxu3 }
 0x81a   :  { %v14659_v24 = vadd.f32 %v5653_v16, %v5539_v2  ;;  %v5900_v49 = vpop.f32.mrf.mxu1  ;;  %v5791_v16 = vpop.f32.mrf.mxu0  ;;  %5848 = vmatmul.bf16.gmra.mxu0 %v14231_v11  ;;  %v8594_v11 = vld [vmem:[%s16327_s6 + $0x1d0] sm:$0xf] }
 0x81c   :  { %17394 = vst [vmem:[#allocation8_spill] sm:$0xff] %v14659_v24  ;;  %v5896_v24 = vadd.f32 %v5895_v21, %v5781_v44  ;;  %v8835_v44 = vld [vmem:[%s16327_s6 + $0x1d8] sm:$0xf0]  ;;  %v5899_v21 = vadd.f32 %v5898_v58, %v5784_v59 }
 0x81e   :  { %8700 = vmatmul.msk.bf16.gmra.mxu3 %vm1987_vm8, %v14437_v1 }
 0x821   :  { %v6007_v2 = vpop.f32.mrf.mxu3 }
 0x822   :  { %v14672_v28 = vadd.f32 %v6007_v2, %v5894_v55  ;;  %v5903_v1 = vpop.f32.mrf.mxu1 }
 0x823   :  { %8626 = vmatmul.msk.bf16.gmra.mxu2 %vm1987_vm8, %v14670_v5 }
 0x824   :  { %v6112_v25 = vadd.f32 %v14672_v28, %v14450_v10  ;;  %v6281_v6 = vmul.f32 %v14672_v28, %v14672_v28 }
 0x825   :  { %5942 = vmatmul.bf16.gmra.mxu1 %v14132_v17 }
 0x826   :  { %6113 = vadd.xlane.f32.xlu0 %v6112_v25  ;;  %v6364_v2 = vadd.f32 %v6281_v6, %v6280_v14  ;;  %v14698_v6 = vor.u32 %v8835_v44, %v8594_v11  ;;  %v6284_v44 = vmul.f32 %v14474_v40, %v14474_v40 }
 0x829   :  { %v6009_v48 = vpop.f32.mrf.mxu3 }
 0x82a   :  { %v14681_v3 = vadd.f32 %v6009_v48, %v5896_v24  ;;  %v5794_v24 = vpop.f32.mrf.mxu0  ;;  %v5905_v25 = vpop.f32.mrf.mxu1 }
 0x82c   :  { %v6115_v55 = vadd.f32 %v14681_v3, %v14465_v45  ;;  %v6283_v17 = vmul.f32 %v14681_v3, %v14681_v3 }
 0x82e   :  { %8701 = vmatmul.msk.bf16.gmra.mxu3 %vm1987_vm8, %v14467_v50  ;;  %6116 = vadd.xlane.f32.xlu2 %v6115_v55  ;;  %v6367_v50 = vadd.f32 %v6283_v17, %v6282_v46  ;;  %v5901_v55 = vadd.f32 %v5900_v49, %v5786_v8  ;;  %v8838_v8 = vld [vmem:[%s16327_s6 + $0x1f0] sm:$0xf0]  ;;  %v5904_v49 = vadd.f32 %v5903_v1, %v5789_v53 }
 0x82f   :  { %6365 = vadd.xlane.f32.xlu0 %v6364_v2  ;;  %v5906_v1 = vadd.f32 %v5905_v25, %v5791_v16 }
 0x831   :  { %v6012_v48 = vpop.f32.mrf.mxu3 }
 0x832   :  { %v14700_v14 = vadd.f32 %v6012_v48, %v5899_v21  ;;  %v5796_v59 = vpop.f32.mrf.mxu0  ;;  %5853 = vmatmul.bf16.gmra.mxu0 %v14263_v0  ;;  %v5908_v2 = vpop.f32.mrf.mxu1  ;;  %v8606_v0 = vld [vmem:[%s16327_s6 + $0x1e8] sm:$0xf] }
 0x833   :  { %8627 = vmatmul.msk.bf16.gmra.mxu2 %vm1987_vm8, %v14698_v6  ;;  %v14726_v48 = vor.u32 %v8838_v8, %v8606_v0 }
 0x834   :  { %v6118_v19 = vadd.f32 %v14700_v14, %v14474_v40  ;;  %v6285_v58 = vmul.f32 %v14700_v14, %v14700_v14 }
 0x835   :  { %5947 = vmatmul.bf16.gmra.mxu1 %v14163_v4 }
 0x836   :  { %6119 = vadd.xlane.f32.xlu1 %v6118_v19  ;;  %6368 = vadd.xlane.f32.xlu2 %v6367_v50  ;;  %v6370_v46 = vadd.f32 %v6285_v58, %v6284_v44 }
 0x839   :  { %v6014_v11 = vpop.f32.mrf.mxu3 }
 0x83a   :  { %v14713_v21 = vadd.f32 %v6014_v11, %v5901_v55  ;;  %v5799_v17 = vpop.f32.mrf.mxu0  ;;  %v5910_v4 = vpop.f32.mrf.mxu1  ;;  %v6286_v11 = vmul.f32 %v14488_v31, %v14488_v31 }
 0x83c   :  { %v6121_v19 = vadd.f32 %v14713_v21, %v14488_v31  ;;  %v6287_v58 = vmul.f32 %v14713_v21, %v14713_v21 }
 0x83e   :  { %8702 = vmatmul.msk.bf16.gmra.mxu3 %vm1987_vm8, %v14490_v36  ;;  %6371 = vadd.xlane.f32.xlu1 %v6370_v46  ;;  %v6373_v36 = vadd.f32 %v6287_v58, %v6286_v11 }
 0x83f   :  { %6122 = vadd.xlane.f32.xlu0 %v6121_v19 }
 0x841   :  { %v6017_v50 = vpop.f32.mrf.mxu3 }
 0x842   :  { %v14730_v55 = vadd.f32 %v6017_v50, %v5904_v49  ;;  %v5801_v53 = vpop.f32.mrf.mxu0  ;;  %5858 = vmatmul.bf16.gmra.mxu0 %v14295_v33  ;;  %v5913_v46 = vpop.f32.mrf.mxu1  ;;  %v6288_v49 = vmul.f32 %v14497_v27, %v14497_v27  ;;  %v5909_v33 = vadd.f32 %v5908_v2, %v5794_v24  ;;  %v5911_v24 = vadd.f32 %v5910_v4, %v5796_v59 }
 0x843   :  { %8628 = vmatmul.msk.bf16.gmra.mxu2 %vm1987_vm8, %v14726_v48 }
 0x844   :  { %v6124_v44 = vadd.f32 %v14730_v55, %v14497_v27  ;;  %v6289_v19 = vmul.f32 %v14730_v55, %v14730_v55 }
 0x845   :  { %5952 = vmatmul.bf16.gmra.mxu1 %v14203_v38  ;;  %v6290_v38 = vmul.f32 %v14511_v30, %v14511_v30 }
 0x846   :  { %6125 = vadd.xlane.f32.xlu2 %v6124_v44  ;;  %v6376_v58 = vadd.f32 %v6289_v19, %v6288_v49 }
 0x847   :  { %6374 = vadd.xlane.f32.xlu0 %v6373_v36 }
 0x849   :  { %v6019_v0 = vpop.f32.mrf.mxu3 }
 0x84a   :  { %v14741_v8 = vadd.f32 %v6019_v0, %v5906_v1  ;;  %v5804_v16 = vpop.f32.mrf.mxu0  ;;  %v5915_v11 = vpop.f32.mrf.mxu1 }
 0x84c   :  { %v6127_v50 = vadd.f32 %v14741_v8, %v14511_v30  ;;  %v6291_v25 = vmul.f32 %v14741_v8, %v14741_v8 }
 0x84e   :  { %8703 = vmatmul.msk.bf16.gmra.mxu3 %vm1987_vm8, %v14513_v61  ;;  %6128 = vadd.xlane.f32.xlu1 %v6127_v50  ;;  %v6379_v1 = vadd.f32 %v6291_v25, %v6290_v38 }
 0x84f   :  { %6377 = vadd.xlane.f32.xlu2 %v6376_v58  ;;  %v6292_v58 = vmul.f32 %v14520_v39, %v14520_v39 }
 0x851   :  { %v6022_v44 = vpop.f32.mrf.mxu3 }
 0x852   :  { %v14752_v36 = vadd.f32 %v6022_v44, %v5909_v33  ;;  %v5806_v61 = vpop.f32.mrf.mxu0  ;;  %5863 = vmatmul.bf16.gmra.mxu0 %v14327_v23  ;;  %v5918_v2 = vpop.f32.mrf.mxu1  ;;  %v5914_v23 = vadd.f32 %v5913_v46, %v5799_v17  ;;  %v5916_v46 = vadd.f32 %v5915_v11, %v5801_v53 }
 0x854   :  { %v6130_v19 = vadd.f32 %v14752_v36, %v14520_v39  ;;  %v6293_v0 = vmul.f32 %v14752_v36, %v14752_v36 }
 0x855   :  { %5957 = vmatmul.bf16.gmra.mxu1 %v14235_v52  ;;  %v6294_v52 = vmul.f32 %v14534_v15, %v14534_v15 }
 0x856   :  { %6380 = vadd.xlane.f32.xlu1 %v6379_v1  ;;  %6131 = vadd.xlane.f32.xlu0 %v6130_v19  ;;  %v6382_v25 = vadd.f32 %v6293_v0, %v6292_v58 }
 0x859   :  { %v6024_v49 = vpop.f32.mrf.mxu3 }
 0x85a   :  { %v14761_v50 = vadd.f32 %v6024_v49, %v5911_v24  ;;  %v5809_v59 = vpop.f32.mrf.mxu0  ;;  %v5920_v1 = vpop.f32.mrf.mxu1  ;;  %v6296_v49 = vmul.f32 %v14543_v9, %v14543_v9 }
 0x85c   :  { %17395 = vst [vmem:[#allocation95_spill] sm:$0xff] %v14761_v50  ;;  %v6133_v33 = vadd.f32 %v14761_v50, %v14534_v15  ;;  %v6295_v4 = vmul.f32 %v14761_v50, %v14761_v50 }
 0x85e   :  { %8704 = vmatmul.msk.bf16.gmra.mxu3 %vm1987_vm8, %v14536_v51  ;;  %6134 = vadd.xlane.f32.xlu2 %v6133_v33  ;;  %v6385_v24 = vadd.f32 %v6295_v4, %v6294_v52 }
 0x85f   :  { %6383 = vadd.xlane.f32.xlu0 %v6382_v25 }
 0x861   :  { %v6027_v44 = vpop.f32.mrf.mxu3 }
 0x862   :  { %v14772_v38 = vadd.f32 %v6027_v44, %v5914_v23  ;;  %v5811_v51 = vpop.f32.mrf.mxu0  ;;  %5868 = vmatmul.bf16.gmra.mxu0 %v14359_v54  ;;  %v5923_v23 = vpop.f32.mrf.mxu1  ;;  %v5919_v54 = vadd.f32 %v5918_v2, %v5804_v16  ;;  %v17399_v16 = vld [vmem:[#allocation108_spill] sm:$0xff]  ;;  %v5921_v2 = vadd.f32 %v5920_v1, %v5806_v61 }
 0x863   :  { %v5924_v61 = vadd.f32 %v5923_v23, %v5809_v59 }
 0x864   :  { %17396 = vst [vmem:[#allocation12_spill] sm:$0xff] %v14772_v38  ;;  %v6136_v19 = vadd.f32 %v14772_v38, %v14543_v9  ;;  %v6297_v17 = vmul.f32 %v14772_v38, %v14772_v38 }
 0x865   :  { %5962 = vmatmul.bf16.gmra.mxu1 %v14267_v26  ;;  %v6298_v26 = vmul.f32 %v14557_v20, %v14557_v20 }
 0x866   :  { %6137 = vadd.xlane.f32.xlu1 %v6136_v19  ;;  %6386 = vadd.xlane.f32.xlu2 %v6385_v24  ;;  %v6388_v33 = vadd.f32 %v6297_v17, %v6296_v49  ;;  %v6300_v49 = vmul.f32 %v14566_v57, %v14566_v57 }
 0x869   :  { %v6029_v0 = vpop.f32.mrf.mxu3 }
 0x86a   :  { %v14783_v58 = vadd.f32 %v6029_v0, %v5916_v46  ;;  %v5814_v53 = vpop.f32.mrf.mxu0  ;;  %v5925_v24 = vpop.f32.mrf.mxu1 }
 0x86c   :  { %17397 = vst [vmem:[#allocation88_spill] sm:$0xff] %v14783_v58  ;;  %v6139_v25 = vadd.f32 %v14783_v58, %v14557_v20  ;;  %v6299_v4 = vmul.f32 %v14783_v58, %v14783_v58 }
 0x86e   :  { %8705 = vmatmul.msk.bf16.gmra.mxu3 %vm1987_vm8, %v14559_v37  ;;  %6389 = vadd.xlane.f32.xlu1 %v6388_v33  ;;  %v6391_v19 = vadd.f32 %v6299_v4, %v6298_v26  ;;  %v17401_v33 = vld [vmem:[#allocation59_spill] sm:$0xff] }
 0x86f   :  { %6140 = vadd.xlane.f32.xlu0 %v6139_v25 }
 0x871   :  { %v6032_v11 = vpop.f32.mrf.mxu3 }
 0x872   :  { %v14792_v44 = vadd.f32 %v6032_v11, %v5919_v54  ;;  %v5816_v37 = vpop.f32.mrf.mxu0  ;;  %5873 = vmatmul.bf16.gmra.mxu0 %v17399_v16  ;;  %v5928_v11 = vpop.f32.mrf.mxu1 }
 0x874   :  { %17398 = vst [vmem:[#allocation76_spill] sm:$0xff] %v14792_v44  ;;  %v6142_v52 = vadd.f32 %v14792_v44, %v14566_v57  ;;  %v6301_v17 = vmul.f32 %v14792_v44, %v14792_v44 }
 0x875   :  { %5967 = vmatmul.bf16.gmra.mxu1 %v17401_v33 }
 0x876   :  { %6143 = vadd.xlane.f32.xlu2 %v6142_v52  ;;  %v6394_v54 = vadd.f32 %v6301_v17, %v6300_v49  ;;  %v6302_v52 = vmul.f32 %v14580_v56, %v14580_v56  ;;  %v17404_v49 = vld [vmem:[#allocation19_spill] sm:$0xff] }
 0x877   :  { %6392 = vadd.xlane.f32.xlu0 %v6391_v19 }
 0x879   :  { %v6034_v46 = vpop.f32.mrf.mxu3 }
 0x87a   :  { %v14801_v0 = vadd.f32 %v6034_v46, %v5921_v2  ;;  %v5930_v17 = vpop.f32.mrf.mxu1  ;;  %v6304_v46 = vmul.f32 %v14589_v35, %v14589_v35 }
 0x87c   :  { %17400 = vst [vmem:[#allocation10_spill] sm:$0xff] %v14801_v0  ;;  %v6145_v25 = vadd.f32 %v14801_v0, %v14580_v56  ;;  %v6303_v1 = vmul.f32 %v14801_v0, %v14801_v0  ;;  %v17427_v0 = vld [vmem:[#allocation14_spill] sm:$0xff] }
 0x87e   :  { %8706 = vmatmul.msk.bf16.gmra.mxu3 %vm1987_vm8, %v14582_v12  ;;  %6146 = vadd.xlane.f32.xlu1 %v6145_v25  ;;  %v6397_v19 = vadd.f32 %v6303_v1, %v6302_v52  ;;  %v5926_v12 = vadd.f32 %v5925_v24, %v5811_v51  ;;  %v5929_v51 = vadd.f32 %v5928_v11, %v5814_v53  ;;  %v5819_v24 = vpop.f32.mrf.mxu0 }
 0x87f   :  { %6395 = vadd.xlane.f32.xlu2 %v6394_v54  ;;  %v5931_v53 = vadd.f32 %v5930_v17, %v5816_v37 }
 0x881   :  { %v6037_v4 = vpop.f32.mrf.mxu3 }
 0x882   :  { %v14812_v26 = vadd.f32 %v6037_v4, %v5924_v61  ;;  %v6306_v4 = vmul.f32 %v14603_v29, %v14603_v29 }
 0x884   :  { %17402 = vst [vmem:[#allocation60_spill] sm:$0xff] %v14812_v26  ;;  %v6148_v16 = vadd.f32 %v14812_v26, %v14589_v35  ;;  %v6305_v59 = vmul.f32 %v14812_v26, %v14812_v26 }
 0x885   :  { %5972 = vmatmul.bf16.gmra.mxu1 %v17404_v49 }
 0x886   :  { %6398 = vadd.xlane.f32.xlu1 %v6397_v19  ;;  %6149 = vadd.xlane.f32.xlu0 %v6148_v16  ;;  %v6400_v25 = vadd.f32 %v6305_v59, %v6304_v46  ;;  %v5933_v16 = vpop.f32.mrf.mxu1  ;;  %v5821_v11 = vpop.f32.mrf.mxu0  ;;  %v6308_v46 = vmul.f32 %v14612_v18, %v14612_v18 }
 0x887   :  { %v5934_v37 = vadd.f32 %v5933_v16, %v5819_v24 }
 0x889   :  { %v6039_v23 = vpop.f32.mrf.mxu3 }
 0x88a   :  { %v14820_v2 = vadd.f32 %v6039_v23, %v5926_v12  ;;  %v17406_v12 = vld [vmem:[#allocation54_spill] sm:$0xff] }
 0x88b   :  { %5878 = vmatmul.bf16.gmra.mxu0 %v17406_v12 }
 0x88c   :  { %17403 = vst [vmem:[#allocation72_spill] sm:$0xff] %v14820_v2  ;;  %v6151_v33 = vadd.f32 %v14820_v2, %v14603_v29  ;;  %v6307_v54 = vmul.f32 %v14820_v2, %v14820_v2 }
 0x88e   :  { %8707 = vmatmul.msk.bf16.gmra.mxu3 %vm1987_vm8, %v14605_v60  ;;  %6152 = vadd.xlane.f32.xlu2 %v6151_v33  ;;  %v6403_v19 = vadd.f32 %v6307_v54, %v6306_v4  ;;  %v17408_v33 = vld [vmem:[#allocation87_spill] sm:$0xff]  ;;  %v5935_v17 = vpop.f32.mrf.mxu1 }
 0x88f   :  { %6401 = vadd.xlane.f32.xlu0 %v6400_v25 }
 0x891   :  { %v6042_v61 = vpop.f32.mrf.mxu3 }
 0x892   :  { %v14831_v1 = vadd.f32 %v6042_v61, %v5929_v51 }
 0x894   :  { %17405 = vst [vmem:[#allocation47_spill] sm:$0xff] %v14831_v1  ;;  %v6154_v52 = vadd.f32 %v14831_v1, %v14612_v18  ;;  %v6309_v60 = vmul.f32 %v14831_v1, %v14831_v1 }
 0x895   :  { %5977 = vmatmul.bf16.gmra.mxu1 %v17408_v33  ;;  %v5824_v33 = vpop.f32.mrf.mxu0 }
 0x896   :  { %6155 = vadd.xlane.f32.xlu1 %v6154_v52  ;;  %6404 = vadd.xlane.f32.xlu2 %v6403_v19  ;;  %v6406_v25 = vadd.f32 %v6309_v60, %v6308_v46  ;;  %v5936_v46 = vadd.f32 %v5935_v17, %v5821_v11 }
 0x899   :  { %v6044_v59 = vpop.f32.mrf.mxu3  ;;  %v6114_v23 = vpop.xlane.xlu0 %6113 }
 0x89a   :  { %v14842_v49 = vadd.f32 %v6044_v59, %v5931_v53  ;;  %v14849_v54 = vmul.f32 0.0051020407, %v6114_v23 }
 0x89c   :  { %17407 = vst [vmem:[#allocation7_spill] sm:$0xff] %v14842_v49  ;;  %v6157_v51 = vadd.f32 %v14842_v49, %v14626_v7  ;;  %v6311_v52 = vmul.f32 %v14842_v49, %v14842_v49  ;;  %v6532_v53 = vmul.f32 %v14849_v54, %v14849_v54 }
 0x89e   :  { %8708 = vmatmul.msk.bf16.gmra.mxu3 %vm1987_vm8, %v14628_v63  ;;  %6407 = vadd.xlane.f32.xlu1 %v6406_v25  ;;  %v6310_v63 = vmul.f32 %v14626_v7, %v14626_v7  ;;  %v5938_v25 = vpop.f32.mrf.mxu1  ;;  %v6312_v7 = vmul.f32 %v14636_v32, %v14636_v32 }
 0x89f   :  { %6158 = vadd.xlane.f32.xlu0 %v6157_v51 }
 0x8a0   :  { %v6409_v59 = vadd.f32 %v6311_v52, %v6310_v63  ;;  %v17411_v52 = vld [vmem:[#allocation56_spill] sm:$0xff] }
 0x8a1   :  { %v6047_v61 = vpop.f32.mrf.mxu3  ;;  %v6117_v4 = vpop.xlane.xlu2 %6116 }
 0x8a2   :  { %v14853_v19 = vadd.f32 %v6047_v61, %v5934_v37  ;;  %v6366_v60 = vpop.xlane.xlu0 %6365 }
 0x8a3   :  { %v6490_v12 = vmul.f32 0.0051020407, %v6366_v60 }
 0x8a4   :  { %17409 = vst [vmem:[#allocation68_spill] sm:$0xff] %v14853_v19  ;;  %v6160_v24 = vadd.f32 %v14853_v19, %v14636_v32  ;;  %v6313_v51 = vmul.f32 %v14853_v19, %v14853_v19  ;;  %v17418_v32 = vld [vmem:[#allocation98_spill] sm:$0xff] }
 0x8a5   :  { %v6574_v16 = vsub.f32 %v6490_v12, %v6532_v53  ;;  %v14867_v53 = vmul.f32 0.0051020407, %v6117_v4  ;;  %5982 = vmatmul.bf16.gmra.mxu1 %v17411_v52 }
 0x8a6   :  { %6161 = vadd.xlane.f32.xlu2 %v6160_v24  ;;  %v6412_v63 = vadd.f32 %v6313_v51, %v6312_v7  ;;  %v5939_v24 = vadd.f32 %v5938_v25, %v5824_v33  ;;  %v5826_v25 = vpop.f32.mrf.mxu0  ;;  %v5940_v51 = vpop.f32.mrf.mxu1 }
 0x8a7   :  { %6410 = vadd.xlane.f32.xlu0 %v6409_v59  ;;  %v6616_v23 = vmax.f32 %v6574_v16, 0.0  ;;  %v6533_v16 = vmul.f32 %v14867_v53, %v14867_v53 }
 0x8a9   :  { %v6049_v37 = vpop.f32.mrf.mxu3  ;;  %v6120_v61 = vpop.xlane.xlu1 %6119  ;;  %v14870_v12 = vadd.f32 1e-05, %v6616_v23 }
 0x8aa   :  { %v14863_v60 = vadd.f32 %v6049_v37, %v5936_v46  ;;  %v6369_v49 = vpop.xlane.xlu2 %6368  ;;  %v17412_v46 = vld [vmem:[#allocation61_spill] sm:$0xff]  ;;  %v14888_v33 = vmul.f32 0.0051020407, %v6120_v61 }
 0x8ab   :  { %v6491_v17 = vmul.f32 0.0051020407, %v6369_v49  ;;  %9099 = vrsqrt.f32 %v14870_v12  ;;  %v14882_v37 = vadd.f32 %v5710_v22, %v17412_v46  ;;  %v5941_v46 = vadd.f32 %v5940_v51, %v5826_v25 }
 0x8ac   :  { %17410 = vst [vmem:[#allocation70_spill] sm:$0xff] %v14863_v60  ;;  %v6163_v11 = vadd.f32 %v14863_v60, %v14650_v62  ;;  %v6315_v4 = vmul.f32 %v14863_v60, %v14863_v60  ;;  %v6534_v22 = vmul.f32 %v14888_v33, %v14888_v33  ;;  %vm6790_vm3 = vweird.f32 %v14870_v12 }
 0x8ad   :  { %v6575_v59 = vsub.f32 %v6491_v17, %v6533_v16  ;;  %17413 = vst [vmem:[#allocation21_spill] sm:$0xff] %v14882_v37 }
 0x8ae   :  { %8709 = vmatmul.msk.bf16.gmra.mxu3 %vm1987_vm8, %v14652_v42  ;;  %6164 = vadd.xlane.f32.xlu1 %v6163_v11  ;;  %v6314_v42 = vmul.f32 %v14650_v62, %v14650_v62  ;;  %v5829_v51 = vpop.f32.mrf.mxu0 }
 0x8af   :  { %6413 = vadd.xlane.f32.xlu2 %v6412_v63  ;;  %v5712_v63 = vpop.f32.mrf.mxu2  ;;  %v6617_v17 = vmax.f32 %v6575_v59, 0.0  ;;  %v6316_v59 = vmul.f32 %v14882_v37, %v14882_v37 }
 0x8b0   :  { %v6415_v52 = vadd.f32 %v6315_v4, %v6314_v42 }
 0x8b1   :  { %v6052_v23 = vpop.f32.mrf.mxu3  ;;  %v6372_v49 = vpop.xlane.xlu1 %6371  ;;  %v14900_v4 = vadd.f32 1e-05, %v6617_v17 }
 0x8b2   :  { %v14884_v7 = vadd.f32 %v6052_v23, %v5939_v24  ;;  %v6492_v16 = vmul.f32 0.0051020407, %v6372_v49  ;;  %v14892_v19 = vpop.eup %9099  ;;  %v17415_v49 = vld [vmem:[#allocation109_spill] sm:$0xff] }
 0x8b3   :  { %v6785_v24 = vmul.f32 %v14892_v19, %v14870_v12  ;;  %9101 = vrsqrt.f32 %v14900_v4  ;;  %vm6791_vm13 = vweird.f32 %v14892_v19  ;;  %vm6800_vm9 = vweird.f32 %v14900_v4 }
 0x8b4   :  { %17414 = vst [vmem:[#allocation75_spill] sm:$0xff] %v14884_v7  ;;  %v6166_v11 = vadd.f32 %v14884_v7, %v14882_v37  ;;  %v6317_v61 = vmul.f32 %v14884_v7, %v14884_v7  ;;  %v6576_v23 = vsub.f32 %v6492_v16, %v6534_v22  ;;  %v5943_v16 = vpop.f32.mrf.mxu1  ;;  %v14914_v22 = vpop.xlane.xlu0 %6122  ;;  %vm6792_vm6 = vmor %vm6790_vm3, %vm6791_vm13 }
 0x8b5   :  { %5987 = vmatmul.bf16.gmra.mxu1 %v17418_v32  ;;  %v6786_v7 = vmul.f32 %v14892_v19, %v6785_v24 }
 0x8b6   :  { %6416 = vadd.xlane.f32.xlu1 %v6415_v52  ;;  %6167 = vadd.xlane.f32.xlu0 %v6166_v11  ;;  %v14905_v52 = vadd.f32 %v5712_v63, %v17415_v49  ;;  %v6418_v60 = vadd.f32 %v6317_v61, %v6316_v59  ;;  %v6618_v17 = vmax.f32 %v6576_v23, 0.0  ;;  %v5944_v63 = vadd.f32 %v5943_v16, %v5829_v51  ;;  %v17419_v59 = vld [vmem:[#allocation81_spill] sm:$0xff] }
 0x8b7   :  { %v6787_v61 = vmul.f32 0.5, %v6786_v7 }
 0x8b8   :  { %17416 = vst [vmem:[#allocation41_spill] sm:$0xff] %v14905_v52  ;;  %v6744_v24 = vadd.f32 1e-05, %v6618_v17 }
 0x8b9   :  { %v6054_v42 = vpop.f32.mrf.mxu3  ;;  %v14918_v32 = vpop.xlane.xlu2 %6125  ;;  %v6788_v51 = vsub.f32 1.5, %v6787_v61 }
 0x8ba   :  { %v14907_v11 = vadd.f32 %v6054_v42, %v5941_v46  ;;  %v5715_v46 = vpop.f32.mrf.mxu2  ;;  %v9102_v62 = vpop.eup %9101  ;;  %9103 = vrsqrt.f32 %v6744_v24  ;;  %vm6810_vm11 = vweird.f32 %v6744_v24 }
 0x8bb   :  { %v14923_v49 = vadd.f32 %v5715_v46, %v17419_v59  ;;  %v6795_v17 = vmul.f32 %v9102_v62, %v14900_v4  ;;  %v6789_v46 = vmul.f32 %v14892_v19, %v6788_v51  ;;  %vm6801_vm7 = vweird.f32 %v9102_v62 }
 0x8bc   :  { %17417 = vst [vmem:[#allocation91_spill] sm:$0xff] %v14907_v11  ;;  %v6169_v25 = vadd.f32 %v14907_v11, %v14905_v52  ;;  %v6319_v23 = vmul.f32 %v14907_v11, %v14907_v11  ;;  %v7204_v11 = vld [vmem:[%s16328_s7] sm:$0xff]  ;;  %vm6802_vm14 = vmor %vm6800_vm9, %vm6801_vm7 }
 0x8bd   :  { %17420 = vst [vmem:[#allocation45_spill] sm:$0xff] %v14923_v49  ;;  %v6796_v61 = vmul.f32 %v9102_v62, %v6795_v17 }
 0x8be   :  { %8710 = vmatmul.msk.bf16.gmra.mxu3 %vm1987_vm8, %v14670_v5  ;;  %6419 = vadd.xlane.f32.xlu0 %v6418_v60  ;;  %v6318_v5 = vmul.f32 %v14905_v52, %v14905_v52 }
 0x8bf   :  { %6170 = vadd.xlane.f32.xlu2 %v6169_v25  ;;  %v6375_v25 = vpop.xlane.xlu0 %6374  ;;  %v6797_v52 = vmul.f32 0.5, %v6796_v61 }
 0x8c0   :  { %v6421_v7 = vadd.f32 %v6319_v23, %v6318_v5  ;;  %v9104_v59 = vpop.eup %9103  ;;  %v17422_v23 = vld [vmem:[#allocation104_spill] sm:$0xff] }
 0x8c1   :  { %v6057_v42 = vpop.f32.mrf.mxu3  ;;  %v6805_v51 = vmul.f32 %v9104_v59, %v6744_v24  ;;  %vm6811_vm10 = vweird.f32 %v9104_v59 }
 0x8c2   :  { %v14925_v37 = vadd.f32 %v6057_v42, %v5944_v63  ;;  %v14935_v63 = vpop.xlane.xlu2 %6377  ;;  %v6320_v42 = vmul.f32 %v14923_v49, %v14923_v49  ;;  %vm6812_vm12 = vmor %vm6810_vm11, %vm6811_vm10  ;;  %v5717_v18 = vpop.f32.mrf.mxu2 }
 0x8c4   :  { %17421 = vst [vmem:[#allocation89_spill] sm:$0xff] %v14925_v37  ;;  %v6172_v60 = vadd.f32 %v14925_v37, %v14923_v49  ;;  %v6321_v16 = vmul.f32 %v14925_v37, %v14925_v37  ;;  %v6806_v49 = vmul.f32 %v9104_v59, %v6805_v51 }
 0x8c5   :  { %5992 = vmatmul.bf16.gmra.mxu1 %v17422_v23  ;;  %v6798_v23 = vsub.f32 1.5, %v6797_v52  ;;  %v7205_v52 = vld [vmem:[%s16328_s7 + $0x8] sm:$0xff] }
 0x8c6   :  { %6173 = vadd.xlane.f32.xlu1 %v6172_v60  ;;  %v6424_v5 = vadd.f32 %v6321_v16, %v6320_v42  ;;  %v6129_v60 = vpop.xlane.xlu1 %6128  ;;  %v6807_v16 = vmul.f32 0.5, %v6806_v49 }
 0x8c7   :  { %6422 = vadd.xlane.f32.xlu2 %v6421_v7  ;;  %v6793_v7 = vsel %vm6792_vm6, %v14892_v19, %v6789_v46  ;;  %v6799_v19 = vmul.f32 %v9102_v62, %v6798_v23  ;;  %v7206_v23 = vld [vmem:[%s16328_s7 + $0x10] sm:$0xff] }
 0x8c8   :  { %v7246_v12 = vmul.f32 %v7204_v11, %v6793_v7  ;;  %v6808_v61 = vsub.f32 1.5, %v6807_v16  ;;  %v14974_v16 = vmul.f32 0.0051020407, %v14914_v22  ;;  %v14988_v22 = vmul.f32 0.0051020407, %v6129_v60 }
 0x8c9   :  { %v14948_v17 = vpop.xlane.xlu0 %6131  ;;  %v14999_v60 = vmul.f32 0.0051020407, %v14918_v32 }
 0x8ca   :  { %v6809_v7 = vmul.f32 %v9104_v59, %v6808_v61 }
 0x8cb   :  { %v6536_v35 = vmul.f32 %v14999_v60, %v14999_v60 }
 0x8ce   :  { %8711 = vmatmul.msk.bf16.gmra.mxu3 %vm1987_vm8, %v14698_v6  ;;  %6425 = vadd.xlane.f32.xlu1 %v6424_v5  ;;  %v6381_v46 = vpop.xlane.xlu1 %6380  ;;  %v6803_v5 = vsel %vm6802_vm14, %v9102_v62, %v6799_v19  ;;  %v6493_v19 = vmul.f32 0.0051020407, %v6375_v25 }
 0x8cf   :  { %v7247_v4 = vmul.f32 %v7205_v52, %v6803_v5 }
 0x8d1   :  { %v6135_v37 = vpop.xlane.xlu2 %6134 }
 0x8d2   :  { %7290 = vperm.xlu0 %8844, %v7246_v12   ;;  %v14950_v42 = vmul.f32 0.0051020407, %v6135_v37  ;;  %v14953_v2 = vpop.xlane.xlu0 %6383  ;;  %v6813_v12 = vsel %vm6812_vm12, %v9104_v59, %v6809_v7  ;;  %v5945_v37 = vpop.f32.mrf.mxu1 }
 0x8d4   :  { %v14960_v11 = vmul.f32 %v14950_v42, %v14950_v42 }
 0x8d9   :  { %v6387_v6 = vpop.xlane.xlu2 %6386  ;;  %v14968_v62 = vpop.xlane.xlu1 %6137 }
 0x8da   :  { %v14962_v49 = vmul.f32 0.0051020407, %v6387_v6  ;;  %v7248_v6 = vmul.f32 %v7206_v23, %v6813_v12 }
 0x8de   :  { %8712 = vmatmul.msk.bf16.gmra.mxu3 %vm1987_vm8, %v14726_v48  ;;  %v6535_v48 = vmul.f32 %v14974_v16, %v14974_v16 }
 0x8df   :  { %7295 = vperm.xlu2 %8846, %v7247_v4  }
 0x8e0   :  { %v6577_v5 = vsub.f32 %v6493_v19, %v6535_v48  ;;  %v5831_v19 = vpop.f32.mrf.mxu0 }
 0x8e1   :  { %v14980_v24 = vpop.xlane.xlu1 %6389 }
 0x8e2   :  { %v6141_v51 = vpop.xlane.xlu0 %6140  ;;  %v6619_v25 = vmax.f32 %v6577_v5, 0.0  ;;  %v6059_v5 = vpop.f32.mrf.mxu3 }
 0x8e3   :  { %v14978_v61 = vmul.f32 0.0051020407, %v6141_v51  ;;  %v6495_v51 = vmul.f32 0.0051020407, %v6381_v46 }
 0x8e4   :  { %v14996_v48 = vadd.f32 1e-05, %v6619_v25  ;;  %v6494_v25 = vmul.f32 0.0051020407, %v14935_v63  ;;  %v5948_v63 = vpop.f32.mrf.mxu1 }
 0x8e5   :  { %17423 = vst [vmem:[#allocation16_spill] sm:$0xff] %v14978_v61  ;;  %v14984_v4 = vmul.f32 %v14978_v61, %v14978_v61 }
 0x8e6   :  { %9105 = vrsqrt.f32 %v14996_v48  ;;  %vm6820_vm15 = vweird.f32 %v14996_v48 }
 0x8e7   :  { %7300 = vperm.xlu1 %8845, %v7248_v6   ;;  %v6537_v6 = vmul.f32 %v14988_v22, %v14988_v22 }
 0x8e9   :  { %v6144_v52 = vpop.xlane.xlu2 %6143  ;;  %v6579_v1 = vsub.f32 %v6495_v51, %v6537_v6 }
 0x8ea   :  { %v6393_v59 = vpop.xlane.xlu0 %6392  ;;  %v14992_v23 = vmul.f32 0.0051020407, %v6144_v52  ;;  %v5946_v52 = vadd.f32 %v5945_v37, %v5831_v19  ;;  %v6578_v37 = vsub.f32 %v6494_v25, %v6536_v35  ;;  %v5834_v19 = vpop.f32.mrf.mxu0 }
 0x8eb   :  { %v14986_v7 = vmul.f32 0.0051020407, %v6393_v59  ;;  %v6621_v32 = vmax.f32 %v6579_v1, 0.0 }
 0x8ec   :  { %17424 = vst [vmem:[#allocation73_spill] sm:$0xff] %v14992_v23  ;;  %v15003_v12 = vmul.f32 %v14992_v23, %v14992_v23  ;;  %v15011_v6 = vadd.f32 %v6059_v5, %v5946_v52  ;;  %v15030_v52 = vpop.eup %9105 }
 0x8ed   :  { %v15020_v44 = vadd.f32 1e-05, %v6621_v32  ;;  %v6815_v25 = vmul.f32 %v15030_v52, %v14996_v48  ;;  %vm6821_vm8 = vweird.f32 %v15030_v52  ;;  %v7207_v48 = vld [vmem:[%s16328_s7 + $0x18] sm:$0xff] }
 0x8ee   :  { %17425 = vst [vmem:[#allocation13_spill] sm:$0xff] %v15011_v6  ;;  %v6323_v32 = vmul.f32 %v15011_v6, %v15011_v6  ;;  %vm6822_vm0 = vmor %vm6820_vm15, %vm6821_vm8 }
 0x8ef   :  { %9107 = vrsqrt.f32 %v15020_v44  ;;  %v6816_v23 = vmul.f32 %v15030_v52, %v6815_v25  ;;  %vm6840_vm5 = vweird.f32 %v15020_v44 }
 0x8f1   :  { %v6147_v29 = vpop.xlane.xlu1 %6146 }
 0x8f2   :  { %v6396_v59 = vpop.xlane.xlu2 %6395  ;;  %v15013_v26 = vmul.f32 0.0051020407, %v6147_v29  ;;  %v5836_v25 = vpop.f32.mrf.mxu0 }
 0x8f3   :  { %v15005_v46 = vmul.f32 0.0051020407, %v6396_v59  ;;  %v15018_v59 = vadd.f32 %v5717_v18, %v17427_v0  ;;  %v6620_v18 = vmax.f32 %v6578_v37, 0.0  ;;  %v5949_v0 = vadd.f32 %v5948_v63, %v5834_v19 }
 0x8f4   :  { %17426 = vst [vmem:[#allocation15_spill] sm:$0xff] %v15013_v26  ;;  %v15024_v51 = vmul.f32 %v15013_v26, %v15013_v26  ;;  %v6062_v26 = vpop.f32.mrf.mxu3  ;;  %v6496_v37 = vmul.f32 0.0051020407, %v14953_v2  ;;  %v17431_v2 = vld [vmem:[#allocation106_spill] sm:$0xff] }
 0x8f5   :  { %17428 = vst [vmem:[#allocation17_spill] sm:$0xff] %v15018_v59  ;;  %v6175_v1 = vadd.f32 %v15011_v6, %v15018_v59  ;;  %v6322_v35 = vmul.f32 %v15018_v59, %v15018_v59  ;;  %v15047_v19 = vadd.f32 1e-05, %v6620_v18  ;;  %v15050_v6 = vadd.f32 %v6062_v26, %v5949_v0  ;;  %v15060_v61 = vpop.eup %9107  ;;  %v5950_v26 = vpop.f32.mrf.mxu1 }
 0x8f6   :  { %v6817_v0 = vmul.f32 0.5, %v6816_v23  ;;  %vm6841_vm1 = vweird.f32 %v15060_v61 }
 0x8f7   :  { %17430 = vst [vmem:[#allocation101_spill] sm:$0xff] %v15050_v6  ;;  %v6427_v20 = vadd.f32 %v6323_v32, %v6322_v35  ;;  %9109 = vrsqrt.f32 %v15047_v19  ;;  %v6325_v9 = vmul.f32 %v15050_v6, %v15050_v6  ;;  %vm6842_vm2 = vmor %vm6840_vm5, %vm6841_vm1  ;;  %vm6830_vm13 = vweird.f32 %v15047_v19 }
 0x8f9   :  { %v6399_v56 = vpop.xlane.xlu1 %6398  ;;  %v6150_v29 = vpop.xlane.xlu0 %6149 }
 0x8fa   :  { %v15026_v5 = vmul.f32 0.0051020407, %v6399_v56  ;;  %v15040_v56 = vmul.f32 0.0051020407, %v14948_v17  ;;  %v15042_v57 = vmul.f32 0.0051020407, %v6150_v29 }
 0x8fc   :  { %6176 = vadd.xlane.f32.xlu0 %v6175_v1  ;;  %17429 = vst [vmem:[#allocation90_spill] sm:$0xff] %v15042_v57  ;;  %v5720_v1 = vpop.f32.mrf.mxu2  ;;  %v6538_v17 = vmul.f32 %v15040_v56, %v15040_v56  ;;  %v15056_v29 = vmul.f32 %v15042_v57, %v15042_v57  ;;  %v5951_v57 = vadd.f32 %v5950_v26, %v5836_v25 }
 0x8fd   :  { %v15063_v18 = vadd.f32 %v5720_v1, %v17431_v2  ;;  %v6818_v2 = vsub.f32 1.5, %v6817_v0  ;;  %v15076_v23 = vpop.eup %9109  ;;  %v17435_v0 = vld [vmem:[#allocation107_spill] sm:$0xff] }
 0x8fe   :  { %v6580_v34 = vsub.f32 %v6496_v37, %v6538_v17  ;;  %v6064_v37 = vpop.f32.mrf.mxu3  ;;  %vm6831_vm4 = vweird.f32 %v15076_v23 }
 0x8ff   :  { %17432 = vst [vmem:[#allocation46_spill] sm:$0xff] %v15063_v18  ;;  %v6178_v32 = vadd.f32 %v15050_v6, %v15063_v18  ;;  %v15079_v15 = vadd.f32 %v6064_v37, %v5951_v57  ;;  %v6324_v25 = vmul.f32 %v15063_v18, %v15063_v18  ;;  %v6825_v57 = vmul.f32 %v15076_v23, %v15047_v19  ;;  %vm6832_vm3 = vmor %vm6830_vm13, %vm6831_vm4 }
 0x900   :  { %v6622_v1 = vmax.f32 %v6580_v34, 0.0 }
 0x901   :  { %v6153_v63 = vpop.xlane.xlu2 %6152  ;;  %17434 = vst [vmem:[#allocation79_spill] sm:$0xff] %v15079_v15  ;;  %v6430_v37 = vadd.f32 %v6325_v9, %v6324_v25 }
 0x902   :  { %v6402_v58 = vpop.xlane.xlu0 %6401  ;;  %v15072_v38 = vmul.f32 0.0051020407, %v6153_v63  ;;  %v15089_v26 = vadd.f32 1e-05, %v6622_v1  ;;  %v6819_v1 = vmul.f32 %v15030_v52, %v6818_v2  ;;  %v6327_v2 = vmul.f32 %v15079_v15, %v15079_v15 }
 0x903   :  { %v15058_v59 = vmul.f32 0.0051020407, %v6402_v58  ;;  %v6835_v58 = vmul.f32 %v15060_v61, %v15020_v44 }
 0x904   :  { %6428 = vadd.xlane.f32.xlu0 %v6427_v20  ;;  %17433 = vst [vmem:[#allocation80_spill] sm:$0xff] %v15072_v38  ;;  %v5722_v20 = vpop.f32.mrf.mxu2  ;;  %v15083_v63 = vmul.f32 %v15072_v38, %v15072_v38  ;;  %9111 = vrsqrt.f32 %v15089_v26  ;;  %vm6850_vm7 = vweird.f32 %v15089_v26 }
 0x905   :  { %v6836_v50 = vmul.f32 %v15060_v61, %v6835_v58 }
 0x908   :  { %6179 = vadd.xlane.f32.xlu2 %v6178_v32  ;;  %v15092_v32 = vadd.f32 %v5722_v20, %v17435_v0 }
 0x909   :  { %v6156_v17 = vpop.xlane.xlu1 %6155  ;;  %v6405_v35 = vpop.xlane.xlu2 %6404 }
 0x90a   :  { %v15085_v34 = vmul.f32 0.0051020407, %v6405_v35  ;;  %17436 = vst [vmem:[#allocation108_spill] sm:$0xff] %v15092_v32  ;;  %v15098_v58 = vmul.f32 0.0051020407, %v6156_v17  ;;  %v6837_v35 = vmul.f32 0.5, %v6836_v50  ;;  %v6181_v18 = vadd.f32 %v15079_v15, %v15092_v32  ;;  %v9112_v6 = vpop.eup %9111 }
 0x90b   :  { %v6826_v17 = vmul.f32 %v15076_v23, %v6825_v57  ;;  %v6326_v57 = vmul.f32 %v15092_v32, %v15092_v32  ;;  %vm6851_vm6 = vweird.f32 %v9112_v6 }
 0x90c   :  { %17437 = vst [vmem:[#allocation59_spill] sm:$0xff] %v15098_v58  ;;  %v15109_v9 = vmul.f32 %v15098_v58, %v15098_v58  ;;  %v6838_v0 = vsub.f32 1.5, %v6837_v35  ;;  %vm6852_vm9 = vmor %vm6850_vm7, %vm6851_vm6 }
 0x90d   :  { %v6433_v15 = vadd.f32 %v6327_v2, %v6326_v57 }
 0x910   :  { %6431 = vadd.xlane.f32.xlu2 %v6430_v37  ;;  %v6823_v37 = vsel %vm6822_vm0, %v15030_v52, %v6819_v1  ;;  %v6839_v52 = vmul.f32 %v15060_v61, %v6838_v0  ;;  %v6845_v1 = vmul.f32 %v9112_v6, %v15089_v26 }
 0x911   :  { %6182 = vadd.xlane.f32.xlu1 %v6181_v18  ;;  %v6408_v20 = vpop.xlane.xlu1 %6407  ;;  %v7249_v38 = vmul.f32 %v7207_v48, %v6823_v37 }
 0x912   :  { %v15111_v50 = vmul.f32 0.0051020407, %v6408_v20  ;;  %v6159_v25 = vpop.xlane.xlu0 %6158  ;;  %v6827_v20 = vmul.f32 0.5, %v6826_v17  ;;  %v6846_v44 = vmul.f32 %v9112_v6, %v6845_v1 }
 0x913   :  { %v15124_v35 = vmul.f32 0.0051020407, %v6159_v25  ;;  %v6843_v25 = vsel %vm6842_vm2, %v15060_v61, %v6839_v52 }
 0x914   :  { %v6828_v32 = vsub.f32 1.5, %v6827_v20 }
 0x915   :  { %17438 = vst [vmem:[#allocation19_spill] sm:$0xff] %v15124_v35  ;;  %v15131_v17 = vmul.f32 %v15124_v35, %v15124_v35 }
 0x916   :  { %v6829_v48 = vmul.f32 %v15076_v23, %v6828_v32 }
 0x918   :  { %7305 = vperm.xlu0 %8844, %v7249_v38   ;;  %v7209_v38 = vld [vmem:[%s16328_s7 + $0x28] sm:$0xff]  ;;  %v6833_v1 = vsel %vm6832_vm3, %v15076_v23, %v6829_v48 }
 0x919   :  { %6434 = vadd.xlane.f32.xlu1 %v6433_v15  ;;  %v6162_v18 = vpop.xlane.xlu2 %6161  ;;  %v7251_v0 = vmul.f32 %v7209_v38, %v6843_v25 }
 0x91a   :  { %v6411_v58 = vpop.xlane.xlu0 %6410  ;;  %v15142_v2 = vmul.f32 0.0051020407, %v6162_v18  ;;  %v7208_v18 = vld [vmem:[%s16328_s7 + $0x20] sm:$0xff] }
 0x91b   :  { %v15133_v37 = vmul.f32 0.0051020407, %v6411_v58  ;;  %v6847_v58 = vmul.f32 0.5, %v6846_v44  ;;  %v7250_v38 = vmul.f32 %v7208_v18, %v6833_v1  ;;  %v7210_v1 = vld [vmem:[%s16328_s7 + $0x30] sm:$0xff] }
 0x91c   :  { %17439 = vst [vmem:[#allocation54_spill] sm:$0xff] %v15142_v2  ;;  %v15148_v20 = vmul.f32 %v15142_v2, %v15142_v2 }
 0x91d   :  { %v6848_v32 = vsub.f32 1.5, %v6847_v58 }
 0x91e   :  { %17440 = vst [vmem:[#allocation87_spill] sm:$0xff] %v15148_v20 }
 0x920   :  { %7315 = vperm.xlu0 %8844, %v7251_v0   ;;  %v6849_v0 = vmul.f32 %v9112_v6, %v6848_v32 }
 0x921   :  { %v6165_v61 = vpop.xlane.xlu1 %6164 }
 0x922   :  { %v6414_v57 = vpop.xlane.xlu2 %6413  ;;  %v15158_v25 = vmul.f32 0.0051020407, %v6165_v61  ;;  %v6853_v61 = vsel %vm6852_vm9, %v9112_v6, %v6849_v0  ;;  %v6498_v6 = vmul.f32 0.0051020407, %v14980_v24 }
 0x923   :  { %v15150_v52 = vmul.f32 0.0051020407, %v6414_v57  ;;  %v7252_v32 = vmul.f32 %v7210_v1, %v6853_v61  ;;  %v5839_v1 = vpop.f32.mrf.mxu0 }
 0x924   :  { %17441 = vst [vmem:[#allocation56_spill] sm:$0xff] %v15158_v25  ;;  %v15162_v57 = vmul.f32 %v15158_v25, %v15158_v25  ;;  %v6067_v25 = vpop.f32.mrf.mxu3 }
 0x928   :  { %7310 = vperm.xlu2 %8846, %v7250_v38   ;;  %v15175_v38 = vmul.f32 0.0051020407, %v14968_v62 }
 0x929   :  { %v6417_v44 = vpop.xlane.xlu1 %6416  ;;  %v6168_v48 = vpop.xlane.xlu0 %6167 }
 0x92a   :  { %v15164_v23 = vmul.f32 0.0051020407, %v6417_v44  ;;  %v15172_v18 = vmul.f32 0.0051020407, %v6168_v48  ;;  %v6540_v48 = vmul.f32 %v15175_v38, %v15175_v38 }
 0x92c   :  { %17442 = vst [vmem:[#allocation61_spill] sm:$0xff] %v15172_v18  ;;  %v15179_v26 = vmul.f32 %v15172_v18, %v15172_v18  ;;  %v6582_v62 = vsub.f32 %v6498_v6, %v6540_v48 }
 0x92e   :  { %17443 = vst [vmem:[#allocation109_spill] sm:$0xff] %v15179_v26  ;;  %v6624_v24 = vmax.f32 %v6582_v62, 0.0 }
 0x930   :  { %v15200_v6 = vadd.f32 1e-05, %v6624_v24 }
 0x931   :  { %v6420_v19 = vpop.xlane.xlu0 %6419 }
 0x932   :  { %v6171_v44 = vpop.xlane.xlu2 %6170  ;;  %7320 = vperm.xlu1 %8845, %v7252_v32   ;;  %v15181_v15 = vmul.f32 0.0051020407, %v6420_v19  ;;  %v5953_v32 = vpop.f32.mrf.mxu1  ;;  %9113 = vrsqrt.f32 %v15200_v6  ;;  %vm6870_vm10 = vweird.f32 %v15200_v6 }
 0x933   :  { %v15188_v61 = vmul.f32 0.0051020407, %v6171_v44  ;;  %v5725_v44 = vpop.f32.mrf.mxu2  ;;  %v5954_v26 = vadd.f32 %v5953_v32, %v5839_v1  ;;  %v6658_v1 = vsub.f32 %v14450_v10, %v14849_v54  ;;  %v6659_v32 = vsub.f32 %v14672_v28, %v14849_v54 }
 0x934   :  { %17444 = vst [vmem:[#allocation98_spill] sm:$0xff] %v15181_v15  ;;  %v6660_v15 = vsub.f32 %v14465_v45, %v14867_v53  ;;  %v15224_v10 = vadd.f32 %v5725_v44, %v14469_v13  ;;  %v17453_v28 = vsub.f32 %v14962_v49, %v14960_v11  ;;  %v17455_v49 = vld [vmem:[#allocation105_spill] sm:$0xff] }
 0x935   :  { %17445 = vst [vmem:[#allocation81_spill] sm:$0xff] %v15188_v61  ;;  %v15192_v18 = vmul.f32 %v15188_v61, %v15188_v61  ;;  %v6661_v61 = vsub.f32 %v14681_v3, %v14867_v53  ;;  %v15216_v45 = vadd.f32 %v6067_v25, %v5954_v26  ;;  %v17454_v26 = vld [vmem:[#allocation25_spill] sm:$0xff] }
 0x936   :  { %v6623_v54 = vmax.f32 %v17453_v28, 0.0 }
 0x937   :  { %17446 = vst [vmem:[#allocation104_spill] sm:$0xff] %v15192_v18  ;;  %v6329_v11 = vmul.f32 %v15216_v45, %v15216_v45 }
 0x938   :  { %17450 = vst [vmem:[#allocation110_spill] sm:$0xff] %v15216_v45  ;;  %v6749_v13 = vadd.f32 1e-05, %v6623_v54 }
 0x939   :  { %v6174_v58 = vpop.xlane.xlu1 %6173 }
 0x93a   :  { %v6423_v2 = vpop.xlane.xlu2 %6422  ;;  %v15198_v35 = vmul.f32 0.0051020407, %v6174_v58  ;;  %v5841_v58 = vpop.f32.mrf.mxu0  ;;  %9115 = vrsqrt.f32 %v6749_v13  ;;  %vm6860_vm8 = vweird.f32 %v6749_v13 }
 0x93b   :  { %v15194_v19 = vmul.f32 0.0051020407, %v6423_v2  ;;  %v5955_v3 = vpop.f32.mrf.mxu1 }
 0x93c   :  { %17448 = vst [vmem:[#allocation106_spill] sm:$0xff] %v15198_v35  ;;  %v15208_v2 = vmul.f32 %v15198_v35, %v15198_v35  ;;  %v5956_v25 = vadd.f32 %v5955_v3, %v5841_v58 }
 0x93d   :  { %17447 = vst [vmem:[#allocation14_spill] sm:$0xff] %v15194_v19 }
 0x93e   :  { %17449 = vst [vmem:[#allocation107_spill] sm:$0xff] %v15208_v2  ;;  %v6069_v2 = vpop.f32.mrf.mxu3 }
 0x93f   :  { %v15233_v44 = vadd.f32 %v6069_v2, %v5956_v25 }
 0x941   :  { %v6426_v48 = vpop.xlane.xlu1 %6425 }
 0x942   :  { %v15210_v62 = vmul.f32 0.0051020407, %v6426_v48  ;;  %v7296_v0 = vpop.permute.xlu2 %7295  ;;  %v17451_v48 = vld [vmem:[#allocation42_spill] sm:$0xff] }
 0x943   :  { %v7500_v18 = vmul.f32 %v7296_v0, %v6660_v15  ;;  %v7501_v19 = vmul.f32 %v7296_v0, %v6661_v61  ;;  %17452 = vst [vmem:[#allocation42_spill] sm:$0xff] %v15224_v10  ;;  %v5958_v3 = vpop.f32.mrf.mxu1 }
 0x944   :  { %v7291_v24 = vpop.permute.xlu0 %7290 }
 0x945   :  { %v7836_v35 = vadd.f32 %v17451_v48, %v7500_v18  ;;  %v7837_v15 = vadd.f32 %v17451_v48, %v7501_v19  ;;  %v7498_v0 = vmul.f32 %v7291_v24, %v6658_v1  ;;  %v7499_v61 = vmul.f32 %v7291_v24, %v6659_v32  ;;  %v9114_v19 = vpop.eup %9113  ;;  %v5727_v1 = vpop.f32.mrf.mxu2 }
 0x946   :  { %v6184_v18 = vadd.f32 %v15216_v45, %v15224_v10  ;;  %v6865_v58 = vmul.f32 %v9114_v19, %v15200_v6  ;;  %v6328_v32 = vmul.f32 %v15224_v10, %v15224_v10  ;;  %v6072_v28 = vpop.f32.mrf.mxu3  ;;  %v9116_v54 = vpop.eup %9115  ;;  %vm6871_vm14 = vweird.f32 %v9114_v19 }
 0x947   :  { %7920 = vst [vmem:[#allocation2 + $0x10] sm:$0xff] %v7836_v35  ;;  %v7834_v20 = vadd.f32 %v17454_v26, %v7498_v0  ;;  %v7835_v53 = vadd.f32 %v17454_v26, %v7499_v61  ;;  %v15238_v35 = vadd.f32 %v5727_v1, %v17455_v49  ;;  %v17456_v0 = vsub.f32 %v14986_v7, %v14984_v4  ;;  %vm6872_vm11 = vmor %vm6870_vm10, %vm6871_vm14 }
 0x948   :  { %7921 = vst [vmem:[#allocation2 + $0x18] sm:$0xff] %v7837_v15  ;;  %v6436_v24 = vadd.f32 %v6329_v11, %v6328_v32  ;;  %v6866_v2 = vmul.f32 %v9114_v19, %v6865_v58  ;;  %v6331_v15 = vmul.f32 %v15233_v44, %v15233_v44  ;;  %v6855_v32 = vmul.f32 %v9116_v54, %v6749_v13 }
 0x949   :  { %7918 = vst [vmem:[#allocation2] sm:$0xff] %v7834_v20  ;;  %v5844_v20 = vpop.f32.mrf.mxu0  ;;  %v6625_v61 = vmax.f32 %v17456_v0, 0.0  ;;  %v6330_v25 = vmul.f32 %v15238_v35, %v15238_v35  ;;  %v6663_v4 = vsub.f32 %v14700_v14, %v14888_v33  ;;  %vm6861_vm12 = vweird.f32 %v9116_v54 }
 0x94a   :  { %7919 = vst [vmem:[#allocation2 + $0x8] sm:$0xff] %v7835_v53  ;;  %6185 = vadd.xlane.f32.xlu0 %v6184_v18  ;;  %v6187_v53 = vadd.f32 %v15233_v44, %v15238_v35  ;;  %v5959_v48 = vadd.f32 %v5958_v3, %v5844_v20  ;;  %v6867_v18 = vmul.f32 0.5, %v6866_v2  ;;  %v6662_v20 = vsub.f32 %v14474_v40, %v14888_v33  ;;  %vm6862_vm15 = vmor %vm6860_vm8, %vm6861_vm12 }
 0x94b   :  { %v6751_v11 = vadd.f32 1e-05, %v6625_v61  ;;  %v6439_v49 = vadd.f32 %v6331_v15, %v6330_v25  ;;  %v17457_v15 = vld [vmem:[#allocation93_spill] sm:$0xff] }
 0x94c   :  { %v15252_v1 = vadd.f32 %v6072_v28, %v5959_v48  ;;  %v6868_v7 = vsub.f32 1.5, %v6867_v18  ;;  %v6856_v48 = vmul.f32 %v9116_v54, %v6855_v32 }
 0x94d   :  { %v5730_v26 = vpop.f32.mrf.mxu2  ;;  %9117 = vrsqrt.f32 %v6751_v11  ;;  %vm6880_vm1 = vweird.f32 %v6751_v11 }
 0x94e   :  { %v15255_v58 = vadd.f32 %v5730_v26, %v14492_v41  ;;  %v6869_v40 = vmul.f32 %v9114_v19, %v6868_v7  ;;  %v6333_v14 = vmul.f32 %v15252_v1, %v15252_v1  ;;  %v6857_v61 = vmul.f32 0.5, %v6856_v48  ;;  %v7212_v26 = vld [vmem:[%s16328_s7 + $0x40] sm:$0xff] }
 0x950   :  { %v6190_v2 = vadd.f32 %v15252_v1, %v15255_v58  ;;  %v6332_v33 = vmul.f32 %v15255_v58, %v15255_v58  ;;  %v6873_v25 = vsel %vm6872_vm11, %v9114_v19, %v6869_v40  ;;  %v7211_v19 = vld [vmem:[%s16328_s7 + $0x38] sm:$0xff]  ;;  %v7213_v40 = vld [vmem:[%s16328_s7 + $0x48] sm:$0xff] }
 0x951   :  { %6188 = vadd.xlane.f32.xlu2 %v6187_v53 }
 0x952   :  { %6437 = vadd.xlane.f32.xlu0 %v6436_v24  ;;  %v6442_v18 = vadd.f32 %v6333_v14, %v6332_v33 }
 0x953   :  { %v9118_v28 = vpop.eup %9117 }
 0x954   :  { %v6875_v32 = vmul.f32 %v9118_v28, %v6751_v11  ;;  %vm6881_vm0 = vweird.f32 %v9118_v28 }
 0x955   :  { %vm6882_vm5 = vmor %vm6880_vm1, %vm6881_vm0 }
 0x956   :  { %v6876_v6 = vmul.f32 %v9118_v28, %v6875_v32 }
 0x958   :  { %v6877_v7 = vmul.f32 0.5, %v6876_v6 }
 0x959   :  { %6440 = vadd.xlane.f32.xlu2 %v6439_v49  ;;  %v7301_v3 = vpop.permute.xlu1 %7300  ;;  %v6858_v49 = vsub.f32 1.5, %v6857_v61 }
 0x95a   :  { %v7502_v53 = vmul.f32 %v7301_v3, %v6662_v20  ;;  %v7503_v24 = vmul.f32 %v7301_v3, %v6663_v4  ;;  %v7254_v20 = vmul.f32 %v7212_v26, %v6873_v25  ;;  %v5846_v25 = vpop.f32.mrf.mxu0  ;;  %v17458_v26 = vsub.f32 %v15026_v5, %v15024_v51 }
 0x95b   :  { %v6859_v4 = vmul.f32 %v9116_v54, %v6858_v49  ;;  %v5960_v49 = vpop.f32.mrf.mxu1  ;;  %v6664_v51 = vsub.f32 %v14488_v31, %v14974_v16  ;;  %v6665_v5 = vsub.f32 %v14713_v21, %v14974_v16 }
 0x95c   :  { %v7838_v41 = vadd.f32 %v17457_v15, %v7502_v53  ;;  %v7839_v0 = vadd.f32 %v17457_v15, %v7503_v24  ;;  %6191 = vadd.xlane.f32.xlu1 %v6190_v2  ;;  %v6878_v2 = vsub.f32 1.5, %v6877_v7 }
 0x95d   :  { %v6863_v3 = vsel %vm6862_vm15, %v9116_v54, %v6859_v4  ;;  %v5961_v4 = vadd.f32 %v5960_v49, %v5846_v25  ;;  %v17460_v25 = vld [vmem:[#allocation37_spill] sm:$0xff] }
 0x95e   :  { %7922 = vst [vmem:[#allocation2 + $0x20] sm:$0xff] %v7838_v41  ;;  %v7253_v24 = vmul.f32 %v7211_v19, %v6863_v3  ;;  %v6879_v15 = vmul.f32 %v9118_v28, %v6878_v2  ;;  %v6074_v19 = vpop.f32.mrf.mxu3  ;;  %v17491_v3 = vld [vmem:[#allocation18_spill] sm:$0xff] }
 0x95f   :  { %7923 = vst [vmem:[#allocation2 + $0x28] sm:$0xff] %v7839_v0  ;;  %v15310_v2 = vadd.f32 %v6074_v19, %v5961_v4 }
 0x960   :  { %v6883_v0 = vsel %vm6882_vm5, %v9118_v28, %v6879_v15  ;;  %v6666_v15 = vsub.f32 %v14497_v27, %v14999_v60 }
 0x961   :  { %v7255_v61 = vmul.f32 %v7213_v40, %v6883_v0  ;;  %17459 = vst [vmem:[#allocation25_spill] sm:$0xff] %v15310_v2 }
 0x962   :  { %v5849_v16 = vpop.f32.mrf.mxu0 }
 0x963   :  { %v5963_v49 = vpop.f32.mrf.mxu1 }
 0x964   :  { %6443 = vadd.xlane.f32.xlu1 %v6442_v18  ;;  %v6627_v18 = vmax.f32 %v17458_v26, 0.0 }
 0x966   :  { %7330 = vperm.xlu0 %8844, %v7254_v20   ;;  %v15300_v7 = vadd.f32 1e-05, %v6627_v18 }
 0x968   :  { %9119 = vrsqrt.f32 %v15300_v7  ;;  %vm6900_vm4 = vweird.f32 %v15300_v7 }
 0x96f   :  { %v6177_v53 = vpop.xlane.xlu0 %6176 }
 0x970   :  { %v15276_v48 = vmul.f32 0.0051020407, %v6177_v53  ;;  %v5732_v53 = vpop.f32.mrf.mxu2 }
 0x971   :  { %7325 = vperm.xlu2 %8846, %v7253_v24   ;;  %v15318_v26 = vadd.f32 %v5732_v53, %v17460_v25  ;;  %v6335_v25 = vmul.f32 %v15310_v2, %v15310_v2 }
 0x972   :  { %v15280_v13 = vmul.f32 %v15276_v48, %v15276_v48 }
 0x973   :  { %17461 = vst [vmem:[#allocation105_spill] sm:$0xff] %v15318_v26 }
 0x977   :  { %v6429_v41 = vpop.xlane.xlu0 %6428 }
 0x978   :  { %v15282_v54 = vmul.f32 0.0051020407, %v6429_v41  ;;  %v6667_v41 = vsub.f32 %v14730_v55, %v14999_v60  ;;  %v17463_v55 = vld [vmem:[#allocation102_spill] sm:$0xff] }
 0x97b   :  { %v6180_v33 = vpop.xlane.xlu2 %6179 }
 0x97c   :  { %v15289_v11 = vmul.f32 0.0051020407, %v6180_v33 }
 0x97d   :  { %7335 = vperm.xlu1 %8845, %v7255_v61  }
 0x97e   :  { %v15296_v28 = vmul.f32 %v15289_v11, %v15289_v11 }
 0x983   :  { %v6432_v32 = vpop.xlane.xlu2 %6431 }
 0x984   :  { %v15298_v20 = vmul.f32 0.0051020407, %v6432_v32  ;;  %v6183_v6 = vpop.xlane.xlu1 %6182  ;;  %v17462_v32 = vld [vmem:[#allocation71_spill] sm:$0xff] }
 0x985   :  { %v15304_v24 = vmul.f32 0.0051020407, %v6183_v6 }
 0x987   :  { %v15323_v27 = vmul.f32 %v15304_v24, %v15304_v24 }
 0x98a   :  { %v7306_v0 = vpop.permute.xlu0 %7305 }
 0x98b   :  { %v7311_v40 = vpop.permute.xlu2 %7310  ;;  %v7504_v33 = vmul.f32 %v7306_v0, %v6664_v51  ;;  %v7505_v61 = vmul.f32 %v7306_v0, %v6665_v5  ;;  %v6193_v51 = vadd.f32 %v15310_v2, %v15318_v26 }
 0x98c   :  { %v7506_v31 = vmul.f32 %v7311_v40, %v6666_v15  ;;  %v7507_v18 = vmul.f32 %v7311_v40, %v6667_v41  ;;  %v6435_v21 = vpop.xlane.xlu1 %6434  ;;  %v15334_v15 = vpop.eup %9119  ;;  %v17464_v41 = vsub.f32 %v15005_v46, %v15003_v12  ;;  %v5964_v40 = vadd.f32 %v5963_v49, %v5849_v16 }
 0x98d   :  { %v7840_v6 = vadd.f32 %v17462_v32, %v7504_v33  ;;  %v15325_v4 = vmul.f32 0.0051020407, %v6435_v21  ;;  %v7841_v53 = vadd.f32 %v17462_v32, %v7505_v61  ;;  %v6077_v33 = vpop.f32.mrf.mxu3  ;;  %v6668_v61 = vsub.f32 %v14511_v30, %v14988_v22  ;;  %v5735_v21 = vpop.f32.mrf.mxu2 }
 0x98e   :  { %v7842_v60 = vadd.f32 %v17463_v55, %v7506_v31  ;;  %v7843_v19 = vadd.f32 %v17463_v55, %v7507_v18  ;;  %v6626_v0 = vmax.f32 %v17464_v41, 0.0  ;;  %v6669_v31 = vsub.f32 %v14741_v8, %v14988_v22  ;;  %v5965_v41 = vpop.f32.mrf.mxu1 }
 0x98f   :  { %7924 = vst [vmem:[#allocation2 + $0x30] sm:$0xff] %v7840_v6  ;;  %v6895_v12 = vmul.f32 %v15334_v15, %v15300_v7  ;;  %v6334_v16 = vmul.f32 %v15318_v26, %v15318_v26  ;;  %v15351_v32 = vadd.f32 %v6077_v33, %v5964_v40  ;;  %v17466_v6 = vld [vmem:[#allocation5_spill] sm:$0xff]  ;;  %vm6901_vm2 = vweird.f32 %v15334_v15  ;;  %v17504_v26 = vld [vmem:[#allocation22_spill] sm:$0xff] }
 0x990   :  { %7926 = vst [vmem:[#allocation2 + $0x40] sm:$0xff] %v7842_v60  ;;  %6194 = vadd.xlane.f32.xlu0 %v6193_v51  ;;  %v15349_v49 = vadd.f32 1e-05, %v6626_v0  ;;  %v15355_v60 = vadd.f32 %v5735_v21, %v14515_v43  ;;  %v5851_v51 = vpop.f32.mrf.mxu0  ;;  %vm6902_vm13 = vmor %vm6900_vm4, %vm6901_vm2 }
 0x991   :  { %7927 = vst [vmem:[#allocation2 + $0x48] sm:$0xff] %v7843_v19  ;;  %v6445_v22 = vadd.f32 %v6335_v25, %v6334_v16  ;;  %v6896_v19 = vmul.f32 %v15334_v15, %v6895_v12  ;;  %v6337_v43 = vmul.f32 %v15351_v32, %v15351_v32  ;;  %v5966_v40 = vadd.f32 %v5965_v41, %v5851_v51 }
 0x992   :  { %7925 = vst [vmem:[#allocation2 + $0x38] sm:$0xff] %v7841_v53  ;;  %v7316_v18 = vpop.permute.xlu0 %7315  ;;  %9121 = vrsqrt.f32 %v15349_v49  ;;  %v6196_v53 = vadd.f32 %v15351_v32, %v15355_v60  ;;  %v17468_v25 = vsub.f32 %v15058_v59, %v15056_v29  ;;  %v6671_v59 = vsub.f32 %v14752_v36, %v15040_v56 }
 0x993   :  { %v7508_v46 = vmul.f32 %v7316_v18, %v6668_v61  ;;  %17465 = vst [vmem:[#allocation93_spill] sm:$0xff] %v15351_v32  ;;  %v7509_v30 = vmul.f32 %v7316_v18, %v6669_v31  ;;  %v6897_v0 = vmul.f32 0.5, %v6896_v19  ;;  %v6336_v61 = vmul.f32 %v15355_v60, %v15355_v60 }
 0x994   :  { %17467 = vst [vmem:[#allocation37_spill] sm:$0xff] %v15355_v60  ;;  %v6628_v31 = vmax.f32 %v17468_v25, 0.0  ;;  %vm6890_vm6 = vweird.f32 %v15349_v49 }
 0x995   :  { %v7844_v55 = vadd.f32 %v17466_v6, %v7508_v46  ;;  %v7845_v8 = vadd.f32 %v17466_v6, %v7509_v30  ;;  %v6079_v18 = vpop.f32.mrf.mxu3  ;;  %v5737_v21 = vpop.f32.mrf.mxu2  ;;  %v6898_v12 = vsub.f32 1.5, %v6897_v0  ;;  %v6448_v46 = vadd.f32 %v6337_v43, %v6336_v61  ;;  %v17469_v6 = vld [vmem:[#allocation40_spill] sm:$0xff] }
 0x996   :  { %v15370_v30 = vadd.f32 %v6079_v18, %v5966_v40  ;;  %v17470_v43 = vld [vmem:[#allocation52_spill] sm:$0xff] }
 0x997   :  { %7928 = vst [vmem:[#allocation2 + $0x50] sm:$0xff] %v7844_v55  ;;  %v15373_v55 = vadd.f32 %v5737_v21, %v17469_v6  ;;  %v6899_v29 = vmul.f32 %v15334_v15, %v6898_v12 }
 0x998   :  { %7929 = vst [vmem:[#allocation2 + $0x58] sm:$0xff] %v7845_v8  ;;  %6446 = vadd.xlane.f32.xlu0 %v6445_v22  ;;  %v9122_v33 = vpop.eup %9121  ;;  %v6754_v8 = vadd.f32 1e-05, %v6628_v31  ;;  %v6670_v22 = vsub.f32 %v14520_v39, %v15040_v56  ;;  %v7215_v56 = vld [vmem:[%s16328_s7 + $0x58] sm:$0xff]  ;;  %v6339_v61 = vmul.f32 %v15370_v30, %v15370_v30 }
 0x999   :  { %v6885_v16 = vmul.f32 %v9122_v33, %v15349_v49  ;;  %v6199_v0 = vadd.f32 %v15370_v30, %v15373_v55  ;;  %v6903_v36 = vsel %vm6902_vm13, %v15334_v15, %v6899_v29  ;;  %v6338_v31 = vmul.f32 %v15373_v55, %v15373_v55  ;;  %v7216_v49 = vld [vmem:[%s16328_s7 + $0x60] sm:$0xff] }
 0x99a   :  { %6197 = vadd.xlane.f32.xlu2 %v6196_v53  ;;  %9123 = vrsqrt.f32 %v6754_v8  ;;  %v7257_v25 = vmul.f32 %v7215_v56, %v6903_v36  ;;  %vm6891_vm3 = vweird.f32 %v9122_v33  ;;  %vm6910_vm14 = vweird.f32 %v6754_v8 }
 0x99b   :  { %v6886_v53 = vmul.f32 %v9122_v33, %v6885_v16  ;;  %v6451_v12 = vadd.f32 %v6339_v61, %v6338_v31  ;;  %vm6892_vm7 = vmor %vm6890_vm6, %vm6891_vm3  ;;  %v5854_v61 = vpop.f32.mrf.mxu0 }
 0x99d   :  { %v6887_v7 = vmul.f32 0.5, %v6886_v53 }
 0x99f   :  { %v6888_v21 = vsub.f32 1.5, %v6887_v7 }
 0x9a0   :  { %v9124_v18 = vpop.eup %9123 }
 0x9a1   :  { %v6889_v15 = vmul.f32 %v9122_v33, %v6888_v21  ;;  %vm6911_vm9 = vweird.f32 %v9124_v18 }
 0x9a2   :  { %6449 = vadd.xlane.f32.xlu2 %v6448_v46  ;;  %v6905_v46 = vmul.f32 %v9124_v18, %v6754_v8  ;;  %vm6912_vm10 = vmor %vm6910_vm14, %vm6911_vm9  ;;  %v17472_v8 = vsub.f32 %v15111_v50, %v15109_v9  ;;  %v5740_v9 = vpop.f32.mrf.mxu2 }
 0x9a3   :  { %v6893_v6 = vsel %vm6892_vm7, %v9122_v33, %v6889_v15 }
 0x9a4   :  { %v7321_v19 = vpop.permute.xlu1 %7320  ;;  %v6906_v16 = vmul.f32 %v9124_v18, %v6905_v46  ;;  %v6630_v56 = vmax.f32 %v17472_v8, 0.0  ;;  %v6082_v46 = vpop.f32.mrf.mxu3 }
 0x9a5   :  { %v7510_v51 = vmul.f32 %v7321_v19, %v6670_v22  ;;  %v7511_v41 = vmul.f32 %v7321_v19, %v6671_v59  ;;  %v7214_v22 = vld [vmem:[%s16328_s7 + $0x50] sm:$0xff] }
 0x9a6   :  { %v6907_v59 = vmul.f32 0.5, %v6906_v16  ;;  %v7256_v29 = vmul.f32 %v7214_v22, %v6893_v6  ;;  %v15416_v21 = vadd.f32 1e-05, %v6630_v56 }
 0x9a7   :  { %v7846_v40 = vadd.f32 %v17470_v43, %v7510_v51  ;;  %v7847_v39 = vadd.f32 %v17470_v43, %v7511_v41  ;;  %6200 = vadd.xlane.f32.xlu1 %v6199_v0 }
 0x9a8   :  { %v6908_v19 = vsub.f32 1.5, %v6907_v59  ;;  %9125 = vrsqrt.f32 %v15416_v21  ;;  %v15430_v59 = vadd.f32 %v5740_v9, %v14538_v47  ;;  %v17478_v9 = vld [vmem:[#allocation12_spill] sm:$0xff]  ;;  %vm6930_vm12 = vweird.f32 %v15416_v21 }
 0x9a9   :  { %7930 = vst [vmem:[#allocation2 + $0x60] sm:$0xff] %v7846_v40 }
 0x9aa   :  { %7931 = vst [vmem:[#allocation2 + $0x68] sm:$0xff] %v7847_v39  ;;  %v6909_v51 = vmul.f32 %v9124_v18, %v6908_v19 }
 0x9ab   :  { %17474 = vst [vmem:[#allocation5_spill] sm:$0xff] %v15430_v59 }
 0x9ac   :  { %7345 = vperm.xlu0 %8844, %v7257_v25   ;;  %v6913_v0 = vsel %vm6912_vm10, %v9124_v18, %v6909_v51  ;;  %v5968_v25 = vpop.f32.mrf.mxu1  ;;  %v17475_v51 = vld [vmem:[#allocation97_spill] sm:$0xff] }
 0x9ad   :  { %v7258_v36 = vmul.f32 %v7216_v49, %v6913_v0  ;;  %v5969_v18 = vadd.f32 %v5968_v25, %v5854_v61  ;;  %v6672_v0 = vsub.f32 %v17475_v51, %v14950_v42  ;;  %v17476_v49 = vld [vmem:[#allocation95_spill] sm:$0xff] }
 0x9ae   :  { %v15440_v8 = vpop.eup %9125 }
 0x9af   :  { %6452 = vadd.xlane.f32.xlu1 %v6451_v12  ;;  %v15426_v22 = vadd.f32 %v6082_v46, %v5969_v18  ;;  %vm6931_vm11 = vweird.f32 %v15440_v8 }
 0x9b0   :  { %vm6932_vm8 = vmor %vm6930_vm12, %vm6931_vm11 }
 0x9b1   :  { %17473 = vst [vmem:[#allocation102_spill] sm:$0xff] %v15426_v22  ;;  %v6341_v47 = vmul.f32 %v15426_v22, %v15426_v22 }
 0x9b4   :  { %v5970_v19 = vpop.f32.mrf.mxu1 }
 0x9ba   :  { %7340 = vperm.xlu2 %8846, %v7256_v29   ;;  %v5856_v29 = vpop.f32.mrf.mxu0 }
 0x9bb   :  { %v5971_v25 = vadd.f32 %v5970_v19, %v5856_v29  ;;  %v17480_v29 = vsub.f32 %v15085_v34, %v15083_v63  ;;  %v5742_v63 = vpop.f32.mrf.mxu2 }
 0x9bd   :  { %v6186_v53 = vpop.xlane.xlu0 %6185  ;;  %v6629_v19 = vmax.f32 %v17480_v29, 0.0 }
 0x9be   :  { %v15398_v41 = vmul.f32 0.0051020407, %v6186_v53 }
 0x9bf   :  { %v6755_v29 = vadd.f32 1e-05, %v6629_v19 }
 0x9c0   :  { %17471 = vst [vmem:[#allocation71_spill] sm:$0xff] %v15398_v41  ;;  %v15405_v40 = vmul.f32 %v15398_v41, %v15398_v41 }
 0x9c1   :  { %9127 = vrsqrt.f32 %v6755_v29  ;;  %vm6920_vm0 = vweird.f32 %v6755_v29 }
 0x9c2   :  { %v5859_v19 = vpop.f32.mrf.mxu0 }
 0x9c4   :  { %v6189_v33 = vpop.xlane.xlu2 %6188 }
 0x9c5   :  { %v6438_v43 = vpop.xlane.xlu0 %6437  ;;  %v15414_v31 = vmul.f32 0.0051020407, %v6189_v33  ;;  %v6673_v33 = vsub.f32 %v17476_v49, %v14950_v42  ;;  %v6675_v42 = vsub.f32 %v17478_v9, %v15175_v38 }
 0x9c6   :  { %v15407_v39 = vmul.f32 0.0051020407, %v6438_v43 }
 0x9c7   :  { %v15420_v15 = vmul.f32 %v15414_v31, %v15414_v31 }
 0x9c8   :  { %7350 = vperm.xlu1 %8845, %v7258_v36   ;;  %v6202_v36 = vadd.f32 %v15426_v22, %v15430_v59 }
 0x9cc   :  { %v6441_v12 = vpop.xlane.xlu2 %6440 }
 0x9cd   :  { %v15422_v16 = vmul.f32 0.0051020407, %v6441_v12  ;;  %v17477_v12 = vld [vmem:[#allocation74_spill] sm:$0xff] }
 0x9ce   :  { %v6674_v46 = vsub.f32 %v17477_v12, %v15175_v38 }
 0x9cf   :  { %v6192_v6 = vpop.xlane.xlu1 %6191 }
 0x9d0   :  { %v15432_v53 = vmul.f32 0.0051020407, %v6192_v6  ;;  %v17479_v6 = vld [vmem:[#allocation94_spill] sm:$0xff] }
 0x9d4   :  { %v7326_v43 = vpop.permute.xlu2 %7325 }
 0x9d5   :  { %v7512_v56 = vmul.f32 %v7326_v43, %v6672_v0  ;;  %v7513_v61 = vmul.f32 %v7326_v43, %v6673_v33  ;;  %v15452_v0 = vmul.f32 %v15432_v53, %v15432_v53 }
 0x9d6   :  { %6203 = vadd.xlane.f32.xlu0 %v6202_v36  ;;  %v6925_v36 = vmul.f32 %v15440_v8, %v15416_v21  ;;  %v17490_v21 = vld [vmem:[#allocation88_spill] sm:$0xff] }
 0x9d7   :  { %v6444_v18 = vpop.xlane.xlu1 %6443  ;;  %v7848_v51 = vadd.f32 %v17479_v6, %v7512_v56  ;;  %v7849_v49 = vadd.f32 %v17479_v6, %v7513_v61  ;;  %v6340_v56 = vmul.f32 %v15430_v59, %v15430_v59  ;;  %v6084_v61 = vpop.f32.mrf.mxu3 }
 0x9d8   :  { %v15454_v33 = vmul.f32 0.0051020407, %v6444_v18  ;;  %v7331_v43 = vpop.permute.xlu0 %7330  ;;  %v17481_v18 = vld [vmem:[#allocation6_spill] sm:$0xff]  ;;  %v6926_v50 = vmul.f32 %v15440_v8, %v6925_v36  ;;  %v5973_v36 = vpop.f32.mrf.mxu1 }
 0x9d9   :  { %v7514_v12 = vmul.f32 %v7331_v43, %v6674_v46  ;;  %v7515_v38 = vmul.f32 %v7331_v43, %v6675_v42  ;;  %7932 = vst [vmem:[#allocation2 + $0x70] sm:$0xff] %v7848_v51  ;;  %v6454_v34 = vadd.f32 %v6341_v47, %v6340_v56  ;;  %v15468_v46 = vadd.f32 %v6084_v61, %v5971_v25  ;;  %v17483_v42 = vld [vmem:[#allocation38_spill] sm:$0xff]  ;;  %v9128_v25 = vpop.eup %9127 }
 0x9da   :  { %7933 = vst [vmem:[#allocation2 + $0x78] sm:$0xff] %v7849_v49  ;;  %v15471_v51 = vadd.f32 %v5742_v63, %v17483_v42  ;;  %v6927_v43 = vmul.f32 0.5, %v6926_v50  ;;  %v17485_v50 = vsub.f32 %v15133_v37, %v15131_v17  ;;  %v6915_v63 = vmul.f32 %v9128_v25, %v6755_v29  ;;  %v7218_v17 = vld [vmem:[%s16328_s7 + $0x70] sm:$0xff] }
 0x9db   :  { %v7850_v6 = vadd.f32 %v17481_v18, %v7514_v12  ;;  %v7851_v7 = vadd.f32 %v17481_v18, %v7515_v38  ;;  %17482 = vst [vmem:[#allocation40_spill] sm:$0xff] %v15468_v46  ;;  %v6343_v47 = vmul.f32 %v15468_v46, %v15468_v46  ;;  %v5974_v38 = vadd.f32 %v5973_v36, %v5859_v19  ;;  %v17487_v37 = vld [vmem:[#allocation103_spill] sm:$0xff]  ;;  %v17489_v36 = vld [vmem:[#allocation77_spill] sm:$0xff] }
 0x9dc   :  { %17484 = vst [vmem:[#allocation52_spill] sm:$0xff] %v15471_v51  ;;  %v6205_v49 = vadd.f32 %v15468_v46, %v15471_v51  ;;  %v6928_v12 = vsub.f32 1.5, %v6927_v43  ;;  %v6631_v56 = vmax.f32 %v17485_v50, 0.0  ;;  %vm6921_vm15 = vweird.f32 %v9128_v25 }
 0x9dd   :  { %7934 = vst [vmem:[#allocation2 + $0x80] sm:$0xff] %v7850_v6  ;;  %vm6922_vm1 = vmor %vm6920_vm0, %vm6921_vm15 }
 0x9de   :  { %7935 = vst [vmem:[#allocation2 + $0x88] sm:$0xff] %v7851_v7  ;;  %6455 = vadd.xlane.f32.xlu0 %v6454_v34  ;;  %v6342_v7 = vmul.f32 %v15471_v51, %v15471_v51  ;;  %v6929_v6 = vmul.f32 %v15440_v8, %v6928_v12  ;;  %v5745_v34 = vpop.f32.mrf.mxu2  ;;  %v6757_v43 = vadd.f32 1e-05, %v6631_v56  ;;  %v17488_v12 = vld [vmem:[#allocation16_spill] sm:$0xff] }
 0x9df   :  { %v6087_v61 = vpop.f32.mrf.mxu3  ;;  %v15492_v19 = vadd.f32 %v5745_v34, %v17487_v37  ;;  %v6677_v50 = vsub.f32 %v17490_v21, %v17488_v12  ;;  %v7217_v21 = vld [vmem:[%s16328_s7 + $0x68] sm:$0xff] }
 0x9e0   :  { %v6457_v18 = vadd.f32 %v6343_v47, %v6342_v7  ;;  %v15485_v42 = vadd.f32 %v6087_v61, %v5974_v38  ;;  %v6916_v47 = vmul.f32 %v9128_v25, %v6915_v63  ;;  %v6676_v7 = vsub.f32 %v17489_v36, %v17488_v12 }
 0x9e1   :  { %9129 = vrsqrt.f32 %v6757_v43  ;;  %v6344_v37 = vmul.f32 %v15492_v19, %v15492_v19  ;;  %vm6940_vm2 = vweird.f32 %v6757_v43 }
 0x9e2   :  { %17486 = vst [vmem:[#allocation97_spill] sm:$0xff] %v15485_v42  ;;  %v6345_v63 = vmul.f32 %v15485_v42, %v15485_v42 }
 0x9e3   :  { %6206 = vadd.xlane.f32.xlu2 %v6205_v49  ;;  %v6933_v49 = vsel %vm6932_vm8, %v15440_v8, %v6929_v6  ;;  %v6208_v8 = vadd.f32 %v15485_v42, %v15492_v19  ;;  %v6917_v6 = vmul.f32 0.5, %v6916_v47 }
 0x9e4   :  { %v7260_v56 = vmul.f32 %v7218_v17, %v6933_v49  ;;  %v6460_v12 = vadd.f32 %v6345_v63, %v6344_v37 }
 0x9e5   :  { %v6918_v49 = vsub.f32 1.5, %v6917_v6 }
 0x9e7   :  { %v9130_v17 = vpop.eup %9129  ;;  %v6919_v47 = vmul.f32 %v9128_v25, %v6918_v49 }
 0x9e8   :  { %v6935_v36 = vmul.f32 %v9130_v17, %v6757_v43  ;;  %vm6941_vm5 = vweird.f32 %v9130_v17  ;;  %v7219_v43 = vld [vmem:[%s16328_s7 + $0x78] sm:$0xff] }
 0x9e9   :  { %vm6942_vm4 = vmor %vm6940_vm2, %vm6941_vm5 }
 0x9eb   :  { %6458 = vadd.xlane.f32.xlu2 %v6457_v18 }
 0x9ef   :  { %v7336_v18 = vpop.permute.xlu1 %7335 }
 0x9f0   :  { %v7516_v38 = vmul.f32 %v7336_v18, %v6676_v7  ;;  %v7517_v61 = vmul.f32 %v7336_v18, %v6677_v50  ;;  %v6923_v7 = vsel %vm6922_vm1, %v9128_v25, %v6919_v47 }
 0x9f2   :  { %v7852_v9 = vadd.f32 %v17491_v3, %v7516_v38  ;;  %v7853_v34 = vadd.f32 %v17491_v3, %v7517_v61  ;;  %7360 = vperm.xlu0 %8844, %v7260_v56   ;;  %6209 = vadd.xlane.f32.xlu1 %v6208_v8  ;;  %v6936_v3 = vmul.f32 %v9130_v17, %v6935_v36  ;;  %v5975_v36 = vpop.f32.mrf.mxu1 }
 0x9f4   :  { %7936 = vst [vmem:[#allocation2 + $0x90] sm:$0xff] %v7852_v9  ;;  %v7259_v9 = vmul.f32 %v7217_v21, %v6923_v7  ;;  %v6937_v50 = vmul.f32 0.5, %v6936_v3 }
 0x9f5   :  { %7937 = vst [vmem:[#allocation2 + $0x98] sm:$0xff] %v7853_v34  ;;  %v17493_v34 = vsub.f32 %v15164_v23, %v15162_v57  ;;  %v5747_v57 = vpop.f32.mrf.mxu2 }
 0x9f6   :  { %v6938_v38 = vsub.f32 1.5, %v6937_v50 }
 0x9f7   :  { %v6633_v63 = vmax.f32 %v17493_v34, 0.0 }
 0x9f8   :  { %v6939_v56 = vmul.f32 %v9130_v17, %v6938_v38  ;;  %v17496_v38 = vld [vmem:[#allocation28_spill] sm:$0xff] }
 0x9f9   :  { %v15525_v7 = vadd.f32 1e-05, %v6633_v63 }
 0x9fa   :  { %6461 = vadd.xlane.f32.xlu1 %v6460_v12  ;;  %v6943_v49 = vsel %vm6942_vm4, %v9130_v17, %v6939_v56  ;;  %v5861_v12 = vpop.f32.mrf.mxu0  ;;  %v15539_v56 = vadd.f32 %v5747_v57, %v17496_v38  ;;  %v17502_v57 = vld [vmem:[#allocation44_spill] sm:$0xff]  ;;  %v17503_v38 = vld [vmem:[#allocation10_spill] sm:$0xff]  ;;  %v5978_v2 = vpop.f32.mrf.mxu1 }
 0x9fb   :  { %v7261_v47 = vmul.f32 %v7219_v43, %v6943_v49  ;;  %v5976_v3 = vadd.f32 %v5975_v36, %v5861_v12  ;;  %9131 = vrsqrt.f32 %v15525_v7  ;;  %v17498_v49 = vld [vmem:[#allocation73_spill] sm:$0xff]  ;;  %v17500_v36 = vld [vmem:[#allocation76_spill] sm:$0xff]  ;;  %vm6960_vm3 = vweird.f32 %v15525_v7 }
 0x9fc   :  { %17497 = vst [vmem:[#allocation94_spill] sm:$0xff] %v15539_v56  ;;  %v17499_v43 = vld [vmem:[#allocation33_spill] sm:$0xff] }
 0x9fd   :  { %v6678_v12 = vsub.f32 %v17499_v43, %v17498_v49 }
 0xa01   :  { %v15545_v63 = vpop.eup %9131 }
 0xa02   :  { %v6955_v43 = vmul.f32 %v15545_v63, %v15525_v7  ;;  %v5864_v59 = vpop.f32.mrf.mxu0  ;;  %vm6961_vm13 = vweird.f32 %v15545_v63 }
 0xa03   :  { %7355 = vperm.xlu2 %8846, %v7259_v9   ;;  %v6195_v18 = vpop.xlane.xlu0 %6194  ;;  %v6089_v9 = vpop.f32.mrf.mxu3  ;;  %v5979_v10 = vadd.f32 %v5978_v2, %v5864_v59  ;;  %vm6962_vm6 = vmor %vm6960_vm3, %vm6961_vm13 }
 0xa04   :  { %v15509_v61 = vmul.f32 0.0051020407, %v6195_v18  ;;  %v15529_v50 = vadd.f32 %v6089_v9, %v5976_v3  ;;  %v17501_v9 = vld [vmem:[#allocation15_spill] sm:$0xff] }
 0xa05   :  { %v6681_v37 = vsub.f32 %v17503_v38, %v17501_v9 }
 0xa06   :  { %17492 = vst [vmem:[#allocation95_spill] sm:$0xff] %v15509_v61  ;;  %v15513_v29 = vmul.f32 %v15509_v61, %v15509_v61  ;;  %v6211_v34 = vadd.f32 %v15529_v50, %v15539_v56 }
 0xa07   :  { %17495 = vst [vmem:[#allocation12_spill] sm:$0xff] %v15529_v50 }
 0xa0b   :  { %v6447_v8 = vpop.xlane.xlu0 %6446 }
 0xa0c   :  { %v15515_v25 = vmul.f32 0.0051020407, %v6447_v8  ;;  %v6347_v8 = vmul.f32 %v15529_v50, %v15529_v50  ;;  %v17505_v50 = vld [vmem:[#allocation9_spill] sm:$0xff] }
 0xa0d   :  { %v6198_v6 = vpop.xlane.xlu2 %6197 }
 0xa0e   :  { %v15527_v21 = vmul.f32 0.0051020407, %v6198_v6 }
 0xa10   :  { %17494 = vst [vmem:[#allocation74_spill] sm:$0xff] %v15527_v21  ;;  %v15534_v17 = vmul.f32 %v15527_v21, %v15527_v21 }
 0xa13   :  { %7365 = vperm.xlu1 %8845, %v7261_v47   ;;  %v6679_v47 = vsub.f32 %v17500_v36, %v17498_v49 }
 0xa15   :  { %v6450_v23 = vpop.xlane.xlu2 %6449 }
 0xa16   :  { %v15536_v18 = vmul.f32 0.0051020407, %v6450_v23  ;;  %v6680_v23 = vsub.f32 %v17502_v57, %v17501_v9  ;;  %v6346_v57 = vmul.f32 %v15539_v56, %v15539_v56  ;;  %v17519_v56 = vld [vmem:[#allocation60_spill] sm:$0xff] }
 0xa1a   :  { %v6201_v6 = vpop.xlane.xlu1 %6200 }
 0xa1b   :  { %v15559_v49 = vmul.f32 0.0051020407, %v6201_v6 }
 0xa1c   :  { %6212 = vadd.xlane.f32.xlu0 %v6211_v34 }
 0xa1d   :  { %v7341_v3 = vpop.permute.xlu2 %7340 }
 0xa1e   :  { %v7518_v5 = vmul.f32 %v7341_v3, %v6678_v12  ;;  %v7519_v14 = vmul.f32 %v7341_v3, %v6679_v47  ;;  %v7346_v22 = vpop.permute.xlu0 %7345  ;;  %v17506_v3 = vld [vmem:[#allocation87_spill] sm:$0xff] }
 0xa1f   :  { %v7520_v34 = vmul.f32 %v7346_v22, %v6680_v23  ;;  %v7521_v36 = vmul.f32 %v7346_v22, %v6681_v37  ;;  %v17507_v61 = vsub.f32 %v15150_v52, %v17506_v3  ;;  %v6463_v23 = vadd.f32 %v6347_v8, %v6346_v57  ;;  %v6092_v37 = vpop.f32.mrf.mxu3 }
 0xa20   :  { %v7854_v9 = vadd.f32 %v17504_v26, %v7518_v5  ;;  %v7855_v38 = vadd.f32 %v17504_v26, %v7519_v14  ;;  %v6956_v22 = vmul.f32 %v15545_v63, %v6955_v43  ;;  %v15573_v5 = vmul.f32 %v15559_v49, %v15559_v49  ;;  %v5750_v26 = vpop.f32.mrf.mxu2 }
 0xa21   :  { %v7856_v12 = vadd.f32 %v17505_v50, %v7520_v34  ;;  %v7857_v47 = vadd.f32 %v17505_v50, %v7521_v36  ;;  %v6632_v45 = vmax.f32 %v17507_v61, 0.0  ;;  %v15579_v59 = vadd.f32 %v6092_v37, %v5979_v10  ;;  %v17509_v50 = vld [vmem:[#allocation86_spill] sm:$0xff]  ;;  %v17512_v37 = vld [vmem:[#allocation109_spill] sm:$0xff] }
 0xa22   :  { %7938 = vst [vmem:[#allocation2 + $0xa0] sm:$0xff] %v7854_v9  ;;  %v6453_v6 = vpop.xlane.xlu1 %6452  ;;  %v6957_v61 = vmul.f32 0.5, %v6956_v22  ;;  %v15582_v8 = vadd.f32 %v5750_v26, %v17509_v50  ;;  %v5866_v9 = vpop.f32.mrf.mxu0  ;;  %v17511_v22 = vld [vmem:[#allocation98_spill] sm:$0xff] }
 0xa23   :  { %7939 = vst [vmem:[#allocation2 + $0xa8] sm:$0xff] %v7855_v38  ;;  %v15575_v14 = vmul.f32 0.0051020407, %v6453_v6  ;;  %v6758_v2 = vadd.f32 1e-05, %v6632_v45  ;;  %v6349_v36 = vmul.f32 %v15579_v59, %v15579_v59  ;;  %v5980_v38 = vpop.f32.mrf.mxu1  ;;  %v17513_v26 = vsub.f32 %v17511_v22, %v17512_v37 }
 0xa24   :  { %7940 = vst [vmem:[#allocation2 + $0xb0] sm:$0xff] %v7856_v12  ;;  %6464 = vadd.xlane.f32.xlu0 %v6463_v23  ;;  %v6214_v43 = vadd.f32 %v15579_v59, %v15582_v8  ;;  %v6958_v34 = vsub.f32 1.5, %v6957_v61  ;;  %v6348_v10 = vmul.f32 %v15582_v8, %v15582_v8  ;;  %v5981_v3 = vadd.f32 %v5980_v38, %v5866_v9  ;;  %v7221_v23 = vld [vmem:[%s16328_s7 + $0x88] sm:$0xff] }
 0xa25   :  { %7941 = vst [vmem:[#allocation2 + $0xb8] sm:$0xff] %v7857_v47  ;;  %9133 = vrsqrt.f32 %v6758_v2  ;;  %v6634_v61 = vmax.f32 %v17513_v26, 0.0  ;;  %vm6950_vm9 = vweird.f32 %v6758_v2 }
 0xa26   :  { %17508 = vst [vmem:[#allocation6_spill] sm:$0xff] %v15579_v59  ;;  %v6959_v57 = vmul.f32 %v15545_v63, %v6958_v34  ;;  %v6466_v12 = vadd.f32 %v6349_v36, %v6348_v10  ;;  %v17515_v10 = vld [vmem:[#allocation32_spill] sm:$0xff] }
 0xa27   :  { %17510 = vst [vmem:[#allocation38_spill] sm:$0xff] %v15582_v8  ;;  %v6094_v50 = vpop.f32.mrf.mxu3  ;;  %v6760_v36 = vadd.f32 1e-05, %v6634_v61 }
 0xa28   :  { %v6963_v6 = vsel %vm6962_vm6, %v15545_v63, %v6959_v57  ;;  %v15600_v7 = vadd.f32 %v6094_v50, %v5981_v3  ;;  %v17517_v63 = vld [vmem:[#allocation90_spill] sm:$0xff]  ;;  %v17518_v57 = vld [vmem:[#allocation35_spill] sm:$0xff]  ;;  %v17520_v3 = vld [vmem:[#allocation57_spill] sm:$0xff] }
 0xa29   :  { %v7263_v34 = vmul.f32 %v7221_v23, %v6963_v6  ;;  %v6682_v38 = vsub.f32 %v17518_v57, %v17517_v63  ;;  %v6683_v41 = vsub.f32 %v17519_v56, %v17517_v63  ;;  %9135 = vrsqrt.f32 %v6760_v36  ;;  %v7220_v63 = vld [vmem:[%s16328_s7 + $0x80] sm:$0xff] }
 0xa2a   :  { %17514 = vst [vmem:[#allocation103_spill] sm:$0xff] %v15600_v7  ;;  %v6351_v50 = vmul.f32 %v15600_v7, %v15600_v7  ;;  %vm6970_vm11 = vweird.f32 %v6760_v36 }
 0xa2b   :  { %v9134_v45 = vpop.eup %9133 }
 0xa2c   :  { %6215 = vadd.xlane.f32.xlu2 %v6214_v43  ;;  %v6945_v47 = vmul.f32 %v9134_v45, %v6758_v2  ;;  %v5752_v43 = vpop.f32.mrf.mxu2  ;;  %vm6951_vm7 = vweird.f32 %v9134_v45 }
 0xa2d   :  { %v15603_v9 = vadd.f32 %v5752_v43, %v17515_v10  ;;  %vm6952_vm14 = vmor %vm6950_vm9, %vm6951_vm7 }
 0xa2e   :  { %v6946_v52 = vmul.f32 %v9134_v45, %v6945_v47 }
 0xa2f   :  { %17516 = vst [vmem:[#allocation16_spill] sm:$0xff] %v15603_v9  ;;  %v6217_v47 = vadd.f32 %v15600_v7, %v15603_v9  ;;  %v6350_v56 = vmul.f32 %v15603_v9, %v15603_v9 }
 0xa30   :  { %v6947_v37 = vmul.f32 0.5, %v6946_v52  ;;  %v9136_v52 = vpop.eup %9135 }
 0xa31   :  { %vm6971_vm10 = vweird.f32 %v9136_v52 }
 0xa32   :  { %v6948_v61 = vsub.f32 1.5, %v6947_v37  ;;  %vm6972_vm12 = vmor %vm6970_vm11, %vm6971_vm10 }
 0xa34   :  { %6467 = vadd.xlane.f32.xlu2 %v6466_v12  ;;  %v6949_v43 = vmul.f32 %v9134_v45, %v6948_v61 }
 0xa36   :  { %v6953_v10 = vsel %vm6952_vm14, %v9134_v45, %v6949_v43  ;;  %v17522_v45 = vld [vmem:[#allocation107_spill] sm:$0xff] }
 0xa38   :  { %7375 = vperm.xlu0 %8844, %v7263_v34   ;;  %v6965_v34 = vmul.f32 %v9136_v52, %v6760_v36 }
 0xa3a   :  { %v7351_v22 = vpop.permute.xlu1 %7350  ;;  %v6966_v57 = vmul.f32 %v9136_v52, %v6965_v34 }
 0xa3b   :  { %v7522_v26 = vmul.f32 %v7351_v22, %v6682_v38  ;;  %v7523_v12 = vmul.f32 %v7351_v22, %v6683_v41  ;;  %v6469_v41 = vadd.f32 %v6351_v50, %v6350_v56  ;;  %v7262_v22 = vmul.f32 %v7220_v63, %v6953_v10  ;;  %v5869_v50 = vpop.f32.mrf.mxu0  ;;  %v5983_v56 = vpop.f32.mrf.mxu1 }
 0xa3c   :  { %v6967_v37 = vmul.f32 0.5, %v6966_v57  ;;  %v5984_v34 = vadd.f32 %v5983_v56, %v5869_v50  ;;  %v6097_v63 = vpop.f32.mrf.mxu3 }
 0xa3d   :  { %v7858_v6 = vadd.f32 %v17520_v3, %v7522_v26  ;;  %v7859_v23 = vadd.f32 %v17520_v3, %v7523_v12  ;;  %6218 = vadd.xlane.f32.xlu1 %v6217_v47 }
 0xa3e   :  { %v6968_v12 = vsub.f32 1.5, %v6967_v37  ;;  %v15640_v37 = vadd.f32 %v6097_v63, %v5984_v34  ;;  %v17530_v63 = vld [vmem:[#allocation47_spill] sm:$0xff] }
 0xa3f   :  { %7942 = vst [vmem:[#allocation2 + $0xc0] sm:$0xff] %v7858_v6  ;;  %v17523_v6 = vsub.f32 %v15210_v62, %v17522_v45  ;;  %v7222_v62 = vld [vmem:[%s16328_s7 + $0x90] sm:$0xff] }
 0xa40   :  { %7943 = vst [vmem:[#allocation2 + $0xc8] sm:$0xff] %v7859_v23 }
 0xa41   :  { %v6636_v23 = vmax.f32 %v17523_v6, 0.0  ;;  %17525 = vst [vmem:[#allocation18_spill] sm:$0xff] %v15640_v37 }
 0xa43   :  { %v15633_v10 = vadd.f32 1e-05, %v6636_v23  ;;  %v5871_v51 = vpop.f32.mrf.mxu0 }
 0xa44   :  { %v6099_v42 = vpop.f32.mrf.mxu3 }
 0xa45   :  { %6470 = vadd.xlane.f32.xlu1 %v6469_v41  ;;  %v6969_v41 = vmul.f32 %v9136_v52, %v6968_v12  ;;  %9137 = vrsqrt.f32 %v15633_v10  ;;  %vm6990_vm15 = vweird.f32 %v15633_v10 }
 0xa47   :  { %v6973_v57 = vsel %vm6972_vm12, %v9136_v52, %v6969_v41  ;;  %v17528_v41 = vld [vmem:[#allocation59_spill] sm:$0xff] }
 0xa48   :  { %v7264_v12 = vmul.f32 %v7222_v62, %v6973_v57  ;;  %v6687_v57 = vsub.f32 %v17530_v63, %v17528_v41  ;;  %v6353_v62 = vmul.f32 %v15640_v37, %v15640_v37 }
 0xa49   :  { %v6204_v38 = vpop.xlane.xlu0 %6203 }
 0xa4a   :  { %v15620_v26 = vmul.f32 0.0051020407, %v6204_v38  ;;  %v5755_v38 = vpop.f32.mrf.mxu2 }
 0xa4b   :  { %v9138_v56 = vpop.eup %9137 }
 0xa4c   :  { %7370 = vperm.xlu2 %8846, %v7262_v22   ;;  %17521 = vst [vmem:[#allocation77_spill] sm:$0xff] %v15620_v26  ;;  %v15624_v2 = vmul.f32 %v15620_v26, %v15620_v26  ;;  %v17531_v26 = vld [vmem:[#allocation80_spill] sm:$0xff]  ;;  %vm6991_vm8 = vweird.f32 %v9138_v56 }
 0xa4d   :  { %vm6992_vm0 = vmor %vm6990_vm15, %vm6991_vm8 }
 0xa51   :  { %v6456_v47 = vpop.xlane.xlu0 %6455 }
 0xa52   :  { %v15626_v3 = vmul.f32 0.0051020407, %v6456_v47  ;;  %v17526_v47 = vld [vmem:[#allocation78_spill] sm:$0xff] }
 0xa53   :  { %v15644_v36 = vadd.f32 %v5755_v38, %v17526_v47 }
 0xa55   :  { %17527 = vst [vmem:[#allocation28_spill] sm:$0xff] %v15644_v36  ;;  %v6220_v23 = vadd.f32 %v15640_v37, %v15644_v36  ;;  %v6352_v50 = vmul.f32 %v15644_v36, %v15644_v36  ;;  %v5985_v37 = vpop.f32.mrf.mxu1  ;;  %v17535_v36 = vld [vmem:[#allocation29_spill] sm:$0xff] }
 0xa56   :  { %v6207_v43 = vpop.xlane.xlu2 %6206  ;;  %v5986_v21 = vadd.f32 %v5985_v37, %v5871_v51 }
 0xa57   :  { %v15638_v22 = vmul.f32 0.0051020407, %v6207_v43  ;;  %v17529_v43 = vld [vmem:[#allocation30_spill] sm:$0xff] }
 0xa58   :  { %v6686_v34 = vsub.f32 %v17529_v43, %v17528_v41  ;;  %v17533_v43 = vld [vmem:[#allocation72_spill] sm:$0xff]  ;;  %v17534_v41 = vld [vmem:[#allocation26_spill] sm:$0xff] }
 0xa59   :  { %17524 = vst [vmem:[#allocation88_spill] sm:$0xff] %v15638_v22  ;;  %v15648_v52 = vmul.f32 %v15638_v22, %v15638_v22  ;;  %v6685_v8 = vsub.f32 %v17533_v43, %v17531_v26  ;;  %v17537_v43 = vld [vmem:[#allocation104_spill] sm:$0xff] }
 0xa5e   :  { %v6459_v45 = vpop.xlane.xlu2 %6458  ;;  %7380 = vperm.xlu1 %8845, %v7264_v12   ;;  %v6985_v12 = vmul.f32 %v9138_v56, %v15633_v10 }
 0xa5f   :  { %v15650_v6 = vmul.f32 0.0051020407, %v6459_v45 }
 0xa62   :  { %6221 = vadd.xlane.f32.xlu0 %v6220_v23  ;;  %v17532_v23 = vld [vmem:[#allocation11_spill] sm:$0xff] }
 0xa63   :  { %v6684_v59 = vsub.f32 %v17532_v23, %v17531_v26  ;;  %v17536_v26 = vld [vmem:[#allocation14_spill] sm:$0xff] }
 0xa64   :  { %v7361_v38 = vpop.permute.xlu0 %7360 }
 0xa65   :  { %v7526_v47 = vmul.f32 %v7361_v38, %v6686_v34  ;;  %v7527_v45 = vmul.f32 %v7361_v38, %v6687_v57  ;;  %v6210_v61 = vpop.xlane.xlu1 %6209  ;;  %v6472_v57 = vadd.f32 %v6353_v62, %v6352_v50  ;;  %v6986_v38 = vmul.f32 %v9138_v56, %v6985_v12  ;;  %v17539_v62 = vld [vmem:[#allocation82_spill] sm:$0xff] }
 0xa66   :  { %v7356_v46 = vpop.permute.xlu2 %7355  ;;  %v15673_v32 = vmul.f32 0.0051020407, %v6210_v61 }
 0xa67   :  { %v7862_v63 = vadd.f32 %v17534_v41, %v7526_v47  ;;  %v7863_v22 = vadd.f32 %v17534_v41, %v7527_v45  ;;  %v7524_v7 = vmul.f32 %v7356_v46, %v6684_v59  ;;  %v7525_v34 = vmul.f32 %v7356_v46, %v6685_v8  ;;  %v5757_v8 = vpop.f32.mrf.mxu2  ;;  %v7224_v41 = vld [vmem:[%s16328_s7 + $0xa0] sm:$0xff] }
 0xa68   :  { %v17538_v47 = vsub.f32 %v17536_v26, %v17537_v43  ;;  %v6987_v59 = vmul.f32 0.5, %v6986_v38  ;;  %v15689_v51 = vadd.f32 %v5757_v8, %v17539_v62  ;;  %v6102_v26 = vpop.f32.mrf.mxu3  ;;  %v17540_v43 = vsub.f32 %v15282_v54, %v15280_v13  ;;  %v17541_v62 = vld [vmem:[#allocation85_spill] sm:$0xff] }
 0xa69   :  { %7946 = vst [vmem:[#allocation2 + $0xe0] sm:$0xff] %v7862_v63  ;;  %v7860_v9 = vadd.f32 %v17535_v36, %v7524_v7  ;;  %v7861_v23 = vadd.f32 %v17535_v36, %v7525_v34  ;;  %v15684_v36 = vadd.f32 %v6099_v42, %v5986_v21  ;;  %v5874_v63 = vpop.f32.mrf.mxu0  ;;  %v5988_v34 = vpop.f32.mrf.mxu1 }
 0xa6a   :  { %7947 = vst [vmem:[#allocation2 + $0xe8] sm:$0xff] %v7863_v22  ;;  %6473 = vadd.xlane.f32.xlu0 %v6472_v57  ;;  %v6635_v60 = vmax.f32 %v17538_v47, 0.0  ;;  %v15680_v22 = vmul.f32 %v15673_v32, %v15673_v32  ;;  %v6354_v21 = vmul.f32 %v15689_v51, %v15689_v51  ;;  %v5989_v10 = vadd.f32 %v5988_v34, %v5874_v63 }
 0xa6b   :  { %7944 = vst [vmem:[#allocation2 + $0xd0] sm:$0xff] %v7860_v9  ;;  %v6988_v9 = vsub.f32 1.5, %v6987_v59  ;;  %v6223_v37 = vadd.f32 %v15684_v36, %v15689_v51  ;;  %v6637_v47 = vmax.f32 %v17540_v43, 0.0 }
 0xa6c   :  { %7945 = vst [vmem:[#allocation2 + $0xd8] sm:$0xff] %v7861_v23  ;;  %v6761_v61 = vadd.f32 1e-05, %v6635_v60  ;;  %v6355_v60 = vmul.f32 %v15684_v36, %v15684_v36 }
 0xa6d   :  { %v6462_v46 = vpop.xlane.xlu1 %6461  ;;  %v6989_v12 = vmul.f32 %v9138_v56, %v6988_v9  ;;  %v6763_v8 = vadd.f32 1e-05, %v6637_v47 }
 0xa6e   :  { %v15682_v7 = vmul.f32 0.0051020407, %v6462_v46  ;;  %9139 = vrsqrt.f32 %v6761_v61  ;;  %v6475_v57 = vadd.f32 %v6355_v60, %v6354_v21  ;;  %v17543_v60 = vld [vmem:[#allocation20_spill] sm:$0xff]  ;;  %vm6980_vm5 = vweird.f32 %v6761_v61 }
 0xa6f   :  { %v6993_v45 = vsel %vm6992_vm0, %v9138_v56, %v6989_v12  ;;  %v5760_v46 = vpop.f32.mrf.mxu2  ;;  %v15704_v56 = vadd.f32 %v6102_v26, %v5989_v10  ;;  %v17542_v12 = vld [vmem:[#allocation19_spill] sm:$0xff]  ;;  %9141 = vrsqrt.f32 %v6763_v8  ;;  %vm7000_vm13 = vweird.f32 %v6763_v8 }
 0xa70   :  { %v7266_v23 = vmul.f32 %v7224_v41, %v6993_v45  ;;  %v15707_v9 = vadd.f32 %v5760_v46, %v17541_v62  ;;  %v6688_v21 = vsub.f32 %v17543_v60, %v17542_v12  ;;  %v17544_v45 = vld [vmem:[#allocation7_spill] sm:$0xff]  ;;  %v7223_v60 = vld [vmem:[%s16328_s7 + $0x98] sm:$0xff] }
 0xa71   :  { %v6689_v41 = vsub.f32 %v17544_v45, %v17542_v12  ;;  %v6357_v26 = vmul.f32 %v15704_v56, %v15704_v56 }
 0xa72   :  { %v6226_v13 = vadd.f32 %v15704_v56, %v15707_v9  ;;  %v6356_v43 = vmul.f32 %v15707_v9, %v15707_v9 }
 0xa74   :  { %v9140_v42 = vpop.eup %9139  ;;  %v6478_v46 = vadd.f32 %v6357_v26, %v6356_v43 }
 0xa75   :  { %6224 = vadd.xlane.f32.xlu2 %v6223_v37  ;;  %v6975_v38 = vmul.f32 %v9140_v42, %v6761_v61  ;;  %vm6981_vm1 = vweird.f32 %v9140_v42 }
 0xa76   :  { %vm6982_vm2 = vmor %vm6980_vm5, %vm6981_vm1 }
 0xa77   :  { %v6976_v59 = vmul.f32 %v9140_v42, %v6975_v38  ;;  %v17545_v38 = vld [vmem:[#allocation65_spill] sm:$0xff] }
 0xa79   :  { %v6977_v37 = vmul.f32 0.5, %v6976_v59  ;;  %v9142_v59 = vpop.eup %9141 }
 0xa7a   :  { %vm7001_vm4 = vweird.f32 %v9142_v59 }
 0xa7b   :  { %v6978_v54 = vsub.f32 1.5, %v6977_v37  ;;  %v6995_v37 = vmul.f32 %v9142_v59, %v6763_v8  ;;  %vm7002_vm3 = vmor %vm7000_vm13, %vm7001_vm4 }
 0xa7d   :  { %6476 = vadd.xlane.f32.xlu2 %v6475_v57  ;;  %v6979_v47 = vmul.f32 %v9140_v42, %v6978_v54  ;;  %v6996_v45 = vmul.f32 %v9142_v59, %v6995_v37  ;;  %v5762_v37 = vpop.f32.mrf.mxu2 }
 0xa7e   :  { %7390 = vperm.xlu0 %8844, %v7266_v23  }
 0xa7f   :  { %v6983_v12 = vsel %vm6982_vm2, %v9140_v42, %v6979_v47  ;;  %v17546_v42 = vsub.f32 %v15325_v4, %v15323_v27  ;;  %v6104_v47 = vpop.f32.mrf.mxu3  ;;  %v17548_v27 = vsub.f32 %v15454_v33, %v15452_v0  ;;  %v17551_v0 = vld [vmem:[#allocation56_spill] sm:$0xff]  ;;  %v17552_v33 = vld [vmem:[#allocation39_spill] sm:$0xff] }
 0xa81   :  { %v6642_v4 = vmax.f32 %v17548_v27, 0.0 }
 0xa85   :  { %v7366_v63 = vpop.permute.xlu1 %7365 }
 0xa86   :  { %v7528_v34 = vmul.f32 %v7366_v63, %v6688_v21  ;;  %v7529_v57 = vmul.f32 %v7366_v63, %v6689_v41  ;;  %v7265_v21 = vmul.f32 %v7223_v60, %v6983_v12  ;;  %v17549_v60 = vld [vmem:[#allocation84_spill] sm:$0xff] }
 0xa88   :  { %v7864_v23 = vadd.f32 %v17545_v38, %v7528_v34  ;;  %v7865_v10 = vadd.f32 %v17545_v38, %v7529_v57  ;;  %6227 = vadd.xlane.f32.xlu1 %v6226_v13  ;;  %v6997_v34 = vmul.f32 0.5, %v6996_v45  ;;  %v6639_v13 = vmax.f32 %v17546_v42, 0.0  ;;  %v5876_v38 = vpop.f32.mrf.mxu0 }
 0xa8a   :  { %7948 = vst [vmem:[#allocation2 + $0xf0] sm:$0xff] %v7864_v23  ;;  %v5990_v23 = vpop.f32.mrf.mxu1  ;;  %v15737_v43 = vadd.f32 1e-05, %v6639_v13 }
 0xa8b   :  { %7949 = vst [vmem:[#allocation2 + $0xf8] sm:$0xff] %v7865_v10  ;;  %v6998_v10 = vsub.f32 1.5, %v6997_v34  ;;  %v5991_v26 = vadd.f32 %v5990_v23, %v5876_v38  ;;  %v15753_v34 = vadd.f32 1e-05, %v6642_v4  ;;  %v6692_v23 = vsub.f32 %v17552_v33, %v17551_v0  ;;  %v17556_v33 = vld [vmem:[#allocation54_spill] sm:$0xff] }
 0xa8c   :  { %9143 = vrsqrt.f32 %v15737_v43  ;;  %vm7020_vm7 = vweird.f32 %v15737_v43 }
 0xa8d   :  { %v15741_v12 = vadd.f32 %v6104_v47, %v5991_v26  ;;  %9145 = vrsqrt.f32 %v15753_v34  ;;  %v17554_v47 = vsub.f32 %v15575_v14, %v15573_v5  ;;  %v17558_v5 = vld [vmem:[#allocation68_spill] sm:$0xff]  ;;  %vm7050_vm10 = vweird.f32 %v15753_v34 }
 0xa8e   :  { %v6691_v14 = vsub.f32 %v17558_v5, %v17556_v33 }
 0xa8f   :  { %v6213_v62 = vpop.xlane.xlu0 %6212  ;;  %17547 = vst [vmem:[#allocation73_spill] sm:$0xff] %v15741_v12  ;;  %v6359_v26 = vmul.f32 %v15741_v12, %v15741_v12 }
 0xa90   :  { %6479 = vadd.xlane.f32.xlu1 %v6478_v46  ;;  %v15724_v41 = vmul.f32 0.0051020407, %v6213_v62  ;;  %v6999_v62 = vmul.f32 %v9142_v59, %v6998_v10 }
 0xa92   :  { %v15728_v61 = vmul.f32 %v15724_v41, %v15724_v41  ;;  %v7003_v45 = vsel %vm7002_vm3, %v9142_v59, %v6999_v62  ;;  %v15759_v38 = vpop.eup %9143  ;;  %v17553_v59 = vld [vmem:[#allocation70_spill] sm:$0xff]  ;;  %v6645_v62 = vmax.f32 %v17554_v47, 0.0 }
 0xa93   :  { %v6693_v10 = vsub.f32 %v17553_v59, %v17551_v0  ;;  %v7015_v27 = vmul.f32 %v15759_v38, %v15737_v43  ;;  %v17557_v59 = vld [vmem:[#allocation92_spill] sm:$0xff]  ;;  %vm7021_vm6 = vweird.f32 %v15759_v38 }
 0xa94   :  { %v15777_v0 = vadd.f32 1e-05, %v6645_v62  ;;  %v6690_v54 = vsub.f32 %v17557_v59, %v17556_v33  ;;  %v5879_v62 = vpop.f32.mrf.mxu0  ;;  %v17559_v59 = vsub.f32 %v15682_v7, %v15680_v22  ;;  %vm7022_vm9 = vmor %vm7020_vm7, %vm7021_vm6 }
 0xa95   :  { %7385 = vperm.xlu2 %8846, %v7265_v21   ;;  %v15748_v21 = vadd.f32 %v5762_v37, %v17549_v60  ;;  %v7016_v50 = vmul.f32 %v15759_v38, %v7015_v27  ;;  %v17561_v27 = vld [vmem:[#allocation49_spill] sm:$0xff] }
 0xa96   :  { %9147 = vrsqrt.f32 %v15777_v0  ;;  %vm7080_vm8 = vweird.f32 %v15777_v0 }
 0xa97   :  { %v6465_v63 = vpop.xlane.xlu0 %6464  ;;  %17550 = vst [vmem:[#allocation33_spill] sm:$0xff] %v15748_v21  ;;  %v6229_v8 = vadd.f32 %v15741_v12, %v15748_v21  ;;  %v6648_v12 = vmax.f32 %v17559_v59, 0.0 }
 0xa98   :  { %v15730_v57 = vmul.f32 0.0051020407, %v6465_v63  ;;  %v7225_v63 = vld [vmem:[%s16328_s7 + $0xa8] sm:$0xff] }
 0xa99   :  { %v7267_v13 = vmul.f32 %v7225_v63, %v7003_v45  ;;  %v6358_v45 = vmul.f32 %v15748_v21, %v15748_v21  ;;  %v17555_v63 = vld [vmem:[#allocation27_spill] sm:$0xff] }
 0xa9a   :  { %v17577_v21 = vld [vmem:[#allocation43_spill] sm:$0xff] }
 0xa9b   :  { %v6481_v47 = vadd.f32 %v6359_v26, %v6358_v45  ;;  %v17560_v26 = vsub.f32 %v15298_v20, %v15296_v28  ;;  %v5765_v20 = vpop.f32.mrf.mxu2 }
 0xa9d   :  { %v6638_v45 = vmax.f32 %v17560_v26, 0.0 }
 0xa9f   :  { %v15739_v46 = vpop.xlane.xlu2 %6215  ;;  %v15801_v28 = vadd.f32 1e-05, %v6638_v45 }
 0xaa1   :  { %vm7010_vm2 = vweird.f32 %v15801_v28 }
 0xaa7   :  { %v15757_v42 = vpop.xlane.xlu2 %6467 }
 0xaa8   :  { %6230 = vadd.xlane.f32.xlu0 %v6229_v8 }
 0xaa9   :  { %7395 = vperm.xlu1 %8845, %v7267_v13  }
 0xaaa   :  { %v7376_v37 = vpop.permute.xlu0 %7375 }
 0xaab   :  { %v7532_v4 = vmul.f32 %v7376_v37, %v6692_v23  ;;  %v7533_v60 = vmul.f32 %v7376_v37, %v6693_v10  ;;  %v15784_v10 = vpop.eup %9145 }
 0xaac   :  { %v7045_v33 = vmul.f32 %v15784_v10, %v15753_v34  ;;  %vm7051_vm14 = vweird.f32 %v15784_v10 }
 0xaad   :  { %v7868_v8 = vadd.f32 %v17555_v63, %v7532_v4  ;;  %v7869_v13 = vadd.f32 %v17555_v63, %v7533_v60  ;;  %v5993_v63 = vpop.f32.mrf.mxu1  ;;  %vm15857_vm11 = vmor %vm7050_vm10, %vm7051_vm14 }
 0xaae   :  { %v5994_v5 = vadd.f32 %v5993_v63, %v5879_v62  ;;  %v17563_v63 = vld [vmem:[#allocation69_spill] sm:$0xff] }
 0xaaf   :  { %7952 = vst [vmem:[#allocation2 + $0x110] sm:$0xff] %v7868_v8  ;;  %v7371_v23 = vpop.permute.xlu2 %7370 }
 0xab0   :  { %7953 = vst [vmem:[#allocation2 + $0x118] sm:$0xff] %v7869_v13  ;;  %v7530_v37 = vmul.f32 %v7371_v23, %v6690_v54  ;;  %v7531_v4 = vmul.f32 %v7371_v23, %v6691_v14  ;;  %6482 = vadd.xlane.f32.xlu0 %v6481_v47  ;;  %v6219_v60 = vpop.xlane.xlu1 %6218  ;;  %v7017_v54 = vmul.f32 0.5, %v7016_v50  ;;  %v6107_v14 = vpop.f32.mrf.mxu3  ;;  %v15797_v47 = vadd.f32 1e-05, %v6648_v12 }
 0xab1   :  { %v15799_v22 = vmul.f32 0.0051020407, %v6219_v60  ;;  %v7046_v23 = vmul.f32 %v15784_v10, %v7045_v33  ;;  %v15806_v50 = vadd.f32 %v6107_v14, %v5994_v5  ;;  %v15812_v60 = vadd.f32 %v5765_v20, %v17563_v63 }
 0xab2   :  { %v7866_v8 = vadd.f32 %v17561_v27, %v7530_v37  ;;  %v7867_v13 = vadd.f32 %v17561_v27, %v7531_v4  ;;  %v7018_v7 = vsub.f32 1.5, %v7017_v54  ;;  %v15804_v37 = vpop.eup %9147  ;;  %9149 = vrsqrt.f32 %v15797_v47 }
 0xab3   :  { %17562 = vst [vmem:[#allocation76_spill] sm:$0xff] %v15806_v50  ;;  %v6567_v12 = vmul.f32 %v15799_v22, %v15799_v22  ;;  %9151 = vrsqrt.f32 %v15801_v28  ;;  %v7047_v59 = vmul.f32 0.5, %v7046_v23  ;;  %v7075_v26 = vmul.f32 %v15804_v37, %v15777_v0 }
 0xab4   :  { %7950 = vst [vmem:[#allocation2 + $0x100] sm:$0xff] %v7866_v8  ;;  %v7019_v27 = vmul.f32 %v15759_v38, %v7018_v7  ;;  %v17564_v8 = vsub.f32 %v15422_v16, %v15420_v15  ;;  %v6232_v54 = vadd.f32 %v15806_v50, %v15812_v60  ;;  %v7227_v15 = vld [vmem:[%s16328_s7 + $0xb8] sm:$0xff]  ;;  %v6361_v43 = vmul.f32 %v15806_v50, %v15806_v50 }
 0xab5   :  { %7951 = vst [vmem:[#allocation2 + $0x108] sm:$0xff] %v7867_v13  ;;  %v7048_v14 = vsub.f32 1.5, %v7047_v59  ;;  %v7076_v20 = vmul.f32 %v15804_v37, %v7075_v26  ;;  %vm7081_vm12 = vweird.f32 %v15804_v37  ;;  %vm7110_vm5 = vweird.f32 %v15797_v47 }
 0xab6   :  { %v6641_v13 = vmax.f32 %v17564_v8, 0.0  ;;  %v7023_v7 = vsel %vm7022_vm9, %v15759_v38, %v7019_v27  ;;  %vm15899_vm15 = vmor %vm7080_vm8, %vm7081_vm12 }
 0xab7   :  { %v7269_v38 = vmul.f32 %v7227_v15, %v7023_v7  ;;  %v7077_v63 = vmul.f32 0.5, %v7076_v20  ;;  %v7049_v59 = vmul.f32 %v15784_v10, %v7048_v14 }
 0xab8   :  { %v6471_v4 = vpop.xlane.xlu1 %6470  ;;  %v15825_v5 = vpop.eup %9149 }
 0xab9   :  { %v6525_v62 = vmul.f32 0.0051020407, %v6471_v4  ;;  %v15834_v16 = vpop.eup %9151  ;;  %v15838_v4 = vadd.f32 1e-05, %v6641_v13  ;;  %v5881_v13 = vpop.f32.mrf.mxu0  ;;  %v7078_v15 = vsub.f32 1.5, %v7077_v63  ;;  %vm7111_vm0 = vweird.f32 %v15825_v5 }
 0xaba   :  { %v7005_v26 = vmul.f32 %v15834_v16, %v15801_v28  ;;  %v5767_v63 = vpop.f32.mrf.mxu2  ;;  %vm7011_vm1 = vweird.f32 %v15834_v16  ;;  %vm15946_vm4 = vmor %vm7110_vm5, %vm7111_vm0  ;;  %v7236_v28 = vld [vmem:[%s16328_s7 + $0x100] sm:$0xff] }
 0xabb   :  { %v6609_v45 = vsub.f32 %v6525_v62, %v6567_v12  ;;  %v6360_v12 = vmul.f32 %v15812_v60, %v15812_v60  ;;  %v7105_v62 = vmul.f32 %v15825_v5, %v15797_v47  ;;  %vm15950_vm13 = vmor %vm7010_vm2, %vm7011_vm1  ;;  %vm7040_vm14 = vweird.f32 %v15838_v4 }
 0xabd   :  { %v6651_v33 = vmax.f32 %v6609_v45, 0.0  ;;  %v17565_v45 = vsub.f32 %v15536_v18, %v15534_v17  ;;  %v6484_v8 = vadd.f32 %v6361_v43, %v6360_v12  ;;  %v7106_v7 = vmul.f32 %v15825_v5, %v7105_v62  ;;  %v7230_v18 = vld [vmem:[%s16328_s7 + $0xd0] sm:$0xff]  ;;  %v6109_v12 = vpop.f32.mrf.mxu3 }
 0xabe   :  { %6233 = vadd.xlane.f32.xlu2 %v6232_v54  ;;  %v5995_v54 = vpop.f32.mrf.mxu1  ;;  %v7053_v17 = vsel %vm15857_vm11, %v15784_v10, %v7049_v59  ;;  %v15874_v62 = vmul.f32 0.0051020407, %v15739_v46  ;;  %v17569_v10 = vsub.f32 %v15650_v6, %v15648_v52  ;;  %v7079_v46 = vmul.f32 %v15804_v37, %v7078_v15 }
 0xabf   :  { %v15828_v23 = vadd.f32 1e-05, %v6651_v33  ;;  %v6644_v27 = vmax.f32 %v17565_v45, 0.0  ;;  %v17566_v33 = vsub.f32 %v15407_v39, %v15405_v40  ;;  %v5996_v40 = vadd.f32 %v5995_v54, %v5881_v13 }
 0xac0   :  { %v7006_v39 = vmul.f32 %v15834_v16, %v7005_v26  ;;  %v6647_v59 = vmax.f32 %v17569_v10, 0.0  ;;  %v6524_v26 = vmul.f32 0.0051020407, %v15757_v42  ;;  %v6566_v42 = vmul.f32 %v15874_v62, %v15874_v62 }
 0xac1   :  { %9153 = vrsqrt.f32 %v15828_v23  ;;  %v6640_v20 = vmax.f32 %v17566_v33, 0.0  ;;  %v15871_v43 = vadd.f32 1e-05, %v6644_v27  ;;  %v7272_v33 = vmul.f32 %v7230_v18, %v7053_v17  ;;  %v17573_v17 = vld [vmem:[#allocation61_spill] sm:$0xff] }
 0xac2   :  { %9155 = vrsqrt.f32 %v15838_v4  ;;  %v15888_v13 = vadd.f32 %v6109_v12, %v5996_v40  ;;  %v7007_v54 = vmul.f32 0.5, %v7006_v39  ;;  %v17574_v18 = vld [vmem:[#allocation21_spill] sm:$0xff]  ;;  %v17575_v39 = vld [vmem:[#allocation75_spill] sm:$0xff]  ;;  %v7083_v10 = vsel %vm15899_vm15, %v15804_v37, %v7079_v46 }
 0xac3   :  { %v15878_v45 = vadd.f32 1e-05, %v6640_v20  ;;  %9157 = vrsqrt.f32 %v15871_v43  ;;  %v17570_v20 = vld [vmem:[#allocation8_spill] sm:$0xff]  ;;  %v6694_v40 = vsub.f32 %v17574_v18, %v17573_v17  ;;  %v6695_v12 = vsub.f32 %v17575_v39, %v17573_v17 }
 0xac4   :  { %7405 = vperm.xlu0 %8844, %v7269_v38   ;;  %v15892_v52 = vadd.f32 %v5767_v63, %v17570_v20  ;;  %v6608_v63 = vsub.f32 %v6524_v26, %v6566_v42  ;;  %v17576_v26 = vsub.f32 %v15515_v25, %v15513_v29  ;;  %v6363_v29 = vmul.f32 %v15888_v13, %v15888_v13 }
 0xac5   :  { %9159 = vrsqrt.f32 %v15878_v45  ;;  %vm7140_vm7 = vweird.f32 %v15828_v23  ;;  %vm7070_vm12 = vweird.f32 %v15871_v43  ;;  %vm7030_vm0 = vweird.f32 %v15878_v45 }
 0xac6   :  { %6485 = vadd.xlane.f32.xlu2 %v6484_v8  ;;  %v7107_v8 = vmul.f32 0.5, %v7106_v7  ;;  %v15903_v7 = vadd.f32 1e-05, %v6647_v59  ;;  %v7233_v59 = vld [vmem:[%s16328_s7 + $0xe8] sm:$0xff]  ;;  %v6235_v20 = vadd.f32 %v15888_v13, %v15892_v52  ;;  %v6643_v42 = vmax.f32 %v17576_v26, 0.0 }
 0xac7   :  { %v15868_v34 = vpop.eup %9153  ;;  %v7275_v37 = vmul.f32 %v7233_v59, %v7083_v10 }
 0xac8   :  { %v15876_v38 = vpop.eup %9155  ;;  %v7135_v27 = vmul.f32 %v15868_v34, %v15828_v23  ;;  %v7108_v15 = vsub.f32 1.5, %v7107_v8  ;;  %v7008_v8 = vsub.f32 1.5, %v7007_v54  ;;  %9161 = vrsqrt.f32 %v15903_v7  ;;  %v7239_v23 = vld [vmem:[%s16328_s7 + $0x118] sm:$0xff] }
 0xac9   :  { %v7035_v6 = vmul.f32 %v15876_v38, %v15838_v4  ;;  %v15923_v39 = vpop.eup %9157  ;;  %v6650_v54 = vmax.f32 %v6608_v63, 0.0  ;;  %v15936_v10 = vadd.f32 1e-05, %v6643_v42  ;;  %v6362_v63 = vmul.f32 %v15892_v52, %v15892_v52 }
 0xaca   :  { %v7136_v0 = vmul.f32 %v15868_v34, %v7135_v27  ;;  %v7109_v46 = vmul.f32 %v15825_v5, %v7108_v15  ;;  %v7009_v25 = vmul.f32 %v15834_v16, %v7008_v8  ;;  %v7065_v15 = vmul.f32 %v15923_v39, %v15871_v43 }
 0xacb   :  { %v7036_v17 = vmul.f32 %v15876_v38, %v7035_v6  ;;  %v15954_v8 = vadd.f32 1e-05, %v6650_v54  ;;  %9163 = vrsqrt.f32 %v15936_v10  ;;  %vm7141_vm3 = vweird.f32 %v15868_v34 }
 0xacc   :  { %7420 = vperm.xlu0 %8844, %v7272_v33   ;;  %v7137_v14 = vmul.f32 0.5, %v7136_v0  ;;  %v7013_v26 = vsel %vm15950_vm13, %v15834_v16, %v7009_v25  ;;  %vm7041_vm6 = vweird.f32 %v15876_v38  ;;  %vm15988_vm9 = vmor %vm7140_vm7, %vm7141_vm3  ;;  %vm7071_vm11 = vweird.f32 %v15923_v39 }
 0xacd   :  { %9165 = vrsqrt.f32 %v15954_v8  ;;  %vm16003_vm10 = vmor %vm7040_vm14, %vm7041_vm6  ;;  %vm7100_vm2 = vweird.f32 %v15903_v7  ;;  %vm7060_vm3 = vweird.f32 %v15936_v10 }
 0xace   :  { %v7138_v47 = vsub.f32 1.5, %v7137_v14  ;;  %vm16036_vm8 = vmor %vm7070_vm12, %vm7071_vm11 }
 0xad0   :  { %v7381_v33 = vpop.permute.xlu1 %7380  ;;  %v7139_v16 = vmul.f32 %v15868_v34, %v7138_v47 }
 0xad1   :  { %v7534_v27 = vmul.f32 %v7381_v33, %v6694_v40  ;;  %v7535_v18 = vmul.f32 %v7381_v33, %v6695_v12  ;;  %v15934_v40 = vpop.eup %9159  ;;  %v7037_v12 = vmul.f32 0.5, %v7036_v17  ;;  %v6487_v17 = vadd.f32 %v6363_v29, %v6362_v63 }
 0xad2   :  { %v15962_v33 = vpop.eup %9161  ;;  %v7143_v63 = vsel %vm15988_vm9, %v15868_v34, %v7139_v16  ;;  %vm7031_vm15 = vweird.f32 %v15934_v40  ;;  %vm7130_vm9 = vweird.f32 %v15954_v8 }
 0xad3   :  { %v7870_v50 = vadd.f32 %v17577_v21, %v7534_v27  ;;  %v7871_v6 = vadd.f32 %v17577_v21, %v7535_v18  ;;  %6236 = vadd.xlane.f32.xlu1 %v6235_v20  ;;  %v7025_v20 = vmul.f32 %v15934_v40, %v15878_v45  ;;  %v7038_v42 = vsub.f32 1.5, %v7037_v12  ;;  %v15992_v12 = vpop.eup %9163  ;;  %vm16053_vm1 = vmor %vm7030_vm0, %vm7031_vm15  ;;  %v7228_v45 = vld [vmem:[%s16328_s7 + $0xc0] sm:$0xff] }
 0xad4   :  { %7435 = vperm.xlu0 %8844, %v7275_v37   ;;  %v7066_v27 = vmul.f32 %v15923_v39, %v7065_v15  ;;  %v7226_v37 = vld [vmem:[%s16328_s7 + $0xb0] sm:$0xff]  ;;  %v16010_v4 = vpop.eup %9165  ;;  %vm7101_vm5 = vweird.f32 %v15962_v33  ;;  %vm7061_vm13 = vweird.f32 %v15992_v12 }
 0xad5   :  { %7954 = vst [vmem:[#allocation2 + $0x120] sm:$0xff] %v7870_v50  ;;  %v6222_v21 = vpop.xlane.xlu0 %6221  ;;  %v7113_v50 = vsel %vm15946_vm4, %v15825_v5, %v7109_v46  ;;  %v17582_v5 = vsub.f32 %v15626_v3, %v15624_v2  ;;  %v7026_v54 = vmul.f32 %v15934_v40, %v7025_v20  ;;  %v7095_v2 = vmul.f32 %v15962_v33, %v15903_v7  ;;  %v7229_v20 = vld [vmem:[%s16328_s7 + $0xc8] sm:$0xff]  ;;  %vm16071_vm4 = vmor %vm7100_vm2, %vm7101_vm5 }
 0xad6   :  { %7955 = vst [vmem:[#allocation2 + $0x128] sm:$0xff] %v7871_v6  ;;  %v7278_v46 = vmul.f32 %v7236_v28, %v7113_v50  ;;  %v7268_v3 = vmul.f32 %v7226_v37, %v7013_v26  ;;  %v7067_v14 = vmul.f32 0.5, %v7066_v27  ;;  %v7039_v29 = vmul.f32 %v15876_v38, %v7038_v42  ;;  %vm16101_vm7 = vmor %vm7060_vm3, %vm7061_vm13 }
 0xad7   :  { %v6646_v18 = vmax.f32 %v17582_v5, 0.0  ;;  %v7096_v59 = vmul.f32 %v15962_v33, %v7095_v2  ;;  %v16008_v47 = vmul.f32 0.0051020407, %v6222_v21  ;;  %v7027_v50 = vmul.f32 0.5, %v7026_v54 }
 0xad8   :  { %v7068_v28 = vsub.f32 1.5, %v7067_v14  ;;  %v7043_v34 = vsel %vm16003_vm10, %v15876_v38, %v7039_v29  ;;  %v17587_v21 = vsub.f32 %v15730_v57, %v15728_v61  ;;  %v7281_v27 = vmul.f32 %v7239_v23, %v7143_v63  ;;  %v7232_v63 = vld [vmem:[%s16328_s7 + $0xe0] sm:$0xff] }
 0xad9   :  { %v15984_v6 = vadd.f32 1e-05, %v6646_v18  ;;  %v7097_v5 = vmul.f32 0.5, %v7096_v59  ;;  %v7125_v18 = vmul.f32 %v16010_v4, %v15954_v8  ;;  %v6568_v38 = vmul.f32 %v16008_v47, %v16008_v47 }
 0xada   :  { %v6649_v26 = vmax.f32 %v17587_v21, 0.0  ;;  %v7271_v37 = vmul.f32 %v7229_v20, %v7043_v34  ;;  %v7069_v16 = vmul.f32 %v15923_v39, %v7068_v28  ;;  %vm7131_vm6 = vweird.f32 %v16010_v4 }
 0xadb   :  { %6488 = vadd.xlane.f32.xlu1 %v6487_v17  ;;  %9167 = vrsqrt.f32 %v15984_v6  ;;  %v7055_v17 = vmul.f32 %v15992_v12, %v15936_v10  ;;  %v7098_v14 = vsub.f32 1.5, %v7097_v5  ;;  %v7126_v29 = vmul.f32 %v16010_v4, %v7125_v18  ;;  %v17594_v5 = vld [vmem:[#allocation106_spill] sm:$0xff]  ;;  %v17595_v18 = vld [vmem:[#allocation45_spill] sm:$0xff]  ;;  %v17602_v10 = vld [vmem:[#allocation91_spill] sm:$0xff] }
 0xadc   :  { %7450 = vperm.xlu0 %8844, %v7278_v46   ;;  %v7028_v46 = vsub.f32 1.5, %v7027_v50  ;;  %v16031_v61 = vadd.f32 1e-05, %v6649_v26  ;;  %vm16121_vm14 = vmor %vm7130_vm9, %vm7131_vm6  ;;  %vm7090_vm11 = vweird.f32 %v15984_v6 }
 0xadd   :  { %v6474_v15 = vpop.xlane.xlu0 %6473  ;;  %v7056_v54 = vmul.f32 %v15992_v12, %v7055_v17  ;;  %v7099_v34 = vmul.f32 %v15962_v33, %v7098_v14 }
 0xade   :  { %7400 = vperm.xlu2 %8846, %v7268_v3   ;;  %v6526_v42 = vmul.f32 0.0051020407, %v6474_v15  ;;  %v7073_v15 = vsel %vm16036_vm8, %v15923_v39, %v7069_v16  ;;  %v7029_v43 = vmul.f32 %v15934_v40, %v7028_v46  ;;  %9169 = vrsqrt.f32 %v16031_v61 }
 0xadf   :  { %v7057_v23 = vmul.f32 0.5, %v7056_v54  ;;  %v7127_v39 = vmul.f32 0.5, %v7126_v29  ;;  %v7274_v28 = vmul.f32 %v7232_v63, %v7073_v15  ;;  %v7103_v7 = vsel %vm16071_vm4, %v15962_v33, %v7099_v34  ;;  %v7235_v63 = vld [vmem:[%s16328_s7 + $0xf8] sm:$0xff] }
 0xae0   :  { %v6610_v57 = vsub.f32 %v6526_v42, %v6568_v38  ;;  %v7033_v17 = vsel %vm16053_vm1, %v15934_v40, %v7029_v43  ;;  %v6698_v38 = vsub.f32 %v17595_v18, %v17594_v5  ;;  %v17596_v40 = vld [vmem:[#allocation89_spill] sm:$0xff]  ;;  %vm7120_vm15 = vweird.f32 %v16031_v61 }
 0xae1   :  { %v16033_v2 = vpop.eup %9167  ;;  %v7058_v21 = vsub.f32 1.5, %v7057_v23  ;;  %v7128_v16 = vsub.f32 1.5, %v7127_v39  ;;  %v7270_v3 = vmul.f32 %v7228_v45, %v7033_v17 }
 0xae2   :  { %v7085_v0 = vmul.f32 %v16033_v2, %v15984_v6  ;;  %v6652_v59 = vmax.f32 %v6610_v57, 0.0  ;;  %vm7091_vm10 = vweird.f32 %v16033_v2 }
 0xae3   :  { %v7059_v23 = vmul.f32 %v15992_v12, %v7058_v21  ;;  %v7129_v17 = vmul.f32 %v16010_v4, %v7128_v16  ;;  %v7231_v16 = vld [vmem:[%s16328_s7 + $0xd8] sm:$0xff]  ;;  %vm7092_vm12 = vmor %vm7090_vm11, %vm7091_vm10 }
 0xae4   :  { %7465 = vperm.xlu0 %8844, %v7281_v27   ;;  %v7086_v26 = vmul.f32 %v16033_v2, %v7085_v0  ;;  %v16069_v42 = vadd.f32 1e-05, %v6652_v59  ;;  %v16079_v46 = vpop.eup %9169  ;;  %v17597_v59 = vld [vmem:[#allocation53_spill] sm:$0xff] }
 0xae5   :  { %v7115_v33 = vmul.f32 %v16079_v46, %v16031_v61  ;;  %v17601_v27 = vld [vmem:[#allocation41_spill] sm:$0xff]  ;;  %vm7121_vm8 = vweird.f32 %v16079_v46 }
 0xae6   :  { %7415 = vperm.xlu2 %8846, %v7271_v37   ;;  %v6699_v37 = vsub.f32 %v17596_v40, %v17594_v5  ;;  %v7087_v43 = vmul.f32 0.5, %v7086_v26  ;;  %9171 = vrsqrt.f32 %v16069_v42  ;;  %v17600_v26 = vld [vmem:[#allocation81_spill] sm:$0xff]  ;;  %vm7122_vm0 = vmor %vm7120_vm15, %vm7121_vm8  ;;  %vm7150_vm13 = vweird.f32 %v16069_v42 }
 0xae7   :  { %v6696_v5 = vsub.f32 %v17601_v27, %v17600_v26  ;;  %v6697_v18 = vsub.f32 %v17602_v10, %v17600_v26 }
 0xae8   :  { %v6225_v25 = vpop.xlane.xlu2 %6224  ;;  %v7088_v21 = vsub.f32 1.5, %v7087_v43  ;;  %v17605_v43 = vld [vmem:[#allocation51_spill] sm:$0xff] }
 0xae9   :  { %v16059_v20 = vmul.f32 0.0051020407, %v6225_v25 }
 0xaeb   :  { %v6569_v14 = vmul.f32 %v16059_v20, %v16059_v20 }
 0xaee   :  { %7430 = vperm.xlu2 %8846, %v7274_v28   ;;  %v7277_v28 = vmul.f32 %v7235_v63, %v7103_v7 }
 0xaf0   :  { %v6477_v54 = vpop.xlane.xlu2 %6476  ;;  %v7391_v57 = vpop.permute.xlu0 %7390 }
 0xaf1   :  { %v6527_v29 = vmul.f32 0.0051020407, %v6477_v54  ;;  %v7538_v25 = vmul.f32 %v7391_v57, %v6698_v38  ;;  %v7539_v15 = vmul.f32 %v7391_v57, %v6699_v37  ;;  %v7116_v38 = vmul.f32 %v16079_v46, %v7115_v33  ;;  %v16117_v54 = vpop.eup %9171 }
 0xaf2   :  { %v7063_v37 = vsel %vm16101_vm7, %v15992_v12, %v7059_v23  ;;  %v7133_v12 = vsel %vm16121_vm14, %v16010_v4, %v7129_v17  ;;  %v7145_v63 = vmul.f32 %v16117_v54, %v16069_v42  ;;  %vm7151_vm4 = vweird.f32 %v16117_v54  ;;  %v17607_v42 = vld [vmem:[#allocation13_spill] sm:$0xff] }
 0xaf3   :  { %v6611_v0 = vsub.f32 %v6527_v29, %v6569_v14  ;;  %v7874_v50 = vadd.f32 %v17597_v59, %v7538_v25  ;;  %v7875_v39 = vadd.f32 %v17597_v59, %v7539_v15  ;;  %v7238_v14 = vld [vmem:[%s16328_s7 + $0x110] sm:$0xff]  ;;  %v7273_v29 = vmul.f32 %v7231_v16, %v7063_v37  ;;  %vm7152_vm3 = vmor %vm7150_vm13, %vm7151_vm4 }
 0xaf4   :  { %7410 = vperm.xlu1 %8845, %v7270_v3   ;;  %v7089_v25 = vmul.f32 %v16033_v2, %v7088_v21  ;;  %v7117_v15 = vmul.f32 0.5, %v7116_v38  ;;  %v7280_v4 = vmul.f32 %v7238_v14, %v7133_v12  ;;  %v7241_v12 = vld [vmem:[%s16328_s7 + $0x128] sm:$0xff] }
 0xaf5   :  { %v6653_v34 = vmax.f32 %v6611_v0, 0.0  ;;  %7958 = vst [vmem:[#allocation2 + $0x140] sm:$0xff] %v7874_v50 }
 0xaf6   :  { %7959 = vst [vmem:[#allocation2 + $0x148] sm:$0xff] %v7875_v39  ;;  %7445 = vperm.xlu2 %8846, %v7277_v28   ;;  %v7118_v50 = vsub.f32 1.5, %v7117_v15  ;;  %v7146_v39 = vmul.f32 %v16117_v54, %v7145_v63  ;;  %v7093_v28 = vsel %vm7092_vm12, %v16033_v2, %v7089_v25  ;;  %v7240_v15 = vld [vmem:[%s16328_s7 + $0x120] sm:$0xff] }
 0xaf7   :  { %v6779_v40 = vadd.f32 1e-05, %v6653_v34  ;;  %v7234_v34 = vld [vmem:[%s16328_s7 + $0xf0] sm:$0xff] }
 0xaf8   :  { %v7386_v3 = vpop.permute.xlu2 %7385  ;;  %v7276_v26 = vmul.f32 %v7234_v34, %v7093_v28  ;;  %v7147_v6 = vmul.f32 0.5, %v7146_v39  ;;  %v6701_v39 = vsub.f32 %v17607_v42, %v15276_v48 }
 0xaf9   :  { %9173 = vrsqrt.f32 %v6779_v40  ;;  %v7536_v8 = vmul.f32 %v7386_v3, %v6696_v5  ;;  %v7537_v7 = vmul.f32 %v7386_v3, %v6697_v18  ;;  %v7119_v5 = vmul.f32 %v16079_v46, %v7118_v50  ;;  %v7237_v3 = vld [vmem:[%s16328_s7 + $0x108] sm:$0xff] }
 0xafa   :  { %v7148_v16 = vsub.f32 1.5, %v7147_v6  ;;  %vm7160_vm5 = vweird.f32 %v6779_v40 }
 0xafb   :  { %v7872_v23 = vadd.f32 %v17605_v43, %v7536_v8  ;;  %v7873_v33 = vadd.f32 %v17605_v43, %v7537_v7  ;;  %v6228_v0 = vpop.xlane.xlu1 %6227  ;;  %v7123_v57 = vsel %vm7122_vm0, %v16079_v46, %v7119_v5 }
 0xafc   :  { %7425 = vperm.xlu1 %8845, %v7273_v29   ;;  %v16143_v45 = vmul.f32 0.0051020407, %v6228_v0  ;;  %v7279_v29 = vmul.f32 %v7237_v3, %v7123_v57  ;;  %v7149_v46 = vmul.f32 %v16117_v54, %v7148_v16 }
 0xafd   :  { %7956 = vst [vmem:[#allocation2 + $0x130] sm:$0xff] %v7872_v23 }
 0xafe   :  { %7957 = vst [vmem:[#allocation2 + $0x138] sm:$0xff] %v7873_v33  ;;  %7460 = vperm.xlu2 %8846, %v7280_v4   ;;  %v6570_v18 = vmul.f32 %v16143_v45, %v16143_v45 }
 0xaff   :  { %v9174_v59 = vpop.eup %9173 }
 0xb00   :  { %v7155_v17 = vmul.f32 %v9174_v59, %v6779_v40  ;;  %vm7161_vm1 = vweird.f32 %v9174_v59  ;;  %v7153_v40 = vsel %vm7152_vm3, %v16117_v54, %v7149_v46 }
 0xb01   :  { %vm7162_vm2 = vmor %vm7160_vm5, %vm7161_vm1  ;;  %v7282_v43 = vmul.f32 %v7240_v15, %v7153_v40 }
 0xb02   :  { %v7156_v21 = vmul.f32 %v9174_v59, %v7155_v17  ;;  %v7242_v17 = vld [vmem:[%s16328_s7 + $0x130] sm:$0xff] }
 0xb03   :  { %v6480_v27 = vpop.xlane.xlu1 %6479 }
 0xb04   :  { %v7157_v10 = vmul.f32 0.5, %v7156_v21  ;;  %v6528_v2 = vmul.f32 0.0051020407, %v6480_v27  ;;  %7440 = vperm.xlu1 %8845, %v7276_v26   ;;  %v17608_v27 = vld [vmem:[#allocation63_spill] sm:$0xff] }
 0xb06   :  { %v7158_v38 = vsub.f32 1.5, %v7157_v10  ;;  %v6612_v37 = vsub.f32 %v6528_v2, %v6570_v18 }
 0xb08   :  { %v6654_v8 = vmax.f32 %v6612_v37, 0.0  ;;  %v7159_v7 = vmul.f32 %v9174_v59, %v7158_v38 }
 0xb0a   :  { %v6780_v61 = vadd.f32 1e-05, %v6654_v8  ;;  %v7163_v14 = vsel %vm7162_vm2, %v9174_v59, %v7159_v7  ;;  %v17606_v59 = vld [vmem:[#allocation17_spill] sm:$0xff] }
 0xb0b   :  { %v7283_v25 = vmul.f32 %v7241_v12, %v7163_v14  ;;  %v6700_v50 = vsub.f32 %v17606_v59, %v15276_v48  ;;  %v17609_v14 = vld [vmem:[#allocation108_spill] sm:$0xff] }
 0xb0c   :  { %9175 = vrsqrt.f32 %v6780_v61  ;;  %7455 = vperm.xlu1 %8845, %v7279_v29   ;;  %vm7170_vm7 = vweird.f32 %v6780_v61  ;;  %v6704_v29 = vsub.f32 %v17609_v14, %v15304_v24  ;;  %v6716_v14 = vsub.f32 %v15373_v55, %v15559_v49 }
 0xb0d   :  { %7475 = vperm.xlu2 %8846, %v7283_v25   ;;  %v17610_v25 = vld [vmem:[#allocation79_spill] sm:$0xff]  ;;  %v6709_v55 = vsub.f32 %v15233_v44, %v15414_v31  ;;  %v6722_v44 = vsub.f32 %v15492_v19, %v15673_v32  ;;  %v17621_v19 = vld [vmem:[#allocation93_spill] sm:$0xff] }
 0xb0e   :  { %v6705_v46 = vsub.f32 %v17610_v25, %v15304_v24 }
 0xb12   :  { %v9176_v63 = vpop.eup %9175 }
 0xb13   :  { %v7165_v23 = vmul.f32 %v9176_v63, %v6780_v61  ;;  %vm7171_vm6 = vweird.f32 %v9176_v63 }
 0xb14   :  { %7470 = vperm.xlu1 %8845, %v7282_v43   ;;  %vm7172_vm9 = vmor %vm7170_vm7, %vm7171_vm6 }
 0xb15   :  { %v7166_v33 = vmul.f32 %v9176_v63, %v7165_v23 }
 0xb17   :  { %v7167_v0 = vmul.f32 0.5, %v7166_v33 }
 0xb19   :  { %v7168_v4 = vsub.f32 1.5, %v7167_v0  ;;  %v17611_v0 = vld [vmem:[#allocation48_spill] sm:$0xff] }
 0xb1b   :  { %v7396_v54 = vpop.permute.xlu1 %7395  ;;  %v6231_v28 = vpop.xlane.xlu0 %6230  ;;  %v7169_v34 = vmul.f32 %v9176_v63, %v7168_v4 }
 0xb1c   :  { %v7540_v21 = vmul.f32 %v7396_v54, %v6700_v50  ;;  %v7541_v26 = vmul.f32 %v7396_v54, %v6701_v39  ;;  %v16173_v2 = vmul.f32 0.0051020407, %v6231_v28  ;;  %v7243_v54 = vld [vmem:[%s16328_s7 + $0x138] sm:$0xff] }
 0xb1d   :  { %v7173_v6 = vsel %vm7172_vm9, %v9176_v63, %v7169_v34  ;;  %v6710_v34 = vsub.f32 %v15255_v58, %v15432_v53 }
 0xb1e   :  { %v7876_v5 = vadd.f32 %v17608_v27, %v7540_v21  ;;  %v7877_v10 = vadd.f32 %v17608_v27, %v7541_v26  ;;  %v7284_v18 = vmul.f32 %v7242_v17, %v7173_v6  ;;  %v6571_v38 = vmul.f32 %v16173_v2, %v16173_v2 }
 0xb1f   :  { %v6711_v17 = vsub.f32 %v15252_v1, %v15432_v53 }
 0xb20   :  { %7960 = vst [vmem:[#allocation2 + $0x150] sm:$0xff] %v7876_v5  ;;  %7480 = vperm.xlu0 %8844, %v7284_v18  }
 0xb21   :  { %7961 = vst [vmem:[#allocation2 + $0x158] sm:$0xff] %v7877_v10 }
 0xb23   :  { %v6483_v48 = vpop.xlane.xlu0 %6482 }
 0xb24   :  { %v6529_v37 = vmul.f32 0.0051020407, %v6483_v48  ;;  %v17612_v48 = vld [vmem:[#allocation46_spill] sm:$0xff] }
 0xb26   :  { %v6613_v16 = vsub.f32 %v6529_v37, %v6571_v38  ;;  %v6702_v38 = vsub.f32 %v17612_v48, %v15289_v11  ;;  %v17613_v37 = vld [vmem:[#allocation101_spill] sm:$0xff]  ;;  %v17619_v48 = vld [vmem:[#allocation74_spill] sm:$0xff] }
 0xb28   :  { %v6655_v57 = vmax.f32 %v6613_v16, 0.0  ;;  %v6703_v16 = vsub.f32 %v17613_v37, %v15289_v11  ;;  %v6717_v11 = vsub.f32 %v15370_v30, %v15559_v49  ;;  %v17616_v30 = vld [vmem:[#allocation58_spill] sm:$0xff] }
 0xb2a   :  { %v6781_v3 = vadd.f32 1e-05, %v6655_v57  ;;  %v17614_v57 = vld [vmem:[#allocation100_spill] sm:$0xff] }
 0xb2c   :  { %9177 = vrsqrt.f32 %v6781_v3  ;;  %vm7180_vm10 = vweird.f32 %v6781_v3 }
 0xb31   :  { %v6234_v8 = vpop.xlane.xlu2 %6233 }
 0xb32   :  { %v9178_v7 = vpop.eup %9177  ;;  %v16181_v40 = vmul.f32 0.0051020407, %v6234_v8 }
 0xb33   :  { %v7175_v12 = vmul.f32 %v9178_v7, %v6781_v3  ;;  %vm7181_vm14 = vweird.f32 %v9178_v7 }
 0xb34   :  { %v6572_v42 = vmul.f32 %v16181_v40, %v16181_v40  ;;  %vm7182_vm11 = vmor %vm7180_vm10, %vm7181_vm14 }
 0xb35   :  { %v7176_v61 = vmul.f32 %v9178_v7, %v7175_v12 }
 0xb36   :  { %v7406_v15 = vpop.permute.xlu0 %7405 }
 0xb37   :  { %v7177_v63 = vmul.f32 0.5, %v7176_v61  ;;  %v7544_v43 = vmul.f32 %v7406_v15, %v6704_v29  ;;  %v7545_v23 = vmul.f32 %v7406_v15, %v6705_v46  ;;  %v7621_v29 = vld [vmem:[%s16329_s8 + $0x138] sm:$0xff] }
 0xb39   :  { %v7178_v33 = vsub.f32 1.5, %v7177_v63  ;;  %v7880_v4 = vadd.f32 %v17611_v0, %v7544_v43  ;;  %v7881_v59 = vadd.f32 %v17611_v0, %v7545_v23  ;;  %v6486_v50 = vpop.xlane.xlu2 %6485  ;;  %v6708_v23 = vsub.f32 %v15238_v35, %v15414_v31  ;;  %v17618_v31 = vld [vmem:[#allocation97_spill] sm:$0xff] }
 0xb3a   :  { %v6530_v39 = vmul.f32 0.0051020407, %v6486_v50 }
 0xb3b   :  { %7964 = vst [vmem:[#allocation2 + $0x170] sm:$0xff] %v7880_v4  ;;  %v7179_v24 = vmul.f32 %v9178_v7, %v7178_v33 }
 0xb3c   :  { %7965 = vst [vmem:[#allocation2 + $0x178] sm:$0xff] %v7881_v59  ;;  %v6614_v28 = vsub.f32 %v6530_v39, %v6572_v42 }
 0xb3d   :  { %v7183_v21 = vsel %vm7182_vm11, %v9178_v7, %v7179_v24  ;;  %v17615_v7 = vld [vmem:[#allocation99_spill] sm:$0xff]  ;;  %v17617_v24 = vld [vmem:[#allocation24_spill] sm:$0xff] }
 0xb3e   :  { %v6656_v26 = vmax.f32 %v6614_v28, 0.0  ;;  %v7421_v6 = vpop.permute.xlu0 %7420  ;;  %v7285_v27 = vmul.f32 %v7243_v54, %v7183_v21 }
 0xb3f   :  { %v7550_v5 = vmul.f32 %v7421_v6, %v6710_v34  ;;  %v7551_v10 = vmul.f32 %v7421_v6, %v6711_v17  ;;  %v6723_v34 = vsub.f32 %v17618_v31, %v15673_v32  ;;  %v17630_v31 = vld [vmem:[#allocation67_spill] sm:$0xff] }
 0xb40   :  { %v6782_v18 = vadd.f32 1e-05, %v6656_v26  ;;  %7485 = vperm.xlu1 %8845, %v7285_v27  }
 0xb41   :  { %v7886_v3 = vadd.f32 %v17614_v57, %v7550_v5  ;;  %v7887_v58 = vadd.f32 %v17614_v57, %v7551_v10  ;;  %v7401_v8 = vpop.permute.xlu2 %7400  ;;  %v17622_v57 = vld [vmem:[#allocation66_spill] sm:$0xff] }
 0xb42   :  { %9179 = vrsqrt.f32 %v6782_v18  ;;  %v7542_v1 = vmul.f32 %v7401_v8, %v6702_v38  ;;  %v7543_v53 = vmul.f32 %v7401_v8, %v6703_v16  ;;  %vm7190_vm8 = vweird.f32 %v6782_v18  ;;  %v17620_v38 = vld [vmem:[#allocation37_spill] sm:$0xff] }
 0xb43   :  { %7970 = vst [vmem:[#allocation2 + $0x1a0] sm:$0xff] %v7886_v3  ;;  %v6714_v37 = vsub.f32 %v17620_v38, %v17619_v48  ;;  %v6715_v16 = vsub.f32 %v17621_v19, %v17619_v48 }
 0xb44   :  { %7971 = vst [vmem:[#allocation2 + $0x1a8] sm:$0xff] %v7887_v58  ;;  %v7878_v12 = vadd.f32 %v17615_v7, %v7542_v1  ;;  %v7879_v61 = vadd.f32 %v17615_v7, %v7543_v53  ;;  %v7244_v53 = vld [vmem:[%s16328_s7 + $0x140] sm:$0xff] }
 0xb46   :  { %7962 = vst [vmem:[#allocation2 + $0x160] sm:$0xff] %v7878_v12  ;;  %v6237_v25 = vpop.xlane.xlu1 %6236  ;;  %v7436_v46 = vpop.permute.xlu0 %7435 }
 0xb47   :  { %7963 = vst [vmem:[#allocation2 + $0x168] sm:$0xff] %v7879_v61  ;;  %v7556_v15 = vmul.f32 %v7436_v46, %v6716_v14  ;;  %v7557_v63 = vmul.f32 %v7436_v46, %v6717_v11  ;;  %v16215_v59 = vmul.f32 0.0051020407, %v6237_v25  ;;  %v17623_v14 = vld [vmem:[#allocation64_spill] sm:$0xff] }
 0xb48   :  { %v9180_v43 = vpop.eup %9179  ;;  %7821 = vperm.xlu1 %8845, %v7621_v29  }
 0xb49   :  { %v7185_v33 = vmul.f32 %v9180_v43, %v6782_v18  ;;  %v7892_v49 = vadd.f32 %v17616_v30, %v7556_v15  ;;  %v7893_v0 = vadd.f32 %v17616_v30, %v7557_v63  ;;  %v7416_v4 = vpop.permute.xlu2 %7415  ;;  %vm7191_vm12 = vweird.f32 %v9180_v43  ;;  %v17624_v15 = vld [vmem:[#allocation16_spill] sm:$0xff] }
 0xb4a   :  { %v7548_v50 = vmul.f32 %v7416_v4, %v6708_v23  ;;  %v7549_v42 = vmul.f32 %v7416_v4, %v6709_v55  ;;  %v6573_v17 = vmul.f32 %v16215_v59, %v16215_v59  ;;  %vm7192_vm15 = vmor %vm7190_vm8, %vm7191_vm12  ;;  %v6728_v63 = vsub.f32 %v17624_v15, %v15799_v22  ;;  %v17625_v23 = vld [vmem:[#allocation103_spill] sm:$0xff] }
 0xb4b   :  { %v7186_v39 = vmul.f32 %v9180_v43, %v7185_v33  ;;  %7976 = vst [vmem:[#allocation2 + $0x1d0] sm:$0xff] %v7892_v49  ;;  %v6729_v55 = vsub.f32 %v17625_v23, %v15799_v22  ;;  %v17626_v49 = vld [vmem:[#allocation88_spill] sm:$0xff] }
 0xb4c   :  { %7977 = vst [vmem:[#allocation2 + $0x1d8] sm:$0xff] %v7893_v0  ;;  %v7884_v54 = vadd.f32 %v17617_v24, %v7548_v50  ;;  %v7885_v35 = vadd.f32 %v17617_v24, %v7549_v42  ;;  %v17627_v0 = vld [vmem:[#allocation52_spill] sm:$0xff] }
 0xb4d   :  { %v7187_v28 = vmul.f32 0.5, %v7186_v39  ;;  %v6720_v4 = vsub.f32 %v17627_v0, %v17626_v49  ;;  %v17628_v50 = vld [vmem:[#allocation40_spill] sm:$0xff]  ;;  %v17629_v39 = vld [vmem:[#allocation31_spill] sm:$0xff] }
 0xb4e   :  { %7968 = vst [vmem:[#allocation2 + $0x190] sm:$0xff] %v7884_v54  ;;  %v6489_v21 = vpop.xlane.xlu1 %6488  ;;  %v7451_v26 = vpop.permute.xlu0 %7450  ;;  %v6721_v42 = vsub.f32 %v17628_v50, %v17626_v49  ;;  %v17638_v49 = vld [vmem:[#allocation23_spill] sm:$0xff]  ;;  %v17640_v50 = vld [vmem:[#allocation105_spill] sm:$0xff] }
 0xb4f   :  { %v7188_v6 = vsub.f32 1.5, %v7187_v28  ;;  %7969 = vst [vmem:[#allocation2 + $0x198] sm:$0xff] %v7885_v35  ;;  %v6531_v27 = vmul.f32 0.0051020407, %v6489_v21  ;;  %v7562_v5 = vmul.f32 %v7451_v26, %v6722_v44  ;;  %v7563_v10 = vmul.f32 %v7451_v26, %v6723_v34  ;;  %v7622_v44 = vld [vmem:[%s16329_s8 + $0x140] sm:$0xff] }
 0xb51   :  { %v6615_v32 = vsub.f32 %v6531_v27, %v6573_v17  ;;  %v7898_v3 = vadd.f32 %v17622_v57, %v7562_v5  ;;  %v7899_v58 = vadd.f32 %v17622_v57, %v7563_v10  ;;  %v7431_v8 = vpop.permute.xlu2 %7430  ;;  %v7189_v1 = vmul.f32 %v9180_v43, %v7188_v6  ;;  %v17631_v27 = vld [vmem:[#allocation38_spill] sm:$0xff] }
 0xb52   :  { %v7554_v18 = vmul.f32 %v7431_v8, %v6714_v37  ;;  %v7555_v7 = vmul.f32 %v7431_v8, %v6715_v16  ;;  %v6726_v5 = vsub.f32 %v17631_v27, %v15874_v62  ;;  %v17632_v10 = vld [vmem:[#allocation6_spill] sm:$0xff]  ;;  %v17634_v8 = vld [vmem:[#allocation71_spill] sm:$0xff] }
 0xb53   :  { %v6657_v12 = vmax.f32 %v6615_v32, 0.0  ;;  %7982 = vst [vmem:[#allocation2 + $0x200] sm:$0xff] %v7898_v3  ;;  %v7193_v61 = vsel %vm7192_vm15, %v9180_v43, %v7189_v1  ;;  %v6727_v48 = vsub.f32 %v17632_v10, %v15874_v62  ;;  %v17633_v57 = vld [vmem:[#allocation62_spill] sm:$0xff] }
 0xb54   :  { %7983 = vst [vmem:[#allocation2 + $0x208] sm:$0xff] %v7899_v58  ;;  %v7890_v11 = vadd.f32 %v17623_v14, %v7554_v18  ;;  %v7891_v29 = vadd.f32 %v17623_v14, %v7555_v7  ;;  %v7286_v25 = vmul.f32 %v7244_v53, %v7193_v61  ;;  %v17635_v1 = vld [vmem:[#allocation42_spill] sm:$0xff] }
 0xb55   :  { %v6783_v46 = vadd.f32 1e-05, %v6657_v12  ;;  %v6706_v53 = vsub.f32 %v17635_v1, %v17634_v8  ;;  %v17636_v18 = vld [vmem:[#allocation110_spill] sm:$0xff] }
 0xb56   :  { %7974 = vst [vmem:[#allocation2 + $0x1c0] sm:$0xff] %v7890_v11  ;;  %7490 = vperm.xlu2 %8846, %v7286_v25   ;;  %v7466_v33 = vpop.permute.xlu0 %7465  ;;  %v6707_v7 = vsub.f32 %v17636_v18, %v17634_v8  ;;  %v7245_v61 = vld [vmem:[%s16328_s7 + $0x148] sm:$0xff]  ;;  %v6733_v25 = vsub.f32 %v15684_v36, %v16059_v20  ;;  %v17641_v36 = vld [vmem:[#allocation25_spill] sm:$0xff]  ;;  %v17649_v8 = vld [vmem:[#allocation36_spill] sm:$0xff] }
 0xb57   :  { %9181 = vrsqrt.f32 %v6783_v46  ;;  %7975 = vst [vmem:[#allocation2 + $0x1c8] sm:$0xff] %v7891_v29  ;;  %v7568_v30 = vmul.f32 %v7466_v33, %v6728_v63  ;;  %v7569_v43 = vmul.f32 %v7466_v33, %v6729_v55  ;;  %vm7200_vm1 = vweird.f32 %v6783_v46  ;;  %v17637_v63 = vld [vmem:[#allocation34_spill] sm:$0xff]  ;;  %v17650_v18 = vld [vmem:[#allocation28_spill] sm:$0xff] }
 0xb58   :  { %v6732_v29 = vsub.f32 %v15689_v51, %v16059_v20  ;;  %v17639_v51 = vld [vmem:[#allocation95_spill] sm:$0xff]  ;;  %v17646_v10 = vld [vmem:[#allocation50_spill] sm:$0xff] }
 0xb59   :  { %v7904_v24 = vadd.f32 %v17629_v39, %v7568_v30  ;;  %v7905_v54 = vadd.f32 %v17629_v39, %v7569_v43  ;;  %v7446_v35 = vpop.permute.xlu2 %7445  ;;  %v6713_v20 = vsub.f32 %v17641_v36, %v17639_v51 }
 0xb5a   :  { %v7560_v28 = vmul.f32 %v7446_v35, %v6720_v4  ;;  %v7561_v22 = vmul.f32 %v7446_v35, %v6721_v42  ;;  %v6712_v42 = vsub.f32 %v17640_v50, %v17639_v51  ;;  %v7623_v35 = vld [vmem:[%s16329_s8 + $0x148] sm:$0xff]  ;;  %s9211_s8 = smov [#allocation2]  }
 0xb5b   :  { %7988 = vst [vmem:[#allocation2 + $0x230] sm:$0xff] %v7904_v24  ;;  %s8006_s30 = sshll.u32 %s9211_s8, 4  ;;  %s8007_s30 = int_to_ptr.vmem [resolvable:$true] %s8006_s30 }
 0xb5c   :  { %7989 = vst [vmem:[#allocation2 + $0x238] sm:$0xff] %v7905_v54  ;;  %v7896_v34 = vadd.f32 %v17630_v31, %v7560_v28  ;;  %v7897_v17 = vadd.f32 %v17630_v31, %v7561_v22  ;;  %v17642_v28 = vld [vmem:[#allocation96_spill] sm:$0xff]  ;;  %v17643_v31 = vld [vmem:[#allocation77_spill] sm:$0xff] }
 0xb5d   :  { %v9182_v21 = vpop.eup %9181 }
 0xb5e   :  { %v7195_v26 = vmul.f32 %v9182_v21, %v6783_v46  ;;  %7980 = vst [vmem:[#allocation2 + $0x1f0] sm:$0xff] %v7896_v34  ;;  %7826 = vperm.xlu2 %8846, %v7622_v44   ;;  %vm7201_vm0 = vweird.f32 %v9182_v21  ;;  %v17644_v34 = vld [vmem:[#allocation5_spill] sm:$0xff] }
 0xb5f   :  { %7981 = vst [vmem:[#allocation2 + $0x1f8] sm:$0xff] %v7897_v17  ;;  %vm7202_vm5 = vmor %vm7200_vm1, %vm7201_vm0  ;;  %v6718_v17 = vsub.f32 %v17644_v34, %v17643_v31 }
 0xb60   :  { %v7196_v6 = vmul.f32 %v9182_v21, %v7195_v26 }
 0xb61   :  { %v7461_v38 = vpop.permute.xlu2 %7460 }
 0xb62   :  { %v7197_v37 = vmul.f32 0.5, %v7196_v6  ;;  %v7566_v19 = vmul.f32 %v7461_v38, %v6726_v5  ;;  %v7567_v16 = vmul.f32 %v7461_v38, %v6727_v48 }
 0xb64   :  { %v7198_v32 = vsub.f32 1.5, %v7197_v37  ;;  %v7902_v3 = vadd.f32 %v17633_v57, %v7566_v19  ;;  %v7903_v58 = vadd.f32 %v17633_v57, %v7567_v16  ;;  %v17647_v37 = vld [vmem:[#allocation94_spill] sm:$0xff]  ;;  %v17648_v16 = vld [vmem:[#allocation12_spill] sm:$0xff] }
 0xb65   :  { %v6724_v19 = vsub.f32 %v17647_v37, %v15724_v41 }
 0xb66   :  { %7986 = vst [vmem:[#allocation2 + $0x220] sm:$0xff] %v7902_v3  ;;  %v7411_v12 = vpop.permute.xlu1 %7410  ;;  %v7199_v62 = vmul.f32 %v9182_v21, %v7198_v32  ;;  %v6725_v32 = vsub.f32 %v17648_v16, %v15724_v41 }
 0xb67   :  { %7987 = vst [vmem:[#allocation2 + $0x228] sm:$0xff] %v7903_v58  ;;  %v7546_v14 = vmul.f32 %v7411_v12, %v6706_v53  ;;  %v7547_v11 = vmul.f32 %v7411_v12, %v6707_v7  ;;  %v6730_v7 = vsub.f32 %v17650_v18, %v16008_v47  ;;  %v17651_v12 = vld [vmem:[#allocation18_spill] sm:$0xff] }
 0xb68   :  { %v7203_v15 = vsel %vm7202_vm5, %v9182_v21, %v7199_v62  ;;  %v17645_v21 = vld [vmem:[#allocation102_spill] sm:$0xff]  ;;  %v6731_v62 = vsub.f32 %v17651_v12, %v16008_v47 }
 0xb69   :  { %v7882_v46 = vadd.f32 %v17637_v63, %v7546_v14  ;;  %v7883_v23 = vadd.f32 %v17637_v63, %v7547_v11  ;;  %v7476_v55 = vpop.permute.xlu2 %7475  ;;  %v7287_v33 = vmul.f32 %v7245_v61, %v7203_v15  ;;  %v6719_v26 = vsub.f32 %v17645_v21, %v17643_v31 }
 0xb6a   :  { %v7572_v30 = vmul.f32 %v7476_v55, %v6732_v29  ;;  %v7573_v43 = vmul.f32 %v7476_v55, %v6733_v25  ;;  %v17652_v29 = vld [vmem:[#allocation55_spill] sm:$0xff]  ;;  %v6734_v15 = vsub.f32 %v15707_v9, %v16143_v45  ;;  %v6735_v63 = vsub.f32 %v15704_v56, %v16143_v45  ;;  %v17655_v56 = vld [vmem:[#allocation33_spill] sm:$0xff] }
 0xb6b   :  { %7966 = vst [vmem:[#allocation2 + $0x180] sm:$0xff] %v7882_v46  ;;  %7495 = vperm.xlu0 %8844, %v7287_v33   ;;  %v17653_v33 = vld [vmem:[#allocation83_spill] sm:$0xff]  ;;  %v6736_v45 = vsub.f32 %v17655_v56, %v16173_v2  ;;  %v6741_v31 = vsub.f32 %v15888_v13, %v16215_v59 }
 0xb6c   :  { %7967 = vst [vmem:[#allocation2 + $0x188] sm:$0xff] %v7883_v23  ;;  %v7908_v0 = vadd.f32 %v17638_v49, %v7572_v30  ;;  %v7909_v4 = vadd.f32 %v17638_v49, %v7573_v43 }
 0xb6e   :  { %7992 = vst [vmem:[#allocation2 + $0x250] sm:$0xff] %v7908_v0  ;;  %v7426_v39 = vpop.permute.xlu1 %7425  ;;  %v6738_v0 = vsub.f32 %v15812_v60, %v16181_v40 }
 0xb6f   :  { %7993 = vst [vmem:[#allocation2 + $0x258] sm:$0xff] %v7909_v4  ;;  %v7552_v24 = vmul.f32 %v7426_v39, %v6712_v42  ;;  %v7553_v54 = vmul.f32 %v7426_v39, %v6713_v20  ;;  %v17654_v4 = vld [vmem:[#allocation76_spill] sm:$0xff]  ;;  %v17656_v42 = vld [vmem:[#allocation73_spill] sm:$0xff] }
 0xb70   :  { %v6739_v9 = vsub.f32 %v17654_v4, %v16181_v40  ;;  %v6737_v36 = vsub.f32 %v17656_v42, %v16173_v2 }
 0xb71   :  { %v7888_v22 = vadd.f32 %v17642_v28, %v7552_v24  ;;  %v7889_v44 = vadd.f32 %v17642_v28, %v7553_v54 }
 0xb73   :  { %7972 = vst [vmem:[#allocation2 + $0x1b0] sm:$0xff] %v7888_v22  ;;  %7831 = vperm.xlu0 %8844, %v7623_v35  }
 0xb74   :  { %7973 = vst [vmem:[#allocation2 + $0x1b8] sm:$0xff] %v7889_v44  ;;  %v6740_v44 = vsub.f32 %v15892_v52, %v16215_v59 }
 0xb76   :  { %v7441_v6 = vpop.permute.xlu1 %7440 }
 0xb77   :  { %v7558_v27 = vmul.f32 %v7441_v6, %v6718_v17  ;;  %v7559_v5 = vmul.f32 %v7441_v6, %v6719_v26 }
 0xb79   :  { %v7894_v48 = vadd.f32 %v17646_v10, %v7558_v27  ;;  %v7895_v38 = vadd.f32 %v17646_v10, %v7559_v5 }
 0xb7b   :  { %7978 = vst [vmem:[#allocation2 + $0x1e0] sm:$0xff] %v7894_v48 }
 0xb7c   :  { %7979 = vst [vmem:[#allocation2 + $0x1e8] sm:$0xff] %v7895_v38 }
 0xb7e   :  { %v7456_v57 = vpop.permute.xlu1 %7455 }
 0xb7f   :  { %v7564_v3 = vmul.f32 %v7456_v57, %v6724_v19  ;;  %v7565_v58 = vmul.f32 %v7456_v57, %v6725_v32 }
 0xb81   :  { %v7900_v1 = vadd.f32 %v17649_v8, %v7564_v3  ;;  %v7901_v53 = vadd.f32 %v17649_v8, %v7565_v58 }
 0xb83   :  { %7984 = vst [vmem:[#allocation2 + $0x210] sm:$0xff] %v7900_v1 }
 0xb84   :  { %7985 = vst [vmem:[#allocation2 + $0x218] sm:$0xff] %v7901_v53 }
 0xb86   :  { %v7471_v61 = vpop.permute.xlu1 %7470 }
 0xb87   :  { %v7570_v14 = vmul.f32 %v7471_v61, %v6730_v7  ;;  %v7571_v11 = vmul.f32 %v7471_v61, %v6731_v62 }
 0xb89   :  { %v7906_v41 = vadd.f32 %v17652_v29, %v7570_v14  ;;  %v7907_v25 = vadd.f32 %v17652_v29, %v7571_v11 }
 0xb8b   :  { %7990 = vst [vmem:[#allocation2 + $0x240] sm:$0xff] %v7906_v41 }
 0xb8c   :  { %7991 = vst [vmem:[#allocation2 + $0x248] sm:$0xff] %v7907_v25 }
 0xb92   :  { %v7481_v46 = vpop.permute.xlu0 %7480 }
 0xb93   :  { %v7574_v23 = vmul.f32 %v7481_v46, %v6734_v15  ;;  %v7575_v55 = vmul.f32 %v7481_v46, %v6735_v63 }
 0xb95   :  { %v7910_v47 = vadd.f32 %v17653_v33, %v7574_v23  ;;  %v7911_v30 = vadd.f32 %v17653_v33, %v7575_v55 }
 0xb97   :  { %7994 = vst [vmem:[#allocation2 + $0x260] sm:$0xff] %v7910_v47 }
 0xb98   :  { %7995 = vst [vmem:[#allocation2 + $0x268] sm:$0xff] %v7911_v30 }
 0xbb0   :  { %v7491_v43 = vpop.permute.xlu2 %7490 }
 0xbb1   :  { %v7578_v51 = vmul.f32 %v7491_v43, %v6738_v0  ;;  %v7579_v50 = vmul.f32 %v7491_v43, %v6739_v9 }
 0xbb2   :  { %v7486_v49 = vpop.permute.xlu1 %7485 }
 0xbb3   :  { %v7576_v39 = vmul.f32 %v7486_v49, %v6736_v45  ;;  %v7577_v24 = vmul.f32 %v7486_v49, %v6737_v36 }
 0xbb8   :  { %v7827_v20 = vpop.permute.xlu2 %7826 }
 0xbb9   :  { %v7914_v54 = vadd.f32 %v7827_v20, %v7578_v51  ;;  %v7915_v35 = vadd.f32 %v7827_v20, %v7579_v50 }
 0xbba   :  { %v7822_v28 = vpop.permute.xlu1 %7821 }
 0xbbb   :  { %7998 = vst [vmem:[#allocation2 + $0x280] sm:$0xff] %v7914_v54  ;;  %v7912_v22 = vadd.f32 %v7822_v28, %v7576_v39  ;;  %v7913_v60 = vadd.f32 %v7822_v28, %v7577_v24 }
 0xbbc   :  { %7999 = vst [vmem:[#allocation2 + $0x288] sm:$0xff] %v7915_v35 }
 0xbbd   :  { %7996 = vst [vmem:[#allocation2 + $0x270] sm:$0xff] %v7912_v22 }
 0xbbe   :  { %7997 = vst [vmem:[#allocation2 + $0x278] sm:$0xff] %v7913_v60 }
 0xbdd   :  { %v7496_v40 = vpop.permute.xlu0 %7495 }
 0xbde   :  { %v7580_v2 = vmul.f32 %v7496_v40, %v6740_v44  ;;  %v7581_v34 = vmul.f32 %v7496_v40, %v6741_v31 }
 0xbe5   :  { %v7832_v17 = vpop.permute.xlu0 %7831 }
 0xbe6   :  { %v7916_v21 = vadd.f32 %v7832_v17, %v7580_v2  ;;  %v7917_v26 = vadd.f32 %v7832_v17, %v7581_v34 }
 0xbe8   :  { %8000 = vst [vmem:[#allocation2 + $0x290] sm:$0xff] %v7916_v21 }
 0xbe9   :  { %8001 = vst [vmem:[#allocation2 + $0x298] sm:$0xff] %v7917_v26 }
 0xbea   :  { %8014 = dma.vmem_to_hbm [thread:$0]  %s8007_s30, 10752, %s8009_s11, [#allocation3], %s9212_s12, %s9212_s12, %s9213_s13  }
 0xbeb   :  { %9207 = dma.done.wait [#allocation3], 10752  }
 0xbec   :  { %9208 = vsyncadd [#allocation3], 4294956544 }
 0xbed   :  { %8019 = vsyncpa [#allocation3], 1 }

</bundles_post_ra>
